<compile_context>
chip_gen: v6e
topology: v6e:2x2x1
jax: 0.10.0
libtpu: 0.0.40
codegen_flags: <defaults>
</compile_context>

<pallas_src>
import math
from functools import partial

import numpy as np
import jax
import jax.numpy as jnp
from jax.experimental import pallas as pl
from jax.experimental.pallas import tpu as pltpu


# ----------------------------------------------------------------------------
# Fused kernel: visual path (step 0) + per-layer transformer + fc_out (last)
# ----------------------------------------------------------------------------

def _radtex_kernel(
        # visual-path operands (constant blocks, used only at grid step 0)
        p1_ref, w1m_ref, b1_ref, w2cat_ref, sel2_ref, b2_ref, pool_ref,
        pcw_ref, pcb_ref, c2w_ref, c2b_ref, emb_ref,
        # decoder operands (hh constant, layer weights streamed per grid step)
        hh_ref,
        inw_ref, inb_ref, outw_ref, outb_ref, ln1g_ref, ln1b_ref,
        fw1_ref, fb1_ref, fw2_ref, fb2_ref, ln2g_ref, ln2b_ref,
        fcw_ref, fcb_ref,
        # outputs
        cls_ref, logits_ref,
        # scratch
        x_scr, z_scr,
        *, seq, tokens, head_dim, proj_dim, n_taps, conv1_rows, oc_pad):
    f32, bf16 = jnp.float32, jnp.bfloat16
    l = pl.program_id(0)

    # ------------------ grid step 0: visual path + residual init ------------
    @pl.when(l == 0)
    def _visual():
        # conv1 as im2col matmul + ReLU                      (128,16)x(16,32)
        y1 = jnp.dot(p1_ref[...], w1m_ref[...], preferred_element_type=f32)
        y1 = jnp.maximum(y1 + b1_ref[...], 0.0)
        # conv2: all 9 taps in one matmul (tap blocks lane-padded to 128),
        # restack through VMEM scratch, then one selection matmul; zero rows
        # of sel2 reproduce zero padding exactly.
        z_all = jnp.dot(y1.astype(bf16), w2cat_ref[...],
                        preferred_element_type=f32)          # (128, 9*128)
        for t in range(n_taps):                              # 9 plain stores
            z_scr[t * conv1_rows:(t + 1) * conv1_rows, :] = \
                z_all[:, t * oc_pad:(t + 1) * oc_pad]
        y2 = jnp.dot(sel2_ref[...], z_scr[...].astype(bf16),
                     preferred_element_type=f32) + b2_ref[...]
        y2 = jnp.maximum(y2, 0.0)                            # (32, 128)
        # AdaptiveAvgPool2d((1,1)) + flatten as a pooling matmul -> (B, 128)
        pooled = jnp.dot(pool_ref[...], y2.astype(bf16),
                         preferred_element_type=f32)
        # fused feature_projection + classifier hidden layer  (B, 768)
        comb = jnp.dot(pooled.astype(bf16), pcw_ref[...],
                       preferred_element_type=f32) + pcb_ref[...]
        projected = comb[:, :proj_dim]                       # (B, 256)
        h = jnp.maximum(comb[:, proj_dim:], 0.0)             # (B, 512)
        cls_ref[...] = jnp.dot(h.astype(bf16), c2w_ref[...],
                               preferred_element_type=f32) + c2b_ref[...]
        # residual stream init: token embedding + projected features repeated
        # over the token axis (rows ordered b*T + t).
        rep = jnp.concatenate(
            [jnp.broadcast_to(projected[b:b + 1, :], (tokens, proj_dim))
             for b in range(seq)], axis=0)
        x_scr[...] = emb_ref[...] + rep

    # ------------------ one transformer encoder layer per grid step ---------
    M, E = x_scr.shape
    N = tokens
    scale = 1.0 / math.sqrt(head_dim)

    def layernorm(v, g, b):                 # residual already added into v
        mu = jnp.mean(v, axis=-1, keepdims=True)
        vc = v - mu
        var = jnp.mean(vc * vc, axis=-1, keepdims=True)
        return vc * jax.lax.rsqrt(var + 1e-5) * g + b

    x = x_scr[...]                          # f32 residual stream (VMEM only)

    # multi-head self-attention over axis 0 (== image batch axis, seq = B)
    qkv = jnp.dot(x.astype(bf16), inw_ref[0],
                  preferred_element_type=f32) + inb_ref[0]        # (M, 3E)
    q, k, v = qkv[:, :E], qkv[:, E:2 * E], qkv[:, 2 * E:]
    qs = [q[i * N:(i + 1) * N] for i in range(seq)]
    ks = [k[i * N:(i + 1) * N] for i in range(seq)]
    vs = [v[i * N:(i + 1) * N] for i in range(seq)]
    # one batched head-reduce+broadcast matmul for all (i, j) score blocks
    prods = jnp.concatenate([qs[i] * ks[j]
                             for i in range(seq) for j in range(seq)], axis=0)
    sc_all = jnp.dot(prods.astype(bf16), hh_ref[...],
                     preferred_element_type=f32) * scale          # (s*s*N, E)
    outs = []
    for i in range(seq):
        sc = [sc_all[(i * seq + j) * N:(i * seq + j + 1) * N]
              for j in range(seq)]
        m = sc[0]
        for j in range(1, seq):
            m = jnp.maximum(m, sc[j])
        ps = [jnp.exp(s - m) for s in sc]
        den = ps[0]
        for j in range(1, seq):
            den = den + ps[j]
        o = ps[0] * vs[0]
        for j in range(1, seq):
            o = o + ps[j] * vs[j]
        outs.append(o / den)                # exact divide (PyTorch parity)
    attn = jnp.concatenate(outs, axis=0)                          # (M, E)
    a = jnp.dot(attn.astype(bf16), outw_ref[0],
                preferred_element_type=f32) + outb_ref[0]
    # residual + LayerNorm 1 (fused)
    x = layernorm(x + a, ln1g_ref[0], ln1b_ref[0])
    # feed-forward (2048) + ReLU + down-projection
    h1 = jnp.maximum(jnp.dot(x.astype(bf16), fw1_ref[0],
                             preferred_element_type=f32) + fb1_ref[0], 0.0)
    f = jnp.dot(h1.astype(bf16), fw2_ref[0],
                preferred_element_type=f32) + fb2_ref[0]
    # residual + LayerNorm 2 (fused)
    x = layernorm(x + f, ln2g_ref[0], ln2b_ref[0])
    x_scr[...] = x

    # ------------------ last step: fc_out vocabulary projection -------------
    @pl.when(l == pl.num_programs(0) - 1)
    def _fc_out():
        logits_ref[...] = jnp.dot(x.astype(bf16), fcw_ref[...],
                                  preferred_element_type=f32) + fcb_ref[...]


def fused_forward(p1, emb, prep, *, seq, tokens, heads):
    M, E = emb.shape
    L = prep['inw'].shape[0]
    Cp = prep['c2w'].shape[1]
    Vp = prep['fcw'].shape[1]
    conv1_rows = p1.shape[0]
    n_taps = prep['sel2'].shape[1] // conv1_rows
    oc_pad = prep['w2cat'].shape[1] // n_taps

    kernel = partial(_radtex_kernel, seq=seq, tokens=tokens,
                     head_dim=E // heads, proj_dim=E, n_taps=n_taps,
                     conv1_rows=conv1_rows, oc_pad=oc_pad)

    def full(a):                     # whole-array block, resident across grid
        return pl.BlockSpec(a.shape, lambda l, n=a.ndim: (0,) * n)

    def per_layer(a):                # one layer slab per grid step (pipelined)
        tail = a.shape[1:]
        return pl.BlockSpec((1,) + tail, lambda l, n=len(tail): (l,) + (0,) * n)

    in_specs = [
        full(p1), full(prep['w1m']), full(prep['b1']), full(prep['w2cat']),
        full(prep['sel2']), full(prep['b2']), full(prep['pool']),
        full(prep['pcw']), full(prep['pcb']), full(prep['c2w']),
        full(prep['c2b']), full(emb), full(prep['hh']),
        per_layer(prep['inw']), per_layer(prep['inb']),
        per_layer(prep['outw']), per_layer(prep['outb']),
        per_layer(prep['ln1g']), per_layer(prep['ln1b']),
        per_layer(prep['fw1']), per_layer(prep['fb1']),
        per_layer(prep['fw2']), per_layer(prep['fb2']),
        per_layer(prep['ln2g']), per_layer(prep['ln2b']),
        full(prep['fcw']), full(prep['fcb']),
    ]
    out_specs = (pl.BlockSpec((seq, Cp), lambda l: (0, 0)),
                 pl.BlockSpec((M, Vp), lambda l: (0, 0)))
    out_shape = (jax.ShapeDtypeStruct((seq, Cp), jnp.float32),
                 jax.ShapeDtypeStruct((M, Vp), jnp.float32))
    scratch_shapes = [pltpu.VMEM((M, E), jnp.float32),               # residual
                      pltpu.VMEM((n_taps * conv1_rows, oc_pad), jnp.float32)]

    return pl.pallas_call(
        kernel,
        out_shape=out_shape,
        grid_spec=pltpu.PrefetchScalarGridSpec(
            num_scalar_prefetch=0, grid=(L,),
            in_specs=in_specs, out_specs=out_specs,
            scratch_shapes=scratch_shapes),
        compiler_params=pltpu.CompilerParams(
            dimension_semantics=("arbitrary",),          # residual carry
            vmem_limit_bytes=32 * 1024 * 1024),
    )(p1, prep['w1m'], prep['b1'], prep['w2cat'], prep['sel2'], prep['b2'],
      prep['pool'], prep['pcw'], prep['pcb'], prep['c2w'], prep['c2b'],
      emb, prep['hh'],
      prep['inw'], prep['inb'], prep['outw'], prep['outb'],
      prep['ln1g'], prep['ln1b'], prep['fw1'], prep['fb1'],
      prep['fw2'], prep['fb2'], prep['ln2g'], prep['ln2b'],
      prep['fcw'], prep['fcb'])


# ----------------------------------------------------------------------------
# Wrapper-side layout helpers (pure reshapes / constant matrices, no compute)
# ----------------------------------------------------------------------------

def im2col(x_nhwc, k=3, stride=2, pad=1):
    B, H, W, C = x_nhwc.shape
    xp = jnp.pad(x_nhwc, ((0, 0), (pad, pad), (pad, pad), (0, 0)))
    OH = (H + 2 * pad - k) // stride + 1
    OW = (W + 2 * pad - k) // stride + 1
    patches = []
    for di in range(k):
        for dj in range(k):
            patches.append(xp[:, di:di + stride * OH:stride,
                               dj:dj + stride * OW:stride, :])
    p = jnp.stack(patches, axis=3)                 # (B, OH, OW, k*k, C)
    return p.reshape(B * OH * OW, k * k * C), OH, OW


def conv_weight_to_matrix(w_oihw):
    """PyTorch (OC, IC, KH, KW) -> (KH*KW*IC, OC), matching im2col ordering."""
    OC = w_oihw.shape[0]
    return jnp.transpose(w_oihw, (2, 3, 1, 0)).reshape(-1, OC)


def conv2_tap_selection(B, IH, IW, k=3, stride=2, pad=1):
    """S[t, out_row, in_row] = 1 where tap t of an output pixel reads an
    in-bounds input pixel; zero rows reproduce zero padding."""
    OH = (IH + 2 * pad - k) // stride + 1
    OW = (IW + 2 * pad - k) // stride + 1
    S = np.zeros((k * k, B * OH * OW, B * IH * IW), np.float32)
    for b in range(B):
        for oi in range(OH):
            for oj in range(OW):
                r = b * OH * OW + oi * OW + oj
                for di in range(k):
                    for dj in range(k):
                        ii = oi * stride + di - pad
                        ij = oj * stride + dj - pad
                        if 0 <= ii < IH and 0 <= ij < IW:
                            S[di * k + dj, r, b * IH * IW + ii * IW + ij] = 1.0
    return jnp.asarray(S), OH, OW


def pooling_matrix(B, HW):
    P = np.zeros((B, B * HW), np.float32)
    for b in range(B):
        P[b, b * HW:(b + 1) * HW] = 1.0 / HW
    return jnp.asarray(P)


def head_block_matrix(E, head_dim):
    H = np.zeros((E, E), np.float32)
    for h in range(E // head_dim):
        H[h * head_dim:(h + 1) * head_dim, h * head_dim:(h + 1) * head_dim] = 1.0
    return jnp.asarray(H)


def _pad_lanes(w, b, mult=128):
    """Pad (K, N) weight / (N,) bias to a lane-dense multiple of 128 columns."""
    n = w.shape[1]
    npad = (-n) % mult
    if npad:
        w = jnp.pad(w, ((0, 0), (0, npad)))
        b = jnp.pad(b, ((0, npad),))
    return w, b


# ----------------------------------------------------------------------------
# One-time parameter preparation (hoisted out of the jitted forward)
# ----------------------------------------------------------------------------

def prepare_params(params, *, batch, img_h, img_w, heads=4):
    bf16, f32 = jnp.bfloat16, jnp.float32
    hidden = params['emb'].shape[1]

    # conv1 weight as (K*K*C, OC), rows padded to 16
    w1m = conv_weight_to_matrix(params['conv1_w'])                 # (9, 32)
    w1m = jnp.pad(w1m, ((0, 16 - w1m.shape[0]), (0, 0))).astype(bf16)

    # conv2: per-tap (IC, OC) blocks lane-padded to 128 and concatenated
    oc2, ic2 = params['conv2_w'].shape[0], params['conv2_w'].shape[1]
    oc_pad = ((oc2 + 127) // 128) * 128
    w2t = jnp.transpose(params['conv2_w'], (2, 3, 1, 0)).reshape(9, ic2, oc2)
    w2cat = jnp.concatenate(
        [jnp.pad(w2t[t], ((0, 0), (0, oc_pad - oc2))) for t in range(9)],
        axis=1).astype(bf16)                                       # (32, 9*128)
    b2 = jnp.pad(params['conv2_b'], (0, oc_pad - oc2)).reshape(1, -1).astype(f32)

    # conv geometry + constant matrices (0/1 and 1/HW values -> exact in bf16)
    oh1 = (img_h + 2 - 3) // 2 + 1
    ow1 = (img_w + 2 - 3) // 2 + 1
    S, oh2, ow2 = conv2_tap_selection(batch, oh1, ow1, 3, 2, 1)
    sel2 = jnp.transpose(S, (1, 0, 2)).reshape(S.shape[1], -1).astype(bf16)
    pool = pooling_matrix(batch, oh2 * ow2).astype(bf16)
    hh = head_block_matrix(hidden, hidden // heads).astype(bf16)

    # fused feature_projection + classifier hidden weight; pooled dim padded
    pcw = jnp.concatenate([params['proj_w'], params['cls_w1']], axis=1)
    pcw = jnp.pad(pcw, ((0, oc_pad - pcw.shape[0]), (0, 0))).astype(bf16)
    pcb = jnp.concatenate([params['proj_b'], params['cls_b1']]
                          ).reshape(1, -1).astype(f32)
    c2w, c2b = _pad_lanes(params['cls_w2'], params['cls_b2'])
    fcw, fcb = _pad_lanes(params['fc_out_w'], params['fc_out_b'])

    L = params['layers']
    nl = len(L)
    stack = lambda key: jnp.stack([lp[key] for lp in L])

    prep = {
        'w1m': w1m, 'b1': params['conv1_b'].reshape(1, -1).astype(f32),
        'w2cat': w2cat, 'sel2': sel2, 'b2': b2, 'pool': pool,
        'pcw': pcw, 'pcb': pcb,
        'c2w': c2w.astype(bf16), 'c2b': c2b.reshape(1, -1).astype(f32),
        'emb': params['emb'].astype(f32),
        'hh': hh,
        'inw': stack('in_w').astype(bf16),
        'inb': stack('in_b').reshape(nl, 1, -1).astype(f32),
        'outw': stack('out_w').astype(bf16),
        'outb': stack('out_b').reshape(nl, 1, -1).astype(f32),
        'ln1g': stack('ln1_g').reshape(nl, 1, -1).astype(f32),
        'ln1b': stack('ln1_b').reshape(nl, 1, -1).astype(f32),
        'fw1': stack('ffn_w1').astype(bf16),
        'fb1': stack('ffn_b1').reshape(nl, 1, -1).astype(f32),
        'fw2': stack('ffn_w2').astype(bf16),
        'fb2': stack('ffn_b2').reshape(nl, 1, -1).astype(f32),
        'ln2g': stack('ln2_g').reshape(nl, 1, -1).astype(f32),
        'ln2b': stack('ln2_b').reshape(nl, 1, -1).astype(f32),
        'fcw': fcw.astype(bf16), 'fcb': fcb.reshape(1, -1).astype(f32),
    }
    return jax.tree_util.tree_map(jnp.asarray, prep)


# ----------------------------------------------------------------------------
# Model forward (jitted): layout glue + one fused pallas_call
# ----------------------------------------------------------------------------

def radtex_forward(prep, images, text_inputs, *, num_classes, vocab, heads=4):
    # visual input: NCHW -> NHWC, im2col patches (layout only), pad K to 16
    x_nhwc = jnp.transpose(images, (0, 2, 3, 1)).astype(jnp.float32)
    p1, _, _ = im2col(x_nhwc, 3, 2, 1)                     # (B*OH1*OW1, 9)
    p1 = jnp.pad(p1, ((0, 0), (0, prep['w1m'].shape[0] - p1.shape[1])))
    p1 = p1.astype(jnp.bfloat16)

    # token embeddings, rows ordered (b, t) -> b*T + t
    B, T = text_inputs.shape
    hidden = prep['emb'].shape[1]
    emb = jnp.take(prep['emb'], text_inputs, axis=0).reshape(B * T, hidden)

    cls_pad, logits_pad = fused_forward(p1, emb, prep, seq=B, tokens=T,
                                        heads=heads)
    classification = cls_pad[:, :num_classes]
    logits = logits_pad[:, :vocab].reshape(B, T, vocab)
    return classification, logits


# ----------------------------------------------------------------------------
# Deterministic parameter init (scratch encoder / scratch decoder)
# ----------------------------------------------------------------------------

def init_params(key, vocab_size=128, num_classes=4, hidden=256, heads=4,
                ffn_dim=2048, num_layers=2):
    keys = iter(jax.random.split(key, 64))

    def w(shape, scale=0.02):
        return jax.random.normal(next(keys), shape, jnp.float32) * scale

    params = {
        'conv1_w': w((32, 1, 3, 3)), 'conv1_b': jnp.zeros((32,), jnp.float32),
        'conv2_w': w((64, 32, 3, 3)), 'conv2_b': jnp.zeros((64,), jnp.float32),
        'proj_w': w((64, hidden)), 'proj_b': jnp.zeros((hidden,), jnp.float32),
        'cls_w1': w((64, 512)), 'cls_b1': jnp.zeros((512,), jnp.float32),
        'cls_w2': w((512, num_classes)),
        'cls_b2': jnp.zeros((num_classes,), jnp.float32),
        'emb': w((vocab_size, hidden)),
        'fc_out_w': w((hidden, vocab_size)),
        'fc_out_b': jnp.zeros((vocab_size,), jnp.float32),
    }
    layers = []
    for _ in range(num_layers):
        layers.append({
            'in_w': w((hidden, 3 * hidden)),
            'in_b': jnp.zeros((3 * hidden,), jnp.float32),
            'out_w': w((hidden, hidden)),
            'out_b': jnp.zeros((hidden,), jnp.float32),
            'ln1_g': jnp.ones((hidden,), jnp.float32),
            'ln1_b': jnp.zeros((hidden,), jnp.float32),
            'ffn_w1': w((hidden, ffn_dim)),
            'ffn_b1': jnp.zeros((ffn_dim,), jnp.float32),
            'ffn_w2': w((ffn_dim, hidden)),
            'ffn_b2': jnp.zeros((hidden,), jnp.float32),
            'ln2_g': jnp.ones((hidden,), jnp.float32),
            'ln2_b': jnp.zeros((hidden,), jnp.float32),
        })
    params['layers'] = layers
    return params


# ----------------------------------------------------------------------------
# Main
# ----------------------------------------------------------------------------

if __name__ == "__main__":
    B, T, V, NUM_CLASSES, IMG = 2, 8, 128, 4, 16
    key = jax.random.PRNGKey(0)
    k_img, k_ids, k_par = jax.random.split(key, 3)

    images = jax.random.normal(k_img, (B, 1, IMG, IMG), jnp.float32)   # NCHW
    text_inputs = jax.random.randint(k_ids, (B, T), 0, V, jnp.int32)
    params = init_params(k_par, vocab_size=V, num_classes=NUM_CLASSES)

    # one-time weight prep (stack / cast / pad / constant matrices) — hoisted
    # out of the jitted forward path
    prep = prepare_params(params, batch=B, img_h=IMG, img_w=IMG, heads=4)
    prep = jax.block_until_ready(prep)

    fwd = jax.jit(lambda pp, im, ti: radtex_forward(
        pp, im, ti, num_classes=NUM_CLASSES, vocab=V, heads=4))
    classification, logits = fwd(prep, images, text_inputs)
    jax.block_until_ready((classification, logits))

    assert classification.shape == (B, NUM_CLASSES)
    assert logits.shape == (B, T, V)
    assert bool(jnp.isfinite(classification).all())
    assert bool(jnp.isfinite(logits).all())
    print("KERNEL_OK")
</pallas_src>

<mosaic_0001>
module attributes {stable_mosaic.version = 11 : i64} {
  func.func @_radtex_kernel(%arg0: i32, %arg1: memref<128x16xbf16, #tpu.memory_space<vmem>>, %arg2: memref<16x32xbf16, #tpu.memory_space<vmem>>, %arg3: memref<1x32xf32, #tpu.memory_space<vmem>>, %arg4: memref<32x1152xbf16, #tpu.memory_space<vmem>>, %arg5: memref<32x1152xbf16, #tpu.memory_space<vmem>>, %arg6: memref<1x128xf32, #tpu.memory_space<vmem>>, %arg7: memref<2x32xbf16, #tpu.memory_space<vmem>>, %arg8: memref<128x768xbf16, #tpu.memory_space<vmem>>, %arg9: memref<1x768xf32, #tpu.memory_space<vmem>>, %arg10: memref<512x128xbf16, #tpu.memory_space<vmem>>, %arg11: memref<1x128xf32, #tpu.memory_space<vmem>>, %arg12: memref<16x256xf32, #tpu.memory_space<vmem>>, %arg13: memref<256x256xbf16, #tpu.memory_space<vmem>>, %arg14: memref<1x256x768xbf16, #tpu.memory_space<vmem>>, %arg15: memref<1x1x768xf32, #tpu.memory_space<vmem>>, %arg16: memref<1x256x256xbf16, #tpu.memory_space<vmem>>, %arg17: memref<1x1x256xf32, #tpu.memory_space<vmem>>, %arg18: memref<1x1x256xf32, #tpu.memory_space<vmem>>, %arg19: memref<1x1x256xf32, #tpu.memory_space<vmem>>, %arg20: memref<1x256x2048xbf16, #tpu.memory_space<vmem>>, %arg21: memref<1x1x2048xf32, #tpu.memory_space<vmem>>, %arg22: memref<1x2048x256xbf16, #tpu.memory_space<vmem>>, %arg23: memref<1x1x256xf32, #tpu.memory_space<vmem>>, %arg24: memref<1x1x256xf32, #tpu.memory_space<vmem>>, %arg25: memref<1x1x256xf32, #tpu.memory_space<vmem>>, %arg26: memref<256x128xbf16, #tpu.memory_space<vmem>>, %arg27: memref<1x128xf32, #tpu.memory_space<vmem>>, %arg28: memref<2x128xf32, #tpu.memory_space<vmem>>, %arg29: memref<16x128xf32, #tpu.memory_space<vmem>>, %arg30: memref<16x256xf32, #tpu.memory_space<vmem>>, %arg31: memref<1152x128xf32, #tpu.memory_space<vmem>>) attributes {dimension_semantics = [#tpu.dimension_semantics<arbitrary>], iteration_bounds = array<i64: 2>, scalar_prefetch = 0 : i64, scratch_operands = 2 : i64, tpu.core_type = #tpu.core_type<tc>, window_params = [{pipeline_mode = #tpu.pipeline_mode<synchronous>, transform_indices = @transform_0, window_bounds = array<i64: 128, 16>}, {pipeline_mode = #tpu.pipeline_mode<synchronous>, transform_indices = @transform_1, window_bounds = array<i64: 16, 32>}, {pipeline_mode = #tpu.pipeline_mode<synchronous>, transform_indices = @transform_2, window_bounds = array<i64: 1, 32>}, {pipeline_mode = #tpu.pipeline_mode<synchronous>, transform_indices = @transform_3, window_bounds = array<i64: 32, 1152>}, {pipeline_mode = #tpu.pipeline_mode<synchronous>, transform_indices = @transform_4, window_bounds = array<i64: 32, 1152>}, {pipeline_mode = #tpu.pipeline_mode<synchronous>, transform_indices = @transform_5, window_bounds = array<i64: 1, 128>}, {pipeline_mode = #tpu.pipeline_mode<synchronous>, transform_indices = @transform_6, window_bounds = array<i64: 2, 32>}, {pipeline_mode = #tpu.pipeline_mode<synchronous>, transform_indices = @transform_7, window_bounds = array<i64: 128, 768>}, {pipeline_mode = #tpu.pipeline_mode<synchronous>, transform_indices = @transform_8, window_bounds = array<i64: 1, 768>}, {pipeline_mode = #tpu.pipeline_mode<synchronous>, transform_indices = @transform_9, window_bounds = array<i64: 512, 128>}, {pipeline_mode = #tpu.pipeline_mode<synchronous>, transform_indices = @transform_10, window_bounds = array<i64: 1, 128>}, {pipeline_mode = #tpu.pipeline_mode<synchronous>, transform_indices = @transform_11, window_bounds = array<i64: 16, 256>}, {pipeline_mode = #tpu.pipeline_mode<synchronous>, transform_indices = @transform_12, window_bounds = array<i64: 256, 256>}, {transform_indices = @transform_13, window_bounds = array<i64: 1, 256, 768>}, {transform_indices = @transform_14, window_bounds = array<i64: 1, 1, 768>}, {transform_indices = @transform_15, window_bounds = array<i64: 1, 256, 256>}, {transform_indices = @transform_16, window_bounds = array<i64: 1, 1, 256>}, {transform_indices = @transform_17, window_bounds = array<i64: 1, 1, 256>}, {transform_indices = @transform_18, window_bounds = array<i64: 1, 1, 256>}, {transform_indices = @transform_19, window_bounds = array<i64: 1, 256, 2048>}, {transform_indices = @transform_20, window_bounds = array<i64: 1, 1, 2048>}, {transform_indices = @transform_21, window_bounds = array<i64: 1, 2048, 256>}, {transform_indices = @transform_22, window_bounds = array<i64: 1, 1, 256>}, {transform_indices = @transform_23, window_bounds = array<i64: 1, 1, 256>}, {transform_indices = @transform_24, window_bounds = array<i64: 1, 1, 256>}, {pipeline_mode = #tpu.pipeline_mode<synchronous>, transform_indices = @transform_25, window_bounds = array<i64: 256, 128>}, {pipeline_mode = #tpu.pipeline_mode<synchronous>, transform_indices = @transform_26, window_bounds = array<i64: 1, 128>}, {pipeline_mode = #tpu.pipeline_mode<synchronous>, transform_indices = @transform_27, window_bounds = array<i64: 2, 128>}, {pipeline_mode = #tpu.pipeline_mode<synchronous>, transform_indices = @transform_28, window_bounds = array<i64: 16, 128>}]} {
    %c0_i32 = arith.constant 0 : i32
    %0 = arith.cmpi eq, %arg0, %c0_i32 : i32
    %1 = arith.extui %0 : i1 to i32
    %c0_i32_0 = arith.constant 0 : i32
    %2 = arith.cmpi ne, %1, %c0_i32_0 : i32
    scf.if %2 {
      %c0_59 = arith.constant 0 : index
      %c0_60 = arith.constant 0 : index
      %136 = vector.load %arg1[%c0_59, %c0_60] : memref<128x16xbf16, #tpu.memory_space<vmem>>, vector<128x16xbf16>
      %c0_61 = arith.constant 0 : index
      %c0_62 = arith.constant 0 : index
      %137 = vector.load %arg2[%c0_61, %c0_62] : memref<16x32xbf16, #tpu.memory_space<vmem>>, vector<16x32xbf16>
      %cst_63 = arith.constant dense<0.000000e+00> : vector<128x32xf32>
      %138 = tpu.matmul %136, %137, %cst_63 {dimension_numbers = #tpu.dot_dimension_numbers<[1], [0], [0], [1], [0, 0, 1, 1], [], []>} : vector<128x16xbf16>, vector<16x32xbf16>, vector<128x32xf32> -> vector<128x32xf32>
      %c0_64 = arith.constant 0 : index
      %c0_65 = arith.constant 0 : index
      %139 = vector.load %arg3[%c0_64, %c0_65] : memref<1x32xf32, #tpu.memory_space<vmem>>, vector<1x32xf32>
      %140 = vector.broadcast %139 : vector<1x32xf32> to vector<128x32xf32>
      %141 = arith.addf %138, %140 : vector<128x32xf32>
      %cst_66 = arith.constant 0.000000e+00 : f32
      %142 = vector.broadcast %cst_66 : f32 to vector<128x32xf32>
      %143 = arith.maximumf %141, %142 : vector<128x32xf32>
      %144 = arith.truncf %143 : vector<128x32xf32> to vector<128x32xbf16>
      %c0_67 = arith.constant 0 : index
      %c0_68 = arith.constant 0 : index
      %145 = vector.load %arg4[%c0_67, %c0_68] : memref<32x1152xbf16, #tpu.memory_space<vmem>>, vector<32x1152xbf16>
      %cst_69 = arith.constant dense<0.000000e+00> : vector<128x1152xf32>
      %146 = tpu.matmul %144, %145, %cst_69 {dimension_numbers = #tpu.dot_dimension_numbers<[1], [0], [0], [1], [0, 0, 1, 1], [], []>} : vector<128x32xbf16>, vector<32x1152xbf16>, vector<128x1152xf32> -> vector<128x1152xf32>
      %147 = vector.extract_strided_slice %146 {offsets = [0, 0], sizes = [128, 128], strides = [1, 1]} : vector<128x1152xf32> to vector<128x128xf32>
      %c0_70 = arith.constant 0 : index
      %c0_71 = arith.constant 0 : index
      %148 = vector.load %arg31[%c0_70, %c0_71] : memref<1152x128xf32, #tpu.memory_space<vmem>>, vector<128x128xf32>
      tpu.vector_store %arg31[%c0_70, %c0_71], %147 {strides = array<i32>} : memref<1152x128xf32, #tpu.memory_space<vmem>>, vector<128x128xf32>,
      %149 = vector.extract_strided_slice %146 {offsets = [0, 128], sizes = [128, 128], strides = [1, 1]} : vector<128x1152xf32> to vector<128x128xf32>
      %c128 = arith.constant 128 : index
      %c0_72 = arith.constant 0 : index
      %150 = vector.load %arg31[%c128, %c0_72] : memref<1152x128xf32, #tpu.memory_space<vmem>>, vector<128x128xf32>
      tpu.vector_store %arg31[%c128, %c0_72], %149 {strides = array<i32>} : memref<1152x128xf32, #tpu.memory_space<vmem>>, vector<128x128xf32>,
      %151 = vector.extract_strided_slice %146 {offsets = [0, 256], sizes = [128, 128], strides = [1, 1]} : vector<128x1152xf32> to vector<128x128xf32>
      %c256 = arith.constant 256 : index
      %c0_73 = arith.constant 0 : index
      %152 = vector.load %arg31[%c256, %c0_73] : memref<1152x128xf32, #tpu.memory_space<vmem>>, vector<128x128xf32>
      tpu.vector_store %arg31[%c256, %c0_73], %151 {strides = array<i32>} : memref<1152x128xf32, #tpu.memory_space<vmem>>, vector<128x128xf32>,
      %153 = vector.extract_strided_slice %146 {offsets = [0, 384], sizes = [128, 128], strides = [1, 1]} : vector<128x1152xf32> to vector<128x128xf32>
      %c384 = arith.constant 384 : index
      %c0_74 = arith.constant 0 : index
      %154 = vector.load %arg31[%c384, %c0_74] : memref<1152x128xf32, #tpu.memory_space<vmem>>, vector<128x128xf32>
      tpu.vector_store %arg31[%c384, %c0_74], %153 {strides = array<i32>} : memref<1152x128xf32, #tpu.memory_space<vmem>>, vector<128x128xf32>,
      %155 = vector.extract_strided_slice %146 {offsets = [0, 512], sizes = [128, 128], strides = [1, 1]} : vector<128x1152xf32> to vector<128x128xf32>
      %c512 = arith.constant 512 : index
      %c0_75 = arith.constant 0 : index
      %156 = vector.load %arg31[%c512, %c0_75] : memref<1152x128xf32, #tpu.memory_space<vmem>>, vector<128x128xf32>
      tpu.vector_store %arg31[%c512, %c0_75], %155 {strides = array<i32>} : memref<1152x128xf32, #tpu.memory_space<vmem>>, vector<128x128xf32>,
      %157 = vector.extract_strided_slice %146 {offsets = [0, 640], sizes = [128, 128], strides = [1, 1]} : vector<128x1152xf32> to vector<128x128xf32>
      %c640 = arith.constant 640 : index
      %c0_76 = arith.constant 0 : index
      %158 = vector.load %arg31[%c640, %c0_76] : memref<1152x128xf32, #tpu.memory_space<vmem>>, vector<128x128xf32>
      tpu.vector_store %arg31[%c640, %c0_76], %157 {strides = array<i32>} : memref<1152x128xf32, #tpu.memory_space<vmem>>, vector<128x128xf32>,
      %159 = vector.extract_strided_slice %146 {offsets = [0, 768], sizes = [128, 128], strides = [1, 1]} : vector<128x1152xf32> to vector<128x128xf32>
      %c768 = arith.constant 768 : index
      %c0_77 = arith.constant 0 : index
      %160 = vector.load %arg31[%c768, %c0_77] : memref<1152x128xf32, #tpu.memory_space<vmem>>, vector<128x128xf32>
      tpu.vector_store %arg31[%c768, %c0_77], %159 {strides = array<i32>} : memref<1152x128xf32, #tpu.memory_space<vmem>>, vector<128x128xf32>,
      %161 = vector.extract_strided_slice %146 {offsets = [0, 896], sizes = [128, 128], strides = [1, 1]} : vector<128x1152xf32> to vector<128x128xf32>
      %c896 = arith.constant 896 : index
      %c0_78 = arith.constant 0 : index
      %162 = vector.load %arg31[%c896, %c0_78] : memref<1152x128xf32, #tpu.memory_space<vmem>>, vector<128x128xf32>
      tpu.vector_store %arg31[%c896, %c0_78], %161 {strides = array<i32>} : memref<1152x128xf32, #tpu.memory_space<vmem>>, vector<128x128xf32>,
      %163 = vector.extract_strided_slice %146 {offsets = [0, 1024], sizes = [128, 128], strides = [1, 1]} : vector<128x1152xf32> to vector<128x128xf32>
      %c1024 = arith.constant 1024 : index
      %c0_79 = arith.constant 0 : index
      %164 = vector.load %arg31[%c1024, %c0_79] : memref<1152x128xf32, #tpu.memory_space<vmem>>, vector<128x128xf32>
      tpu.vector_store %arg31[%c1024, %c0_79], %163 {strides = array<i32>} : memref<1152x128xf32, #tpu.memory_space<vmem>>, vector<128x128xf32>,
      %c0_80 = arith.constant 0 : index
      %c0_81 = arith.constant 0 : index
      %165 = vector.load %arg5[%c0_80, %c0_81] : memref<32x1152xbf16, #tpu.memory_space<vmem>>, vector<32x1152xbf16>
      %c0_82 = arith.constant 0 : index
      %c0_83 = arith.constant 0 : index
      %166 = vector.load %arg31[%c0_82, %c0_83] : memref<1152x128xf32, #tpu.memory_space<vmem>>, vector<1152x128xf32>
      %167 = arith.truncf %166 : vector<1152x128xf32> to vector<1152x128xbf16>
      %cst_84 = arith.constant dense<0.000000e+00> : vector<32x128xf32>
      %168 = tpu.matmul %165, %167, %cst_84 {dimension_numbers = #tpu.dot_dimension_numbers<[1], [0], [0], [1], [0, 0, 1, 1], [], []>} : vector<32x1152xbf16>, vector<1152x128xbf16>, vector<32x128xf32> -> vector<32x128xf32>
      %c0_85 = arith.constant 0 : index
      %c0_86 = arith.constant 0 : index
      %169 = vector.load %arg6[%c0_85, %c0_86] : memref<1x128xf32, #tpu.memory_space<vmem>>, vector<1x128xf32>
      %170 = vector.broadcast %169 : vector<1x128xf32> to vector<32x128xf32>
      %171 = arith.addf %168, %170 : vector<32x128xf32>
      %cst_87 = arith.constant 0.000000e+00 : f32
      %172 = vector.broadcast %cst_87 : f32 to vector<32x128xf32>
      %173 = arith.maximumf %171, %172 : vector<32x128xf32>
      %c0_88 = arith.constant 0 : index
      %c0_89 = arith.constant 0 : index
      %174 = vector.load %arg7[%c0_88, %c0_89] : memref<2x32xbf16, #tpu.memory_space<vmem>>, vector<2x32xbf16>
      %175 = arith.truncf %173 : vector<32x128xf32> to vector<32x128xbf16>
      %cst_90 = arith.constant dense<0.000000e+00> : vector<2x128xf32>
      %176 = tpu.matmul %174, %175, %cst_90 {dimension_numbers = #tpu.dot_dimension_numbers<[1], [0], [0], [1], [0, 0, 1, 1], [], []>} : vector<2x32xbf16>, vector<32x128xbf16>, vector<2x128xf32> -> vector<2x128xf32>
      %177 = arith.truncf %176 : vector<2x128xf32> to vector<2x128xbf16>
      %c0_91 = arith.constant 0 : index
      %c0_92 = arith.constant 0 : index
      %178 = vector.load %arg8[%c0_91, %c0_92] : memref<128x768xbf16, #tpu.memory_space<vmem>>, vector<128x768xbf16>
      %cst_93 = arith.constant dense<0.000000e+00> : vector<2x768xf32>
      %179 = tpu.matmul %177, %178, %cst_93 {dimension_numbers = #tpu.dot_dimension_numbers<[1], [0], [0], [1], [0, 0, 1, 1], [], []>} : vector<2x128xbf16>, vector<128x768xbf16>, vector<2x768xf32> -> vector<2x768xf32>
      %c0_94 = arith.constant 0 : index
      %c0_95 = arith.constant 0 : index
      %180 = vector.load %arg9[%c0_94, %c0_95] : memref<1x768xf32, #tpu.memory_space<vmem>>, vector<1x768xf32>
      %181 = vector.broadcast %180 : vector<1x768xf32> to vector<2x768xf32>
      %182 = arith.addf %179, %181 : vector<2x768xf32>
      %183 = vector.extract_strided_slice %182 {offsets = [0, 0], sizes = [2, 256], strides = [1, 1]} : vector<2x768xf32> to vector<2x256xf32>
      %184 = vector.extract_strided_slice %182 {offsets = [0, 256], sizes = [2, 512], strides = [1, 1]} : vector<2x768xf32> to vector<2x512xf32>
      %cst_96 = arith.constant 0.000000e+00 : f32
      %185 = vector.broadcast %cst_96 : f32 to vector<2x512xf32>
      %186 = arith.maximumf %184, %185 : vector<2x512xf32>
      %187 = arith.truncf %186 : vector<2x512xf32> to vector<2x512xbf16>
      %c0_97 = arith.constant 0 : index
      %c0_98 = arith.constant 0 : index
      %188 = vector.load %arg10[%c0_97, %c0_98] : memref<512x128xbf16, #tpu.memory_space<vmem>>, vector<512x128xbf16>
      %cst_99 = arith.constant dense<0.000000e+00> : vector<2x128xf32>
      %189 = tpu.matmul %187, %188, %cst_99 {dimension_numbers = #tpu.dot_dimension_numbers<[1], [0], [0], [1], [0, 0, 1, 1], [], []>} : vector<2x512xbf16>, vector<512x128xbf16>, vector<2x128xf32> -> vector<2x128xf32>
      %c0_100 = arith.constant 0 : index
      %c0_101 = arith.constant 0 : index
      %190 = vector.load %arg11[%c0_100, %c0_101] : memref<1x128xf32, #tpu.memory_space<vmem>>, vector<1x128xf32>
      %191 = vector.broadcast %190 : vector<1x128xf32> to vector<2x128xf32>
      %192 = arith.addf %189, %191 : vector<2x128xf32>
      %c0_102 = arith.constant 0 : index
      %c0_103 = arith.constant 0 : index
      %193 = vector.load %arg28[%c0_102, %c0_103] : memref<2x128xf32, #tpu.memory_space<vmem>>, vector<2x128xf32>
      tpu.vector_store %arg28[%c0_102, %c0_103], %192 {strides = array<i32>} : memref<2x128xf32, #tpu.memory_space<vmem>>, vector<2x128xf32>,
      %194 = vector.extract_strided_slice %183 {offsets = [0, 0], sizes = [1, 256], strides = [1, 1]} : vector<2x256xf32> to vector<1x256xf32>
      %195 = vector.shape_cast %194 : vector<1x256xf32> to vector<1x256xf32>
      %196 = vector.broadcast %195 : vector<1x256xf32> to vector<8x256xf32>
      %197 = vector.extract_strided_slice %183 {offsets = [1, 0], sizes = [1, 256], strides = [1, 1]} : vector<2x256xf32> to vector<1x256xf32>
      %198 = vector.shape_cast %197 : vector<1x256xf32> to vector<1x256xf32>
      %199 = vector.broadcast %198 : vector<1x256xf32> to vector<8x256xf32>
      %200 = tpu.concatenate %196, %199 in 0 : vector<8x256xf32>, vector<8x256xf32> -> vector<16x256xf32>
      %c0_104 = arith.constant 0 : index
      %c0_105 = arith.constant 0 : index
      %201 = vector.load %arg12[%c0_104, %c0_105] : memref<16x256xf32, #tpu.memory_space<vmem>>, vector<16x256xf32>
      %202 = arith.addf %201, %200 : vector<16x256xf32>
      %c0_106 = arith.constant 0 : index
      %c0_107 = arith.constant 0 : index
      %203 = vector.load %arg30[%c0_106, %c0_107] : memref<16x256xf32, #tpu.memory_space<vmem>>, vector<16x256xf32>
      tpu.vector_store %arg30[%c0_106, %c0_107], %202 {strides = array<i32>} : memref<16x256xf32, #tpu.memory_space<vmem>>, vector<16x256xf32>,
    } else {
    }
    %c0 = arith.constant 0 : index
    %c0_1 = arith.constant 0 : index
    %3 = vector.load %arg30[%c0, %c0_1] : memref<16x256xf32, #tpu.memory_space<vmem>>, vector<16x256xf32>
    %4 = arith.truncf %3 : vector<16x256xf32> to vector<16x256xbf16>
    %c0_2 = arith.constant 0 : index
    %c0_3 = arith.constant 0 : index
    %c0_4 = arith.constant 0 : index
    %5 = vector.load %arg14[%c0_2, %c0_3, %c0_4] : memref<1x256x768xbf16, #tpu.memory_space<vmem>>, vector<1x256x768xbf16>
    %6 = vector.shape_cast %5 : vector<1x256x768xbf16> to vector<256x768xbf16>
    %cst = arith.constant dense<0.000000e+00> : vector<16x768xf32>
    %7 = tpu.matmul %4, %6, %cst {dimension_numbers = #tpu.dot_dimension_numbers<[1], [0], [0], [1], [0, 0, 1, 1], [], []>} : vector<16x256xbf16>, vector<256x768xbf16>, vector<16x768xf32> -> vector<16x768xf32>
    %c0_5 = arith.constant 0 : index
    %c0_6 = arith.constant 0 : index
    %c0_7 = arith.constant 0 : index
    %8 = vector.load %arg15[%c0_5, %c0_6, %c0_7] : memref<1x1x768xf32, #tpu.memory_space<vmem>>, vector<1x1x768xf32>
    %9 = vector.shape_cast %8 : vector<1x1x768xf32> to vector<1x768xf32>
    %10 = vector.broadcast %9 : vector<1x768xf32> to vector<16x768xf32>
    %11 = arith.addf %7, %10 : vector<16x768xf32>
    %12 = vector.extract_strided_slice %11 {offsets = [0, 0], sizes = [16, 256], strides = [1, 1]} : vector<16x768xf32> to vector<16x256xf32>
    %13 = vector.extract_strided_slice %11 {offsets = [0, 256], sizes = [16, 256], strides = [1, 1]} : vector<16x768xf32> to vector<16x256xf32>
    %14 = vector.extract_strided_slice %11 {offsets = [0, 512], sizes = [16, 256], strides = [1, 1]} : vector<16x768xf32> to vector<16x256xf32>
    %15 = vector.extract_strided_slice %12 {offsets = [0, 0], sizes = [8, 256], strides = [1, 1]} : vector<16x256xf32> to vector<8x256xf32>
    %16 = vector.extract_strided_slice %12 {offsets = [8, 0], sizes = [8, 256], strides = [1, 1]} : vector<16x256xf32> to vector<8x256xf32>
    %17 = vector.extract_strided_slice %13 {offsets = [0, 0], sizes = [8, 256], strides = [1, 1]} : vector<16x256xf32> to vector<8x256xf32>
    %18 = vector.extract_strided_slice %13 {offsets = [8, 0], sizes = [8, 256], strides = [1, 1]} : vector<16x256xf32> to vector<8x256xf32>
    %19 = vector.extract_strided_slice %14 {offsets = [0, 0], sizes = [8, 256], strides = [1, 1]} : vector<16x256xf32> to vector<8x256xf32>
    %20 = vector.extract_strided_slice %14 {offsets = [8, 0], sizes = [8, 256], strides = [1, 1]} : vector<16x256xf32> to vector<8x256xf32>
    %21 = arith.mulf %15, %17 : vector<8x256xf32>
    %22 = arith.mulf %15, %18 : vector<8x256xf32>
    %23 = arith.mulf %16, %17 : vector<8x256xf32>
    %24 = arith.mulf %16, %18 : vector<8x256xf32>
    %25 = tpu.concatenate %21, %22, %23, %24 in 0 : vector<8x256xf32>, vector<8x256xf32>, vector<8x256xf32>, vector<8x256xf32> -> vector<32x256xf32>
    %26 = arith.truncf %25 : vector<32x256xf32> to vector<32x256xbf16>
    %c0_8 = arith.constant 0 : index
    %c0_9 = arith.constant 0 : index
    %27 = vector.load %arg13[%c0_8, %c0_9] : memref<256x256xbf16, #tpu.memory_space<vmem>>, vector<256x256xbf16>
    %cst_10 = arith.constant dense<0.000000e+00> : vector<32x256xf32>
    %28 = tpu.matmul %26, %27, %cst_10 {dimension_numbers = #tpu.dot_dimension_numbers<[1], [0], [0], [1], [0, 0, 1, 1], [], []>} : vector<32x256xbf16>, vector<256x256xbf16>, vector<32x256xf32> -> vector<32x256xf32>
    %cst_11 = arith.constant 1.250000e-01 : f32
    %29 = vector.broadcast %cst_11 : f32 to vector<32x256xf32>
    %30 = arith.mulf %28, %29 : vector<32x256xf32>
    %31 = vector.extract_strided_slice %30 {offsets = [0, 0], sizes = [8, 256], strides = [1, 1]} : vector<32x256xf32> to vector<8x256xf32>
    %32 = vector.extract_strided_slice %30 {offsets = [8, 0], sizes = [8, 256], strides = [1, 1]} : vector<32x256xf32> to vector<8x256xf32>
    %33 = arith.maximumf %31, %32 : vector<8x256xf32>
    %34 = arith.subf %31, %33 : vector<8x256xf32>
    %35 = math.exp %34 : vector<8x256xf32>
    %36 = arith.subf %32, %33 : vector<8x256xf32>
    %37 = math.exp %36 : vector<8x256xf32>
    %38 = arith.addf %35, %37 : vector<8x256xf32>
    %39 = arith.mulf %35, %19 : vector<8x256xf32>
    %40 = arith.mulf %37, %20 : vector<8x256xf32>
    %41 = arith.addf %39, %40 : vector<8x256xf32>
    %42 = arith.divf %41, %38 : vector<8x256xf32>
    %43 = vector.extract_strided_slice %30 {offsets = [16, 0], sizes = [8, 256], strides = [1, 1]} : vector<32x256xf32> to vector<8x256xf32>
    %44 = vector.extract_strided_slice %30 {offsets = [24, 0], sizes = [8, 256], strides = [1, 1]} : vector<32x256xf32> to vector<8x256xf32>
    %45 = arith.maximumf %43, %44 : vector<8x256xf32>
    %46 = arith.subf %43, %45 : vector<8x256xf32>
    %47 = math.exp %46 : vector<8x256xf32>
    %48 = arith.subf %44, %45 : vector<8x256xf32>
    %49 = math.exp %48 : vector<8x256xf32>
    %50 = arith.addf %47, %49 : vector<8x256xf32>
    %51 = arith.mulf %47, %19 : vector<8x256xf32>
    %52 = arith.mulf %49, %20 : vector<8x256xf32>
    %53 = arith.addf %51, %52 : vector<8x256xf32>
    %54 = arith.divf %53, %50 : vector<8x256xf32>
    %55 = tpu.concatenate %42, %54 in 0 : vector<8x256xf32>, vector<8x256xf32> -> vector<16x256xf32>
    %56 = arith.truncf %55 : vector<16x256xf32> to vector<16x256xbf16>
    %c0_12 = arith.constant 0 : index
    %c0_13 = arith.constant 0 : index
    %c0_14 = arith.constant 0 : index
    %57 = vector.load %arg16[%c0_12, %c0_13, %c0_14] : memref<1x256x256xbf16, #tpu.memory_space<vmem>>, vector<1x256x256xbf16>
    %58 = vector.shape_cast %57 : vector<1x256x256xbf16> to vector<256x256xbf16>
    %cst_15 = arith.constant dense<0.000000e+00> : vector<16x256xf32>
    %59 = tpu.matmul %56, %58, %cst_15 {dimension_numbers = #tpu.dot_dimension_numbers<[1], [0], [0], [1], [0, 0, 1, 1], [], []>} : vector<16x256xbf16>, vector<256x256xbf16>, vector<16x256xf32> -> vector<16x256xf32>
    %c0_16 = arith.constant 0 : index
    %c0_17 = arith.constant 0 : index
    %c0_18 = arith.constant 0 : index
    %60 = vector.load %arg17[%c0_16, %c0_17, %c0_18] : memref<1x1x256xf32, #tpu.memory_space<vmem>>, vector<1x1x256xf32>
    %61 = vector.shape_cast %60 : vector<1x1x256xf32> to vector<1x256xf32>
    %62 = vector.broadcast %61 : vector<1x256xf32> to vector<16x256xf32>
    %63 = arith.addf %59, %62 : vector<16x256xf32>
    %64 = arith.addf %3, %63 : vector<16x256xf32>
    %c0_19 = arith.constant 0 : index
    %c0_20 = arith.constant 0 : index
    %c0_21 = arith.constant 0 : index
    %65 = vector.load %arg18[%c0_19, %c0_20, %c0_21] : memref<1x1x256xf32, #tpu.memory_space<vmem>>, vector<1x1x256xf32>
    %66 = vector.shape_cast %65 : vector<1x1x256xf32> to vector<1x256xf32>
    %c0_22 = arith.constant 0 : index
    %c0_23 = arith.constant 0 : index
    %c0_24 = arith.constant 0 : index
    %67 = vector.load %arg19[%c0_22, %c0_23, %c0_24] : memref<1x1x256xf32, #tpu.memory_space<vmem>>, vector<1x1x256xf32>
    %68 = vector.shape_cast %67 : vector<1x1x256xf32> to vector<1x256xf32>
    %cst_25 = arith.constant dense<0.000000e+00> : vector<16xf32>
    %69 = vector.multi_reduction <add>, %64, %cst_25 [1] : vector<16x256xf32> to vector<16xf32>
    %70 = vector.shape_cast %69 : vector<16xf32> to vector<16x1xf32>
    %cst_26 = arith.constant 2.560000e+02 : f32
    %71 = vector.broadcast %cst_26 : f32 to vector<16x1xf32>
    %72 = arith.divf %70, %71 : vector<16x1xf32>
    %73 = vector.broadcast %72 : vector<16x1xf32> to vector<16x256xf32>
    %74 = arith.subf %64, %73 : vector<16x256xf32>
    %75 = arith.mulf %74, %74 : vector<16x256xf32>
    %cst_27 = arith.constant dense<0.000000e+00> : vector<16xf32>
    %76 = vector.multi_reduction <add>, %75, %cst_27 [1] : vector<16x256xf32> to vector<16xf32>
    %77 = vector.shape_cast %76 : vector<16xf32> to vector<16x1xf32>
    %cst_28 = arith.constant 2.560000e+02 : f32
    %78 = vector.broadcast %cst_28 : f32 to vector<16x1xf32>
    %79 = arith.divf %77, %78 : vector<16x1xf32>
    %cst_29 = arith.constant 9.99999974E-6 : f32
    %80 = vector.broadcast %cst_29 : f32 to vector<16x1xf32>
    %81 = arith.addf %79, %80 : vector<16x1xf32>
    %82 = math.rsqrt %81 : vector<16x1xf32>
    %83 = vector.broadcast %82 : vector<16x1xf32> to vector<16x256xf32>
    %84 = arith.mulf %74, %83 : vector<16x256xf32>
    %85 = vector.broadcast %66 : vector<1x256xf32> to vector<16x256xf32>
    %86 = arith.mulf %84, %85 : vector<16x256xf32>
    %87 = vector.broadcast %68 : vector<1x256xf32> to vector<16x256xf32>
    %88 = arith.addf %86, %87 : vector<16x256xf32>
    %89 = arith.truncf %88 : vector<16x256xf32> to vector<16x256xbf16>
    %c0_30 = arith.constant 0 : index
    %c0_31 = arith.constant 0 : index
    %c0_32 = arith.constant 0 : index
    %90 = vector.load %arg20[%c0_30, %c0_31, %c0_32] : memref<1x256x2048xbf16, #tpu.memory_space<vmem>>, vector<1x256x2048xbf16>
    %91 = vector.shape_cast %90 : vector<1x256x2048xbf16> to vector<256x2048xbf16>
    %cst_33 = arith.constant dense<0.000000e+00> : vector<16x2048xf32>
    %92 = tpu.matmul %89, %91, %cst_33 {dimension_numbers = #tpu.dot_dimension_numbers<[1], [0], [0], [1], [0, 0, 1, 1], [], []>} : vector<16x256xbf16>, vector<256x2048xbf16>, vector<16x2048xf32> -> vector<16x2048xf32>
    %c0_34 = arith.constant 0 : index
    %c0_35 = arith.constant 0 : index
    %c0_36 = arith.constant 0 : index
    %93 = vector.load %arg21[%c0_34, %c0_35, %c0_36] : memref<1x1x2048xf32, #tpu.memory_space<vmem>>, vector<1x1x2048xf32>
    %94 = vector.shape_cast %93 : vector<1x1x2048xf32> to vector<1x2048xf32>
    %95 = vector.broadcast %94 : vector<1x2048xf32> to vector<16x2048xf32>
    %96 = arith.addf %92, %95 : vector<16x2048xf32>
    %cst_37 = arith.constant 0.000000e+00 : f32
    %97 = vector.broadcast %cst_37 : f32 to vector<16x2048xf32>
    %98 = arith.maximumf %96, %97 : vector<16x2048xf32>
    %99 = arith.truncf %98 : vector<16x2048xf32> to vector<16x2048xbf16>
    %c0_38 = arith.constant 0 : index
    %c0_39 = arith.constant 0 : index
    %c0_40 = arith.constant 0 : index
    %100 = vector.load %arg22[%c0_38, %c0_39, %c0_40] : memref<1x2048x256xbf16, #tpu.memory_space<vmem>>, vector<1x2048x256xbf16>
    %101 = vector.shape_cast %100 : vector<1x2048x256xbf16> to vector<2048x256xbf16>
    %cst_41 = arith.constant dense<0.000000e+00> : vector<16x256xf32>
    %102 = tpu.matmul %99, %101, %cst_41 {dimension_numbers = #tpu.dot_dimension_numbers<[1], [0], [0], [1], [0, 0, 1, 1], [], []>} : vector<16x2048xbf16>, vector<2048x256xbf16>, vector<16x256xf32> -> vector<16x256xf32>
    %c0_42 = arith.constant 0 : index
    %c0_43 = arith.constant 0 : index
    %c0_44 = arith.constant 0 : index
    %103 = vector.load %arg23[%c0_42, %c0_43, %c0_44] : memref<1x1x256xf32, #tpu.memory_space<vmem>>, vector<1x1x256xf32>
    %104 = vector.shape_cast %103 : vector<1x1x256xf32> to vector<1x256xf32>
    %105 = vector.broadcast %104 : vector<1x256xf32> to vector<16x256xf32>
    %106 = arith.addf %102, %105 : vector<16x256xf32>
    %107 = arith.addf %88, %106 : vector<16x256xf32>
    %c0_45 = arith.constant 0 : index
    %c0_46 = arith.constant 0 : index
    %c0_47 = arith.constant 0 : index
    %108 = vector.load %arg24[%c0_45, %c0_46, %c0_47] : memref<1x1x256xf32, #tpu.memory_space<vmem>>, vector<1x1x256xf32>
    %109 = vector.shape_cast %108 : vector<1x1x256xf32> to vector<1x256xf32>
    %c0_48 = arith.constant 0 : index
    %c0_49 = arith.constant 0 : index
    %c0_50 = arith.constant 0 : index
    %110 = vector.load %arg25[%c0_48, %c0_49, %c0_50] : memref<1x1x256xf32, #tpu.memory_space<vmem>>, vector<1x1x256xf32>
    %111 = vector.shape_cast %110 : vector<1x1x256xf32> to vector<1x256xf32>
    %cst_51 = arith.constant dense<0.000000e+00> : vector<16xf32>
    %112 = vector.multi_reduction <add>, %107, %cst_51 [1] : vector<16x256xf32> to vector<16xf32>
    %113 = vector.shape_cast %112 : vector<16xf32> to vector<16x1xf32>
    %cst_52 = arith.constant 2.560000e+02 : f32
    %114 = vector.broadcast %cst_52 : f32 to vector<16x1xf32>
    %115 = arith.divf %113, %114 : vector<16x1xf32>
    %116 = vector.broadcast %115 : vector<16x1xf32> to vector<16x256xf32>
    %117 = arith.subf %107, %116 : vector<16x256xf32>
    %118 = arith.mulf %117, %117 : vector<16x256xf32>
    %cst_53 = arith.constant dense<0.000000e+00> : vector<16xf32>
    %119 = vector.multi_reduction <add>, %118, %cst_53 [1] : vector<16x256xf32> to vector<16xf32>
    %120 = vector.shape_cast %119 : vector<16xf32> to vector<16x1xf32>
    %cst_54 = arith.constant 2.560000e+02 : f32
    %121 = vector.broadcast %cst_54 : f32 to vector<16x1xf32>
    %122 = arith.divf %120, %121 : vector<16x1xf32>
    %cst_55 = arith.constant 9.99999974E-6 : f32
    %123 = vector.broadcast %cst_55 : f32 to vector<16x1xf32>
    %124 = arith.addf %122, %123 : vector<16x1xf32>
    %125 = math.rsqrt %124 : vector<16x1xf32>
    %126 = vector.broadcast %125 : vector<16x1xf32> to vector<16x256xf32>
    %127 = arith.mulf %117, %126 : vector<16x256xf32>
    %128 = vector.broadcast %109 : vector<1x256xf32> to vector<16x256xf32>
    %129 = arith.mulf %127, %128 : vector<16x256xf32>
    %130 = vector.broadcast %111 : vector<1x256xf32> to vector<16x256xf32>
    %131 = arith.addf %129, %130 : vector<16x256xf32>
    %c0_56 = arith.constant 0 : index
    %c0_57 = arith.constant 0 : index
    %132 = vector.load %arg30[%c0_56, %c0_57] : memref<16x256xf32, #tpu.memory_space<vmem>>, vector<16x256xf32>
    tpu.vector_store %arg30[%c0_56, %c0_57], %131 {strides = array<i32>} : memref<16x256xf32, #tpu.memory_space<vmem>>, vector<16x256xf32>,
    %c1_i32 = arith.constant 1 : i32
    %133 = arith.cmpi eq, %arg0, %c1_i32 : i32
    %134 = arith.extui %133 : i1 to i32
    %c0_i32_58 = arith.constant 0 : i32
    %135 = arith.cmpi ne, %134, %c0_i32_58 : i32
    scf.if %135 {
      %136 = arith.truncf %131 : vector<16x256xf32> to vector<16x256xbf16>
      %c0_59 = arith.constant 0 : index
      %c0_60 = arith.constant 0 : index
      %137 = vector.load %arg26[%c0_59, %c0_60] : memref<256x128xbf16, #tpu.memory_space<vmem>>, vector<256x128xbf16>
      %cst_61 = arith.constant dense<0.000000e+00> : vector<16x128xf32>
      %138 = tpu.matmul %136, %137, %cst_61 {dimension_numbers = #tpu.dot_dimension_numbers<[1], [0], [0], [1], [0, 0, 1, 1], [], []>} : vector<16x256xbf16>, vector<256x128xbf16>, vector<16x128xf32> -> vector<16x128xf32>
      %c0_62 = arith.constant 0 : index
      %c0_63 = arith.constant 0 : index
      %139 = vector.load %arg27[%c0_62, %c0_63] : memref<1x128xf32, #tpu.memory_space<vmem>>, vector<1x128xf32>
      %140 = vector.broadcast %139 : vector<1x128xf32> to vector<16x128xf32>
      %141 = arith.addf %138, %140 : vector<16x128xf32>
      %c0_64 = arith.constant 0 : index
      %c0_65 = arith.constant 0 : index
      %142 = vector.load %arg29[%c0_64, %c0_65] : memref<16x128xf32, #tpu.memory_space<vmem>>, vector<16x128xf32>
      tpu.vector_store %arg29[%c0_64, %c0_65], %141 {strides = array<i32>} : memref<16x128xf32, #tpu.memory_space<vmem>>, vector<16x128xf32>,
    } else {
    }
    return
  }
  func.func @transform_0(%arg0: i32) -> (i32, i32) {
    %c0_i32 = arith.constant 0 : i32
    %c0_i32_0 = arith.constant 0 : i32
    %c0_i32_1 = arith.constant 0 : i32
    return %c0_i32, %c0_i32_0 : i32, i32
  }
  func.func @transform_1(%arg0: i32) -> (i32, i32) {
    %c0_i32 = arith.constant 0 : i32
    %c0_i32_0 = arith.constant 0 : i32
    %c0_i32_1 = arith.constant 0 : i32
    return %c0_i32, %c0_i32_0 : i32, i32
  }
  func.func @transform_2(%arg0: i32) -> (i32, i32) {
    %c0_i32 = arith.constant 0 : i32
    %c0_i32_0 = arith.constant 0 : i32
    %c0_i32_1 = arith.constant 0 : i32
    return %c0_i32, %c0_i32_0 : i32, i32
  }
  func.func @transform_3(%arg0: i32) -> (i32, i32) {
    %c0_i32 = arith.constant 0 : i32
    %c0_i32_0 = arith.constant 0 : i32
    %c0_i32_1 = arith.constant 0 : i32
    return %c0_i32, %c0_i32_0 : i32, i32
  }
  func.func @transform_4(%arg0: i32) -> (i32, i32) {
    %c0_i32 = arith.constant 0 : i32
    %c0_i32_0 = arith.constant 0 : i32
    %c0_i32_1 = arith.constant 0 : i32
    return %c0_i32, %c0_i32_0 : i32, i32
  }
  func.func @transform_5(%arg0: i32) -> (i32, i32) {
    %c0_i32 = arith.constant 0 : i32
    %c0_i32_0 = arith.constant 0 : i32
    %c0_i32_1 = arith.constant 0 : i32
    return %c0_i32, %c0_i32_0 : i32, i32
  }
  func.func @transform_6(%arg0: i32) -> (i32, i32) {
    %c0_i32 = arith.constant 0 : i32
    %c0_i32_0 = arith.constant 0 : i32
    %c0_i32_1 = arith.constant 0 : i32
    return %c0_i32, %c0_i32_0 : i32, i32
  }
  func.func @transform_7(%arg0: i32) -> (i32, i32) {
    %c0_i32 = arith.constant 0 : i32
    %c0_i32_0 = arith.constant 0 : i32
    %c0_i32_1 = arith.constant 0 : i32
    return %c0_i32, %c0_i32_0 : i32, i32
  }
  func.func @transform_8(%arg0: i32) -> (i32, i32) {
    %c0_i32 = arith.constant 0 : i32
    %c0_i32_0 = arith.constant 0 : i32
    %c0_i32_1 = arith.constant 0 : i32
    return %c0_i32, %c0_i32_0 : i32, i32
  }
  func.func @transform_9(%arg0: i32) -> (i32, i32) {
    %c0_i32 = arith.constant 0 : i32
    %c0_i32_0 = arith.constant 0 : i32
    %c0_i32_1 = arith.constant 0 : i32
    return %c0_i32, %c0_i32_0 : i32, i32
  }
  func.func @transform_10(%arg0: i32) -> (i32, i32) {
    %c0_i32 = arith.constant 0 : i32
    %c0_i32_0 = arith.constant 0 : i32
    %c0_i32_1 = arith.constant 0 : i32
    return %c0_i32, %c0_i32_0 : i32, i32
  }
  func.func @transform_11(%arg0: i32) -> (i32, i32) {
    %c0_i32 = arith.constant 0 : i32
    %c0_i32_0 = arith.constant 0 : i32
    %c0_i32_1 = arith.constant 0 : i32
    return %c0_i32, %c0_i32_0 : i32, i32
  }
  func.func @transform_12(%arg0: i32) -> (i32, i32) {
    %c0_i32 = arith.constant 0 : i32
    %c0_i32_0 = arith.constant 0 : i32
    %c0_i32_1 = arith.constant 0 : i32
    return %c0_i32, %c0_i32_0 : i32, i32
  }
  func.func @transform_13(%arg0: i32) -> (i32, i32, i32) {
    %c0_i32 = arith.constant 0 : i32
    %c0_i32_0 = arith.constant 0 : i32
    %c0_i32_1 = arith.constant 0 : i32
    return %arg0, %c0_i32, %c0_i32_0 : i32, i32, i32
  }
  func.func @transform_14(%arg0: i32) -> (i32, i32, i32) {
    %c0_i32 = arith.constant 0 : i32
    %c0_i32_0 = arith.constant 0 : i32
    %c0_i32_1 = arith.constant 0 : i32
    return %arg0, %c0_i32, %c0_i32_0 : i32, i32, i32
  }
  func.func @transform_15(%arg0: i32) -> (i32, i32, i32) {
    %c0_i32 = arith.constant 0 : i32
    %c0_i32_0 = arith.constant 0 : i32
    %c0_i32_1 = arith.constant 0 : i32
    return %arg0, %c0_i32, %c0_i32_0 : i32, i32, i32
  }
  func.func @transform_16(%arg0: i32) -> (i32, i32, i32) {
    %c0_i32 = arith.constant 0 : i32
    %c0_i32_0 = arith.constant 0 : i32
    %c0_i32_1 = arith.constant 0 : i32
    return %arg0, %c0_i32, %c0_i32_0 : i32, i32, i32
  }
  func.func @transform_17(%arg0: i32) -> (i32, i32, i32) {
    %c0_i32 = arith.constant 0 : i32
    %c0_i32_0 = arith.constant 0 : i32
    %c0_i32_1 = arith.constant 0 : i32
    return %arg0, %c0_i32, %c0_i32_0 : i32, i32, i32
  }
  func.func @transform_18(%arg0: i32) -> (i32, i32, i32) {
    %c0_i32 = arith.constant 0 : i32
    %c0_i32_0 = arith.constant 0 : i32
    %c0_i32_1 = arith.constant 0 : i32
    return %arg0, %c0_i32, %c0_i32_0 : i32, i32, i32
  }
  func.func @transform_19(%arg0: i32) -> (i32, i32, i32) {
    %c0_i32 = arith.constant 0 : i32
    %c0_i32_0 = arith.constant 0 : i32
    %c0_i32_1 = arith.constant 0 : i32
    return %arg0, %c0_i32, %c0_i32_0 : i32, i32, i32
  }
  func.func @transform_20(%arg0: i32) -> (i32, i32, i32) {
    %c0_i32 = arith.constant 0 : i32
    %c0_i32_0 = arith.constant 0 : i32
    %c0_i32_1 = arith.constant 0 : i32
    return %arg0, %c0_i32, %c0_i32_0 : i32, i32, i32
  }
  func.func @transform_21(%arg0: i32) -> (i32, i32, i32) {
    %c0_i32 = arith.constant 0 : i32
    %c0_i32_0 = arith.constant 0 : i32
    %c0_i32_1 = arith.constant 0 : i32
    return %arg0, %c0_i32, %c0_i32_0 : i32, i32, i32
  }
  func.func @transform_22(%arg0: i32) -> (i32, i32, i32) {
    %c0_i32 = arith.constant 0 : i32
    %c0_i32_0 = arith.constant 0 : i32
    %c0_i32_1 = arith.constant 0 : i32
    return %arg0, %c0_i32, %c0_i32_0 : i32, i32, i32
  }
  func.func @transform_23(%arg0: i32) -> (i32, i32, i32) {
    %c0_i32 = arith.constant 0 : i32
    %c0_i32_0 = arith.constant 0 : i32
    %c0_i32_1 = arith.constant 0 : i32
    return %arg0, %c0_i32, %c0_i32_0 : i32, i32, i32
  }
  func.func @transform_24(%arg0: i32) -> (i32, i32, i32) {
    %c0_i32 = arith.constant 0 : i32
    %c0_i32_0 = arith.constant 0 : i32
    %c0_i32_1 = arith.constant 0 : i32
    return %arg0, %c0_i32, %c0_i32_0 : i32, i32, i32
  }
  func.func @transform_25(%arg0: i32) -> (i32, i32) {
    %c0_i32 = arith.constant 0 : i32
    %c0_i32_0 = arith.constant 0 : i32
    %c0_i32_1 = arith.constant 0 : i32
    return %c0_i32, %c0_i32_0 : i32, i32
  }
  func.func @transform_26(%arg0: i32) -> (i32, i32) {
    %c0_i32 = arith.constant 0 : i32
    %c0_i32_0 = arith.constant 0 : i32
    %c0_i32_1 = arith.constant 0 : i32
    return %c0_i32, %c0_i32_0 : i32, i32
  }
  func.func @transform_27(%arg0: i32) -> (i32, i32) {
    %c0_i32 = arith.constant 0 : i32
    %c0_i32_0 = arith.constant 0 : i32
    %c0_i32_1 = arith.constant 0 : i32
    return %c0_i32, %c0_i32_0 : i32, i32
  }
  func.func @transform_28(%arg0: i32) -> (i32, i32) {
    %c0_i32 = arith.constant 0 : i32
    %c0_i32_0 = arith.constant 0 : i32
    %c0_i32_1 = arith.constant 0 : i32
    return %c0_i32, %c0_i32_0 : i32, i32
  }
}

</mosaic_0001>

<bundles_post_ra>
// kernel: _lambda_.1
= control target key start
LH: loop header
LB: loop body
LE: loop exit
PB: predicated region body
PF: predicated region fallthrough
CT: control target
= control target key end

     0   :  { %s15292_s0 = inlined_call_operand.vmem [shape: bf16[128,16], index: 0, kind: input, shape index: {}]   ;;  %s15293_s1 = inlined_call_operand.hbm [shape: bf16[16,32], index: 1, kind: input, shape index: {}]   ;;  %s15294_s2 = inlined_call_operand.hbm [shape: f32[1,32], index: 2, kind: input, shape index: {}]   ;;  %s15295_s3 = inlined_call_operand.hbm [shape: bf16[32,1152], index: 3, kind: input, shape index: {}]   ;;  %s15296_s4 = inlined_call_operand.hbm [shape: bf16[32,1152], index: 4, kind: input, shape index: {}]   ;;  %s15297_s5 = inlined_call_operand.hbm [shape: f32[1,128], index: 5, kind: input, shape index: {}]   ;;  %s15298_s6 = inlined_call_operand.hbm [shape: bf16[2,32], index: 6, kind: input, shape index: {}]   ;;  %s15299_s7 = inlined_call_operand.hbm [shape: bf16[128,768], index: 7, kind: input, shape index: {}]   ;;  %s15300_s8 = inlined_call_operand.hbm [shape: f32[1,768], index: 8, kind: input, shape index: {}]   ;;  %s15301_s9 = inlined_call_operand.hbm [shape: bf16[512,128], index: 9, kind: input, shape index: {}]   ;;  %s15302_s10 = inlined_call_operand.hbm [shape: f32[1,128], index: 10, kind: input, shape index: {}]   ;;  %s15303_s11 = inlined_call_operand.vmem [shape: f32[16,256], index: 11, kind: input, shape index: {}]   ;;  %s15304_s12 = inlined_call_operand.hbm [shape: bf16[256,256], index: 12, kind: input, shape index: {}]   ;;  %s15305_s13 = inlined_call_operand.hbm [shape: bf16[2,256,768], index: 13, kind: input, shape index: {}]   ;;  %s15306_s14 = inlined_call_operand.hbm [shape: f32[2,1,768], index: 14, kind: input, shape index: {}]   ;;  %s15307_s15 = inlined_call_operand.hbm [shape: bf16[2,256,256], index: 15, kind: input, shape index: {}]   ;;  %s15308_s16 = inlined_call_operand.hbm [shape: f32[2,1,256], index: 16, kind: input, shape index: {}]   ;;  %s15309_s17 = inlined_call_operand.hbm [shape: f32[2,1,256], index: 17, kind: input, shape index: {}]   ;;  %s15310_s18 = inlined_call_operand.hbm [shape: f32[2,1,256], index: 18, kind: input, shape index: {}]   ;;  %s15311_s19 = inlined_call_operand.hbm [shape: bf16[2,256,2048], index: 19, kind: input, shape index: {}]   ;;  %s15312_s20 = inlined_call_operand.hbm [shape: f32[2,1,2048], index: 20, kind: input, shape index: {}]   ;;  %s15313_s21 = inlined_call_operand.hbm [shape: bf16[2,2048,256], index: 21, kind: input, shape index: {}]   ;;  %s15314_s22 = inlined_call_operand.hbm [shape: f32[2,1,256], index: 22, kind: input, shape index: {}]   ;;  %s15315_s23 = inlined_call_operand.hbm [shape: f32[2,1,256], index: 23, kind: input, shape index: {}]   ;;  %s15316_s24 = inlined_call_operand.hbm [shape: f32[2,1,256], index: 24, kind: input, shape index: {}]   ;;  %s15317_s25 = inlined_call_operand.hbm [shape: bf16[256,128], index: 25, kind: input, shape index: {}]   ;;  %s15318_s26 = inlined_call_operand.hbm [shape: f32[1,128], index: 26, kind: input, shape index: {}]   ;;  %s15319_s27 = inlined_call_operand.hbm [shape: f32[2,128], index: 27, kind: output, shape index: {0}]   ;;  %s15320_s28 = inlined_call_operand.hbm [shape: f32[16,128], index: 28, kind: output, shape index: {1}]  }
   0x1   :  { %15386 = sst [smem:[#allocation89_spill]] %s15292_s0 }
   0x2   :  { %15387 = sst [smem:[#allocation90_spill]] %s15293_s1 }
   0x3   :  { %15388 = sst [smem:[#allocation91_spill]] %s15294_s2 }
   0x4   :  { %15389 = sst [smem:[#allocation92_spill]] %s15295_s3 }
   0x5   :  { %15390 = sst [smem:[#allocation93_spill]] %s15296_s4 }
   0x6   :  { %15391 = sst [smem:[#allocation94_spill]] %s15297_s5 }
   0x7   :  { %15392 = sst [smem:[#allocation95_spill]] %s15298_s6 }
   0x8   :  { %15393 = sst [smem:[#allocation96_spill]] %s15299_s7 }
   0x9   :  { %15394 = sst [smem:[#allocation97_spill]] %s15300_s8 }
   0xa   :  { %15395 = sst [smem:[#allocation98_spill]] %s15301_s9 }
   0xb   :  { %15396 = sst [smem:[#allocation99_spill]] %s15302_s10 }
   0xc   :  { %15397 = sst [smem:[#allocation100_spill]] %s15303_s11 }
   0xd   :  { %15398 = sst [smem:[#allocation101_spill]] %s15304_s12 }
   0xe   :  { %15399 = sst [smem:[#allocation102_spill]] %s15305_s13 }
   0xf   :  { %15400 = sst [smem:[#allocation103_spill]] %s15307_s15 }
  0x10   :  { %15401 = sst [smem:[#allocation104_spill]] %s15309_s17 }
  0x11   :  { %15402 = sst [smem:[#allocation105_spill]] %s15311_s19 }
  0x12   :  { %15403 = sst [smem:[#allocation106_spill]] %s15312_s20 }
  0x13   :  { %15404 = sst [smem:[#allocation107_spill]] %s15314_s22 }
  0x14   :  { %15405 = sst [smem:[#allocation108_spill]] %s15316_s24 }
  0x15   :  { %15406 = sst [smem:[#allocation109_spill]] %s15317_s25 }
  0x16   :  { %15407 = sst [smem:[#allocation110_spill]] %s15319_s27 }
  0x17   :  { %15408 = sst [smem:[#allocation111_spill]] %s15320_s28 }
  0x18   :  { %34 = vsyncpa [#allocation5], 0 }
  0x19   :  { %35 = vsyncpa [#allocation8], 0 }
  0x1a   :  { %36 = vsyncpa [#allocation11], 0 }
  0x1b   :  { %37 = vsyncpa [#allocation14], 0 }
  0x1c   :  { %38 = vsyncpa [#allocation17], 0 }
  0x1d   :  { %39 = vsyncpa [#allocation20], 0 }
  0x1e   :  { %40 = vsyncpa [#allocation23], 0 }
  0x1f   :  { %42 = vsyncpa [#allocation23 + $0x1], 0 }
  0x20   :  { %43 = vsyncpa [#allocation26], 0 }
  0x21   :  { %45 = vsyncpa [#allocation26 + $0x1], 0 }
  0x22   :  { %46 = vsyncpa [#allocation29], 0 }
  0x23   :  { %48 = vsyncpa [#allocation29 + $0x1], 0 }
  0x24   :  { %49 = vsyncpa [#allocation32], 0 }
  0x25   :  { %51 = vsyncpa [#allocation32 + $0x1], 0 }
  0x26   :  { %52 = vsyncpa [#allocation35], 0 }
  0x27   :  { %54 = vsyncpa [#allocation35 + $0x1], 0 }
  0x28   :  { %55 = vsyncpa [#allocation38], 0 }
  0x29   :  { %57 = vsyncpa [#allocation38 + $0x1], 0 }
  0x2a   :  { %58 = vsyncpa [#allocation41], 0 }
  0x2b   :  { %59 = vsyncpa [#allocation6], 0 }
  0x2c   :  { %60 = vsyncpa [#allocation45], 0  ;;  %s13254_s8 = smov 0   ;;  %s13256_s5 = smov 0  }
  0x2d   :  { %s13258_s9 = smov 0   ;;  %s13260_s30 = smov 0  }
  0x2e LB: > { %15409 = sst [smem:[#allocation61_spill]] %s13058_s5  ;;  %s13068_s3 = smov [#allocation7]   ;;  %s13066_s30 = sphi %s13260_s30, %s15548_s30   ;;  %s13062_s9 = sphi %s13258_s9, %s15551_s9   ;;  %s13058_s5 = sphi %s13256_s5, %s15550_s5   ;;  %s13054_s8 = sphi %s13254_s8, %s15549_s8  }
  0x2f   : > { %15410 = sst [smem:[#allocation62_spill]] %s13062_s9  ;;  %s769_s6 = sshll.u32 %s13068_s3, 4  ;;  %s770_s6 = int_to_ptr.vmem [resolvable:$true] %s769_s6 }
  0x30   : > { %s13275_s10 = sadd.s32 4294967295, %s13066_s30   ;;  %p9923_p0 = scmp.ge.s32.totalorder %s13066_s30, 1 }
  0x31   : > { %15411 = sst [smem:[#allocation63_spill]] %s13275_s10  ;;  %p15327_p1 = scmp.eq.s32.totalorder %s13275_s10, 0 }
  0x32   : > { %p740_p2 = scmp.lt.s32.totalorder %s13066_s30, 3  ;;  %s13069_s11 = smov [#allocation10]  }
  0x33   : > { %s792_s29 = sshll.u32 %s13069_s11, 4  ;;  %s13070_s7 = smov [#allocation13]   ;;  %s13293_s29 = int_to_ptr.vmem [resolvable:$true] %s792_s29 }
  0x34   : > { %p13281_p4 = pnand %p9923_p0, %p740_p2  ;;  %s817_s12 = sshll.u32 %s13070_s7, 4  ;;  %s13295_s12 = int_to_ptr.vmem [resolvable:$true] %s817_s12 }
  0x35   : > { %s12265_s4 = scalar_lea.vmem %s770_s6, 16  ;;  %s12272_s3 = scalar_lea.vmem %s770_s6, 32 }
  0x36   : > { %s15412_s0 = scalar_select %p13281_p4, 1, 0 }
  0x37   : > { %p11244_p5 = pneg %p13281_p4  ;;  %p12266_p8 = scmp.ne.s32.totalorder %s770_s6, %s12265_s4 }
  0x38   : > { %15413 = sst [smem:[#allocation64_spill]] %s15412_s0  ;;  %p12273_p11 = scmp.lt.s32.totalorder %s770_s6, %s770_s6 }
  0x39   : > { %p13289_p6 = pnand %p11244_p5, %p15327_p1  ;;  %p12274_p12 = scmp.lt.s32.totalorder %s12272_s3, %s12265_s4 }
  0x3b   : > { %s15414_s2 = scalar_select %p13289_p6, 1, 0 }
  0x3c   : > { %p13299_p7 = pneg %p13289_p6  ;;  %p12275_p13 = por %p12274_p12, %p12273_p11 }
  0x3e   : > { %s15415_s1 = scalar_select %p13299_p7, 1, 0 }
  0x3f   : > { %p12268_p9 = pnand %p12266_p8, %p13299_p7 }
  0x41   : > { %p12269_p10 = pneg %p12268_p9 }
  0x43   : > { %p12276_p0 = pnand %p12275_p13, %p12269_p10 }
  0x45   : > { %12279 = shalt.err (!%p12276_p0)
}
  0x46   : > { %s15416_s28 = sld [smem:[#allocation91_spill]]  ;;  %s12291_s27 = scalar_lea.vmem %s13293_s29, 2304 }
  0x47   : > { %p12292_p2 = scmp.ne.s32.totalorder %s13293_s29, %s12291_s27  ;;  %p12299_p9 = scmp.lt.s32.totalorder %s13293_s29, %s13293_s29 }
  0x48   : > { %p12300_p11 = scmp.lt.s32.totalorder %s12291_s27, %s12291_s27 }
  0x49   : > { %p12294_p5 = pnand %p12292_p2, %p13299_p7 }
  0x4a   : > { %p12301_p10 = por %p12300_p11, %p12299_p9 }
  0x4b   : > { %p12295_p8 = pneg %p12294_p5 }
  0x4c   : > { %11250 = dma.hbm_to_vmem [thread:$0]  (!%p13289_p6), %s15416_s28, 16, %s770_s6, [#allocation8]  }
  0x4d   : > { %p12302_p12 = pnand %p12301_p10, %p12295_p8 }
  0x4f   : > { %12305 = shalt.err (!%p12302_p12)
}
  0x50   : > { %s15326_s4 = smov 576   ;;  %s15328_s28 = smov 36  }
  0x51   : > { %s15417_s11 = sld [smem:[#allocation93_spill]]  ;;  %s12317_s27 = scalar_lea.vmem %s13295_s12, 16 }
  0x52   : > { %p12318_p13 = scmp.ne.s32.totalorder %s13295_s12, %s12317_s27  ;;  %s12324_s7 = scalar_lea.vmem %s13295_s12, 32 }
  0x53   : > { %p12325_p5 = scmp.lt.s32.totalorder %s13295_s12, %s13295_s12  ;;  %p12326_p8 = scmp.lt.s32.totalorder %s12324_s7, %s12317_s27 }
  0x54   : > { %p12320_p0 = pnand %p12318_p13, %p13299_p7 }
  0x55   : > { %p12327_p9 = por %p12326_p8, %p12325_p5 }
  0x56   : > { %p12321_p2 = pneg %p12320_p0 }
  0x57   : > { %11256 = dma.hbm_to_vmem [thread:$0]  (!%p13289_p6), %s15417_s11, 2304, %s13293_s29, [#allocation11], %s15326_s4, %s15326_s4, %s15328_s28  }
  0x58   : > { %p12328_p11 = pnand %p12327_p9, %p12321_p2 }
  0x5a   : > { %12331 = shalt.err (!%p12328_p11)
}
  0x5b   : > { %s15418_s22 = sld [smem:[#allocation95_spill]]  ;;  %s13073_s29 = smov [#allocation16]  }
  0x5c   : > { %s841_s6 = sshll.u32 %s13073_s29, 4  ;;  %s13074_s3 = smov [#allocation19]   ;;  %s842_s6 = int_to_ptr.vmem [resolvable:$true] %s841_s6 }
  0x5d   : > { %s865_s11 = sshll.u32 %s13074_s3, 4  ;;  %s12343_s4 = scalar_lea.vmem %s842_s6, 96  ;;  %s866_s11 = int_to_ptr.vmem [resolvable:$true] %s865_s11 }
  0x5e   : > { %p12344_p10 = scmp.ne.s32.totalorder %s842_s6, %s12343_s4  ;;  %p12351_p0 = scmp.lt.s32.totalorder %s842_s6, %s842_s6 }
  0x5f   : > { %p12352_p2 = scmp.lt.s32.totalorder %s12343_s4, %s12343_s4 }
  0x60   : > { %p12346_p12 = pnand %p12344_p10, %p13299_p7 }
  0x61   : > { %11262 = dma.hbm_to_vmem [thread:$0]  (!%p13289_p6), %s15418_s22, 16, %s13295_s12, [#allocation14]  }
  0x62   : > { %p12347_p13 = pneg %p12346_p12  ;;  %p12353_p5 = por %p12352_p2, %p12351_p0 }
  0x64   : > { %p12354_p8 = pnand %p12353_p5, %p12347_p13 }
  0x66   : > { %12357 = shalt.err (!%p12354_p8)
}
  0x67   : > { %s15419_s22 = sld [smem:[#allocation97_spill]]  ;;  %s12369_s12 = scalar_lea.vmem %s866_s11, 16 }
  0x68   : > { %p12370_p9 = scmp.ne.s32.totalorder %s866_s11, %s12369_s12  ;;  %s12376_s27 = scalar_lea.vmem %s866_s11, 32 }
  0x69   : > { %p12377_p10 = scmp.lt.s32.totalorder %s866_s11, %s866_s11  ;;  %p12378_p12 = scmp.lt.s32.totalorder %s12376_s27, %s12369_s12 }
  0x6a   : > { %p12372_p11 = pnand %p12370_p9, %p13299_p7 }
  0x6b   : > { %p12379_p1 = por %p12378_p12, %p12377_p10 }
  0x6c   : > { %p12373_p3 = pneg %p12372_p11 }
  0x6d   : > { %11268 = dma.hbm_to_vmem [thread:$0]  (!%p13289_p6), %s15419_s22, 96, %s842_s6, [#allocation17]  }
  0x6e   : > { %p12380_p0 = pnand %p12379_p1, %p12373_p3 }
  0x70   : > { %12383 = shalt.err (!%p12380_p0)
}
  0x71   : > { %s15420_s29 = sld [smem:[#allocation99_spill]]  ;;  %s13075_s6 = smov [#allocation40]  }
  0x72   : > { %s891_s3 = sshll.u32 %s13075_s6, 4  ;;  %s892_s3 = int_to_ptr.vmem [resolvable:$true] %s891_s3 }
  0x73   : > { %s12395_s24 = scalar_lea.vmem %s892_s3, 2048  ;;  %p12403_p8 = scmp.lt.s32.totalorder %s892_s3, %s892_s3 }
  0x74   : > { %p12396_p13 = scmp.ne.s32.totalorder %s892_s3, %s12395_s24  ;;  %p12404_p9 = scmp.lt.s32.totalorder %s12395_s24, %s12395_s24 }
  0x76   : > { %p12398_p2 = pnand %p12396_p13, %p13299_p7  ;;  %p12405_p11 = por %p12404_p9, %p12403_p8 }
  0x77   : > { %11274 = dma.hbm_to_vmem [thread:$0]  (!%p13289_p6), %s15420_s29, 16, %s866_s11, [#allocation20]  }
  0x78   : > { %p12399_p5 = pneg %p12398_p2 }
  0x7a   : > { %p12406_p1 = pnand %p12405_p11, %p12399_p5 }
  0x7c   : > { %12409 = shalt.err (!%p12406_p1)
}
  0x7d   : > { %s15331_s0 = smov 64   ;;  %s15329_s11 = smov 4  }
  0x7e   : > { %s15421_s25 = sld [smem:[#allocation109_spill]]  ;;  %s13363_s27 = sadd.s32 1, %s13066_s30  }
  0x7f   : > { %15422 = sst [smem:[#allocation65_spill]] %s13363_s27  ;;  %s346_s4 = sadd.s32 1, %s13062_s9 }
  0x80   : > { %s343_s7 = ssub.s32 %s13066_s30, %s13363_s27  ;;  %p353_p3 = scmp.ne.s32.totalorder %s13062_s9, %s13058_s5 }
  0x81   : > { %p344_p10 = scmp.eq.s32.totalorder %s343_s7, 0  ;;  %p354_p12 = scmp.eq.s32.totalorder %s13066_s30, 0 }
  0x82   : > { %p359_p0 = scmp.ne.s32.totalorder %s13058_s5, %s13054_s8  ;;  %p15424_p2 = scmp.eq.s32.totalorder %s13275_s10, 0 }
  0x83   : > { %s13374_s29 = scalar_select %p344_p10, %s13062_s9, %s346_s4  }
  0x84   : > { %11280 = dma.hbm_to_vmem [thread:$0]  (!%p13289_p6), %s15421_s25, 2048, %s892_s3, [#allocation41], %s15331_s0, %s15331_s0, %s15329_s11  }
  0x85   : > { %15423 = sst [smem:[#allocation66_spill]] %s13374_s29  ;;  %p355_p13 = por %p354_p12, %p353_p3 }
  0x86   : > { %p13378_p5 = por %p15424_p2, %p359_p0  ;;  %p11334_p8 = scmp.lt.s32.totalorder %s13066_s30, 2 }
  0x87   : > { %s13384_s24 = sand.u32 1, %s13066_s30   ;;  %s13387_s3 = sand.u32 1, %s13062_s9  }
  0x88   : > { %s15425_s6 = scalar_select %p13378_p5, 1, 0 }
  0x89   : > { %s11154_s22 = smul.u32 768, %s13387_s3  ;;  %p13391_p9 = pnand %p11334_p8, %p355_p13 }
  0x8a   : > { %15426 = sst [smem:[#allocation67_spill]] %s15425_s6  ;;  %s11155_s12 = smul.u32 12288, %s13066_s30 }
  0x8b   : > { %s15427_s7 = scalar_select %p13391_p9, 1, 0 }
  0x8c   : > { %s15428_s13 = sld [smem:[#allocation102_spill]]  ;;  %s920_s11 = scalar_lea.vmem [#allocation22], %s11154_s22 }
  0x8d   : > { %s927_s0 = sshll.u32 %s920_s11, 4  ;;  %p13407_p1 = pneg %p13391_p9  ;;  %s13400_s0 = int_to_ptr.vmem [resolvable:$true] %s927_s0 }
  0x8f   : > { %s15429_s9 = scalar_select %p13407_p1, 1, 0 }
  0x92   : > { %s13398_s28 = scalar_lea.hbm %s15428_s13, %s11155_s12  ;;  %s12415_s4 = scalar_lea.hbm %s15428_s13, 24576 }
  0x93   : > { %s12410_s29 = scalar_lea.hbm %s13398_s28, 12288  ;;  %p12416_p12 = scmp.lt.s32.totalorder %s13398_s28, %s15428_s13 }
  0x94   : > { %p12411_p11 = scmp.ne.s32.totalorder %s13398_s28, %s12410_s29  ;;  %p12417_p0 = scmp.lt.s32.totalorder %s12415_s4, %s12410_s29 }
  0x96   : > { %p12413_p3 = pnand %p13407_p1, %p12411_p11  ;;  %p12418_p13 = por %p12417_p0, %p12416_p12 }
  0x98   : > { %p12414_p10 = pneg %p12413_p3 }
  0x9a   : > { %p12419_p2 = pnand %p12418_p13, %p12414_p10 }
  0x9c   : > { %12422 = shalt.err (!%p12419_p2)
}
  0x9d   : > { %s12423_s25 = scalar_lea.vmem %s13400_s0, 12288  ;;  %s13078_s27 = smov [#allocation22]  }
  0x9e   : > { %p12424_p8 = scmp.ne.s32.totalorder %s13400_s0, %s12423_s25  ;;  %s12428_s12 = sshll.u32 %s13078_s27, 4  ;;  %s12429_s12 = int_to_ptr.vmem [resolvable:$false] %s12428_s12 }
  0x9f   : > { %s12430_s8 = scalar_lea.vmem %s12429_s12, 24576  ;;  %p12431_p5 = scmp.lt.s32.totalorder %s13400_s0, %s12429_s12 }
  0xa0   : > { %p12426_p11 = pnand %p12424_p8, %p13407_p1  ;;  %p12432_p4 = scmp.lt.s32.totalorder %s12430_s8, %s12423_s25 }
  0xa2   : > { %p12427_p3 = pneg %p12426_p11  ;;  %p12433_p6 = por %p12432_p4, %p12431_p5 }
  0xa4   : > { %p12434_p7 = pnand %p12433_p6, %p12427_p3 }
  0xa6   : > { %12437 = shalt.err (!%p12434_p7)
}
  0xa7   : > { %s15349_s29 = smov 384   ;;  %s15350_s4 = smov 24  }
  0xa8   : > { %s15430_s25 = scalar_lea.sflag [#allocation23], %s13384_s24  ;;  %s9940_s27 = sshll.u32 %s13387_s3, 8 }
  0xa9   : > { %11287 = dma.hbm_to_vmem [thread:$0]  (!%p13391_p9), %s13398_s28, 12288, %s13400_s0, %s15430_s25, %s15349_s29, %s15349_s29, %s15350_s4  }
  0xaa   : > { %s10868_s22 = sshll.u32 %s13066_s30, 12  ;;  %s15431_s15 = sld [smem:[#allocation103_spill]] }
  0xab   : > { %s960_s13 = scalar_lea.vmem [#allocation25], %s9940_s27  ;;  %s13442_s5 = sshll.u32 %s13387_s3, 1 }
  0xac   : > { %s967_s6 = sshll.u32 %s960_s13, 4  ;;  %s13447_s10 = sshll.u32 %s13066_s30, 5  ;;  %s13444_s6 = int_to_ptr.vmem [resolvable:$true] %s967_s6 }
  0xad   : > { %s15351_s20 = scalar_lea.sflag [#allocation26], %s13384_s24 }
  0xb0   : > { %s13439_s8 = scalar_lea.hbm %s15431_s15, %s10868_s22  ;;  %s12443_s22 = scalar_lea.hbm %s15431_s15, 8192 }
  0xb1   : > { %s12438_s28 = scalar_lea.hbm %s13439_s8, 4096  ;;  %p12444_p5 = scmp.lt.s32.totalorder %s13439_s8, %s15431_s15 }
  0xb2   : > { %p12439_p4 = scmp.ne.s32.totalorder %s13439_s8, %s12438_s28  ;;  %p12445_p10 = scmp.lt.s32.totalorder %s12443_s22, %s12438_s28 }
  0xb4   : > { %p12441_p6 = pnand %p12439_p4, %p13407_p1  ;;  %p12446_p12 = por %p12445_p10, %p12444_p5 }
  0xb6   : > { %p12442_p7 = pneg %p12441_p6 }
  0xb8   : > { %p12447_p0 = pnand %p12446_p12, %p12442_p7 }
  0xba   : > { %12450 = shalt.err (!%p12447_p0)
}
  0xbb   : > { %s12451_s13 = scalar_lea.vmem %s13444_s6, 4096  ;;  %s13081_s27 = smov [#allocation25]  }
  0xbc   : > { %p12452_p13 = scmp.ne.s32.totalorder %s13444_s6, %s12451_s13  ;;  %s12456_s0 = sshll.u32 %s13081_s27, 4  ;;  %s12457_s0 = int_to_ptr.vmem [resolvable:$false] %s12456_s0 }
  0xbd   : > { %s12458_s25 = scalar_lea.vmem %s12457_s0, 8192  ;;  %p12459_p11 = scmp.lt.s32.totalorder %s13444_s6, %s12457_s0 }
  0xbe   : > { %p12454_p2 = pnand %p12452_p13, %p13407_p1  ;;  %p12460_p3 = scmp.lt.s32.totalorder %s12458_s25, %s12451_s13 }
  0xc0   : > { %p12455_p8 = pneg %p12454_p2  ;;  %p12461_p4 = por %p12460_p3, %p12459_p11 }
  0xc2   : > { %p12462_p6 = pnand %p12461_p4, %p12455_p8 }
  0xc4   : > { %12465 = shalt.err (!%p12462_p6)
}
  0xc5   : > { %s15352_s28 = smov 128   ;;  %s15355_s22 = smov 8  }
  0xc6   : > { %11293 = dma.hbm_to_vmem [thread:$0]  (!%p13391_p9), %s13439_s8, 4096, %s13444_s6, %s15351_s20, %s15352_s28, %s15352_s28, %s15355_s22  }
  0xc7   : > { %s15432_s17 = sld [smem:[#allocation104_spill]]  ;;  %s1000_s27 = scalar_lea.vmem [#allocation28], %s13442_s5 }
  0xc8   : > { %s1008_s0 = sshll.u32 %s1000_s27, 4  ;;  %s15354_s25 = scalar_lea.sflag [#allocation29], %s13384_s24  ;;  %s1009_s0 = int_to_ptr.vmem [resolvable:$true] %s1008_s0 }
  0xcd   : > { %s13479_s13 = scalar_lea.hbm %s15432_s17, %s13447_s10  ;;  %s12471_s6 = scalar_lea.hbm %s15432_s17, 64 }
  0xce   : > { %s12466_s29 = scalar_lea.hbm %s13479_s13, 32  ;;  %p12472_p12 = scmp.lt.s32.totalorder %s13479_s13, %s15432_s17 }
  0xcf   : > { %p12467_p7 = scmp.ne.s32.totalorder %s13479_s13, %s12466_s29  ;;  %p12473_p0 = scmp.lt.s32.totalorder %s12471_s6, %s12466_s29 }
  0xd1   : > { %p12469_p5 = pnand %p12467_p7, %p13407_p1  ;;  %p12474_p13 = por %p12473_p0, %p12472_p12 }
  0xd3   : > { %p12470_p10 = pneg %p12469_p5 }
  0xd5   : > { %p12475_p2 = pnand %p12474_p13, %p12470_p10 }
  0xd7   : > { %12478 = shalt.err (!%p12475_p2)
}
  0xd8   : > { %s12479_s12 = scalar_lea.vmem %s1009_s0, 32  ;;  %s13084_s27 = smov [#allocation28]  }
  0xd9   : > { %p12480_p8 = scmp.ne.s32.totalorder %s1009_s0, %s12479_s12  ;;  %s12484_s20 = sshll.u32 %s13084_s27, 4  ;;  %s12485_s20 = int_to_ptr.vmem [resolvable:$false] %s12484_s20 }
  0xda   : > { %s12486_s28 = scalar_lea.vmem %s12485_s20, 64  ;;  %p12487_p4 = scmp.lt.s32.totalorder %s1009_s0, %s12485_s20 }
  0xdb   : > { %p12482_p11 = pnand %p12480_p8, %p13407_p1  ;;  %p12488_p6 = scmp.lt.s32.totalorder %s12486_s28, %s12479_s12 }
  0xdd   : > { %p12483_p3 = pneg %p12482_p11  ;;  %p12489_p7 = por %p12488_p6, %p12487_p4 }
  0xdf   : > { %p12490_p5 = pnand %p12489_p7, %p12483_p3 }
  0xe1   : > { %12493 = shalt.err (!%p12490_p5)
}
  0xe2   : > { %11299 = dma.hbm_to_vmem [thread:$0]  (!%p13391_p9), %s13479_s13, 32, %s1009_s0, %s15354_s25  }
  0xe3   : > { %s9952_s15 = sshll.u32 %s13387_s3, 11  ;;  %s10872_s29 = sshll.u32 %s13066_s30, 15 }
  0xe4   : > { %s15433_s19 = sld [smem:[#allocation105_spill]]  ;;  %s1038_s6 = scalar_lea.vmem [#allocation31], %s9952_s15 }
  0xe5   : > { %s1045_s8 = sshll.u32 %s1038_s6, 4  ;;  %s15357_s11 = scalar_lea.sflag [#allocation32], %s13384_s24  ;;  %s13512_s8 = int_to_ptr.vmem [resolvable:$true] %s1045_s8 }
  0xea   : > { %s13508_s28 = scalar_lea.hbm %s15433_s19, %s10872_s29  ;;  %s12499_s27 = scalar_lea.hbm %s15433_s19, 65536 }
  0xeb   : > { %s12494_s12 = scalar_lea.hbm %s13508_s28, 32768  ;;  %p12500_p13 = scmp.lt.s32.totalorder %s13508_s28, %s15433_s19 }
  0xec   : > { %p12495_p10 = scmp.ne.s32.totalorder %s13508_s28, %s12494_s12  ;;  %p12501_p2 = scmp.lt.s32.totalorder %s12499_s27, %s12494_s12 }
  0xee   : > { %p12497_p12 = pnand %p12495_p10, %p13407_p1  ;;  %p12502_p8 = por %p12501_p2, %p12500_p13 }
  0xf0   : > { %p12498_p0 = pneg %p12497_p12 }
  0xf2   : > { %p12503_p11 = pnand %p12502_p8, %p12498_p0 }
  0xf4   : > { %12506 = shalt.err (!%p12503_p11)
}
  0xf5   : > { %s12507_s6 = scalar_lea.vmem %s13512_s8, 32768  ;;  %s13085_s25 = smov [#allocation31]  }
  0xf6   : > { %p12508_p3 = scmp.ne.s32.totalorder %s13512_s8, %s12507_s6  ;;  %s12512_s13 = sshll.u32 %s13085_s25, 4  ;;  %s12513_s13 = int_to_ptr.vmem [resolvable:$false] %s12512_s13 }
  0xf7   : > { %s12514_s0 = scalar_lea.vmem %s12513_s13, 65536  ;;  %p12515_p7 = scmp.lt.s32.totalorder %s13512_s8, %s12513_s13 }
  0xf8   : > { %p12510_p4 = pnand %p12508_p3, %p13407_p1  ;;  %p12516_p5 = scmp.lt.s32.totalorder %s12514_s0, %s12507_s6 }
  0xfa   : > { %p12511_p6 = pneg %p12510_p4  ;;  %p12517_p10 = por %p12516_p5, %p12515_p7 }
  0xfc   : > { %p12518_p12 = pnand %p12517_p10, %p12511_p6 }
  0xfe   : > { %12521 = shalt.err (!%p12518_p12)
}
  0xff   : > { %s13086_s12 = smov 1024   ;;  %s15434_s27 = smov 64  }
 0x100   : > { %11305 = dma.hbm_to_vmem [thread:$0]  (!%p13391_p9), %s13508_s28, 32768, %s13512_s8, %s15357_s11, %s13086_s12, %s13086_s12, %s15434_s27  }
 0x101   : > { %s13543_s4 = scalar_lea.hbm %s15313_s21, %s10872_s29  ;;  %s1078_s6 = scalar_lea.vmem [#allocation34], %s9952_s15 }
 0x102   : > { %s1085_s13 = sshll.u32 %s1078_s6, 4  ;;  %s15358_s0 = scalar_lea.sflag [#allocation35], %s13384_s24  ;;  %s13547_s13 = int_to_ptr.vmem [resolvable:$true] %s1085_s13 }
 0x103   : > { %s12522_s22 = scalar_lea.hbm %s13543_s4, 32768  ;;  %s12527_s12 = scalar_lea.hbm %s15313_s21, 65536 }
 0x104   : > { %p12523_p0 = scmp.ne.s32.totalorder %s13543_s4, %s12522_s22  ;;  %p12528_p8 = scmp.lt.s32.totalorder %s13543_s4, %s15313_s21 }
 0x105   : > { %p12529_p11 = scmp.lt.s32.totalorder %s12527_s12, %s12522_s22 }
 0x106   : > { %p12525_p13 = pnand %p12523_p0, %p13407_p1 }
 0x107   : > { %p12530_p3 = por %p12529_p11, %p12528_p8 }
 0x108   : > { %p12526_p2 = pneg %p12525_p13 }
 0x10a   : > { %p12531_p4 = pnand %p12530_p3, %p12526_p2 }
 0x10c   : > { %12534 = shalt.err (!%p12531_p4)
}
 0x10d   : > { %s12535_s15 = scalar_lea.vmem %s13547_s13, 32768  ;;  %s13087_s20 = smov [#allocation34]  }
 0x10e   : > { %p12536_p6 = scmp.ne.s32.totalorder %s13547_s13, %s12535_s15  ;;  %s12540_s6 = sshll.u32 %s13087_s20, 4  ;;  %s12541_s6 = int_to_ptr.vmem [resolvable:$false] %s12540_s6 }
 0x10f   : > { %s12542_s28 = scalar_lea.vmem %s12541_s6, 65536  ;;  %p12543_p10 = scmp.lt.s32.totalorder %s13547_s13, %s12541_s6 }
 0x110   : > { %p12538_p7 = pnand %p12536_p6, %p13407_p1  ;;  %p12544_p12 = scmp.lt.s32.totalorder %s12542_s28, %s12535_s15 }
 0x112   : > { %p12539_p5 = pneg %p12538_p7  ;;  %p12545_p0 = por %p12544_p12, %p12543_p10 }
 0x114   : > { %p12546_p13 = pnand %p12545_p0, %p12539_p5 }
 0x116   : > { %12549 = shalt.err (!%p12546_p13)
}
 0x117   : > { %s15435_s22 = smov 8   ;;  %s15436_s8 = smov 128  }
 0x118   : > { %11311 = dma.hbm_to_vmem [thread:$0]  (!%p13391_p9), %s13543_s4, 32768, %s13547_s13, %s15358_s0, %s15436_s8, %s15436_s8, %s15435_s22  }
 0x119   : > { %s13579_s25 = scalar_lea.hbm %s15315_s23, %s13447_s10  ;;  %s1118_s15 = scalar_lea.vmem [#allocation37], %s13442_s5 }
 0x11a   : > { %s1126_s20 = sshll.u32 %s1118_s15, 4  ;;  %s12550_s28 = scalar_lea.hbm %s13579_s25, 32  ;;  %s1127_s20 = int_to_ptr.vmem [resolvable:$true] %s1126_s20 }
 0x11b   : > { %p12551_p2 = scmp.ne.s32.totalorder %s13579_s25, %s12550_s28  ;;  %s12555_s4 = scalar_lea.hbm %s15315_s23, 64 }
 0x11c   : > { %p12556_p3 = scmp.lt.s32.totalorder %s13579_s25, %s15315_s23  ;;  %p12557_p4 = scmp.lt.s32.totalorder %s12555_s4, %s12550_s28 }
 0x11d   : > { %p12553_p8 = pnand %p12551_p2, %p13407_p1 }
 0x11e   : > { %p12558_p6 = por %p12557_p4, %p12556_p3 }
 0x11f   : > { %p12554_p11 = pneg %p12553_p8 }
 0x121   : > { %p12559_p7 = pnand %p12558_p6, %p12554_p11 }
 0x123   : > { %12562 = shalt.err (!%p12559_p7)
}
 0x124   : > { %s12563_s29 = scalar_lea.vmem %s1127_s20, 32  ;;  %s13088_s15 = smov [#allocation37]  }
 0x125   : > { %p12564_p5 = scmp.ne.s32.totalorder %s1127_s20, %s12563_s29  ;;  %s12568_s0 = sshll.u32 %s13088_s15, 4  ;;  %s12569_s0 = int_to_ptr.vmem [resolvable:$false] %s12568_s0 }
 0x126   : > { %s12570_s6 = scalar_lea.vmem %s12569_s0, 64  ;;  %p12571_p0 = scmp.lt.s32.totalorder %s1127_s20, %s12569_s0 }
 0x127   : > { %p12566_p10 = pnand %p12564_p5, %p13407_p1  ;;  %p12572_p13 = scmp.lt.s32.totalorder %s12570_s6, %s12563_s29 }
 0x129   : > { %p12567_p12 = pneg %p12566_p10  ;;  %p12573_p2 = por %p12572_p13, %p12571_p0 }
 0x12b   : > { %p12574_p8 = pnand %p12573_p2, %p12567_p12 }
 0x12d   : > { %12577 = shalt.err (!%p12574_p8)
}
 0x12e   : > { %s15437_s17 = scalar_lea.sflag [#allocation38], %s13384_s24  ;;  %s13089_s11 = smov [#allocation4]  }
 0x12f   : > { %11317 = dma.hbm_to_vmem [thread:$0]  (!%p13391_p9), %s13579_s25, 32, %s1127_s20, %s15437_s17  }
 0x130   : > { %s755_s28 = sshll.u32 %s13089_s11, 4  ;;  %s13090_s4 = smov [#allocation9]   ;;  %s756_s28 = int_to_ptr.vmem [resolvable:$true] %s755_s28 }
 0x131   : > { %s779_s13 = sshll.u32 %s13090_s4, 4  ;;  %s12589_s12 = scalar_lea.vmem %s756_s28, 128  ;;  %s780_s13 = int_to_ptr.vmem [resolvable:$true] %s779_s13 }
 0x132   : > { %p12590_p11 = scmp.ne.s32.totalorder %s756_s28, %s12589_s12  ;;  %p15438_p3 = scmp.ne.s32.totalorder %s15415_s1, 0 }
 0x133   : > { %p12597_p7 = scmp.lt.s32.totalorder %s756_s28, %s756_s28  ;;  %p12598_p5 = scmp.lt.s32.totalorder %s12589_s12, %s12589_s12 }
 0x134   : > { %p12592_p4 = pnand %p12590_p11, %p15438_p3 }
 0x135   : > { %p12599_p10 = por %p12598_p5, %p12597_p7 }
 0x136   : > { %p12593_p6 = pneg %p12592_p4 }
 0x138   : > { %p12600_p12 = pnand %p12599_p10, %p12593_p6 }
 0x13a   : > { %12603 = shalt.err (!%p12600_p12)
}
 0x13b   : > { %p15439_p0 = scmp.ne.s32.totalorder %s15414_s2, 0  ;;  %s15440_s0 = smov 4  }
 0x13c   : > { %s15441_s6 = sld [smem:[#allocation90_spill]]  ;;  %s12615_s29 = scalar_lea.vmem %s780_s13, 2304 }
 0x13d   : > { %p12616_p13 = scmp.ne.s32.totalorder %s780_s13, %s12615_s29  ;;  %p12623_p11 = scmp.lt.s32.totalorder %s780_s13, %s780_s13 }
 0x13e   : > { %p12624_p4 = scmp.lt.s32.totalorder %s12615_s29, %s12615_s29 }
 0x13f   : > { %p12618_p2 = pnand %p12616_p13, %p15438_p3 }
 0x140   : > { %p12625_p6 = por %p12624_p4, %p12623_p11 }
 0x141   : > { %p12619_p8 = pneg %p12618_p2 }
 0x142   : > { %11247 = dma.hbm_to_vmem [thread:$0]  (!%p15439_p0), %s15441_s6, 128, %s756_s28, [#allocation5], %s15434_s27, %s15434_s27, %s15440_s0  }
 0x143   : > { %p12626_p7 = pnand %p12625_p6, %p12619_p8 }
 0x145   : > { %12629 = shalt.err (!%p12626_p7)
}
 0x146   : > { %s15442_s15 = smov 36   ;;  %s15443_s17 = smov 576  }
 0x147   : > { %s15444_s12 = sld [smem:[#allocation92_spill]]  ;;  %s13091_s28 = smov [#allocation12]  }
 0x148   : > { %s806_s25 = sshll.u32 %s13091_s28, 4  ;;  %s13092_s20 = smov [#allocation15]   ;;  %s807_s25 = int_to_ptr.vmem [resolvable:$true] %s806_s25 }
 0x149   : > { %s827_s6 = sshll.u32 %s13092_s20, 4  ;;  %s12641_s19 = scalar_lea.vmem %s807_s25, 16  ;;  %s828_s6 = int_to_ptr.vmem [resolvable:$true] %s827_s6 }
 0x14a   : > { %p12642_p5 = scmp.ne.s32.totalorder %s807_s25, %s12641_s19  ;;  %s12648_s29 = scalar_lea.vmem %s807_s25, 32 }
 0x14b   : > { %p12649_p13 = scmp.lt.s32.totalorder %s807_s25, %s807_s25  ;;  %p12650_p2 = scmp.lt.s32.totalorder %s12648_s29, %s12641_s19 }
 0x14c   : > { %p12644_p10 = pnand %p12642_p5, %p15438_p3 }
 0x14d   : > { %11253 = dma.hbm_to_vmem [thread:$0]  (!%p15439_p0), %s15444_s12, 2304, %s780_s13, [#allocation8], %s15443_s17, %s15443_s17, %s15442_s15  }
 0x14e   : > { %p12645_p12 = pneg %p12644_p10  ;;  %p12651_p8 = por %p12650_p2, %p12649_p13 }
 0x150   : > { %p12652_p11 = pnand %p12651_p8, %p12645_p12 }
 0x152   : > { %12655 = shalt.err (!%p12652_p11)
}
 0x153   : > { %s15445_s15 = sld [smem:[#allocation94_spill]]  ;;  %s12667_s17 = scalar_lea.vmem %s828_s6, 6144 }
 0x154   : > { %p12668_p4 = scmp.ne.s32.totalorder %s828_s6, %s12667_s17  ;;  %p12675_p5 = scmp.lt.s32.totalorder %s828_s6, %s828_s6 }
 0x155   : > { %p12676_p10 = scmp.lt.s32.totalorder %s12667_s17, %s12667_s17 }
 0x156   : > { %p12670_p6 = pnand %p12668_p4, %p15438_p3 }
 0x157   : > { %p12677_p9 = por %p12676_p10, %p12675_p5 }
 0x158   : > { %p12671_p7 = pneg %p12670_p6 }
 0x159   : > { %11259 = dma.hbm_to_vmem [thread:$0]  (!%p15439_p0), %s15445_s15, 16, %s807_s25, [#allocation11]  }
 0x15a   : > { %p12678_p1 = pnand %p12677_p9, %p12671_p7 }
 0x15c   : > { %12681 = shalt.err (!%p12678_p1)
}
 0x15d   : > { %s15446_s19 = smov 24   ;;  %s15447_s4 = smov 384  }
 0x15e   : > { %s15448_s20 = sld [smem:[#allocation96_spill]]  ;;  %s13093_s25 = smov [#allocation18]  }
 0x15f   : > { %s851_s29 = sshll.u32 %s13093_s25, 4  ;;  %s13094_s11 = smov [#allocation21]   ;;  %s852_s29 = int_to_ptr.vmem [resolvable:$true] %s851_s29 }
 0x160   : > { %s878_s13 = sshll.u32 %s13094_s11, 4  ;;  %s12693_s15 = scalar_lea.vmem %s852_s29, 4096  ;;  %s879_s13 = int_to_ptr.vmem [resolvable:$true] %s878_s13 }
 0x161   : > { %p12694_p12 = scmp.ne.s32.totalorder %s852_s29, %s12693_s15  ;;  %p12701_p13 = scmp.lt.s32.totalorder %s852_s29, %s852_s29 }
 0x162   : > { %p12702_p2 = scmp.lt.s32.totalorder %s12693_s15, %s12693_s15 }
 0x163   : > { %p12696_p9 = pnand %p12694_p12, %p15438_p3 }
 0x164   : > { %11265 = dma.hbm_to_vmem [thread:$0]  (!%p15439_p0), %s15448_s20, 6144, %s828_s6, [#allocation14], %s15447_s4, %s15447_s4, %s15446_s19  }
 0x165   : > { %p12697_p1 = pneg %p12696_p9  ;;  %p12703_p8 = por %p12702_p2, %p12701_p13 }
 0x167   : > { %p12704_p11 = pnand %p12703_p8, %p12697_p1 }
 0x169   : > { %12707 = shalt.err (!%p12704_p11)
}
 0x16a   : > { %s15449_s19 = sld [smem:[#allocation98_spill]]  ;;  %s12719_s4 = scalar_lea.vmem %s879_s13, 4096 }
 0x16b   : > { %p12720_p4 = scmp.ne.s32.totalorder %s879_s13, %s12719_s4  ;;  %p12727_p5 = scmp.lt.s32.totalorder %s879_s13, %s879_s13 }
 0x16c   : > { %p12728_p10 = scmp.lt.s32.totalorder %s12719_s4, %s12719_s4 }
 0x16d   : > { %p12722_p6 = pnand %p12720_p4, %p15438_p3 }
 0x16e   : > { %p12729_p12 = por %p12728_p10, %p12727_p5 }
 0x16f   : > { %p12723_p7 = pneg %p12722_p6 }
 0x170   : > { %11271 = dma.hbm_to_vmem [thread:$0]  (!%p15439_p0), %s15449_s19, 4096, %s852_s29, [#allocation17], %s15434_s27, %s15434_s27, %s15440_s0  }
 0x171   : > { %p12730_p9 = pnand %p12729_p12, %p12723_p7 }
 0x173   : > { %12733 = shalt.err (!%p12730_p9)
}
 0x174   : > { %s15450_s20 = sld [smem:[#allocation101_spill]]  ;;  %s13095_s27 = smov [#allocation42]  }
 0x175   : > { %s905_s0 = sshll.u32 %s13095_s27, 4  ;;  %s11156_s25 = smul.u32 6, %s13387_s3  ;;  %s906_s0 = int_to_ptr.vmem [resolvable:$true] %s905_s0 }
 0x176   : > { %s11157_s29 = smul.u32 96, %s13066_s30  ;;  %s12745_s11 = scalar_lea.vmem %s906_s0, 16 }
 0x177   : > { %p12746_p1 = scmp.ne.s32.totalorder %s906_s0, %s12745_s11  ;;  %s12752_s15 = scalar_lea.vmem %s906_s0, 32 }
 0x178   : > { %p12753_p8 = scmp.lt.s32.totalorder %s906_s0, %s906_s0  ;;  %p12754_p11 = scmp.lt.s32.totalorder %s12752_s15, %s12745_s11 }
 0x179   : > { %p12748_p13 = pnand %p12746_p1, %p15438_p3 }
 0x17a   : > { %11277 = dma.hbm_to_vmem [thread:$0]  (!%p15439_p0), %s15450_s20, 4096, %s879_s13, [#allocation20], %s15436_s8, %s15436_s8, %s15435_s22  }
 0x17b   : > { %p12749_p2 = pneg %p12748_p13  ;;  %p12755_p4 = por %p12754_p11, %p12753_p8 }
 0x17d   : > { %p12756_p6 = pnand %p12755_p4, %p12749_p2 }
 0x17f   : > { %12759 = shalt.err (!%p12756_p6)
}
 0x180   : > { %11283 = dma.hbm_to_vmem [thread:$0]  (!%p15439_p0), %s15318_s26, 16, %s906_s0, [#allocation41]  }
 0x181   : > { %s13670_s1 = scalar_lea.hbm %s15306_s14, %s11157_s29  ;;  %s941_s17 = scalar_lea.vmem [#allocation24], %s11156_s25 }
 0x182   : > { %s949_s19 = sshll.u32 %s941_s17, 4  ;;  %s13676_s2 = scalar_lea.hbm %s15308_s16, %s13447_s10  ;;  %s950_s19 = int_to_ptr.vmem [resolvable:$true] %s949_s19 }
 0x183   : > { %s12760_s28 = scalar_lea.hbm %s13670_s1, 96  ;;  %p15451_p7 = scmp.ne.s32.totalorder %s15429_s9, 0 }
 0x184   : > { %p12761_p3 = scmp.ne.s32.totalorder %s13670_s1, %s12760_s28  ;;  %s12765_s0 = scalar_lea.hbm %s15306_s14, 192 }
 0x185   : > { %p12766_p10 = scmp.lt.s32.totalorder %s13670_s1, %s15306_s14  ;;  %p12767_p12 = scmp.lt.s32.totalorder %s12765_s0, %s12760_s28 }
 0x186   : > { %p12763_p0 = pnand %p12761_p3, %p15451_p7 }
 0x187   : > { %p12768_p9 = por %p12767_p12, %p12766_p10 }
 0x188   : > { %p12764_p5 = pneg %p12763_p0 }
 0x18a   : > { %p12769_p1 = pnand %p12768_p9, %p12764_p5 }
 0x18c   : > { %12772 = shalt.err (!%p12769_p1)
}
 0x18d   : > { %s12773_s25 = scalar_lea.vmem %s950_s19, 96  ;;  %s13096_s15 = smov [#allocation24]  }
 0x18e   : > { %p12774_p13 = scmp.ne.s32.totalorder %s950_s19, %s12773_s25  ;;  %s12778_s6 = sshll.u32 %s13096_s15, 4  ;;  %s12779_s6 = int_to_ptr.vmem [resolvable:$false] %s12778_s6 }
 0x18f   : > { %s12780_s22 = scalar_lea.vmem %s12779_s6, 192  ;;  %p12781_p11 = scmp.lt.s32.totalorder %s950_s19, %s12779_s6 }
 0x190   : > { %p12776_p2 = pnand %p12774_p13, %p15451_p7  ;;  %p12782_p4 = scmp.lt.s32.totalorder %s12780_s22, %s12773_s25 }
 0x192   : > { %p12777_p8 = pneg %p12776_p2  ;;  %p12783_p6 = por %p12782_p4, %p12781_p11 }
 0x194   : > { %p12784_p3 = pnand %p12783_p6, %p12777_p8 }
 0x196   : > { %12787 = shalt.err (!%p12784_p3)
}
 0x197   : > { %p15452_p0 = scmp.ne.s32.totalorder %s15427_s7, 0  ;;  %s15453_s8 = scalar_lea.sflag [#allocation23], %s13384_s24 }
 0x198   : > { %s981_s13 = scalar_lea.vmem [#allocation27], %s13442_s5  ;;  %s13701_s28 = scalar_lea.hbm %s15310_s18, %s13447_s10 }
 0x199   : > { %11290 = dma.hbm_to_vmem [thread:$0]  (!%p15452_p0), %s13670_s1, 96, %s950_s19, %s15453_s8  }
 0x19a   : > { %s989_s17 = sshll.u32 %s981_s13, 4  ;;  %s12788_s20 = scalar_lea.hbm %s13676_s2, 32  ;;  %s990_s17 = int_to_ptr.vmem [resolvable:$true] %s989_s17 }
 0x19b   : > { %p12789_p5 = scmp.ne.s32.totalorder %s13676_s2, %s12788_s20  ;;  %s12793_s29 = scalar_lea.hbm %s15308_s16, 64 }
 0x19c   : > { %p12794_p9 = scmp.lt.s32.totalorder %s13676_s2, %s15308_s16  ;;  %p12795_p1 = scmp.lt.s32.totalorder %s12793_s29, %s12788_s20 }
 0x19d   : > { %p12791_p10 = pnand %p12789_p5, %p15451_p7 }
 0x19e   : > { %p12796_p13 = por %p12795_p1, %p12794_p9 }
 0x19f   : > { %p12792_p12 = pneg %p12791_p10 }
 0x1a1   : > { %p12797_p2 = pnand %p12796_p13, %p12792_p12 }
 0x1a3   : > { %12800 = shalt.err (!%p12797_p2)
}
 0x1a4   : > { %s12801_s1 = scalar_lea.vmem %s990_s17, 32  ;;  %s13097_s19 = smov [#allocation27]  }
 0x1a5   : > { %p12802_p8 = scmp.ne.s32.totalorder %s990_s17, %s12801_s1  ;;  %s12806_s15 = sshll.u32 %s13097_s19, 4  ;;  %s12807_s15 = int_to_ptr.vmem [resolvable:$false] %s12806_s15 }
 0x1a6   : > { %s12808_s6 = scalar_lea.vmem %s12807_s15, 64  ;;  %p12809_p6 = scmp.lt.s32.totalorder %s990_s17, %s12807_s15 }
 0x1a7   : > { %p12804_p11 = pnand %p12802_p8, %p15451_p7  ;;  %p12810_p3 = scmp.lt.s32.totalorder %s12808_s6, %s12801_s1 }
 0x1a9   : > { %p12805_p4 = pneg %p12804_p11  ;;  %p12811_p5 = por %p12810_p3, %p12809_p6 }
 0x1ab   : > { %p12812_p10 = pnand %p12811_p5, %p12805_p4 }
 0x1ad   : > { %12815 = shalt.err (!%p12812_p10)
}
 0x1ae   : > { %s15454_s22 = scalar_lea.sflag [#allocation26], %s13384_s24  ;;  %s1019_s8 = scalar_lea.vmem [#allocation30], %s13442_s5 }
 0x1af   : > { %11296 = dma.hbm_to_vmem [thread:$0]  (!%p15452_p0), %s13676_s2, 32, %s990_s17, %s15454_s22  }
 0x1b0   : > { %s1027_s13 = sshll.u32 %s1019_s8, 4  ;;  %s9955_s4 = sshll.u32 %s13387_s3, 4  ;;  %s1028_s13 = int_to_ptr.vmem [resolvable:$true] %s1027_s13 }
 0x1b1   : > { %s12816_s12 = scalar_lea.hbm %s13701_s28, 32  ;;  %s12821_s0 = scalar_lea.hbm %s15310_s18, 64 }
 0x1b2   : > { %p12817_p12 = scmp.ne.s32.totalorder %s13701_s28, %s12816_s12  ;;  %p12822_p13 = scmp.lt.s32.totalorder %s13701_s28, %s15310_s18 }
 0x1b3   : > { %p12823_p2 = scmp.lt.s32.totalorder %s12821_s0, %s12816_s12 }
 0x1b4   : > { %p12819_p9 = pnand %p12817_p12, %p15451_p7 }
 0x1b5   : > { %p12824_p8 = por %p12823_p2, %p12822_p13 }
 0x1b6   : > { %p12820_p1 = pneg %p12819_p9 }
 0x1b8   : > { %p12825_p11 = pnand %p12824_p8, %p12820_p1 }
 0x1ba   : > { %12828 = shalt.err (!%p12825_p11)
}
 0x1bb   : > { %s12829_s2 = scalar_lea.vmem %s1028_s13, 32  ;;  %s13098_s3 = smov [#allocation30]  }
 0x1bc   : > { %p12830_p4 = scmp.ne.s32.totalorder %s1028_s13, %s12829_s2  ;;  %s12834_s17 = sshll.u32 %s13098_s3, 4  ;;  %s12835_s17 = int_to_ptr.vmem [resolvable:$false] %s12834_s17 }
 0x1bd   : > { %s12836_s25 = scalar_lea.vmem %s12835_s17, 64  ;;  %p12837_p5 = scmp.lt.s32.totalorder %s1028_s13, %s12835_s17 }
 0x1be   : > { %p12832_p6 = pnand %p12830_p4, %p15451_p7  ;;  %p12838_p10 = scmp.lt.s32.totalorder %s12836_s25, %s12829_s2 }
 0x1c0   : > { %p12833_p3 = pneg %p12832_p6  ;;  %p12839_p12 = por %p12838_p10, %p12837_p5 }
 0x1c2   : > { %p12840_p9 = pnand %p12839_p12, %p12833_p3 }
 0x1c4   : > { %12843 = shalt.err (!%p12840_p9)
}
 0x1c5   : > { %s15455_s1 = scalar_lea.sflag [#allocation29], %s13384_s24  ;;  %s10873_s19 = sshll.u32 %s13066_s30, 8 }
 0x1c6   : > { %11302 = dma.hbm_to_vmem [thread:$0]  (!%p15452_p0), %s13701_s28, 32, %s1028_s13, %s15455_s1  }
 0x1c7   : > { %s1059_s15 = scalar_lea.vmem [#allocation33], %s9955_s4  ;;  %s15456_s12 = sld [smem:[#allocation106_spill]] }
 0x1c8   : > { %s1067_s6 = sshll.u32 %s1059_s15, 4  ;;  %s1068_s6 = int_to_ptr.vmem [resolvable:$true] %s1067_s6 }
 0x1cd   : > { %s1065_s20 = scalar_lea.hbm %s15456_s12, %s10873_s19  ;;  %s12849_s11 = scalar_lea.hbm %s15456_s12, 512 }
 0x1ce   : > { %s12844_s27 = scalar_lea.hbm %s1065_s20, 256  ;;  %p12850_p8 = scmp.lt.s32.totalorder %s1065_s20, %s15456_s12 }
 0x1cf   : > { %p12845_p1 = scmp.ne.s32.totalorder %s1065_s20, %s12844_s27  ;;  %p12851_p11 = scmp.lt.s32.totalorder %s12849_s11, %s12844_s27 }
 0x1d1   : > { %p12847_p13 = pnand %p12845_p1, %p15451_p7  ;;  %p12852_p4 = por %p12851_p11, %p12850_p8 }
 0x1d3   : > { %p12848_p2 = pneg %p12847_p13 }
 0x1d5   : > { %p12853_p6 = pnand %p12852_p4, %p12848_p2 }
 0x1d7   : > { %12856 = shalt.err (!%p12853_p6)
}
 0x1d8   : > { %s12857_s30 = scalar_lea.vmem %s1068_s6, 256  ;;  %s13099_s28 = smov [#allocation33]  }
 0x1d9   : > { %p12858_p3 = scmp.ne.s32.totalorder %s1068_s6, %s12857_s30  ;;  %s12862_s13 = sshll.u32 %s13099_s28, 4  ;;  %s12863_s13 = int_to_ptr.vmem [resolvable:$false] %s12862_s13 }
 0x1da   : > { %s12864_s4 = scalar_lea.vmem %s12863_s13, 512  ;;  %p12865_p12 = scmp.lt.s32.totalorder %s1068_s6, %s12863_s13 }
 0x1db   : > { %p12860_p5 = pnand %p12858_p3, %p15451_p7  ;;  %p12866_p9 = scmp.lt.s32.totalorder %s12864_s4, %s12857_s30 }
 0x1dd   : > { %p12861_p10 = pneg %p12860_p5  ;;  %p12867_p1 = por %p12866_p9, %p12865_p12 }
 0x1df   : > { %p12868_p13 = pnand %p12867_p1, %p12861_p10 }
 0x1e1   : > { %12871 = shalt.err (!%p12868_p13)
}
 0x1e2   : > { %s15457_s17 = scalar_lea.sflag [#allocation32], %s13384_s24  ;;  %s15458_s19 = sld [smem:[#allocation107_spill]] }
 0x1e3   : > { %11308 = dma.hbm_to_vmem [thread:$0]  (!%p15452_p0), %s1065_s20, 256, %s1068_s6, %s15457_s17  }
 0x1e4   : > { %s1099_s22 = scalar_lea.vmem [#allocation36], %s13442_s5  ;;  %s15459_s29 = sld [smem:[#allocation108_spill]] }
 0x1e5   : > { %s1107_s8 = sshll.u32 %s1099_s22, 4  ;;  %s1108_s8 = int_to_ptr.vmem [resolvable:$true] %s1107_s8 }
 0x1e8   : > { %s13763_s15 = scalar_lea.hbm %s15458_s19, %s13447_s10  ;;  %s12877_s3 = scalar_lea.hbm %s15458_s19, 64 }
 0x1e9   : > { %s12872_s2 = scalar_lea.hbm %s13763_s15, 32  ;;  %p12878_p4 = scmp.lt.s32.totalorder %s13763_s15, %s15458_s19 }
 0x1ea   : > { %s13770_s11 = scalar_lea.hbm %s15459_s29, %s13447_s10  ;;  %p12873_p2 = scmp.ne.s32.totalorder %s13763_s15, %s12872_s2 }
 0x1eb   : > { %p12879_p6 = scmp.lt.s32.totalorder %s12877_s3, %s12872_s2 }
 0x1ec   : > { %p12875_p8 = pnand %p12873_p2, %p15451_p7 }
 0x1ed   : > { %p12880_p3 = por %p12879_p6, %p12878_p4 }
 0x1ee   : > { %p12876_p11 = pneg %p12875_p8 }
 0x1f0   : > { %p12881_p5 = pnand %p12880_p3, %p12876_p11 }
 0x1f2   : > { %12884 = shalt.err (!%p12881_p5)
}
 0x1f3   : > { %s12885_s13 = scalar_lea.vmem %s1108_s8, 32  ;;  %s13100_s10 = smov [#allocation36]  }
 0x1f4   : > { %p12886_p10 = scmp.ne.s32.totalorder %s1108_s8, %s12885_s13  ;;  %s12890_s4 = sshll.u32 %s13100_s10, 4  ;;  %s12891_s4 = int_to_ptr.vmem [resolvable:$false] %s12890_s4 }
 0x1f5   : > { %s12892_s17 = scalar_lea.vmem %s12891_s4, 64  ;;  %p12893_p1 = scmp.lt.s32.totalorder %s1108_s8, %s12891_s4 }
 0x1f6   : > { %p12888_p12 = pnand %p12886_p10, %p15451_p7  ;;  %p12894_p13 = scmp.lt.s32.totalorder %s12892_s17, %s12885_s13 }
 0x1f8   : > { %p12889_p9 = pneg %p12888_p12  ;;  %p12895_p2 = por %p12894_p13, %p12893_p1 }
 0x1fa   : > { %p12896_p8 = pnand %p12895_p2, %p12889_p9 }
 0x1fc   : > { %12899 = shalt.err (!%p12896_p8)
}
 0x1fd   : > { %s15460_s25 = scalar_lea.sflag [#allocation35], %s13384_s24  ;;  %s1137_s1 = scalar_lea.vmem [#allocation39], %s13442_s5 }
 0x1fe   : > { %11314 = dma.hbm_to_vmem [thread:$0]  (!%p15452_p0), %s13763_s15, 32, %s1108_s8, %s15460_s25  }
 0x1ff   : > { %s1145_s22 = sshll.u32 %s1137_s1, 4  ;;  %s12900_s27 = scalar_lea.hbm %s13770_s11, 32  ;;  %s1146_s22 = int_to_ptr.vmem [resolvable:$true] %s1145_s22 }
 0x200   : > { %p12901_p11 = scmp.ne.s32.totalorder %s13770_s11, %s12900_s27  ;;  %s12905_s6 = scalar_lea.hbm %s15459_s29, 64 }
 0x201   : > { %p12906_p3 = scmp.lt.s32.totalorder %s13770_s11, %s15459_s29  ;;  %p12907_p5 = scmp.lt.s32.totalorder %s12905_s6, %s12900_s27 }
 0x202   : > { %p12903_p4 = pnand %p12901_p11, %p15451_p7 }
 0x203   : > { %p12908_p10 = por %p12907_p5, %p12906_p3 }
 0x204   : > { %p12904_p6 = pneg %p12903_p4 }
 0x206   : > { %p12909_p12 = pnand %p12908_p10, %p12904_p6 }
 0x208   : > { %12912 = shalt.err (!%p12909_p12)
}
 0x209   : > { %s12913_s5 = scalar_lea.vmem %s1146_s22, 32  ;;  %s13101_s15 = smov [#allocation39]  }
 0x20a   : > { %p12914_p9 = scmp.ne.s32.totalorder %s1146_s22, %s12913_s5  ;;  %s12918_s8 = sshll.u32 %s13101_s15, 4  ;;  %s12919_s8 = int_to_ptr.vmem [resolvable:$false] %s12918_s8 }
 0x20b   : > { %s12920_s30 = scalar_lea.vmem %s12919_s8, 64  ;;  %p12921_p2 = scmp.lt.s32.totalorder %s1146_s22, %s12919_s8 }
 0x20c   : > { %p12916_p1 = pnand %p12914_p9, %p15451_p7  ;;  %p12922_p8 = scmp.lt.s32.totalorder %s12920_s30, %s12913_s5 }
 0x20e   : > { %p12917_p13 = pneg %p12916_p1  ;;  %p12923_p11 = por %p12922_p8, %p12921_p2 }
 0x210   : > { %p12924_p4 = pnand %p12923_p11, %p12917_p13 }
 0x212   : > { %12927 = shalt.err (!%p12924_p4)
}
 0x213   : > { %s15461_s28 = scalar_lea.sflag [#allocation38], %s13384_s24  ;;  %s15462_s13 = sld [smem:[#allocation64_spill]] }
 0x214   : > { %11320 = dma.hbm_to_vmem [thread:$0]  (!%p15452_p0), %s13770_s11, 32, %s1146_s22, %s15461_s28  }
 0x219   : > { %p15463_p6 = scmp.ne.s32.totalorder %s15462_s13, 0 }
 0x21a   : > { %s15464_s9 = sld [smem:[#allocation63_spill]] (!%p15463_p6) }
 0x21b   : > { %1154 = sbr.rel (%p15463_p6) target bundleno = 4314 (0x10da), region = 128 }
 0x220   : > { %p15465_p7 = scmp.eq.s32.totalorder %s15464_s9, 0 }
 0x222   : > { %12993 = dma.done.wait (%p15465_p7), [#allocation5], 128   ;;  %p15466_p3 = pmov %p15465_p7 }
 0x224   : > { %12995 = vsyncadd (%p15466_p3), [#allocation5], 4294967168  ;;  %p15467_p5 = pmov %p15466_p3 }
 0x225   : > { %p15468_p10 = pmov %p15466_p3 }
 0x226   : > { %12997 = dma.done.wait (%p15467_p5), [#allocation8], 2320  }
 0x227   : > { %12999 = vsyncadd (%p15468_p10), [#allocation8], 4294964976  ;;  %p15469_p12 = pmov %p15466_p3 }
 0x228   : > { %p15470_p0 = pmov %p15466_p3 }
 0x229   : > { %13001 = dma.done.wait (%p15469_p12), [#allocation11], 2320  }
 0x22a   : > { %13003 = vsyncadd (%p15470_p0), [#allocation11], 4294964976  ;;  %p15471_p9 = pmov %p15470_p0 }
 0x22b   : > { %p15472_p1 = pmov %p15470_p0 }
 0x22c   : > { %13005 = dma.done.wait (%p15471_p9), [#allocation14], 6160  }
 0x22d   : > { %13007 = vsyncadd (%p15472_p1), [#allocation14], 4294961136  ;;  %p15473_p13 = pmov %p15470_p0 }
 0x22e   : > { %p15474_p2 = pmov %p15470_p0 }
 0x22f   : > { %13009 = dma.done.wait (%p15473_p13), [#allocation17], 4192  }
 0x230   : > { %13011 = vsyncadd (%p15474_p2), [#allocation17], 4294963104  ;;  %p15475_p8 = pmov %p15470_p0 }
 0x231   : > { %p15476_p11 = pmov %p15470_p0 }
 0x232   : > { %13013 = dma.done.wait (%p15475_p8), [#allocation20], 4112  }
 0x233   : > { %13015 = vsyncadd (%p15476_p11), [#allocation20], 4294963184  ;;  %s15477_s24 = sld [smem:[#allocation61_spill]]  ;;  %s13836_s11 = sand.u32 1, %s15464_s9  }
 0x234   : > { %s15478_s7 = sld [smem:[#allocation67_spill]]  ;;  %s1201_s17 = scalar_lea.sflag [#allocation23], %s13836_s11 }
 0x239   : > { %s1202_s10 = sand.u32 1, %s15477_s24  }
 0x23a   : > { %s11158_s4 = smul.u32 768, %s1202_s10  ;;  %p15479_p4 = scmp.ne.s32.totalorder %s15478_s7, 0 }
 0x23c   : > { %s13840_s25 = scalar_lea.vmem [#allocation22], %s11158_s4 }
 0x23d   : > { %13017 = dma.done.wait (%p15479_p4), %s1201_s17, 12384  }
 0x23e   : > { %13019 = vsyncadd (%p15479_p4), %s1201_s17, 4294954912  ;;  %s11159_s1 = smul.u32 6, %s1202_s10  ;;  %s9982_s22 = sshll.u32 %s1202_s10, 8 }
 0x23f   : > { %s1219_s0 = scalar_lea.sflag [#allocation26], %s13836_s11  ;;  %s13849_s2 = scalar_lea.vmem [#allocation25], %s9982_s22 }
 0x240   : > { %s13846_s27 = scalar_lea.vmem [#allocation24], %s11159_s1 }
 0x241   : > { %13021 = dma.done.wait (%p15479_p4), %s1219_s0, 4128  }
 0x242   : > { %13023 = vsyncadd (%p15479_p4), %s1219_s0, 4294963168  ;;  %s13855_s6 = sshll.u32 %s1202_s10, 1  ;;  %s1237_s3 = scalar_lea.sflag [#allocation29], %s13836_s11 }
 0x243   : > { %s1231_s20 = scalar_lea.vmem [#allocation27], %s13855_s6  ;;  %s1240_s5 = scalar_lea.vmem [#allocation28], %s13855_s6 }
 0x244   : > { %13025 = dma.done.wait (%p15479_p4), %s1237_s3, 64  }
 0x245   : > { %13027 = vsyncadd (%p15479_p4), %s1237_s3, 4294967232  ;;  %s9986_s15 = sshll.u32 %s1202_s10, 11  ;;  %s1249_s8 = scalar_lea.vmem [#allocation30], %s13855_s6 }
 0x246   : > { %s1255_s30 = scalar_lea.sflag [#allocation32], %s13836_s11  ;;  %s13866_s28 = scalar_lea.vmem [#allocation31], %s9986_s15 }
 0x247   : > { %13029 = dma.done.wait (%p15479_p4), %s1255_s30, 33024  }
 0x248   : > { %13031 = vsyncadd (%p15479_p4), %s1255_s30, 4294934272  ;;  %s9987_s13 = sshll.u32 %s1202_s10, 4  ;;  %s1273_s4 = scalar_lea.sflag [#allocation35], %s13836_s11 }
 0x249   : > { %s13872_s24 = scalar_lea.vmem [#allocation33], %s9987_s13  ;;  %s13875_s17 = scalar_lea.vmem [#allocation34], %s9986_s15 }
 0x24a   : > { %13033 = dma.done.wait (%p15479_p4), %s1273_s4, 32800  }
 0x24b   : > { %13035 = vsyncadd (%p15479_p4), %s1273_s4, 4294934496  ;;  %s1285_s1 = scalar_lea.vmem [#allocation36], %s13855_s6  ;;  %s1291_s22 = scalar_lea.sflag [#allocation38], %s13836_s11 }
 0x24c   : > { %s1294_s0 = scalar_lea.vmem [#allocation37], %s13855_s6 }
 0x24d   : > { %13037 = dma.done.wait (%p15479_p4), %s1291_s22, 64  }
 0x24e   : > { %13039 = vsyncadd (%p15479_p4), %s1291_s22, 4294967232  ;;  %s1303_s10 = scalar_lea.vmem [#allocation39], %s13855_s6  ;;  %p15480_p6 = pmov %p15470_p0 }
 0x24f   : > { %p15481_p7 = pmov %p15470_p0 }
 0x250   : > { %13041 = dma.done.wait (%p15480_p6), [#allocation41], 2064  }
 0x251   : > { %13043 = vsyncadd (%p15481_p7), [#allocation41], 4294965232  ;;  %p15482_p3 = scmp.ne.s32.totalorder %s15464_s9, 0 }
 0x253   : > { %1438 = sbr.rel (%p15482_p3) target bundleno = 2037 (0x7f5), region = 232 }
 0x258   : > { %v11413_v0 = vld [vmem:[#allocation4] sm:$0xff]   ;;  %vm1510_vm0 = vcmask 130048   ;;  %s15483_s15 = sld [smem:[#allocation89_spill]]  ;;  %v11425_v11 = vld [vmem:[#allocation9 + $0x4c] ss:$36 sps:$4 sm:$0xff]   ;;  %v15363_v17 = vmov 0  }
 0x259   : > { %11088 = vmatprep.subr.bf16.mxu0 %v11413_v0  ;;  %v11422_v6 = vld [vmem:[#allocation9 + $0x50] ss:$36 sps:$4 sm:$0xff]   ;;  %v11427_v12 = vld [vmem:[#allocation9 + $0x48] ss:$36 sps:$4 sm:$0xff]   ;;  %1805 = vmatprep.subr.bf16.mxu1 %v11425_v11  ;;  %v11433_v16 = vld [vmem:[#allocation9] ss:$36 sps:$4 sm:$0xff]  }
 0x25a   : > { %11089 = vmatpush3.bf16.msra.mxu0 %v11413_v0  ;;  %v11424_v7 = vld [vmem:[#allocation9 + $0x54] ss:$36 sps:$4 sm:$0xff]   ;;  %1806 = vmatpush1.bf16.msra.mxu1 %v11427_v12  ;;  %v11428_v13 = vld [vmem:[#allocation9 + $0x4] ss:$36 sps:$4 sm:$0xff]   ;;  %v11432_v14 = vld [vmem:[#allocation9 + $0xc] ss:$36 sps:$4 sm:$0xff]  }
 0x25b   : > { %1918 = vmatprep.subr.bf16.mxu0 %v11424_v7  ;;  %v11430_v15 = vld [vmem:[#allocation9 + $0x8] ss:$36 sps:$4 sm:$0xff]   ;;  %1807 = vmatprep.subr.bf16.mxu1 %v11428_v13  ;;  %v11436_v18 = vld [vmem:[#allocation9 + $0x5c] ss:$36 sps:$4 sm:$0xff]   ;;  %vm1768_vm1 = vcmask 261120   ;;  %vm13104_vm2 = vmmov 0  }
 0x25c   : > { %1825 = vmatprep.mubr.bf16.mxu1 %v15363_v17  ;;  %v11439_v19 = vld [vmem:[#allocation9 + $0x64] ss:$36 sps:$4 sm:$0xff]   ;;  %v13929_v22 = vld [vmem:[#allocation7] ss:$0 sm:$0xff]  ;;  %v11442_v36 = vld [vmem:[#allocation9 + $0x14] ss:$36 sps:$4 sm:$0xff]  }
 0x25d   : > { %v11434_v31 = vld [vmem:[#allocation9 + $0x58] ss:$36 sps:$4 sm:$0xff]   ;;  %v11437_v34 = vld [vmem:[#allocation9 + $0x60] ss:$36 sps:$4 sm:$0xff]   ;;  %v11440_v39 = vld [vmem:[#allocation9 + $0x10] ss:$36 sps:$4 sm:$0xff]  }
 0x25e   : > { %v11414_v1 = vld [vmem:[%s15483_s15] sm:$0xff]   ;;  %v11415_v2 = vld [vmem:[%s15483_s15 + $0x8] sm:$0xff]   ;;  %v11416_v3 = vld [vmem:[%s15483_s15 + $0x10] sm:$0xff]   ;;  %1808 = vmatpush1.bf16.msra.mxu1 %v11433_v16  ;;  %s15543_s7 = sld [smem:[#allocation100_spill]] }
 0x25f   : > { %11090 = vmatprep.mubr.msk.bf16.mxu0 %vm1510_vm0, %v11414_v1  ;;  %v11417_v4 = vld [vmem:[%s15483_s15 + $0x18] sm:$0xff]   ;;  %v11418_v5 = vld [vmem:[%s15483_s15 + $0x20] sm:$0xff]   ;;  %v11419_v8 = vld [vmem:[%s15483_s15 + $0x28] sm:$0xff]   ;;  %2031 = vmatprep.subr.bf16.mxu1 %v11436_v18 }
 0x260   : > { %11091 = vmatmul.mubr.msk.bf16.vlgmr.msra.gmra.mxu0 %vm1510_vm0, %v11415_v2  ;;  %v11420_v9 = vld [vmem:[%s15483_s15 + $0x30] sm:$0xff]   ;;  %v11421_v10 = vld [vmem:[%s15483_s15 + $0x38] sm:$0xff]   ;;  %v11445_v37 = vld [vmem:[#allocation9 + $0x1c] ss:$36 sps:$4 sm:$0xff]  }
 0x261   : > { %11094 = vmatprep.mubr.msk.bf16.mxu0 %vm1510_vm0, %v11416_v3  ;;  %1919 = vmatpush1.bf16.msra.mxu0 %v11422_v6  ;;  %v11443_v41 = vld [vmem:[#allocation9 + $0x18] ss:$36 sps:$4 sm:$0xff]   ;;  %v13943_v42 = vld [vmem:[#allocation9 + $0x68] ss:$36 sps:$4 sm:$0xff]  }
 0x262   : > { %1920 = vmatprep.subr.bf16.mxu0 %v11432_v14 }
 0x265   : > { %1921 = vmatpush1.bf16.msra.mxu0 %v11430_v15 }
 0x266   : > { %2144 = vmatprep.subr.bf16.mxu0 %v11439_v19 }
 0x268   : > { %11095 = vmatmul.mubr.msk.bf16.gmra.mxu0 %vm1510_vm0, %v11417_v4 }
 0x269   : > { %11098 = vmatprep.mubr.msk.bf16.mxu0 %vm1510_vm0, %v11418_v5 }
 0x270   : > { %11099 = vmatmul.mubr.msk.bf16.gmra.mxu0 %vm1510_vm0, %v11419_v8 }
 0x271   : > { %11102 = vmatprep.mubr.msk.bf16.mxu0 %vm1510_vm0, %v11420_v9 }
 0x278   : > { %11103 = vmatmul.mubr.msk.bf16.gmra.mxu0 %vm1510_vm0, %v11421_v10 }
 0x279   : > { %1938 = vmatprep.mubr.bf16.mxu0 %v15363_v17 }
 0x320   : > { %v11092_v20 = vpop.f32.mrf.mxu0 }
 0x321   : > { %v1578_v38 = vadd.f32 %v11092_v20, %v13929_v22 }
 0x322   : > { %v1569_v21 = vpop.f32.mrf.mxu0 }
 0x323   : > { %v1570_v24 = vadd.f32 %v13929_v22, %v1569_v21  ;;  %v1634_v44 = vmax.f32 %v1578_v38, 0.0  ;;  %v11447_v21 = vld [vmem:[#allocation9 + $0x20] ss:$36 sps:$4 sm:$0xff]  }
 0x324   : > { %v11093_v23 = vpop.f32.mrf.mxu0 }
 0x325   : > { %v1632_v28 = vmax.f32 %v1570_v24, 0.0  ;;  %v1581_v32 = vadd.f32 %v11093_v23, %v13929_v22  ;;  %v11453_v23 = vld [vmem:[#allocation10 + $0xc] ss:$36 sps:$4 sm:$0xff]  }
 0x326   : > { %v1572_v25 = vpop.f32.mrf.mxu0 }
 0x327   : > { %v1573_v26 = vadd.f32 %v13929_v22, %v1572_v25  ;;  %v1635_v40 = vmax.f32 %v1581_v32, 0.0 }
 0x328   : > { %v11096_v27 = vpop.f32.mrf.mxu0 }
 0x329   : > { %v1633_v29 = vmax.f32 %v1573_v26, 0.0  ;;  %v13945_v45 = vpack.c.bf16 %v1635_v40, %v1634_v44  ;;  %v1594_v52 = vadd.f32 %v11096_v27, %v13929_v22 }
 0x32a   : > { %v1585_v30 = vpop.f32.mrf.mxu0 }
 0x32b   : > { %v13934_v33 = vpack.c.bf16 %v1633_v29, %v1632_v28  ;;  %v1586_v46 = vadd.f32 %v13929_v22, %v1585_v30  ;;  %v1638_v56 = vmax.f32 %v1594_v52, 0.0 }
 0x32c   : > { %v11097_v35 = vpop.f32.mrf.mxu0 }
 0x32d   : > { %10031 = vmatmul.mubr.msk.bf16.vlgmr.msra.gmra.mxu1 %vm1768_vm1, %v13934_v33  ;;  %10039 = vmatmul.mubr.msk.bf16.vlgmr.msra.gmra.mxu0 %vm1768_vm1, %v13934_v33  ;;  %v1636_v49 = vmax.f32 %v1586_v46, 0.0  ;;  %v1597_v53 = vadd.f32 %v11097_v35, %v13929_v22 }
 0x32e   : > { %2032 = vmatpush1.bf16.msra.mxu1 %v11434_v31  ;;  %1835 = vmatprep.mubr.bf16.mxu1 %v15363_v17  ;;  %v1588_v43 = vpop.f32.mrf.mxu0 }
 0x32f   : > { %1948 = vmatprep.mubr.bf16.mxu0 %v15363_v17  ;;  %2145 = vmatpush1.bf16.msra.mxu0 %v11437_v34  ;;  %v1589_v47 = vadd.f32 %v13929_v22, %v1588_v43  ;;  %v1639_v57 = vmax.f32 %v1597_v53, 0.0 }
 0x330   : > { %2033 = vmatprep.subr.bf16.mxu1 %v11442_v36  ;;  %2146 = vmatprep.subr.bf16.mxu0 %v11445_v37  ;;  %v11100_v48 = vpop.f32.mrf.mxu0 }
 0x331   : > { %v1637_v50 = vmax.f32 %v1589_v47, 0.0  ;;  %v13966_v59 = vpack.c.bf16 %v1639_v57, %v1638_v56  ;;  %v1610_v2 = vadd.f32 %v11100_v48, %v13929_v22 }
 0x332   : > { %2034 = vmatpush1.bf16.msra.mxu1 %v11440_v39  ;;  %v1601_v51 = vpop.f32.mrf.mxu0 }
 0x333   : > { %2147 = vmatpush1.bf16.msra.mxu0 %v11443_v41  ;;  %11106 = vmatprep.subr.bf16.mxu1 %v13943_v42  ;;  %v13958_v54 = vpack.c.bf16 %v1637_v50, %v1636_v49  ;;  %v1602_v60 = vadd.f32 %v13929_v22, %v1601_v51  ;;  %v1642_v6 = vmax.f32 %v1610_v2, 0.0 }
 0x334   : > { %v11101_v55 = vpop.f32.mrf.mxu0 }
 0x335   : > { %10032 = vmatmul.mubr.msk.bf16.gmra.mxu1 %vm1768_vm1, %v13945_v45  ;;  %10040 = vmatmul.mubr.msk.bf16.gmra.mxu0 %vm1768_vm1, %v13945_v45  ;;  %v1640_v63 = vmax.f32 %v1602_v60, 0.0  ;;  %v1613_v3 = vadd.f32 %v11101_v55, %v13929_v22 }
 0x336   : > { %1845 = vmatprep.mubr.bf16.mxu1 %v15363_v17  ;;  %1958 = vmatprep.mubr.bf16.mxu0 %v15363_v17  ;;  %v1604_v58 = vpop.f32.mrf.mxu0 }
 0x337   : > { %v1605_v61 = vadd.f32 %v13929_v22, %v1604_v58  ;;  %v1643_v7 = vmax.f32 %v1613_v3, 0.0 }
 0x338   : > { %v11104_v62 = vpop.f32.mrf.mxu0 }
 0x339   : > { %v1641_v0 = vmax.f32 %v1605_v61, 0.0  ;;  %v1653_v9 = vpack.c.bf16 %v1643_v7, %v1642_v6  ;;  %v1626_v14 = vadd.f32 %v11104_v62, %v13929_v22 }
 0x33a   : > { %v1617_v1 = vpop.f32.mrf.mxu0 }
 0x33b   : > { %v13978_v4 = vpack.c.bf16 %v1641_v0, %v1640_v63  ;;  %v1618_v10 = vadd.f32 %v13929_v22, %v1617_v1  ;;  %v1646_v18 = vmax.f32 %v1626_v14, 0.0 }
 0x33c   : > { %v11105_v5 = vpop.f32.mrf.mxu0 }
 0x33d   : > { %10033 = vmatmul.mubr.msk.bf16.gmra.mxu1 %vm1768_vm1, %v13958_v54  ;;  %10041 = vmatmul.mubr.msk.bf16.gmra.mxu0 %vm1768_vm1, %v13958_v54  ;;  %v1644_v12 = vmax.f32 %v1618_v10, 0.0  ;;  %v1629_v15 = vadd.f32 %v11105_v5, %v13929_v22 }
 0x33e   : > { %1855 = vmatprep.mubr.bf16.mxu1 %v15363_v17  ;;  %1968 = vmatprep.mubr.bf16.mxu0 %v15363_v17  ;;  %v1620_v8 = vpop.f32.mrf.mxu0 }
 0x33f   : > { %v1621_v11 = vadd.f32 %v13929_v22, %v1620_v8  ;;  %v1647_v19 = vmax.f32 %v1629_v15, 0.0  ;;  %v11450_v22 = vld [vmem:[#allocation10 + $0x4] ss:$36 sps:$4 sm:$0xff]  }
 0x341   : > { %v1645_v13 = vmax.f32 %v1621_v11, 0.0  ;;  %v1655_v20 = vpack.c.bf16 %v1647_v19, %v1646_v18 }
 0x343   : > { %v1654_v16 = vpack.c.bf16 %v1645_v13, %v1644_v12 }
 0x345   : > { %10034 = vmatmul.mubr.msk.bf16.gmra.mxu1 %vm1768_vm1, %v13966_v59  ;;  %10042 = vmatmul.mubr.msk.bf16.gmra.mxu0 %vm1768_vm1, %v13966_v59 }
 0x346   : > { %1865 = vmatprep.mubr.bf16.mxu1 %v15363_v17  ;;  %1978 = vmatprep.mubr.bf16.mxu0 %v15363_v17 }
 0x34d   : > { %10035 = vmatmul.mubr.msk.bf16.gmra.mxu1 %vm1768_vm1, %v13978_v4  ;;  %10043 = vmatmul.mubr.msk.bf16.gmra.mxu0 %vm1768_vm1, %v13978_v4 }
 0x34e   : > { %1875 = vmatprep.mubr.bf16.mxu1 %v15363_v17  ;;  %1988 = vmatprep.mubr.bf16.mxu0 %v15363_v17 }
 0x355   : > { %10036 = vmatmul.mubr.msk.bf16.gmra.mxu1 %vm1768_vm1, %v1653_v9  ;;  %10044 = vmatmul.mubr.msk.bf16.gmra.mxu0 %vm1768_vm1, %v1653_v9 }
 0x356   : > { %1885 = vmatprep.mubr.bf16.mxu1 %v15363_v17  ;;  %1998 = vmatprep.mubr.bf16.mxu0 %v15363_v17 }
 0x35d   : > { %10037 = vmatmul.mubr.msk.bf16.gmra.mxu1 %vm1768_vm1, %v1654_v16  ;;  %10045 = vmatmul.mubr.msk.bf16.gmra.mxu0 %vm1768_vm1, %v1654_v16 }
 0x35e   : > { %1895 = vmatprep.mubr.bf16.mxu1 %v15363_v17  ;;  %2008 = vmatprep.mubr.bf16.mxu0 %v15363_v17 }
 0x365   : > { %10038 = vmatmul.mubr.msk.bf16.gmra.mxu1 %vm1768_vm1, %v1655_v20  ;;  %10046 = vmatmul.mubr.msk.bf16.gmra.mxu0 %vm1768_vm1, %v1655_v20 }
 0x366   : > { %2051 = vmatprep.mubr.bf16.mxu1 %v15363_v17  ;;  %2164 = vmatprep.mubr.bf16.mxu0 %v15363_v17 }
 0x36d   : > { %10047 = vmatmul.mubr.msk.bf16.vlgmr.msra.gmra.mxu1 %vm1768_vm1, %v13934_v33  ;;  %10055 = vmatmul.mubr.msk.bf16.vlgmr.msra.gmra.mxu0 %vm1768_vm1, %v13934_v33 }
 0x36e   : > { %11107 = vmatpush3.bf16.msra.mxu1 %v13943_v42  ;;  %2061 = vmatprep.mubr.bf16.mxu1 %v15363_v17 }
 0x36f   : > { %2174 = vmatprep.mubr.bf16.mxu0 %v15363_v17  ;;  %11108 = vmatprep.subr.bf16.mxu1 %v11447_v21 }
 0x372   : > { %11109 = vmatpush3.bf16.msra.mxu1 %v11447_v21 }
 0x375   : > { %10048 = vmatmul.mubr.msk.bf16.gmra.mxu1 %vm1768_vm1, %v13945_v45  ;;  %10056 = vmatmul.mubr.msk.bf16.gmra.mxu0 %vm1768_vm1, %v13945_v45 }
 0x376   : > { %2071 = vmatprep.mubr.bf16.mxu1 %v15363_v17  ;;  %2184 = vmatprep.mubr.bf16.mxu0 %v15363_v17 }
 0x37d   : > { %10049 = vmatmul.mubr.msk.bf16.gmra.mxu1 %vm1768_vm1, %v13958_v54  ;;  %10057 = vmatmul.mubr.msk.bf16.gmra.mxu0 %vm1768_vm1, %v13958_v54 }
 0x37e   : > { %2081 = vmatprep.mubr.bf16.mxu1 %v15363_v17  ;;  %2194 = vmatprep.mubr.bf16.mxu0 %v15363_v17 }
 0x385   : > { %10050 = vmatmul.mubr.msk.bf16.gmra.mxu1 %vm1768_vm1, %v13966_v59  ;;  %10058 = vmatmul.mubr.msk.bf16.gmra.mxu0 %vm1768_vm1, %v13966_v59 }
 0x386   : > { %2091 = vmatprep.mubr.bf16.mxu1 %v15363_v17  ;;  %2204 = vmatprep.mubr.bf16.mxu0 %v15363_v17 }
 0x38d   : > { %10051 = vmatmul.mubr.msk.bf16.gmra.mxu1 %vm1768_vm1, %v13978_v4  ;;  %10059 = vmatmul.mubr.msk.bf16.gmra.mxu0 %vm1768_vm1, %v13978_v4 }
 0x38e   : > { %2101 = vmatprep.mubr.bf16.mxu1 %v15363_v17  ;;  %2214 = vmatprep.mubr.bf16.mxu0 %v15363_v17 }
 0x395   : > { %10052 = vmatmul.mubr.msk.bf16.gmra.mxu1 %vm1768_vm1, %v1653_v9  ;;  %10060 = vmatmul.mubr.msk.bf16.gmra.mxu0 %vm1768_vm1, %v1653_v9 }
 0x396   : > { %2111 = vmatprep.mubr.bf16.mxu1 %v15363_v17  ;;  %2224 = vmatprep.mubr.bf16.mxu0 %v15363_v17 }
 0x39d   : > { %10053 = vmatmul.mubr.msk.bf16.gmra.mxu1 %vm1768_vm1, %v1654_v16  ;;  %10061 = vmatmul.mubr.msk.bf16.gmra.mxu0 %vm1768_vm1, %v1654_v16 }
 0x39e   : > { %2121 = vmatprep.mubr.bf16.mxu1 %v15363_v17  ;;  %2234 = vmatprep.mubr.bf16.mxu0 %v15363_v17 }
 0x3a5   : > { %10054 = vmatmul.mubr.msk.bf16.gmra.mxu1 %vm1768_vm1, %v1655_v20  ;;  %10062 = vmatmul.mubr.msk.bf16.gmra.mxu0 %vm1768_vm1, %v1655_v20 }
 0x3a6   : > { %11110 = vmatprep.mubr.msk.bf16.mxu1 %vm1768_vm1, %v13934_v33  ;;  %2853 = vmatprep.mubr.bf16.mxu0 %v11450_v22 }
 0x3ad   : > { %11111 = vmatmul.mubr.msk.bf16.vlgmr.msra.gmra.mxu1 %vm1768_vm1, %v13945_v45 }
 0x3ae   : > { %11114 = vmatprep.mubr.msk.bf16.mxu1 %vm1768_vm1, %v13958_v54 }
 0x3b5   : > { %11115 = vmatmul.mubr.msk.bf16.gmra.mxu1 %vm1768_vm1, %v13966_v59 }
 0x3b6   : > { %11118 = vmatprep.mubr.msk.bf16.mxu1 %vm1768_vm1, %v13978_v4 }
 0x3bd   : > { %11119 = vmatmul.mubr.msk.bf16.gmra.mxu1 %vm1768_vm1, %v1653_v9 }
 0x3be   : > { %11122 = vmatprep.mubr.msk.bf16.mxu1 %vm1768_vm1, %v1654_v16 }
 0x3c5   : > { %11123 = vmatmul.mubr.msk.bf16.gmra.mxu1 %vm1768_vm1, %v1655_v20 }
 0x3c6   : > { %2902 = vmatprep.mubr.bf16.mxu1 %v11453_v23 }
 0x3ed   : > { %v14056_v24 = vpop.f32.mrf.mxu1  ;;  %v14058_v25 = vpop.f32.mrf.mxu0 }
 0x3ee   : > { %15484 = vst [vmem:[#allocation68_spill] sm:$0xff] %v14056_v24  ;;  %15485 = vst [vmem:[#allocation69_spill] sm:$0xff] %v14058_v25 }
 0x3ef   : > { %v14060_v26 = vpop.f32.mrf.mxu1  ;;  %v14062_v27 = vpop.f32.mrf.mxu0 }
 0x3f0   : > { %15486 = vst [vmem:[#allocation70_spill] sm:$0xff] %v14060_v26  ;;  %15487 = vst [vmem:[#allocation71_spill] sm:$0xff] %v14062_v27 }
 0x3f1   : > { %v14064_v28 = vpop.f32.mrf.mxu1  ;;  %v14066_v29 = vpop.f32.mrf.mxu0 }
 0x3f2   : > { %15488 = vst [vmem:[#allocation72_spill] sm:$0xff] %v14064_v28  ;;  %15489 = vst [vmem:[#allocation73_spill] sm:$0xff] %v14066_v29 }
 0x3f3   : > { %v14072_v32 = vpop.f32.mrf.mxu1  ;;  %v14074_v33 = vpop.f32.mrf.mxu0 }
 0x3f4   : > { %15490 = vst [vmem:[#allocation74_spill] sm:$0xff] %v14072_v32  ;;  %15491 = vst [vmem:[#allocation75_spill] sm:$0xff] %v14074_v33 }
 0x3f5   : > { %v14080_v36 = vpop.f32.mrf.mxu1  ;;  %v14082_v37 = vpop.f32.mrf.mxu0 }
 0x3f6   : > { %15492 = vst [vmem:[#allocation76_spill] sm:$0xff] %v14082_v37 }
 0x3f7   : > { %v14084_v38 = vpop.f32.mrf.mxu1  ;;  %v14086_v39 = vpop.f32.mrf.mxu0 }
 0x3f9   : > { %v14088_v40 = vpop.f32.mrf.mxu1  ;;  %v14090_v41 = vpop.f32.mrf.mxu0 }
 0x3fa   : > { %15493 = vst [vmem:[#allocation77_spill] sm:$0xff] %v14090_v41 }
 0x3fb   : > { %v14096_v44 = vpop.f32.mrf.mxu1  ;;  %v14098_v45 = vpop.f32.mrf.mxu0 }
 0x3fd   : > { %v14104_v48 = vpop.f32.mrf.mxu1  ;;  %v14106_v49 = vpop.f32.mrf.mxu0 }
 0x3ff   : > { %v14108_v50 = vpop.f32.mrf.mxu1  ;;  %v14110_v51 = vpop.f32.mrf.mxu0 }
 0x401   : > { %v14112_v52 = vpop.f32.mrf.mxu1  ;;  %v14114_v53 = vpop.f32.mrf.mxu0 }
 0x403   : > { %v14116_v54 = vpop.f32.mrf.mxu1  ;;  %v14118_v55 = vpop.f32.mrf.mxu0 }
 0x405   : > { %v14120_v56 = vpop.f32.mrf.mxu1  ;;  %v14122_v57 = vpop.f32.mrf.mxu0 }
 0x407   : > { %v14124_v58 = vpop.f32.mrf.mxu1  ;;  %v14126_v59 = vpop.f32.mrf.mxu0 }
 0x409   : > { %v14128_v60 = vpop.f32.mrf.mxu1  ;;  %v14130_v61 = vpop.f32.mrf.mxu0 }
 0x40b   : > { %v14132_v62 = vpop.f32.mrf.mxu1  ;;  %v14134_v63 = vpop.f32.mrf.mxu0 }
 0x40d   : > { %v14136_v0 = vpop.f32.mrf.mxu1  ;;  %v14138_v1 = vpop.f32.mrf.mxu0 }
 0x40f   : > { %v14140_v2 = vpop.f32.mrf.mxu1  ;;  %v14142_v3 = vpop.f32.mrf.mxu0 }
 0x411   : > { %v14144_v4 = vpop.f32.mrf.mxu1  ;;  %v14146_v5 = vpop.f32.mrf.mxu0 }
 0x413   : > { %v14148_v6 = vpop.f32.mrf.mxu1  ;;  %v14150_v7 = vpop.f32.mrf.mxu0 }
 0x415   : > { %v14152_v8 = vpop.f32.mrf.mxu1  ;;  %v14154_v9 = vpop.f32.mrf.mxu0 }
 0x417   : > { %v1879_v10 = vpop.f32.mrf.mxu1  ;;  %v1992_v11 = vpop.f32.mrf.mxu0 }
 0x419   : > { %v1881_v12 = vpop.f32.mrf.mxu1  ;;  %v1994_v13 = vpop.f32.mrf.mxu0 }
 0x41b   : > { %v1883_v14 = vpop.f32.mrf.mxu1  ;;  %v1996_v15 = vpop.f32.mrf.mxu0 }
 0x41d   : > { %v1887_v16 = vpop.f32.mrf.mxu1  ;;  %v2000_v18 = vpop.f32.mrf.mxu0 }
 0x41f   : > { %v1889_v19 = vpop.f32.mrf.mxu1  ;;  %v2002_v20 = vpop.f32.mrf.mxu0 }
 0x421   : > { %v1891_v21 = vpop.f32.mrf.mxu1  ;;  %v2004_v22 = vpop.f32.mrf.mxu0 }
 0x423   : > { %v1893_v23 = vpop.f32.mrf.mxu1  ;;  %v2006_v17 = vpop.f32.mrf.mxu0 }
 0x424   : > { %v2664_v26 = vpack.c.bf16 %v1893_v23, %v1889_v19  ;;  %v2680_v32 = vpack.c.bf16 %v2006_v17, %v2002_v20  ;;  %v2676_v19 = vpack.c.bf16 %v14118_v55, %v14110_v51  ;;  %v15505_v55 = vpack.c.bf16 %v14096_v44, %v14084_v38  ;;  %v15508_v23 = vld [vmem:[#allocation77_spill] sm:$0xff]  ;;  %v15511_v44 = vld [vmem:[#allocation74_spill] sm:$0xff] }
 0x425   : > { %v1897_v31 = vpop.f32.mrf.mxu1  ;;  %v2010_v30 = vpop.f32.mrf.mxu0 }
 0x427   : > { %v1899_v35 = vpop.f32.mrf.mxu1  ;;  %v2012_v34 = vpop.f32.mrf.mxu0 }
 0x429   : > { %v1901_v43 = vpop.f32.mrf.mxu1  ;;  %v2014_v42 = vpop.f32.mrf.mxu0 }
 0x42a   : > { %v2657_v24 = vpack.c.bf16 %v1901_v43, %v1897_v31  ;;  %v2673_v28 = vpack.c.bf16 %v2014_v42, %v2010_v30  ;;  %v2663_v42 = vpack.c.bf16 %v1883_v14, %v1879_v10  ;;  %v2679_v43 = vpack.c.bf16 %v1996_v15, %v1992_v11 }
 0x42b   : > { %v1903_v47 = vpop.f32.mrf.mxu1  ;;  %v2016_v46 = vpop.f32.mrf.mxu0  ;;  %v2662_v11 = vpack.c.bf16 %v14148_v6, %v14140_v2  ;;  %v2678_v14 = vpack.c.bf16 %v14150_v7, %v14142_v3  ;;  %v2661_v3 = vpack.c.bf16 %v14132_v62, %v14124_v58  ;;  %v2677_v6 = vpack.c.bf16 %v14134_v63, %v14126_v59 }
 0x42c   : > { %v2665_v25 = vpack.c.bf16 %v1903_v47, %v1899_v35  ;;  %v2681_v29 = vpack.c.bf16 %v2016_v46, %v2012_v34  ;;  %v2656_v35 = vpack.c.bf16 %v1891_v21, %v1887_v16  ;;  %v2672_v34 = vpack.c.bf16 %v2004_v22, %v2000_v18 }
 0x42d   : > { %v14156_v27 = vpop.f32.mrf.mxu1  ;;  %v14158_v33 = vpop.f32.mrf.mxu0  ;;  %v2671_v46 = vpack.c.bf16 %v1994_v13, %v14154_v9  ;;  %v2670_v9 = vpack.c.bf16 %v14146_v5, %v14138_v1  ;;  %v2653_v59 = vpack.c.bf16 %v14128_v60, %v14120_v56  ;;  %v2669_v62 = vpack.c.bf16 %v14130_v61, %v14122_v57 }
 0x42e   : > { %15494 = vst [vmem:[#allocation78_spill] sm:$0xff] %v14156_v27  ;;  %15495 = vst [vmem:[#allocation79_spill] sm:$0xff] %v14158_v33  ;;  %10897 = vmatprep.subr.bf16.mxu0 %v2665_v25  ;;  %10925 = vmatprep.subr.bf16.mxu1 %v2681_v29  ;;  %v2660_v18 = vpack.c.bf16 %v14116_v54, %v14108_v50  ;;  %v2652_v56 = vpack.c.bf16 %v14112_v52, %v14104_v48 }
 0x42f   : > { %v14160_v37 = vpop.f32.mrf.mxu1  ;;  %v14162_v41 = vpop.f32.mrf.mxu0  ;;  %10898 = vmatpush3.bf16.msra.mxu0 %v2657_v24  ;;  %10926 = vmatpush3.bf16.msra.mxu1 %v2673_v28  ;;  %v2668_v57 = vpack.c.bf16 %v14114_v53, %v14106_v49  ;;  %v15506_v48 = vpack.c.bf16 %v14098_v45, %v14086_v39  ;;  %v15507_v22 = vpack.c.bf16 %v14088_v40, %v14080_v36  ;;  %v15514_v45 = vld [vmem:[#allocation75_spill] sm:$0xff] }
 0x430   : > { %15496 = vst [vmem:[#allocation80_spill] sm:$0xff] %v14160_v37  ;;  %15497 = vst [vmem:[#allocation81_spill] sm:$0xff] %v14162_v41  ;;  %10899 = vmatprep.subr.bf16.mxu0 %v2664_v26  ;;  %10927 = vmatprep.subr.bf16.mxu1 %v2680_v32  ;;  %v2655_v32 = vpack.c.bf16 %v1881_v12, %v14152_v8  ;;  %v2654_v8 = vpack.c.bf16 %v14144_v4, %v14136_v0 }
 0x431   : > { %v14164_v31 = vpop.f32.mrf.mxu1  ;;  %v14166_v30 = vpop.f32.mrf.mxu0 }
 0x432   : > { %15498 = vst [vmem:[#allocation82_spill] sm:$0xff] %v14164_v31  ;;  %15499 = vst [vmem:[#allocation83_spill] sm:$0xff] %v14166_v30 }
 0x433   : > { %v14172_v29 = vpop.f32.mrf.mxu1  ;;  %v14174_v24 = vpop.f32.mrf.mxu0  ;;  %10900 = vmatpush3.bf16.msra.mxu0 %v2656_v35  ;;  %10928 = vmatpush3.bf16.msra.mxu1 %v2672_v34  ;;  %v15509_v35 = vld [vmem:[#allocation76_spill] sm:$0xff]  ;;  %v15512_v34 = vld [vmem:[#allocation70_spill] sm:$0xff] }
 0x434   : > { %15500 = vst [vmem:[#allocation84_spill] sm:$0xff] %v14172_v29  ;;  %15501 = vst [vmem:[#allocation85_spill] sm:$0xff] %v14174_v24  ;;  %10901 = vmatprep.subr.bf16.mxu0 %v2663_v42  ;;  %10929 = vmatprep.subr.bf16.mxu1 %v2679_v43  ;;  %v15510_v38 = vpack.c.bf16 %v15508_v23, %v15509_v35  ;;  %v15513_v39 = vpack.c.bf16 %v15511_v44, %v15512_v34  ;;  %v15515_v42 = vld [vmem:[#allocation71_spill] sm:$0xff] }
 0x435   : > { %v14182_v47 = vpop.f32.mrf.mxu1  ;;  %v14184_v10 = vpop.f32.mrf.mxu0  ;;  %v15516_v43 = vpack.c.bf16 %v15514_v45, %v15515_v42  ;;  %v11456_v35 = vld [vmem:[#allocation10 + $0x48] ss:$36 sps:$4 sm:$0xff]   ;;  %v11465_v45 = vld [vmem:[#allocation10 + $0x1c] ss:$36 sps:$4 sm:$0xff]  }
 0x436   : > { %15502 = vst [vmem:[#allocation86_spill] sm:$0xff] %v14182_v47  ;;  %15503 = vst [vmem:[#allocation87_spill] sm:$0xff] %v14184_v10 }
 0x437   : > { %v14190_v15 = vpop.f32.mrf.mxu1  ;;  %v14192_v16 = vpop.f32.mrf.mxu0  ;;  %10902 = vmatpush3.bf16.msra.mxu0 %v2655_v32  ;;  %10930 = vmatpush3.bf16.msra.mxu1 %v2671_v46 }
 0x438   : > { %10903 = vmatprep.subr.bf16.mxu0 %v2662_v11  ;;  %10931 = vmatprep.subr.bf16.mxu1 %v2678_v14  ;;  %v11448_v11 = vld [vmem:[#allocation10] ss:$36 sps:$4 sm:$0xff]   ;;  %v11451_v14 = vld [vmem:[#allocation10 + $0x8] ss:$36 sps:$4 sm:$0xff]  }
 0x439   : > { %v14198_v12 = vpop.f32.mrf.mxu1  ;;  %v14200_v2 = vpop.f32.mrf.mxu0 }
 0x43a   : > { %15504 = vst [vmem:[#allocation88_spill] sm:$0xff] %v14200_v2 }
 0x43b   : > { %v14210_v0 = vpop.f32.mrf.mxu1  ;;  %v14212_v4 = vpop.f32.mrf.mxu0  ;;  %10904 = vmatpush3.bf16.msra.mxu0 %v2654_v8  ;;  %10932 = vmatpush3.bf16.msra.mxu1 %v2670_v9  ;;  %v15517_v8 = vld [vmem:[#allocation72_spill] sm:$0xff] }
 0x43c   : > { %10905 = vmatprep.subr.bf16.mxu0 %v2661_v3  ;;  %10933 = vmatprep.subr.bf16.mxu1 %v2677_v6  ;;  %v15518_v9 = vld [vmem:[#allocation68_spill] sm:$0xff]  ;;  %v15520_v6 = vld [vmem:[#allocation73_spill] sm:$0xff] }
 0x43d   : > { %v14222_v63 = vpop.f32.mrf.mxu1  ;;  %v14224_v5 = vpop.f32.mrf.mxu0  ;;  %v15519_v3 = vpack.c.bf16 %v15517_v8, %v15518_v9 }
 0x43f   : > { %v14230_v20 = vpop.f32.mrf.mxu1  ;;  %v14232_v21 = vpop.f32.mrf.mxu0  ;;  %10906 = vmatpush3.bf16.msra.mxu0 %v2653_v59  ;;  %10934 = vmatpush3.bf16.msra.mxu1 %v2669_v62  ;;  %v15521_v59 = vld [vmem:[#allocation69_spill] sm:$0xff] }
 0x440   : > { %10907 = vmatprep.subr.bf16.mxu0 %v2660_v18  ;;  %10935 = vmatprep.subr.bf16.mxu1 %v2676_v19  ;;  %v15522_v62 = vpack.c.bf16 %v15520_v6, %v15521_v59  ;;  %v11454_v18 = vld [vmem:[#allocation10 + $0x4c] ss:$36 sps:$4 sm:$0xff]   ;;  %v11457_v19 = vld [vmem:[#allocation10 + $0x54] ss:$36 sps:$4 sm:$0xff]  }
 0x441   : > { %v14238_v60 = vpop.f32.mrf.mxu1  ;;  %v14240_v50 = vpop.f32.mrf.mxu0 }
 0x443   : > { %v14242_v54 = vpop.f32.mrf.mxu1  ;;  %v14244_v51 = vpop.f32.mrf.mxu0  ;;  %10908 = vmatpush3.bf16.msra.mxu0 %v2652_v56  ;;  %10936 = vmatpush3.bf16.msra.mxu1 %v2668_v57 }
 0x444   : > { %10909 = vmatprep.subr.bf16.mxu0 %v15505_v55  ;;  %10937 = vmatprep.subr.bf16.mxu1 %v15506_v48 }
 0x445   : > { %v14252_v52 = vpop.f32.mrf.mxu1  ;;  %v14254_v49 = vpop.f32.mrf.mxu0 }
 0x447   : > { %v14256_v53 = vpop.f32.mrf.mxu1  ;;  %v14258_v61 = vpop.f32.mrf.mxu0  ;;  %10910 = vmatpush3.bf16.msra.mxu0 %v15507_v22  ;;  %10938 = vmatpush3.bf16.msra.mxu1 %v15510_v38  ;;  %v11459_v38 = vld [vmem:[#allocation10 + $0x50] ss:$36 sps:$4 sm:$0xff]  }
 0x448   : > { %10911 = vmatprep.subr.bf16.mxu0 %v15513_v39  ;;  %10939 = vmatprep.subr.bf16.mxu1 %v15516_v43  ;;  %v11462_v39 = vld [vmem:[#allocation10 + $0x14] ss:$36 sps:$4 sm:$0xff]  }
 0x449   : > { %v14272_v32 = vpop.f32.mrf.mxu1  ;;  %v14274_v46 = vpop.f32.mrf.mxu0 }
 0x44b   : > { %v14276_v36 = vpop.f32.mrf.mxu1  ;;  %v14278_v40 = vpop.f32.mrf.mxu0  ;;  %10912 = vmatpush3.bf16.msra.mxu0 %v15519_v3  ;;  %10940 = vmatpush3.bf16.msra.mxu1 %v15522_v62 }
 0x44d   : > { %v14286_v56 = vpop.f32.mrf.mxu1  ;;  %v14288_v57 = vpop.f32.mrf.mxu0 }
 0x44e   : > { %2854 = vmatmul.mubr.bf16.vlgmr.msra.gmra.mxu0 %v11448_v11  ;;  %2903 = vmatmul.mubr.bf16.vlgmr.msra.gmra.mxu1 %v11451_v14 }
 0x44f   : > { %v14290_v55 = vpop.f32.mrf.mxu1  ;;  %v14292_v48 = vpop.f32.mrf.mxu0  ;;  %2861 = vmatprep.mubr.bf16.mxu0 %v11454_v18  ;;  %2910 = vmatprep.mubr.bf16.mxu1 %v11457_v19 }
 0x451   : > { %v14294_v22 = vpop.f32.mrf.mxu1  ;;  %v14296_v23 = vpop.f32.mrf.mxu0 }
 0x453   : > { %v14298_v44 = vpop.f32.mrf.mxu1  ;;  %v14300_v34 = vpop.f32.mrf.mxu0 }
 0x455   : > { %v2103_v42 = vpop.f32.mrf.mxu1  ;;  %v2216_v43 = vpop.f32.mrf.mxu0 }
 0x456   : > { %2862 = vmatmul.mubr.bf16.gmra.mxu0 %v11456_v35  ;;  %2911 = vmatmul.mubr.bf16.gmra.mxu1 %v11459_v38 }
 0x457   : > { %v2105_v11 = vpop.f32.mrf.mxu1  ;;  %v2218_v14 = vpop.f32.mrf.mxu0  ;;  %2951 = vmatprep.mubr.bf16.mxu0 %v11462_v39  ;;  %3000 = vmatprep.mubr.bf16.mxu1 %v11465_v45 }
 0x459   : > { %v2107_v8 = vpop.f32.mrf.mxu1  ;;  %v2220_v9 = vpop.f32.mrf.mxu0 }
 0x45b   : > { %v2109_v3 = vpop.f32.mrf.mxu1  ;;  %v2222_v6 = vpop.f32.mrf.mxu0 }
 0x45d   : > { %v2113_v59 = vpop.f32.mrf.mxu1  ;;  %v2226_v62 = vpop.f32.mrf.mxu0 }
 0x45f   : > { %v2115_v18 = vpop.f32.mrf.mxu1  ;;  %v2228_v19 = vpop.f32.mrf.mxu0 }
 0x461   : > { %v2117_v25 = vpop.f32.mrf.mxu1  ;;  %v2230_v17 = vpop.f32.mrf.mxu0 }
 0x462   : > { %v2688_v10 = vpack.c.bf16 %v2117_v25, %v2113_v59  ;;  %v2704_v2 = vpack.c.bf16 %v2230_v17, %v2226_v62  ;;  %v2686_v17 = vpack.c.bf16 %v14294_v22, %v14286_v56  ;;  %v2702_v25 = vpack.c.bf16 %v14296_v23, %v14288_v57  ;;  %v15531_v57 = vld [vmem:[#allocation80_spill] sm:$0xff]  ;;  %v11471_v62 = vld [vmem:[#allocation10 + $0x60] ss:$36 sps:$4 sm:$0xff]  }
 0x463   : > { %v2119_v28 = vpop.f32.mrf.mxu1  ;;  %v2232_v26 = vpop.f32.mrf.mxu0  ;;  %v2692_v56 = vpack.c.bf16 %v14242_v54, %v14230_v20  ;;  %v15523_v20 = vpack.c.bf16 %v14210_v0, %v14190_v15  ;;  %v15533_v15 = vld [vmem:[#allocation85_spill] sm:$0xff]  ;;  %v11460_v22 = vld [vmem:[#allocation10 + $0x10] ss:$36 sps:$4 sm:$0xff]  }
 0x464   : > { %v2696_v24 = vpack.c.bf16 %v2119_v28, %v2115_v18  ;;  %v2712_v37 = vpack.c.bf16 %v2232_v26, %v2228_v19  ;;  %v2693_v28 = vpack.c.bf16 %v14276_v36, %v14256_v53  ;;  %v2708_v53 = vpack.c.bf16 %v14244_v51, %v14232_v21  ;;  %v15534_v0 = vld [vmem:[#allocation81_spill] sm:$0xff] }
 0x465   : > { %v2123_v13 = vpop.f32.mrf.mxu1  ;;  %v2236_v7 = vpop.f32.mrf.mxu0  ;;  %v15524_v21 = vpack.c.bf16 %v14212_v4, %v14192_v16  ;;  %v11463_v23 = vld [vmem:[#allocation10 + $0x18] ss:$36 sps:$4 sm:$0xff]   ;;  %v11472_v18 = vld [vmem:[#allocation10 + $0x20] ss:$36 sps:$4 sm:$0xff]  }
 0x466   : > { %v11468_v59 = vld [vmem:[#allocation10 + $0x58] ss:$36 sps:$4 sm:$0xff]  }
 0x467   : > { %v2125_v35 = vpop.f32.mrf.mxu1  ;;  %v2238_v38 = vpop.f32.mrf.mxu0 }
 0x469   : > { %v2127_v58 = vpop.f32.mrf.mxu1  ;;  %v2240_v1 = vpop.f32.mrf.mxu0 }
 0x46a   : > { %v2689_v27 = vpack.c.bf16 %v2127_v58, %v2123_v13  ;;  %v2705_v31 = vpack.c.bf16 %v2240_v1, %v2236_v7  ;;  %v2685_v7 = vpack.c.bf16 %v14272_v32, %v14252_v52  ;;  %v2701_v1 = vpack.c.bf16 %v14274_v46, %v14254_v49  ;;  %v15525_v46 = vld [vmem:[#allocation86_spill] sm:$0xff] }
 0x46b   : > { %v2129_v39 = vpop.f32.mrf.mxu1  ;;  %v2242_v45 = vpop.f32.mrf.mxu0  ;;  %v2700_v52 = vpack.c.bf16 %v14240_v50, %v14224_v5  ;;  %v15528_v5 = vld [vmem:[#allocation87_spill] sm:$0xff] }
 0x46c   : > { %v2697_v33 = vpack.c.bf16 %v2129_v39, %v2125_v35  ;;  %v2713_v30 = vpack.c.bf16 %v2242_v45, %v2238_v38  ;;  %v2695_v35 = vpack.c.bf16 %v2109_v3, %v2105_v11  ;;  %v2711_v38 = vpack.c.bf16 %v2222_v6, %v2218_v14  ;;  %v15540_v11 = vld [vmem:[#allocation79_spill] sm:$0xff] }
 0x46d   : > { %v14302_v41 = vpop.f32.mrf.mxu1  ;;  %v15542_v39 = vmov 0  }
 0x46e   : > { %10953 = vmatprep.subr.bf16.mxu0 %v2697_v33  ;;  %10981 = vmatprep.subr.bf16.mxu1 %v2713_v30  ;;  %v2687_v33 = vpack.c.bf16 %v2107_v8, %v2103_v42  ;;  %v2703_v30 = vpack.c.bf16 %v2220_v9, %v2216_v43  ;;  %v15539_v43 = vld [vmem:[#allocation83_spill] sm:$0xff]  ;;  %v11466_v8 = vld [vmem:[#allocation10 + $0x5c] ss:$36 sps:$4 sm:$0xff]   ;;  %v11469_v9 = vld [vmem:[#allocation10 + $0x64] ss:$36 sps:$4 sm:$0xff]  }
 0x46f   : > { %v14304_v29 = vpop.f32.mrf.mxu1  ;;  %10954 = vmatpush3.bf16.msra.mxu0 %v2689_v27  ;;  %10982 = vmatpush3.bf16.msra.mxu1 %v2705_v31  ;;  %v2694_v27 = vpack.c.bf16 %v14298_v44, %v14290_v55  ;;  %v15541_v14 = vpack.c.bf16 %v15539_v43, %v15540_v11  ;;  %v10071_v11 = vld [vmem:[#allocation12] ss:$0 sm:$0xff] }
 0x470   : > { %10955 = vmatprep.subr.bf16.mxu0 %v2696_v24  ;;  %10983 = vmatprep.subr.bf16.mxu1 %v2712_v37  ;;  %v2710_v37 = vpack.c.bf16 %v14300_v34, %v14292_v48  ;;  %v15535_v48 = vpack.c.bf16 %v15533_v15, %v15534_v0  ;;  %v15536_v34 = vld [vmem:[#allocation82_spill] sm:$0xff] }
 0x471   : > { %v14306_v47 = vpop.f32.mrf.mxu1 }
 0x473   : > { %v14308_v13 = vpop.f32.mrf.mxu1  ;;  %10956 = vmatpush3.bf16.msra.mxu0 %v2688_v10  ;;  %10984 = vmatpush3.bf16.msra.mxu1 %v2704_v2  ;;  %v2709_v10 = vpack.c.bf16 %v14278_v40, %v14258_v61  ;;  %v2684_v61 = vpack.c.bf16 %v14238_v60, %v14222_v63  ;;  %v15526_v63 = vpack.c.bf16 %v14198_v12, %v15525_v46  ;;  %v15527_v60 = vld [vmem:[#allocation88_spill] sm:$0xff]  ;;  %v15537_v12 = vld [vmem:[#allocation78_spill] sm:$0xff] }
 0x474   : > { %10957 = vmatprep.subr.bf16.mxu0 %v2695_v35  ;;  %10985 = vmatprep.subr.bf16.mxu1 %v2711_v38  ;;  %v15529_v50 = vpack.c.bf16 %v15527_v60, %v15528_v5  ;;  %v15530_v40 = vld [vmem:[#allocation84_spill] sm:$0xff]  ;;  %v15538_v42 = vpack.c.bf16 %v15536_v34, %v15537_v12  ;;  %v2715_v38 = vpack.c.bf16 %v14306_v47, %v14302_v41  ;;  %v11488_v47 = vld [vmem:[#allocation15 + $0xf4] ss:$24 sps:$4 sm:$0xff]  }
 0x475   : > { %v14310_v26 = vpop.f32.mrf.mxu1  ;;  %v15532_v55 = vpack.c.bf16 %v15530_v40, %v15531_v57  ;;  %v11480_v41 = vld [vmem:[#allocation15 + $0x120] ss:$24 sps:$4 sm:$0xff]  }
 0x477   : > { %v14316_v31 = vpop.f32.mrf.mxu1  ;;  %10958 = vmatpush3.bf16.msra.mxu0 %v2687_v33  ;;  %10986 = vmatpush3.bf16.msra.mxu1 %v2703_v30  ;;  %v2714_v33 = vpack.c.bf16 %v14308_v13, %v14304_v29  ;;  %v11473_v30 = vld [vmem:[#allocation10 + $0x68] ss:$36 sps:$4 sm:$0xff]   ;;  %v11486_v29 = vld [vmem:[#allocation15 + $0xf0] ss:$24 sps:$4 sm:$0xff]   ;;  %v11494_v13 = vld [vmem:[#allocation15 + $0xc4] ss:$24 sps:$4 sm:$0xff]  }
 0x478   : > { %10959 = vmatprep.subr.bf16.mxu0 %v2694_v27  ;;  %10987 = vmatprep.subr.bf16.mxu1 %v2710_v37  ;;  %v11474_v27 = vld [vmem:[#allocation15 + $0x150] ss:$24 sps:$4 sm:$0xff]   ;;  %v11476_v37 = vld [vmem:[#allocation15 + $0x154] ss:$24 sps:$4 sm:$0xff]  }
 0x479   : > { %v11117_v24 = vpop.f32.mrf.mxu1 }
 0x47a   : > { %v2717_v45 = vpack.c.bf16 %v11117_v24, %v14310_v26  ;;  %v13103_v26 = vmov 0.0   ;;  %v11498_v24 = vld [vmem:[#allocation15 + $0x90] ss:$24 sps:$4 sm:$0xff]  }
 0x47b   : > { %v2298_v2 = vpop.f32.mrf.mxu1  ;;  %10960 = vmatpush3.bf16.msra.mxu0 %v2686_v17  ;;  %10988 = vmatpush3.bf16.msra.mxu1 %v2702_v25  ;;  %v11492_v17 = vld [vmem:[#allocation15 + $0xc0] ss:$24 sps:$4 sm:$0xff]   ;;  %v11500_v25 = vld [vmem:[#allocation15 + $0x94] ss:$24 sps:$4 sm:$0xff]  }
 0x47c   : > { %10961 = vmatprep.subr.bf16.mxu0 %v2693_v28  ;;  %10989 = vmatprep.subr.bf16.mxu1 %v2709_v10  ;;  %v2716_v35 = vpack.c.bf16 %v2298_v2, %v14316_v31  ;;  %v11482_v31 = vld [vmem:[#allocation15 + $0x124] ss:$24 sps:$4 sm:$0xff]   ;;  %v11504_v10 = vld [vmem:[#allocation15 + $0x60] ss:$24 sps:$4 sm:$0xff]   ;;  %v11512_v2 = vld [vmem:[#allocation15 + $0x34] ss:$24 sps:$4 sm:$0xff]  }
 0x47d   : > { %v11120_v58 = vpop.f32.mrf.mxu1  ;;  %v11506_v28 = vld [vmem:[#allocation15 + $0x64] ss:$24 sps:$4 sm:$0xff]  }
 0x47f   : > { %v2311_v36 = vpop.f32.mrf.mxu1  ;;  %10962 = vmatpush3.bf16.msra.mxu0 %v2685_v7  ;;  %10990 = vmatpush3.bf16.msra.mxu1 %v2701_v1  ;;  %v11510_v7 = vld [vmem:[#allocation15 + $0x30] ss:$24 sps:$4 sm:$0xff]   ;;  %v11518_v1 = vld [vmem:[#allocation15 + $0x4] ss:$24 sps:$4 sm:$0xff]  }
 0x480   : > { %10963 = vmatprep.subr.bf16.mxu0 %v2692_v56  ;;  %10991 = vmatprep.subr.bf16.mxu1 %v2708_v53 }
 0x481   : > { %v11121_v32 = vpop.f32.mrf.mxu1 }
 0x482   : > { %v2719_v6 = vpack.c.bf16 %v11121_v32, %v11120_v58  ;;  %v11516_v58 = vld [vmem:[#allocation15] ss:$24 sps:$4 sm:$0xff]  }
 0x483   : > { %v2314_v49 = vpop.f32.mrf.mxu1  ;;  %10964 = vmatpush3.bf16.msra.mxu0 %v2684_v61  ;;  %10992 = vmatpush3.bf16.msra.mxu1 %v2700_v52 }
 0x484   : > { %10965 = vmatprep.subr.bf16.mxu0 %v15523_v20  ;;  %10993 = vmatprep.subr.bf16.mxu1 %v15524_v21  ;;  %v2718_v19 = vpack.c.bf16 %v2314_v49, %v2311_v36 }
 0x485   : > { %v11124_v54 = vpop.f32.mrf.mxu1 }
 0x487   : > { %v2327_v51 = vpop.f32.mrf.mxu1  ;;  %10966 = vmatpush3.bf16.msra.mxu0 %v15526_v63  ;;  %10994 = vmatpush3.bf16.msra.mxu1 %v15529_v50 }
 0x488   : > { %10967 = vmatprep.subr.bf16.mxu0 %v15532_v55  ;;  %10995 = vmatprep.subr.bf16.mxu1 %v15535_v48 }
 0x489   : > { %v11125_v16 = vpop.f32.mrf.mxu1 }
 0x48a   : > { %v2721_v4 = vpack.c.bf16 %v11125_v16, %v11124_v54 }
 0x48b   : > { %v2330_v44 = vpop.f32.mrf.mxu1  ;;  %10968 = vmatpush3.bf16.msra.mxu0 %v15538_v42  ;;  %10996 = vmatpush3.bf16.msra.mxu1 %v15541_v14 }
 0x48c   : > { %11126 = vmatprep.subr.bf16.mxu0 %v2721_v4  ;;  %v2720_v3 = vpack.c.bf16 %v2330_v44, %v2327_v51  ;;  %3437 = vmatprep.subr.bf16.mxu1 %v11476_v37 }
 0x48e   : > { %2952 = vmatmul.mubr.bf16.vlgmr.msra.gmra.mxu0 %v11460_v22  ;;  %3001 = vmatmul.mubr.bf16.vlgmr.msra.gmra.mxu1 %v11463_v23 }
 0x48f   : > { %11127 = vmatpush3.bf16.msra.mxu0 %v2721_v4  ;;  %2959 = vmatprep.mubr.bf16.mxu0 %v11466_v8 }
 0x490   : > { %11128 = vmatprep.subr.bf16.mxu0 %v2720_v3  ;;  %3008 = vmatprep.mubr.bf16.mxu1 %v11469_v9 }
 0x491   : > { %3438 = vmatpush1.bf16.msra.mxu1 %v11474_v27 }
 0x492   : > { %3439 = vmatprep.subr.bf16.mxu1 %v11482_v31 }
 0x493   : > { %11129 = vmatpush3.bf16.msra.mxu0 %v2720_v3 }
 0x494   : > { %11130 = vmatprep.subr.bf16.mxu0 %v2719_v6 }
 0x495   : > { %3440 = vmatpush1.bf16.msra.mxu1 %v11480_v41 }
 0x496   : > { %2960 = vmatmul.mubr.bf16.gmra.mxu0 %v11468_v59  ;;  %3009 = vmatmul.mubr.bf16.gmra.mxu1 %v11471_v62 }
 0x497   : > { %11131 = vmatpush3.bf16.msra.mxu0 %v2719_v6  ;;  %11142 = vmatprep.mubr.bf16.mxu0 %v11472_v18 }
 0x498   : > { %11132 = vmatprep.subr.bf16.mxu0 %v2718_v19  ;;  %3469 = vmatprep.mubr.bf16.mxu1 %v15542_v39 }
 0x499   : > { %3441 = vmatprep.subr.bf16.mxu1 %v11488_v47 }
 0x49a   : > { %3442 = vmatpush1.bf16.msra.mxu1 %v11486_v29 }
 0x49b   : > { %11133 = vmatpush3.bf16.msra.mxu0 %v2718_v19  ;;  %3443 = vmatprep.subr.bf16.mxu1 %v11494_v13 }
 0x49c   : > { %11134 = vmatprep.subr.bf16.mxu0 %v2717_v45 }
 0x49e   : > { %3444 = vmatpush1.bf16.msra.mxu1 %v11492_v17 }
 0x49f   : > { %11135 = vmatpush3.bf16.msra.mxu0 %v2717_v45  ;;  %3445 = vmatprep.subr.bf16.mxu1 %v11500_v25 }
 0x4a0   : > { %11136 = vmatprep.subr.bf16.mxu0 %v2716_v35 }
 0x4a2   : > { %3446 = vmatpush1.bf16.msra.mxu1 %v11498_v24 }
 0x4a3   : > { %11137 = vmatpush3.bf16.msra.mxu0 %v2716_v35  ;;  %3447 = vmatprep.subr.bf16.mxu1 %v11506_v28 }
 0x4a4   : > { %11138 = vmatprep.subr.bf16.mxu0 %v2715_v38 }
 0x4a6   : > { %3448 = vmatpush1.bf16.msra.mxu1 %v11504_v10 }
 0x4a7   : > { %11139 = vmatpush3.bf16.msra.mxu0 %v2715_v38  ;;  %3449 = vmatprep.subr.bf16.mxu1 %v11512_v2 }
 0x4a8   : > { %11140 = vmatprep.subr.bf16.mxu0 %v2714_v33 }
 0x4aa   : > { %3450 = vmatpush1.bf16.msra.mxu1 %v11510_v7 }
 0x4ab   : > { %11141 = vmatpush3.bf16.msra.mxu0 %v2714_v33  ;;  %3451 = vmatprep.subr.bf16.mxu1 %v11518_v1 }
 0x4ac   : > { %11146 = vmatprep.subr.bf16.mxu0 %v13103_v26 }
 0x4ae   : > { %11143 = vmatmul.mubr.bf16.vlgmr.msra.gmra.mxu0 %v11473_v30  ;;  %3452 = vmatpush1.bf16.msra.mxu1 %v11516_v58 }
 0x4af   : > { %11150 = vmatprep.mubr.msk.bf16.mxu0 %vm13104_vm2, %v13103_v26 }
 0x50e   : > { %v10913_v56 = vpop.f32.mrf.mxu0  ;;  %v10941_v53 = vpop.f32.mrf.mxu1 }
 0x510   : > { %v10914_v36 = vpop.f32.mrf.mxu0  ;;  %v10942_v61 = vpop.f32.mrf.mxu1 }
 0x511   : > { %v10915_v14 = vadd.f32 %v10914_v36, %v10913_v56  ;;  %v10943_v35 = vadd.f32 %v10942_v61, %v10941_v53 }
 0x512   : > { %v10916_v52 = vpop.f32.mrf.mxu0  ;;  %v10944_v32 = vpop.f32.mrf.mxu1 }
 0x513   : > { %v2856_v45 = vadd.f32 %v10915_v14, %v10071_v11  ;;  %v11519_v14 = vld [vmem:[#allocation15 + $0x8] ss:$24 sps:$4 sm:$0xff]  }
 0x514   : > { %v10917_v49 = vpop.f32.mrf.mxu0  ;;  %v10945_v20 = vpop.f32.mrf.mxu1 }
 0x515   : > { %v10918_v8 = vadd.f32 %v10917_v49, %v10916_v52  ;;  %v10946_v33 = vadd.f32 %v10945_v20, %v10944_v32  ;;  %v2905_v17 = vadd.f32 %v10943_v35, %v2856_v45  ;;  %v11548_v45 = vld [vmem:[#allocation18 + $0x70] sm:$0xff]  }
 0x516   : > { %v10919_v21 = vpop.f32.mrf.mxu0  ;;  %v10947_v54 = vpop.f32.mrf.mxu1 }
 0x517   : > { %v2859_v38 = vadd.f32 %v10918_v8, %v10071_v11  ;;  %v11524_v8 = vld [vmem:[#allocation15 + $0x164] ss:$24 sps:$4 sm:$0xff]  }
 0x518   : > { %v10920_v51 = vpop.f32.mrf.mxu0  ;;  %v10948_v46 = vpop.f32.mrf.mxu1  ;;  %3519 = vmatprep.subr.bf16.mxu1 %v11524_v8 }
 0x519   : > { %v10921_v34 = vadd.f32 %v10920_v51, %v10919_v21  ;;  %v10949_v3 = vadd.f32 %v10948_v46, %v10947_v54  ;;  %v2908_v25 = vadd.f32 %v10946_v33, %v2859_v38  ;;  %v11525_v38 = vld [vmem:[#allocation15 + $0x130] ss:$24 sps:$4 sm:$0xff]   ;;  %v11530_v33 = vld [vmem:[#allocation15 + $0x104] ss:$24 sps:$4 sm:$0xff]  }
 0x51a   : > { %v10922_v63 = vpop.f32.mrf.mxu0  ;;  %v10950_v60 = vpop.f32.mrf.mxu1 }
 0x51b   : > { %v2864_v9 = vadd.f32 %v10921_v34, %v10071_v11  ;;  %v11509_v34 = vld [vmem:[#allocation15 + $0x6c] ss:$24 sps:$4 sm:$0xff]  }
 0x51c   : > { %v10923_v5 = vpop.f32.mrf.mxu0  ;;  %v10951_v50 = vpop.f32.mrf.mxu1 }
 0x51d   : > { %v10924_v12 = vadd.f32 %v10923_v5, %v10922_v63  ;;  %v10952_v59 = vadd.f32 %v10951_v50, %v10950_v60  ;;  %v2913_v30 = vadd.f32 %v10949_v3, %v2864_v9  ;;  %v11546_v9 = vld [vmem:[#allocation18 + $0x78] sm:$0xff]  }
 0x51f   : > { %v2867_v6 = vadd.f32 %v10924_v12, %v10071_v11  ;;  %v11507_v12 = vld [vmem:[#allocation15 + $0x68] ss:$24 sps:$4 sm:$0xff]   ;;  %v11521_v11 = vld [vmem:[#allocation15 + $0xc] ss:$24 sps:$4 sm:$0xff]  }
 0x521   : > { %v2916_v37 = vadd.f32 %v10952_v59, %v2867_v6  ;;  %v11522_v6 = vld [vmem:[#allocation15 + $0x160] ss:$24 sps:$4 sm:$0xff]  }
 0x54e   : > { %v10969_v40 = vpop.f32.mrf.mxu0  ;;  %v10997_v57 = vpop.f32.mrf.mxu1 }
 0x550   : > { %v10970_v55 = vpop.f32.mrf.mxu0  ;;  %v10998_v0 = vpop.f32.mrf.mxu1 }
 0x551   : > { %v10971_v41 = vadd.f32 %v10970_v55, %v10969_v40  ;;  %v10999_v10 = vadd.f32 %v10998_v0, %v10997_v57  ;;  %v11479_v40 = vld [vmem:[#allocation15 + $0x15c] ss:$24 sps:$4 sm:$0xff]   ;;  %v11485_v0 = vld [vmem:[#allocation15 + $0x12c] ss:$24 sps:$4 sm:$0xff]  }
 0x552   : > { %v10972_v15 = vpop.f32.mrf.mxu0  ;;  %v11000_v16 = vpop.f32.mrf.mxu1  ;;  %v3070_v55 = vld [vmem:[#allocation13] sm:$0x1] }
 0x553   : > { %v2954_v7 = vadd.f32 %v10971_v41, %v2905_v17  ;;  %v11533_v41 = vld [vmem:[#allocation15 + $0xd4] ss:$24 sps:$4 sm:$0xff]   ;;  %v11536_v17 = vld [vmem:[#allocation15 + $0xa4] ss:$24 sps:$4 sm:$0xff]  }
 0x554   : > { %v10973_v48 = vpop.f32.mrf.mxu0  ;;  %v11001_v22 = vpop.f32.mrf.mxu1 }
 0x555   : > { %v10974_v47 = vadd.f32 %v10973_v48, %v10972_v15  ;;  %v11002_v58 = vadd.f32 %v11001_v22, %v11000_v16  ;;  %v3003_v32 = vadd.f32 %v10999_v10, %v2954_v7  ;;  %v11477_v15 = vld [vmem:[#allocation15 + $0x158] ss:$24 sps:$4 sm:$0xff]   ;;  %v11483_v48 = vld [vmem:[#allocation15 + $0x128] ss:$24 sps:$4 sm:$0xff]   ;;  %v11491_v16 = vld [vmem:[#allocation15 + $0xfc] ss:$24 sps:$4 sm:$0xff]  }
 0x556   : > { %v10975_v4 = vpop.f32.mrf.mxu0  ;;  %v11003_v44 = vpop.f32.mrf.mxu1  ;;  %v11497_v22 = vld [vmem:[#allocation15 + $0xcc] ss:$24 sps:$4 sm:$0xff]   ;;  %v11537_v7 = vld [vmem:[#allocation15 + $0x70] ss:$24 sps:$4 sm:$0xff]  }
 0x557   : > { %v2957_v1 = vadd.f32 %v10974_v47, %v2908_v25  ;;  %v11551_v47 = vld [vmem:[#allocation18 + $0x28] sm:$0xff]   ;;  %v11554_v25 = vld [vmem:[#allocation18 + $0x58] sm:$0xff]  }
 0x558   : > { %v10976_v23 = vpop.f32.mrf.mxu0  ;;  %v11004_v43 = vpop.f32.mrf.mxu1  ;;  %v11555_v10 = vld [vmem:[#allocation18 + $0x18] sm:$0xff]  }
 0x559   : > { %v10977_v19 = vadd.f32 %v10976_v23, %v10975_v4  ;;  %v11005_v13 = vadd.f32 %v11004_v43, %v11003_v44  ;;  %v3006_v20 = vadd.f32 %v11002_v58, %v2957_v1  ;;  %v11489_v4 = vld [vmem:[#allocation15 + $0xf8] ss:$24 sps:$4 sm:$0xff]   ;;  %v11503_v23 = vld [vmem:[#allocation15 + $0x9c] ss:$24 sps:$4 sm:$0xff]  }
 0x55a   : > { %v10978_v42 = vpop.f32.mrf.mxu0  ;;  %v11006_v18 = vpop.f32.mrf.mxu1  ;;  %v11501_v44 = vld [vmem:[#allocation15 + $0x98] ss:$24 sps:$4 sm:$0xff]   ;;  %v11542_v1 = vld [vmem:[#allocation15 + $0x44] ss:$24 sps:$4 sm:$0xff]  }
 0x55b   : > { %v2962_v29 = vadd.f32 %v10977_v19, %v2913_v30  ;;  %v11513_v43 = vld [vmem:[#allocation15 + $0x38] ss:$24 sps:$4 sm:$0xff]  }
 0x55c   : > { %v10979_v62 = vpop.f32.mrf.mxu0  ;;  %v11007_v31 = vpop.f32.mrf.mxu1  ;;  %v11549_v30 = vld [vmem:[#allocation18 + $0x30] sm:$0xff]  }
 0x55d   : > { %v10980_v27 = vadd.f32 %v10979_v62, %v10978_v42  ;;  %v11008_v28 = vadd.f32 %v11007_v31, %v11006_v18  ;;  %v3011_v56 = vadd.f32 %v11005_v13, %v2962_v29  ;;  %v11515_v42 = vld [vmem:[#allocation15 + $0x3c] ss:$24 sps:$4 sm:$0xff]   ;;  %v11528_v31 = vld [vmem:[#allocation15 + $0x100] ss:$24 sps:$4 sm:$0xff]   ;;  %v11552_v29 = vld [vmem:[#allocation18 + $0x60] sm:$0xff]  }
 0x55e   : > { %v11527_v62 = vld [vmem:[#allocation15 + $0x134] ss:$24 sps:$4 sm:$0xff]   ;;  %v11547_v18 = vld [vmem:[#allocation18 + $0x38] sm:$0xff]   ;;  %v11531_v13 = vld [vmem:[#allocation15 + $0xd0] ss:$24 sps:$4 sm:$0xff]  }
 0x55f   : > { %v2965_v24 = vadd.f32 %v10980_v27, %v2916_v37  ;;  %v11550_v37 = vld [vmem:[#allocation18 + $0x68] sm:$0xff]   ;;  %v11557_v58 = vld [vmem:[#allocation18 + $0x10] sm:$0xff]  }
 0x561   : > { %v3014_v61 = vadd.f32 %v11008_v28, %v2965_v24  ;;  %v11534_v24 = vld [vmem:[#allocation15 + $0xa0] ss:$24 sps:$4 sm:$0xff]   ;;  %v11539_v28 = vld [vmem:[#allocation15 + $0x74] ss:$24 sps:$4 sm:$0xff]  }
 0x56e   : > { %v11144_v2 = vpop.f32.mrf.mxu0 }
 0x56f   : > { %v3060_v36 = vadd.f32 %v11144_v2, %v3011_v56  ;;  %v11556_v2 = vld [vmem:[#allocation18 + $0x50] sm:$0xff]  }
 0x570   : > { %v3051_v53 = vpop.f32.mrf.mxu0  ;;  %v11540_v56 = vld [vmem:[#allocation15 + $0x40] ss:$24 sps:$4 sm:$0xff]  }
 0x571   : > { %v3068_v54 = vmax.f32 %v3060_v36, 0.0  ;;  %v3052_v51 = vadd.f32 %v3051_v53, %v3003_v32  ;;  %v11545_v53 = vld [vmem:[#allocation15 + $0x14] ss:$24 sps:$4 sm:$0xff]   ;;  %v11543_v36 = vld [vmem:[#allocation15 + $0x10] ss:$24 sps:$4 sm:$0xff]  }
 0x572   : > { %v11145_v52 = vpop.f32.mrf.mxu0  ;;  %v11560_v32 = vld [vmem:[#allocation18 + $0x40] sm:$0xff]  }
 0x573   : > { %v3063_v49 = vadd.f32 %v11145_v52, %v3014_v61  ;;  %v3066_v50 = vmax.f32 %v3052_v51, 0.0  ;;  %v11558_v61 = vld [vmem:[#allocation18 + $0x48] sm:$0xff]   ;;  %v11565_v51 = vld [vmem:[#allocation18 + $0xb0] sm:$0xff]  }
 0x574   : > { %v3054_v21 = vpop.f32.mrf.mxu0  ;;  %v11559_v52 = vld [vmem:[#allocation18 + $0x8] sm:$0xff]  }
 0x575   : > { %v3069_v46 = vmax.f32 %v3063_v49, 0.0  ;;  %v3055_v63 = vadd.f32 %v3054_v21, %v3006_v20  ;;  %v11561_v49 = vld [vmem:[#allocation18] sm:$0xff]   ;;  %v11562_v20 = vld [vmem:[#allocation18 + $0xf8] sm:$0xff]  }
 0x576   : > { %v11563_v21 = vld [vmem:[#allocation18 + $0xb8] sm:$0xff]  }
 0x577   : > { %v3072_v60 = vpack.c.bf16 %v3069_v46, %v3068_v54  ;;  %v3067_v5 = vmax.f32 %v3055_v63, 0.0  ;;  %v11564_v54 = vld [vmem:[#allocation18 + $0xf0] sm:$0xff]   ;;  %v11566_v46 = vld [vmem:[#allocation18 + $0xe8] sm:$0xff]  }
 0x578   : > { %v11567_v63 = vld [vmem:[#allocation18 + $0xa8] sm:$0xff]  }
 0x579   : > { %11147 = vmatpush3.bf16.msra.mxu0 %v3072_v60  ;;  %v3071_v57 = vpack.c.bf16 %v3067_v5, %v3066_v50  ;;  %v11568_v60 = vld [vmem:[#allocation18 + $0xe0] sm:$0xff]   ;;  %v11570_v50 = vld [vmem:[#allocation18 + $0xd8] sm:$0xff]  }
 0x57a   : > { %11148 = vmatprep.subr.bf16.mxu0 %v13103_v26  ;;  %v11495_v26 = vld [vmem:[#allocation15 + $0xc8] ss:$24 sps:$4 sm:$0xff]  }
 0x57b   : > { %v11569_v5 = vld [vmem:[#allocation18 + $0xa0] sm:$0xff]  }
 0x57d   : > { %11149 = vmatpush3.bf16.msra.mxu0 %v3071_v57  ;;  %v11572_v57 = vld [vmem:[#allocation18 + $0xd0] sm:$0xff]  }
 0x57e   : > { %3478 = vmatprep.subr.bf16.mxu0 %v11479_v40  ;;  %v11571_v40 = vld [vmem:[#allocation18 + $0x98] sm:$0xff]  }
 0x580   : > { %11151 = vmatmul.mubr.msk.bf16.vlgmr.msra.gmra.mxu0 %vm1768_vm1, %v3070_v55  ;;  %v11573_v55 = vld [vmem:[#allocation18 + $0x90] sm:$0xff]  }
 0x581   : > { %3479 = vmatpush1.bf16.msra.mxu0 %v11477_v15  ;;  %3510 = vmatprep.mubr.bf16.mxu0 %v15542_v39  ;;  %v11574_v15 = vld [vmem:[#allocation18 + $0xc8] sm:$0xff]  }
 0x582   : > { %3480 = vmatprep.subr.bf16.mxu0 %v11485_v0  ;;  %v11575_v0 = vld [vmem:[#allocation18 + $0x88] sm:$0xff]  }
 0x585   : > { %3481 = vmatpush1.bf16.msra.mxu0 %v11483_v48  ;;  %v11576_v48 = vld [vmem:[#allocation18 + $0xc0] sm:$0xff]  }
 0x586   : > { %3482 = vmatprep.subr.bf16.mxu0 %v11491_v16  ;;  %v11577_v16 = vld [vmem:[#allocation18 + $0x80] sm:$0xff]  }
 0x589   : > { %3483 = vmatpush1.bf16.msra.mxu0 %v11489_v4  ;;  %v3167_v4 = vlaneseq }
 0x58a   : > { %3484 = vmatprep.subr.bf16.mxu0 %v11497_v22 }
 0x58b   : > { %v3168_v22 = vshrl.u32 %v3167_v4, 7 }
 0x58d   : > { %3485 = vmatpush1.bf16.msra.mxu0 %v11495_v26  ;;  %v3169_v26 = vsub.s32 0, %v3168_v22 }
 0x58e   : > { %3486 = vmatprep.subr.bf16.mxu0 %v11503_v23  ;;  %v3177_v23 = vsub.s32 2, %v3168_v22 }
 0x591   : > { %3487 = vmatpush1.bf16.msra.mxu0 %v11501_v44  ;;  %v3165_v44 = vld [vmem:[#allocation16] sm:$0x3f] }
 0x592   : > { %3488 = vmatprep.subr.bf16.mxu0 %v11509_v34  ;;  %v3173_v34 = vsub.s32 1, %v3168_v22 }
 0x595   : > { %3489 = vmatpush1.bf16.msra.mxu0 %v11507_v12  ;;  %v3181_v12 = vsub.s32 3, %v3168_v22 }
 0x596   : > { %3490 = vmatprep.subr.bf16.mxu0 %v11515_v42  ;;  %v3170_v42 = vrot.slane %v3165_v44, %v3169_v26 }
 0x599   : > { %3491 = vmatpush1.bf16.msra.mxu0 %v11513_v43  ;;  %v3178_v43 = vrot.slane %v3165_v44, %v3177_v23 }
 0x59a   : > { %3492 = vmatprep.subr.bf16.mxu0 %v11521_v11  ;;  %v3174_v11 = vrot.slane %v3165_v44, %v3173_v34 }
 0x59d   : > { %3493 = vmatpush1.bf16.msra.mxu0 %v11519_v14 }
 0x59e   : > { %11022 = vmatprep.subr.bf16.mxu0 %v11546_v9  ;;  %v3182_v9 = vrot.slane %v3165_v44, %v3181_v12 }
 0x640   : > { %v3110_v3 = vpop.f32.mrf.mxu0 }
 0x641   : > { %v3116_v59 = vpack.c.bf16 %v3110_v3, %v3110_v3 }
 0x642   : > { %v11152_v19 = vpop.f32.mrf.mxu0 }
 0x643   : > { %3470 = vmatmul.mubr.bf16.vlgmr.msra.gmra.mxu1 %v3116_v59  ;;  %3511 = vmatmul.mubr.bf16.vlgmr.msra.gmra.mxu0 %v3116_v59 }
 0x644   : > { %3520 = vmatpush1.bf16.msra.mxu1 %v11522_v6  ;;  %v3113_v35 = vpop.f32.mrf.mxu0  ;;  %3551 = vmatprep.mubr.bf16.mxu1 %v15542_v39  ;;  %v11553_v39 = vld [vmem:[#allocation18 + $0x20] sm:$0xff]  }
 0x645   : > { %3521 = vmatprep.subr.bf16.mxu1 %v11527_v62  ;;  %11023 = vmatpush3.bf16.msra.mxu0 %v11547_v18  ;;  %v3930_v62 = vld [vmem:[%s15543_s7 + $0x10] sm:$0xff] }
 0x646   : > { %v11153_v27 = vpop.f32.mrf.mxu0  ;;  %11024 = vmatprep.subr.bf16.mxu0 %v11548_v45 }
 0x648   : > { %3522 = vmatpush1.bf16.msra.mxu1 %v11525_v38 }
 0x649   : > { %3523 = vmatprep.subr.bf16.mxu1 %v11530_v33  ;;  %11025 = vmatpush3.bf16.msra.mxu0 %v11549_v30  ;;  %v3929_v33 = vld [vmem:[%s15543_s7 + $0x8] sm:$0xff] }
 0x64a   : > { %11026 = vmatprep.subr.bf16.mxu0 %v11550_v37 }
 0x64c   : > { %3524 = vmatpush1.bf16.msra.mxu1 %v11528_v31 }
 0x64d   : > { %3525 = vmatprep.subr.bf16.mxu1 %v11533_v41  ;;  %11027 = vmatpush3.bf16.msra.mxu0 %v11551_v47 }
 0x64e   : > { %11028 = vmatprep.subr.bf16.mxu0 %v11552_v29 }
 0x650   : > { %3526 = vmatpush1.bf16.msra.mxu1 %v11531_v13  ;;  %v3931_v13 = vld [vmem:[%s15543_s7 + $0x18] sm:$0xff] }
 0x651   : > { %3527 = vmatprep.subr.bf16.mxu1 %v11536_v17  ;;  %11029 = vmatpush3.bf16.msra.mxu0 %v11553_v39 }
 0x652   : > { %11030 = vmatprep.subr.bf16.mxu0 %v11554_v25 }
 0x654   : > { %3528 = vmatpush1.bf16.msra.mxu1 %v11534_v24 }
 0x655   : > { %3529 = vmatprep.subr.bf16.mxu1 %v11539_v28  ;;  %11031 = vmatpush3.bf16.msra.mxu0 %v11555_v10 }
 0x656   : > { %11032 = vmatprep.subr.bf16.mxu0 %v11556_v2 }
 0x658   : > { %3530 = vmatpush1.bf16.msra.mxu1 %v11537_v7 }
 0x659   : > { %3531 = vmatprep.subr.bf16.mxu1 %v11542_v1  ;;  %11033 = vmatpush3.bf16.msra.mxu0 %v11557_v58  ;;  %v3185_v1 = vsub.s32 4, %v3168_v22  ;;  %v3189_v58 = vsub.s32 5, %v3168_v22 }
 0x65a   : > { %11034 = vmatprep.subr.bf16.mxu0 %v11558_v61 }
 0x65c   : > { %3532 = vmatpush1.bf16.msra.mxu1 %v11540_v56  ;;  %v3186_v56 = vrot.slane %v3165_v44, %v3185_v1 }
 0x65d   : > { %3533 = vmatprep.subr.bf16.mxu1 %v11545_v53  ;;  %11035 = vmatpush3.bf16.msra.mxu0 %v11559_v52  ;;  %v3190_v53 = vrot.slane %v3165_v44, %v3189_v58 }
 0x65e   : > { %11036 = vmatprep.subr.bf16.mxu0 %v11560_v32 }
 0x660   : > { %3534 = vmatpush1.bf16.msra.mxu1 %v11543_v36 }
 0x661   : > { %11037 = vmatpush3.bf16.msra.mxu0 %v11561_v49  ;;  %11044 = vmatprep.subr.bf16.mxu1 %v11562_v20 }
 0x663   : > { %3552 = vmatmul.mubr.bf16.vlgmr.msra.gmra.mxu1 %v3116_v59  ;;  %v3928_v59 = vld [vmem:[%s15543_s7] sm:$0xff] }
 0x664   : > { %11045 = vmatpush3.bf16.msra.mxu1 %v11563_v21 }
 0x665   : > { %11046 = vmatprep.subr.bf16.mxu1 %v11564_v54 }
 0x668   : > { %11047 = vmatpush3.bf16.msra.mxu1 %v11565_v51 }
 0x669   : > { %11048 = vmatprep.subr.bf16.mxu1 %v11566_v46 }
 0x66c   : > { %11049 = vmatpush3.bf16.msra.mxu1 %v11567_v63 }
 0x66d   : > { %11050 = vmatprep.subr.bf16.mxu1 %v11568_v60 }
 0x670   : > { %11051 = vmatpush3.bf16.msra.mxu1 %v11569_v5 }
 0x671   : > { %11052 = vmatprep.subr.bf16.mxu1 %v11570_v50 }
 0x674   : > { %11053 = vmatpush3.bf16.msra.mxu1 %v11571_v40 }
 0x675   : > { %11054 = vmatprep.subr.bf16.mxu1 %v11572_v57  ;;  %v10139_v57 = vld [vmem:[#allocation19] ss:$0 sm:$0xff] }
 0x678   : > { %11055 = vmatpush3.bf16.msra.mxu1 %v11573_v55 }
 0x679   : > { %11056 = vmatprep.subr.bf16.mxu1 %v11574_v15 }
 0x67c   : > { %11057 = vmatpush3.bf16.msra.mxu1 %v11575_v0 }
 0x67d   : > { %11058 = vmatprep.subr.bf16.mxu1 %v11576_v48 }
 0x680   : > { %11059 = vmatpush3.bf16.msra.mxu1 %v11577_v16 }
 0x703   : > { %v3471_v14 = vpop.f32.mrf.mxu1  ;;  %v3512_v8 = vpop.f32.mrf.mxu0 }
 0x704   : > { %v3472_v3 = vadd.f32 %v3471_v14, %v3170_v42  ;;  %v3513_v6 = vadd.f32 %v3512_v8, %v3178_v43 }
 0x705   : > { %v3473_v18 = vpop.f32.mrf.mxu1  ;;  %v3514_v19 = vpop.f32.mrf.mxu0 }
 0x706   : > { %v3915_v45 = vrot.slane %v3472_v3, %v3169_v26  ;;  %v3923_v35 = vrot.slane %v3472_v3, %v3173_v34  ;;  %v3474_v38 = vadd.f32 %v3473_v18, %v3174_v11  ;;  %v3515_v30 = vadd.f32 %v3514_v19, %v3182_v9 }
 0x707   : > { %v3475_v27 = vpop.f32.mrf.mxu1  ;;  %v3516_v37 = vpop.f32.mrf.mxu0  ;;  %v3560_v47 = vmax.f32 %v3513_v6, 0.0 }
 0x708   : > { %v3932_v31 = vadd.f32 %v3928_v59, %v3915_v45  ;;  %v3934_v41 = vadd.f32 %v3930_v62, %v3923_v35  ;;  %v3919_v29 = vrot.slane %v3474_v38, %v3169_v26  ;;  %v3927_v17 = vrot.slane %v3474_v38, %v3173_v34 }
 0x709   : > { %v3561_v39 = vmax.f32 %v3515_v30, 0.0  ;;  %v3476_v25 = vpop.f32.mrf.mxu1  ;;  %v3517_v24 = vpop.f32.mrf.mxu0  ;;  %v3564_v7 = vpack.c.bf16 %v3560_v47, %v3560_v47 }
 0x70a   : > { %3936 = vst [vmem:[#allocation2 + $0x10] sm:$0xff] %v3932_v31  ;;  %3938 = vst [vmem:[#allocation2 + $0x18] sm:$0xff] %v3934_v41  ;;  %v3933_v28 = vadd.f32 %v3929_v33, %v3919_v29  ;;  %v3935_v10 = vadd.f32 %v3931_v13, %v3927_v17 }
 0x70b   : > { %v3565_v2 = vpack.c.bf16 %v3561_v39, %v3561_v39 }
 0x70c   : > { %3937 = vst [vmem:[#allocation2] sm:$0xff] %v3933_v28  ;;  %3939 = vst [vmem:[#allocation2 + $0x8] sm:$0xff] %v3935_v10 }
 0x70d   : > { %3863 = vmatprep.mubr.bf16.mxu0 %v3565_v2 }
 0x70e   : > { %3864 = vmatmul.mubr.bf16.vlgmr.msra.gmra.mxu0 %v3564_v7 }
 0x723   : > { %v3553_v36 = vpop.f32.mrf.mxu1 }
 0x724   : > { %v3554_v61 = vadd.f32 %v3553_v36, %v3186_v56 }
 0x725   : > { %v3555_v52 = vpop.f32.mrf.mxu1 }
 0x726   : > { %v3556_v32 = vadd.f32 %v3555_v52, %v3190_v53  ;;  %v3562_v49 = vmax.f32 %v3554_v61, 0.0 }
 0x727   : > { %v3557_v20 = vpop.f32.mrf.mxu1 }
 0x728   : > { %v3563_v21 = vmax.f32 %v3556_v32, 0.0  ;;  %v3566_v46 = vpack.c.bf16 %v3562_v49, %v3562_v49 }
 0x729   : > { %v3558_v54 = vpop.f32.mrf.mxu1 }
 0x72a   : > { %v3567_v51 = vpack.c.bf16 %v3563_v21, %v3563_v21 }
 0x72c   : > { %3903 = vmatprep.mubr.bf16.mxu1 %v3567_v51 }
 0x72d   : > { %3904 = vmatmul.mubr.bf16.vlgmr.msra.gmra.mxu1 %v3566_v46 }
 0x7ce   : > { %v11038_v63 = vpop.f32.mrf.mxu0 }
 0x7d0   : > { %v11039_v60 = vpop.f32.mrf.mxu0 }
 0x7d1   : > { %v11040_v40 = vadd.f32 %v11039_v60, %v11038_v63 }
 0x7d2   : > { %v11041_v5 = vpop.f32.mrf.mxu0 }
 0x7d3   : > { %v3866_v0 = vadd.f32 %v11040_v40, %v10139_v57 }
 0x7d4   : > { %v11042_v50 = vpop.f32.mrf.mxu0 }
 0x7ed   : > { %v11060_v55 = vpop.f32.mrf.mxu1 }
 0x7ef   : > { %v11061_v15 = vpop.f32.mrf.mxu1 }
 0x7f0   : > { %v11062_v48 = vadd.f32 %v11061_v15, %v11060_v55 }
 0x7f1   : > { %v11063_v16 = vpop.f32.mrf.mxu1 }
 0x7f2   : > { %v3906_v4 = vadd.f32 %v11062_v48, %v3866_v0 }
 0x7f3   : > { %v11064_v22 = vpop.f32.mrf.mxu1 }
 0x7f4   : > { %3911 = vst [vmem:[#allocation43] sm:$0x3] %v3906_v4 }
 0x7f5 PF: > { %v11578_v26 = vld [vmem:[%s13840_s25 + $0x154] ss:$24 sps:$4 sm:$0xff]   ;;  %v11582_v44 = vld [vmem:[%s13840_s25 + $0x150] ss:$24 sps:$4 sm:$0xff]   ;;  %v11584_v12 = vld [vmem:[%s13840_s25 + $0x124] ss:$24 sps:$4 sm:$0xff]  }
 0x7f6   : > { %v11580_v23 = vld [vmem:[%s13840_s25 + $0x15c] ss:$24 sps:$4 sm:$0xff]   ;;  %4554 = vmatprep.subr.bf16.mxu0 %v11578_v26  ;;  %v11583_v34 = vld [vmem:[%s13840_s25 + $0x158] ss:$24 sps:$4 sm:$0xff]   ;;  %v11586_v42 = vld [vmem:[%s13840_s25 + $0x12c] ss:$24 sps:$4 sm:$0xff]  }
 0x7f7   : > { %4597 = vmatprep.subr.bf16.mxu1 %v11580_v23  ;;  %4555 = vmatpush1.bf16.msra.mxu0 %v11582_v44  ;;  %v11588_v43 = vld [vmem:[%s13840_s25 + $0x120] ss:$24 sps:$4 sm:$0xff]   ;;  %v11590_v14 = vld [vmem:[%s13840_s25 + $0xf4] ss:$24 sps:$4 sm:$0xff]   ;;  %v11594_v9 = vld [vmem:[%s13840_s25 + $0xf0] ss:$24 sps:$4 sm:$0xff]  }
 0x7f8   : > { %4598 = vmatpush1.bf16.msra.mxu1 %v11583_v34  ;;  %4556 = vmatprep.subr.bf16.mxu0 %v11584_v12  ;;  %v11589_v11 = vld [vmem:[%s13840_s25 + $0x128] ss:$24 sps:$4 sm:$0xff]   ;;  %v11592_v8 = vld [vmem:[%s13840_s25 + $0xfc] ss:$24 sps:$4 sm:$0xff]   ;;  %v11595_v3 = vld [vmem:[%s13840_s25 + $0xf8] ss:$24 sps:$4 sm:$0xff]  }
 0x7f9   : > { %4599 = vmatprep.subr.bf16.mxu1 %v11586_v42  ;;  %v11596_v6 = vld [vmem:[%s13840_s25 + $0xc4] ss:$24 sps:$4 sm:$0xff]   ;;  %v11600_v62 = vld [vmem:[%s13840_s25 + $0xc0] ss:$24 sps:$4 sm:$0xff]   ;;  %v11602_v19 = vld [vmem:[%s13840_s25 + $0x94] ss:$24 sps:$4 sm:$0xff]  }
 0x7fa   : > { %v11598_v59 = vld [vmem:[%s13840_s25 + $0xcc] ss:$24 sps:$4 sm:$0xff]   ;;  %v11601_v18 = vld [vmem:[%s13840_s25 + $0xc8] ss:$24 sps:$4 sm:$0xff]   ;;  %v11604_v45 = vld [vmem:[%s13840_s25 + $0x9c] ss:$24 sps:$4 sm:$0xff]  }
 0x7fb   : > { %4557 = vmatpush1.bf16.msra.mxu0 %v11588_v43  ;;  %v11606_v35 = vld [vmem:[%s13840_s25 + $0x90] ss:$24 sps:$4 sm:$0xff]   ;;  %v11608_v33 = vld [vmem:[%s13840_s25 + $0x64] ss:$24 sps:$4 sm:$0xff]   ;;  %v11612_v27 = vld [vmem:[%s13840_s25 + $0x60] ss:$24 sps:$4 sm:$0xff]  }
 0x7fc   : > { %4600 = vmatpush1.bf16.msra.mxu1 %v11589_v11  ;;  %4558 = vmatprep.subr.bf16.mxu0 %v11590_v14  ;;  %v11607_v38 = vld [vmem:[%s13840_s25 + $0x98] ss:$24 sps:$4 sm:$0xff]   ;;  %v11610_v30 = vld [vmem:[%s13840_s25 + $0x6c] ss:$24 sps:$4 sm:$0xff]   ;;  %v11613_v37 = vld [vmem:[%s13840_s25 + $0x68] ss:$24 sps:$4 sm:$0xff]  }
 0x7fd   : > { %4601 = vmatprep.subr.bf16.mxu1 %v11592_v8  ;;  %v11614_v31 = vld [vmem:[%s13840_s25 + $0x34] ss:$24 sps:$4 sm:$0xff]   ;;  %v11618_v47 = vld [vmem:[%s13840_s25 + $0x30] ss:$24 sps:$4 sm:$0xff]   ;;  %v11620_v13 = vld [vmem:[%s13840_s25 + $0x4] ss:$24 sps:$4 sm:$0xff]  }
 0x7fe   : > { %v11616_v41 = vld [vmem:[%s13840_s25 + $0x3c] ss:$24 sps:$4 sm:$0xff]   ;;  %v11619_v29 = vld [vmem:[%s13840_s25 + $0x38] ss:$24 sps:$4 sm:$0xff]   ;;  %v11622_v17 = vld [vmem:[%s13840_s25 + $0xc] ss:$24 sps:$4 sm:$0xff]  }
 0x7ff   : > { %4559 = vmatpush1.bf16.msra.mxu0 %v11594_v9  ;;  %v11624_v39 = vld [vmem:[%s13840_s25] ss:$24 sps:$4 sm:$0xff]   ;;  %v11626_v24 = vld [vmem:[%s13840_s25 + $0x2d4] ss:$24 sps:$4 sm:$0xff]   ;;  %v11630_v10 = vld [vmem:[%s13840_s25 + $0x2d0] ss:$24 sps:$4 sm:$0xff]  }
 0x800   : > { %4602 = vmatpush1.bf16.msra.mxu1 %v11595_v3  ;;  %4560 = vmatprep.subr.bf16.mxu0 %v11596_v6  ;;  %v11625_v25 = vld [vmem:[%s13840_s25 + $0x8] ss:$24 sps:$4 sm:$0xff]   ;;  %v11628_v28 = vld [vmem:[%s13840_s25 + $0x2dc] ss:$24 sps:$4 sm:$0xff]   ;;  %v11631_v2 = vld [vmem:[%s13840_s25 + $0x2d8] ss:$24 sps:$4 sm:$0xff]  }
 0x801   : > { %4603 = vmatprep.subr.bf16.mxu1 %v11598_v59  ;;  %v11632_v7 = vld [vmem:[%s13840_s25 + $0x2a4] ss:$24 sps:$4 sm:$0xff]   ;;  %v11636_v58 = vld [vmem:[%s13840_s25 + $0x2a0] ss:$24 sps:$4 sm:$0xff]   ;;  %v11638_v53 = vld [vmem:[%s13840_s25 + $0x274] ss:$24 sps:$4 sm:$0xff]  }
 0x802   : > { %v11634_v1 = vld [vmem:[%s13840_s25 + $0x2ac] ss:$24 sps:$4 sm:$0xff]   ;;  %v11637_v56 = vld [vmem:[%s13840_s25 + $0x2a8] ss:$24 sps:$4 sm:$0xff]   ;;  %v11640_v36 = vld [vmem:[%s13840_s25 + $0x27c] ss:$24 sps:$4 sm:$0xff]  }
 0x803   : > { %4561 = vmatpush1.bf16.msra.mxu0 %v11600_v62  ;;  %v11642_v61 = vld [vmem:[%s13840_s25 + $0x270] ss:$24 sps:$4 sm:$0xff]   ;;  %v11644_v32 = vld [vmem:[%s13840_s25 + $0x244] ss:$24 sps:$4 sm:$0xff]   ;;  %v11648_v21 = vld [vmem:[%s13840_s25 + $0x240] ss:$24 sps:$4 sm:$0xff]  }
 0x804   : > { %4604 = vmatpush1.bf16.msra.mxu1 %v11601_v18  ;;  %4562 = vmatprep.subr.bf16.mxu0 %v11602_v19  ;;  %v11643_v52 = vld [vmem:[%s13840_s25 + $0x278] ss:$24 sps:$4 sm:$0xff]   ;;  %v11646_v49 = vld [vmem:[%s13840_s25 + $0x24c] ss:$24 sps:$4 sm:$0xff]   ;;  %v11649_v54 = vld [vmem:[%s13840_s25 + $0x248] ss:$24 sps:$4 sm:$0xff]  }
 0x805   : > { %4605 = vmatprep.subr.bf16.mxu1 %v11604_v45  ;;  %v3941_v20 = vld [vmem:[#allocation2] sm:$0xff]  ;;  %v3943_v51 = vld [vmem:[#allocation2 + $0x8] sm:$0xff]  ;;  %v11656_v40 = vld [vmem:[%s13840_s25 + $0x1e4] ss:$24 sps:$4 sm:$0xff]  }
 0x806   : > { %v11650_v46 = vld [vmem:[%s13840_s25 + $0x214] ss:$24 sps:$4 sm:$0xff]   ;;  %v3945_v63 = vpack.c.bf16 %v3943_v51, %v3941_v20  ;;  %v11654_v5 = vld [vmem:[%s13840_s25 + $0x210] ss:$24 sps:$4 sm:$0xff]   ;;  %v11660_v55 = vld [vmem:[%s13840_s25 + $0x1e0] ss:$24 sps:$4 sm:$0xff]  }
 0x807   : > { %4563 = vmatpush1.bf16.msra.mxu0 %v11606_v35  ;;  %v11652_v60 = vld [vmem:[%s13840_s25 + $0x21c] ss:$24 sps:$4 sm:$0xff]   ;;  %v11655_v50 = vld [vmem:[%s13840_s25 + $0x218] ss:$24 sps:$4 sm:$0xff]   ;;  %v11658_v57 = vld [vmem:[%s13840_s25 + $0x1ec] ss:$24 sps:$4 sm:$0xff]  }
 0x808   : > { %4606 = vmatpush1.bf16.msra.mxu1 %v11607_v38  ;;  %4564 = vmatprep.subr.bf16.mxu0 %v11608_v33  ;;  %v11661_v15 = vld [vmem:[%s13840_s25 + $0x1e8] ss:$24 sps:$4 sm:$0xff]   ;;  %v11662_v0 = vld [vmem:[%s13840_s25 + $0x1b4] ss:$24 sps:$4 sm:$0xff]   ;;  %v11667_v4 = vld [vmem:[%s13840_s25 + $0x1b8] ss:$24 sps:$4 sm:$0xff]  }
 0x809   : > { %4607 = vmatprep.subr.bf16.mxu1 %v11610_v30  ;;  %4586 = vmatprep.mubr.bf16.mxu0 %v3945_v63  ;;  %v11664_v48 = vld [vmem:[%s13840_s25 + $0x1bc] ss:$24 sps:$4 sm:$0xff]   ;;  %v11666_v16 = vld [vmem:[%s13840_s25 + $0x1b0] ss:$24 sps:$4 sm:$0xff]   ;;  %v11670_v26 = vld [vmem:[%s13840_s25 + $0x18c] ss:$24 sps:$4 sm:$0xff]  }
 0x80a   : > { %4629 = vmatprep.mubr.bf16.mxu1 %v3945_v63  ;;  %v11668_v22 = vld [vmem:[%s13840_s25 + $0x184] ss:$24 sps:$4 sm:$0xff]   ;;  %v11672_v23 = vld [vmem:[%s13840_s25 + $0x180] ss:$24 sps:$4 sm:$0xff]   ;;  %v11697_v3 = vld [vmem:[%s13840_s25 + $0x134] ss:$24 sps:$4 sm:$0xff]  }
 0x80b   : > { %4565 = vmatpush1.bf16.msra.mxu0 %v11612_v27  ;;  %v11673_v44 = vld [vmem:[%s13840_s25 + $0x188] ss:$24 sps:$4 sm:$0xff]   ;;  %v11676_v42 = vld [vmem:[#allocation21 + $0x74] ss:$8 sps:$4 sm:$0xff]   ;;  %v11674_v14 = vld [vmem:[#allocation21 + $0x70] ss:$8 sps:$4 sm:$0xff]  }
 0x80c   : > { %4608 = vmatpush1.bf16.msra.mxu1 %v11613_v37  ;;  %4566 = vmatprep.subr.bf16.mxu0 %v11614_v31  ;;  %v3940_v34 = vld [vmem:[#allocation2 + $0x10] sm:$0xff]  ;;  %v3942_v12 = vld [vmem:[#allocation2 + $0x18] sm:$0xff]  ;;  %v11709_v38 = vld [vmem:[%s13840_s25 + $0xd4] ss:$24 sps:$4 sm:$0xff]  }
 0x80d   : > { %4609 = vmatprep.subr.bf16.mxu1 %v11616_v41  ;;  %v11691_v43 = vld [vmem:[%s13840_s25 + $0x164] ss:$24 sps:$4 sm:$0xff]   ;;  %v14452_v11 = vpack.c.bf16 %v3942_v12, %v3940_v34  ;;  %v11689_v9 = vld [vmem:[%s13840_s25 + $0x160] ss:$24 sps:$4 sm:$0xff]   ;;  %v11695_v62 = vld [vmem:[%s13840_s25 + $0x130] ss:$24 sps:$4 sm:$0xff]  }
 0x80e   : > { %v11679_v8 = vld [vmem:[#allocation21 + $0x64] ss:$8 sps:$4 sm:$0xff]   ;;  %v11677_v6 = vld [vmem:[#allocation21 + $0x60] ss:$8 sps:$4 sm:$0xff]   ;;  %v11682_v59 = vld [vmem:[#allocation21 + $0x54] ss:$8 sps:$4 sm:$0xff]  }
 0x80f   : > { %4567 = vmatpush1.bf16.msra.mxu0 %v11618_v47  ;;  %v11703_v18 = vld [vmem:[%s13840_s25 + $0x104] ss:$24 sps:$4 sm:$0xff]   ;;  %v11680_v19 = vld [vmem:[#allocation21 + $0x50] ss:$8 sps:$4 sm:$0xff]   ;;  %v11683_v33 = vld [vmem:[#allocation21 + $0x40] ss:$8 sps:$4 sm:$0xff]  }
 0x810   : > { %4610 = vmatpush1.bf16.msra.mxu1 %v11619_v29  ;;  %4568 = vmatprep.subr.bf16.mxu0 %v11620_v13  ;;  %v11685_v45 = vld [vmem:[#allocation21 + $0x44] ss:$8 sps:$4 sm:$0xff]   ;;  %v11701_v35 = vld [vmem:[%s13840_s25 + $0x100] ss:$24 sps:$4 sm:$0xff]   ;;  %v11707_v30 = vld [vmem:[%s13840_s25 + $0xd0] ss:$24 sps:$4 sm:$0xff]  }
 0x811   : > { %4611 = vmatprep.subr.bf16.mxu1 %v11622_v17  ;;  %v11688_v27 = vld [vmem:[#allocation21 + $0x34] ss:$8 sps:$4 sm:$0xff]   ;;  %v11686_v31 = vld [vmem:[#allocation21 + $0x30] ss:$8 sps:$4 sm:$0xff]   ;;  %v11694_v47 = vld [vmem:[#allocation21 + $0x24] ss:$8 sps:$4 sm:$0xff]  }
 0x812   : > { %v11715_v37 = vld [vmem:[%s13840_s25 + $0xa4] ss:$24 sps:$4 sm:$0xff]   ;;  %v11713_v41 = vld [vmem:[%s13840_s25 + $0xa0] ss:$24 sps:$4 sm:$0xff]   ;;  %v11721_v29 = vld [vmem:[%s13840_s25 + $0x74] ss:$24 sps:$4 sm:$0xff]  }
 0x813   : > { %4569 = vmatpush1.bf16.msra.mxu0 %v11624_v39  ;;  %v11692_v13 = vld [vmem:[#allocation21 + $0x20] ss:$8 sps:$4 sm:$0xff]   ;;  %v11700_v39 = vld [vmem:[#allocation21 + $0x14] ss:$8 sps:$4 sm:$0xff]   ;;  %v11742_v51 = vld [vmem:[#allocation21 + $0xa4] ss:$8 sps:$4 sm:$0xff]  }
 0x814   : > { %4612 = vmatpush1.bf16.msra.mxu1 %v11625_v25  ;;  %4570 = vmatprep.subr.bf16.mxu0 %v11626_v24  ;;  %v11719_v17 = vld [vmem:[%s13840_s25 + $0x70] ss:$24 sps:$4 sm:$0xff]   ;;  %v11727_v25 = vld [vmem:[%s13840_s25 + $0x44] ss:$24 sps:$4 sm:$0xff]   ;;  %v11764_v34 = vld [vmem:[%s13840_s25 + $0x1c0] ss:$24 sps:$4 sm:$0xff]  }
 0x815   : > { %4613 = vmatprep.subr.bf16.mxu1 %v11628_v28  ;;  %v11698_v24 = vld [vmem:[#allocation21 + $0x10] ss:$8 sps:$4 sm:$0xff]   ;;  %v11736_v20 = vld [vmem:[#allocation21 + $0xb4] ss:$8 sps:$4 sm:$0xff]  }
 0x816   : > { %v11725_v28 = vld [vmem:[%s13840_s25 + $0x40] ss:$24 sps:$4 sm:$0xff]   ;;  %v11769_v12 = vld [vmem:[%s13840_s25 + $0x194] ss:$24 sps:$4 sm:$0xff]  }
 0x817   : > { %4571 = vmatpush2.bf16.msra.mxu0 %v11630_v10  ;;  %v11706_v10 = vld [vmem:[#allocation21 + $0x4] ss:$8 sps:$4 sm:$0xff]  }
 0x818   : > { %4614 = vmatpush2.bf16.msra.mxu1 %v11631_v2  ;;  %4572 = vmatprep.subr.bf16.mxu0 %v11632_v7  ;;  %v11733_v2 = vld [vmem:[%s13840_s25 + $0x14] ss:$24 sps:$4 sm:$0xff]   ;;  %v11704_v7 = vld [vmem:[#allocation21] ss:$8 sps:$4 sm:$0xff]  }
 0x819   : > { %4615 = vmatprep.subr.bf16.mxu1 %v11634_v1  ;;  %v11731_v1 = vld [vmem:[%s13840_s25 + $0x10] ss:$24 sps:$4 sm:$0xff]  }
 0x81b   : > { %4573 = vmatpush2.bf16.msra.mxu0 %v11636_v58  ;;  %v11712_v58 = vld [vmem:[#allocation21 + $0xf4] ss:$8 sps:$4 sm:$0xff]  }
 0x81c   : > { %4616 = vmatpush2.bf16.msra.mxu1 %v11637_v56  ;;  %4574 = vmatprep.subr.bf16.mxu0 %v11638_v53  ;;  %v11710_v56 = vld [vmem:[#allocation21 + $0xf0] ss:$8 sps:$4 sm:$0xff]   ;;  %v11718_v53 = vld [vmem:[#allocation21 + $0xe4] ss:$8 sps:$4 sm:$0xff]  }
 0x81d   : > { %4617 = vmatprep.subr.bf16.mxu1 %v11640_v36  ;;  %v11716_v36 = vld [vmem:[#allocation21 + $0xe0] ss:$8 sps:$4 sm:$0xff]  }
 0x81f   : > { %4575 = vmatpush2.bf16.msra.mxu0 %v11642_v61  ;;  %v11724_v61 = vld [vmem:[#allocation21 + $0xd4] ss:$8 sps:$4 sm:$0xff]  }
 0x820   : > { %4618 = vmatpush2.bf16.msra.mxu1 %v11643_v52  ;;  %4576 = vmatprep.subr.bf16.mxu0 %v11644_v32  ;;  %v11722_v52 = vld [vmem:[#allocation21 + $0xd0] ss:$8 sps:$4 sm:$0xff]   ;;  %v11730_v32 = vld [vmem:[#allocation21 + $0xc4] ss:$8 sps:$4 sm:$0xff]  }
 0x821   : > { %4619 = vmatprep.subr.bf16.mxu1 %v11646_v49  ;;  %v11728_v49 = vld [vmem:[#allocation21 + $0xc0] ss:$8 sps:$4 sm:$0xff]  }
 0x823   : > { %4577 = vmatpush2.bf16.msra.mxu0 %v11648_v21  ;;  %v11734_v21 = vld [vmem:[#allocation21 + $0xb0] ss:$8 sps:$4 sm:$0xff]  }
 0x824   : > { %4620 = vmatpush2.bf16.msra.mxu1 %v11649_v54  ;;  %4578 = vmatprep.subr.bf16.mxu0 %v11650_v46  ;;  %v11739_v54 = vld [vmem:[%s13840_s25 + $0x2e4] ss:$24 sps:$4 sm:$0xff]   ;;  %v11737_v46 = vld [vmem:[%s13840_s25 + $0x2e0] ss:$24 sps:$4 sm:$0xff]  }
 0x825   : > { %4621 = vmatprep.subr.bf16.mxu1 %v11652_v60  ;;  %v11745_v60 = vld [vmem:[%s13840_s25 + $0x2b4] ss:$24 sps:$4 sm:$0xff]  }
 0x827   : > { %4579 = vmatpush2.bf16.msra.mxu0 %v11654_v5  ;;  %v11748_v5 = vld [vmem:[#allocation21 + $0x94] ss:$8 sps:$4 sm:$0xff]  }
 0x828   : > { %4622 = vmatpush2.bf16.msra.mxu1 %v11655_v50  ;;  %4580 = vmatprep.subr.bf16.mxu0 %v11656_v40  ;;  %v11743_v50 = vld [vmem:[%s13840_s25 + $0x2b0] ss:$24 sps:$4 sm:$0xff]  }
 0x829   : > { %4623 = vmatprep.subr.bf16.mxu1 %v11658_v57  ;;  %v11746_v40 = vld [vmem:[#allocation21 + $0x90] ss:$8 sps:$4 sm:$0xff]   ;;  %v11751_v57 = vld [vmem:[%s13840_s25 + $0x284] ss:$24 sps:$4 sm:$0xff]  }
 0x82b   : > { %4581 = vmatpush2.bf16.msra.mxu0 %v11660_v55  ;;  %v11754_v55 = vld [vmem:[#allocation21 + $0x84] ss:$8 sps:$4 sm:$0xff]  }
 0x82c   : > { %4624 = vmatpush2.bf16.msra.mxu1 %v11661_v15  ;;  %4582 = vmatprep.subr.bf16.mxu0 %v11662_v0  ;;  %v11749_v15 = vld [vmem:[%s13840_s25 + $0x280] ss:$24 sps:$4 sm:$0xff]  }
 0x82d   : > { %4625 = vmatprep.subr.bf16.mxu1 %v11664_v48  ;;  %v11752_v0 = vld [vmem:[#allocation21 + $0x80] ss:$8 sps:$4 sm:$0xff]   ;;  %v11757_v48 = vld [vmem:[%s13840_s25 + $0x254] ss:$24 sps:$4 sm:$0xff]  }
 0x82f   : > { %4583 = vmatpush2.bf16.msra.mxu0 %v11666_v16  ;;  %v11755_v16 = vld [vmem:[%s13840_s25 + $0x250] ss:$24 sps:$4 sm:$0xff]  }
 0x830   : > { %4626 = vmatpush2.bf16.msra.mxu1 %v11667_v4  ;;  %4584 = vmatprep.subr.bf16.mxu0 %v11668_v22  ;;  %v11758_v4 = vld [vmem:[%s13840_s25 + $0x220] ss:$24 sps:$4 sm:$0xff]   ;;  %v11760_v22 = vld [vmem:[%s13840_s25 + $0x224] ss:$24 sps:$4 sm:$0xff]  }
 0x831   : > { %4627 = vmatprep.subr.bf16.mxu1 %v11670_v26  ;;  %v11763_v26 = vld [vmem:[%s13840_s25 + $0x1f4] ss:$24 sps:$4 sm:$0xff]  }
 0x833   : > { %4585 = vmatpush2.bf16.msra.mxu0 %v11672_v23  ;;  %v11761_v23 = vld [vmem:[%s13840_s25 + $0x1f0] ss:$24 sps:$4 sm:$0xff]  }
 0x834   : > { %4628 = vmatpush2.bf16.msra.mxu1 %v11673_v44  ;;  %4640 = vmatprep.subr.bf16.mxu0 %v11691_v43  ;;  %v11766_v44 = vld [vmem:[%s13840_s25 + $0x1c4] ss:$24 sps:$4 sm:$0xff]   ;;  %v11772_v43 = vld [vmem:[%s13849_s2 + $0x74] ss:$8 sps:$4 sm:$0xff]  }
 0x835   : > { %4887 = vmatprep.subr.bf16.mxu1 %v11676_v42  ;;  %v11767_v42 = vld [vmem:[%s13840_s25 + $0x190] ss:$24 sps:$4 sm:$0xff]   ;;  %s15544_s25 = sld [smem:[#allocation63_spill]] }
 0x836   : > { %4587 = vmatmul.mubr.bf16.vlgmr.msra.gmra.mxu0 %v14452_v11 }
 0x837   : > { %4630 = vmatmul.mubr.bf16.vlgmr.msra.gmra.mxu1 %v14452_v11  ;;  %4641 = vmatpush1.bf16.msra.mxu0 %v11689_v9  ;;  %v11773_v9 = vld [vmem:[%s13849_s2 + $0x60] ss:$8 sps:$4 sm:$0xff]  }
 0x838   : > { %4888 = vmatpush1.bf16.msra.mxu1 %v11674_v14  ;;  %4642 = vmatprep.subr.bf16.mxu0 %v11697_v3  ;;  %v11770_v14 = vld [vmem:[%s13849_s2 + $0x70] ss:$8 sps:$4 sm:$0xff]   ;;  %v4044_v3 = vlaneseq }
 0x839   : > { %4889 = vmatprep.subr.bf16.mxu1 %v11679_v8  ;;  %4672 = vmatprep.mubr.bf16.mxu0 %v3945_v63  ;;  %v11740_v63 = vld [vmem:[#allocation21 + $0xa0] ss:$8 sps:$4 sm:$0xff]   ;;  %v11775_v8 = vld [vmem:[%s13849_s2 + $0x64] ss:$8 sps:$4 sm:$0xff]  }
 0x83b   : > { %4643 = vmatpush1.bf16.msra.mxu0 %v11695_v62  ;;  %p10844_p5 = scmp.ne.s32.totalorder %s15544_s25, 1 }
 0x83c   : > { %4890 = vmatpush1.bf16.msra.mxu1 %v11677_v6  ;;  %4644 = vmatprep.subr.bf16.mxu0 %v11703_v18  ;;  %v14492_v6 = vshrl.u32 %v4044_v3, 7  ;;  %v11812_v3 = vld [vmem:[%s13849_s2 + $0x90] ss:$8 sps:$4 sm:$0xff]  }
 0x83d   : > { %4891 = vmatprep.subr.bf16.mxu1 %v11682_v59 }
 0x83e   : > { %v14495_v59 = vsub.s32 1, %v14492_v6  ;;  %v14498_v62 = vsub.s32 3, %v14492_v6  ;;  %v14501_v18 = vsub.s32 0, %v14492_v6 }
 0x83f   : > { %4645 = vmatpush1.bf16.msra.mxu0 %v11701_v35 }
 0x840   : > { %4892 = vmatpush1.bf16.msra.mxu1 %v11680_v19  ;;  %4646 = vmatprep.subr.bf16.mxu0 %v11709_v38  ;;  %v14504_v19 = vsub.s32 2, %v14492_v6 }
 0x841   : > { %4893 = vmatprep.subr.bf16.mxu1 %v11685_v45  ;;  %v14507_v45 = vld [vmem:[%s13846_s27] sm:$0x3f] }
 0x842   : > { %v4051_v38 = vrot.slane %v14507_v45, %v14495_v59 }
 0x843   : > { %4647 = vmatpush1.bf16.msra.mxu0 %v11707_v30  ;;  %v4059_v30 = vrot.slane %v14507_v45, %v14498_v62 }
 0x844   : > { %4894 = vmatpush1.bf16.msra.mxu1 %v11683_v33  ;;  %4648 = vmatprep.subr.bf16.mxu0 %v11715_v37  ;;  %v4047_v37 = vrot.slane %v14507_v45, %v14501_v18 }
 0x845   : > { %4895 = vmatprep.subr.bf16.mxu1 %v11688_v27 }
 0x847   : > { %4649 = vmatpush1.bf16.msra.mxu0 %v11713_v41 }
 0x848   : > { %4896 = vmatpush1.bf16.msra.mxu1 %v11686_v31  ;;  %4650 = vmatprep.subr.bf16.mxu0 %v11721_v29  ;;  %v4055_v31 = vrot.slane %v14507_v45, %v14504_v19 }
 0x849   : > { %4897 = vmatprep.subr.bf16.mxu1 %v11694_v47 }
 0x84b   : > { %4651 = vmatpush1.bf16.msra.mxu0 %v11719_v17 }
 0x84c   : > { %4898 = vmatpush1.bf16.msra.mxu1 %v11692_v13  ;;  %4652 = vmatprep.subr.bf16.mxu0 %v11727_v25 }
 0x84d   : > { %4899 = vmatprep.subr.bf16.mxu1 %v11700_v39 }
 0x84f   : > { %4653 = vmatpush1.bf16.msra.mxu0 %v11725_v28 }
 0x850   : > { %4900 = vmatpush1.bf16.msra.mxu1 %v11698_v24  ;;  %4654 = vmatprep.subr.bf16.mxu0 %v11733_v2 }
 0x851   : > { %4901 = vmatprep.subr.bf16.mxu1 %v11706_v10 }
 0x853   : > { %4655 = vmatpush1.bf16.msra.mxu0 %v11731_v1 }
 0x854   : > { %4902 = vmatpush1.bf16.msra.mxu1 %v11704_v7  ;;  %4656 = vmatprep.subr.bf16.mxu0 %v11739_v54 }
 0x855   : > { %4903 = vmatprep.subr.bf16.mxu1 %v11712_v58 }
 0x857   : > { %4657 = vmatpush2.bf16.msra.mxu0 %v11737_v46  ;;  %v11776_v46 = vld [vmem:[%s13849_s2 + $0x50] ss:$8 sps:$4 sm:$0xff]  }
 0x858   : > { %4904 = vmatpush2.bf16.msra.mxu1 %v11710_v56  ;;  %4658 = vmatprep.subr.bf16.mxu0 %v11745_v60  ;;  %v11779_v60 = vld [vmem:[%s13849_s2 + $0x40] ss:$8 sps:$4 sm:$0xff]  }
 0x859   : > { %4905 = vmatprep.subr.bf16.mxu1 %v11718_v53 }
 0x85b   : > { %4659 = vmatpush2.bf16.msra.mxu0 %v11743_v50  ;;  %v11782_v50 = vld [vmem:[%s13849_s2 + $0x30] ss:$8 sps:$4 sm:$0xff]  }
 0x85c   : > { %4906 = vmatpush2.bf16.msra.mxu1 %v11716_v36  ;;  %4660 = vmatprep.subr.bf16.mxu0 %v11751_v57  ;;  %v11785_v57 = vld [vmem:[%s13849_s2 + $0x20] ss:$8 sps:$4 sm:$0xff]  }
 0x85d   : > { %4907 = vmatprep.subr.bf16.mxu1 %v11724_v61 }
 0x85f   : > { %4661 = vmatpush2.bf16.msra.mxu0 %v11749_v15  ;;  %v11788_v15 = vld [vmem:[%s13849_s2 + $0x10] ss:$8 sps:$4 sm:$0xff]  }
 0x860   : > { %4908 = vmatpush2.bf16.msra.mxu1 %v11722_v52  ;;  %4662 = vmatprep.subr.bf16.mxu0 %v11757_v48  ;;  %v11791_v48 = vld [vmem:[%s13849_s2] ss:$8 sps:$4 sm:$0xff]  }
 0x861   : > { %4909 = vmatprep.subr.bf16.mxu1 %v11730_v32 }
 0x863   : > { %4663 = vmatpush2.bf16.msra.mxu0 %v11755_v16  ;;  %v11796_v16 = vld [vmem:[%s13849_s2 + $0xf4] ss:$8 sps:$4 sm:$0xff]  }
 0x864   : > { %4910 = vmatpush2.bf16.msra.mxu1 %v11728_v49  ;;  %4664 = vmatprep.subr.bf16.mxu0 %v11760_v22  ;;  %v11799_v22 = vld [vmem:[%s13849_s2 + $0xe4] ss:$8 sps:$4 sm:$0xff]  }
 0x865   : > { %4911 = vmatprep.subr.bf16.mxu1 %v11736_v20 }
 0x867   : > { %4665 = vmatpush2.bf16.msra.mxu0 %v11758_v4  ;;  %v11794_v4 = vld [vmem:[%s13849_s2 + $0xf0] ss:$8 sps:$4 sm:$0xff]  }
 0x868   : > { %4912 = vmatpush2.bf16.msra.mxu1 %v11734_v21  ;;  %4666 = vmatprep.subr.bf16.mxu0 %v11763_v26  ;;  %v11797_v26 = vld [vmem:[%s13849_s2 + $0xe0] ss:$8 sps:$4 sm:$0xff]  }
 0x869   : > { %4913 = vmatprep.subr.bf16.mxu1 %v11742_v51  ;;  %v11778_v51 = vld [vmem:[%s13849_s2 + $0x54] ss:$8 sps:$4 sm:$0xff]  }
 0x86b   : > { %4667 = vmatpush2.bf16.msra.mxu0 %v11761_v23  ;;  %v11802_v23 = vld [vmem:[%s13849_s2 + $0xd4] ss:$8 sps:$4 sm:$0xff]  }
 0x86c   : > { %4914 = vmatpush2.bf16.msra.mxu1 %v11740_v63  ;;  %4668 = vmatprep.subr.bf16.mxu0 %v11766_v44  ;;  %v11781_v63 = vld [vmem:[%s13849_s2 + $0x44] ss:$8 sps:$4 sm:$0xff]   ;;  %v11800_v44 = vld [vmem:[%s13849_s2 + $0xd0] ss:$8 sps:$4 sm:$0xff]  }
 0x86d   : > { %4915 = vmatprep.subr.bf16.mxu1 %v11748_v5  ;;  %v11784_v5 = vld [vmem:[%s13849_s2 + $0x34] ss:$8 sps:$4 sm:$0xff]  }
 0x86f   : > { %4669 = vmatpush2.bf16.msra.mxu0 %v11764_v34  ;;  %v11805_v34 = vld [vmem:[%s13849_s2 + $0xc4] ss:$8 sps:$4 sm:$0xff]  }
 0x870   : > { %4916 = vmatpush2.bf16.msra.mxu1 %v11746_v40  ;;  %4670 = vmatprep.subr.bf16.mxu0 %v11769_v12  ;;  %v11787_v40 = vld [vmem:[%s13849_s2 + $0x24] ss:$8 sps:$4 sm:$0xff]   ;;  %v11803_v12 = vld [vmem:[%s13849_s2 + $0xc0] ss:$8 sps:$4 sm:$0xff]  }
 0x871   : > { %4917 = vmatprep.subr.bf16.mxu1 %v11754_v55  ;;  %v11790_v55 = vld [vmem:[%s13849_s2 + $0x14] ss:$8 sps:$4 sm:$0xff]  }
 0x873   : > { %4671 = vmatpush2.bf16.msra.mxu0 %v11767_v42  ;;  %v11808_v42 = vld [vmem:[%s13849_s2 + $0xb4] ss:$8 sps:$4 sm:$0xff]  }
 0x874   : > { %4918 = vmatpush2.bf16.msra.mxu1 %v11752_v0  ;;  %5206 = vmatprep.subr.bf16.mxu0 %v11772_v43  ;;  %v11793_v0 = vld [vmem:[%s13849_s2 + $0x4] ss:$8 sps:$4 sm:$0xff]   ;;  %v11806_v43 = vld [vmem:[%s13849_s2 + $0xb0] ss:$8 sps:$4 sm:$0xff]  }
 0x876   : > { %4673 = vmatmul.mubr.bf16.vlgmr.msra.gmra.mxu0 %v14452_v11 }
 0x877   : > { %5207 = vmatpush1.bf16.msra.mxu0 %v11770_v14  ;;  %v11811_v14 = vld [vmem:[%s13849_s2 + $0xa4] ss:$8 sps:$4 sm:$0xff]  }
 0x878   : > { %5208 = vmatprep.subr.bf16.mxu0 %v11775_v8  ;;  %v11809_v8 = vld [vmem:[%s13849_s2 + $0xa0] ss:$8 sps:$4 sm:$0xff]  }
 0x87b   : > { %5209 = vmatpush1.bf16.msra.mxu0 %v11773_v9  ;;  %v11814_v9 = vld [vmem:[%s13849_s2 + $0x94] ss:$8 sps:$4 sm:$0xff]  }
 0x87c   : > { %5210 = vmatprep.subr.bf16.mxu0 %v11778_v51 }
 0x87f   : > { %5211 = vmatpush1.bf16.msra.mxu0 %v11776_v46 }
 0x880   : > { %5212 = vmatprep.subr.bf16.mxu0 %v11781_v63 }
 0x883   : > { %5213 = vmatpush1.bf16.msra.mxu0 %v11779_v60 }
 0x884   : > { %5214 = vmatprep.subr.bf16.mxu0 %v11784_v5 }
 0x887   : > { %5215 = vmatpush1.bf16.msra.mxu0 %v11782_v50 }
 0x888   : > { %5216 = vmatprep.subr.bf16.mxu0 %v11787_v40 }
 0x88b   : > { %5217 = vmatpush1.bf16.msra.mxu0 %v11785_v57 }
 0x88c   : > { %5218 = vmatprep.subr.bf16.mxu0 %v11790_v55 }
 0x88f   : > { %5219 = vmatpush1.bf16.msra.mxu0 %v11788_v15 }
 0x890   : > { %5220 = vmatprep.subr.bf16.mxu0 %v11793_v0 }
 0x893   : > { %5221 = vmatpush1.bf16.msra.mxu0 %v11791_v48 }
 0x894   : > { %5222 = vmatprep.subr.bf16.mxu0 %v11796_v16 }
 0x897   : > { %5223 = vmatpush2.bf16.msra.mxu0 %v11794_v4 }
 0x898   : > { %5224 = vmatprep.subr.bf16.mxu0 %v11799_v22 }
 0x89b   : > { %5225 = vmatpush2.bf16.msra.mxu0 %v11797_v26 }
 0x89c   : > { %5226 = vmatprep.subr.bf16.mxu0 %v11802_v23 }
 0x89f   : > { %5227 = vmatpush2.bf16.msra.mxu0 %v11800_v44 }
 0x8a0   : > { %5228 = vmatprep.subr.bf16.mxu0 %v11805_v34  ;;  %v14546_v34 = vsub.s32 5, %v14492_v6 }
 0x8a3   : > { %5229 = vmatpush2.bf16.msra.mxu0 %v11803_v12 }
 0x8a4   : > { %5230 = vmatprep.subr.bf16.mxu0 %v11808_v42  ;;  %v14549_v42 = vsub.s32 4, %v14492_v6 }
 0x8a7   : > { %5231 = vmatpush2.bf16.msra.mxu0 %v11806_v43 }
 0x8a8   : > { %5232 = vmatprep.subr.bf16.mxu0 %v11811_v14 }
 0x8ab   : > { %5233 = vmatpush2.bf16.msra.mxu0 %v11809_v8  ;;  %v4067_v8 = vrot.slane %v14507_v45, %v14546_v34 }
 0x8ac   : > { %5234 = vmatprep.subr.bf16.mxu0 %v11814_v9  ;;  %v4063_v9 = vrot.slane %v14507_v45, %v14549_v42 }
 0x8af   : > { %5235 = vmatpush2.bf16.msra.mxu0 %v11812_v3 }
 0x8f6   : > { %v4588_v11 = vpop.f32.mrf.mxu0 }
 0x8f7   : > { %v4631_v35 = vpop.f32.mrf.mxu1  ;;  %v4589_v24 = vadd.f32 %v4588_v11, %v4047_v37  ;;  %v11815_v11 = vld [vmem:[%s13849_s2 + $0x80] ss:$8 sps:$4 sm:$0xff]  }
 0x8f8   : > { %v4590_v33 = vpop.f32.mrf.mxu0  ;;  %v4632_v28 = vadd.f32 %v4631_v35, %v4055_v31  ;;  %v11817_v35 = vld [vmem:[%s13849_s2 + $0x84] ss:$8 sps:$4 sm:$0xff]  }
 0x8f9   : > { %v4633_v27 = vpop.f32.mrf.mxu1  ;;  %v4591_v13 = vadd.f32 %v4590_v33, %v4051_v38  ;;  %5236 = vmatprep.subr.bf16.mxu0 %v11817_v35 }
 0x8fa   : > { %v4592_v41 = vpop.f32.mrf.mxu0  ;;  %v4634_v17 = vadd.f32 %v4633_v27, %v4059_v30  ;;  %v4683_v36 = vmul.f32 %v4632_v28, %v4589_v24  ;;  %5237 = vmatpush2.bf16.msra.mxu0 %v11815_v11 }
 0x8fb   : > { %v4635_v47 = vpop.f32.mrf.mxu1  ;;  %v4593_v52 = vadd.f32 %v4592_v41, %v4047_v37 }
 0x8fc   : > { %v4636_v29 = vadd.f32 %v4635_v47, %v4055_v31  ;;  %v4594_v39 = vpop.f32.mrf.mxu0  ;;  %v4684_v1 = vmul.f32 %v4634_v17, %v4591_v13 }
 0x8fd   : > { %v4637_v25 = vpop.f32.mrf.mxu1  ;;  %v4595_v10 = vadd.f32 %v4594_v39, %v4051_v38  ;;  %v4687_v20 = vmul.f32 %v4632_v28, %v4593_v52 }
 0x8fe   : > { %v4638_v2 = vadd.f32 %v4637_v25, %v4059_v30  ;;  %v4685_v7 = vmul.f32 %v4636_v29, %v4589_v24  ;;  %v4689_v21 = vmul.f32 %v4636_v29, %v4593_v52 }
 0x8ff   : > { %v4688_v58 = vmul.f32 %v4634_v17, %v4595_v10 }
 0x900   : > { %v4686_v56 = vmul.f32 %v4638_v2, %v4591_v13  ;;  %v4690_v53 = vmul.f32 %v4638_v2, %v4595_v10  ;;  %v4691_v32 = vpack.c.bf16 %v4685_v7, %v4683_v36  ;;  %v4693_v54 = vpack.c.bf16 %v4689_v21, %v4687_v20 }
 0x902   : > { %v4692_v61 = vpack.c.bf16 %v4686_v56, %v4684_v1  ;;  %v4694_v49 = vpack.c.bf16 %v4690_v53, %v4688_v58 }
 0x904   : > { %4919 = vmatprep.mubr.bf16.mxu1 %v4692_v61 }
 0x905   : > { %4920 = vmatmul.mubr.bf16.vlgmr.msra.gmra.mxu1 %v4691_v32 }
 0x906   : > { %4929 = vmatprep.mubr.bf16.mxu1 %v4694_v49 }
 0x90d   : > { %4930 = vmatmul.mubr.bf16.gmra.mxu1 %v4693_v54 }
 0x936   : > { %v4674_v55 = vpop.f32.mrf.mxu0 }
 0x938   : > { %v4676_v16 = vpop.f32.mrf.mxu0 }
 0x939   : > { %v4677_v11 = vadd.f32 %v4676_v16, %v4067_v8 }
 0x93a   : > { %v4678_v43 = vpop.f32.mrf.mxu0 }
 0x93c   : > { %v4680_v3 = vpop.f32.mrf.mxu0 }
 0x93d   : > { %v4681_v35 = vadd.f32 %v4680_v3, %v4067_v8  ;;  %v5424_v8 = vld [vmem:[%s13866_s28 + $0x340] sm:$0xff] }
 0x9c5   : > { %v4921_v38 = vpop.f32.mrf.mxu1 }
 0x9c6   : > { %v4940_v27 = vmul.f32 0.125, %v4921_v38  ;;  %v4675_v38 = vadd.f32 %v4674_v55, %v4063_v9 }
 0x9c7   : > { %v4923_v33 = vpop.f32.mrf.mxu1 }
 0x9c8   : > { %v4941_v41 = vmul.f32 0.125, %v4923_v33  ;;  %v4679_v33 = vadd.f32 %v4678_v43, %v4063_v9  ;;  %v5441_v43 = vld [vmem:[%s13866_s28 + $0x3c8] sm:$0xff] }
 0x9c9   : > { %v4925_v30 = vpop.f32.mrf.mxu1 }
 0x9ca   : > { %v4942_v37 = vmul.f32 0.125, %v4925_v30 }
 0x9cb   : > { %v4927_v31 = vpop.f32.mrf.mxu1 }
 0x9cc   : > { %v4948_v47 = vmax.f32 %v4940_v27, %v4942_v37  ;;  %v4943_v29 = vmul.f32 0.125, %v4927_v31 }
 0x9cd   : > { %v4931_v13 = vpop.f32.mrf.mxu1 }
 0x9ce   : > { %v4950_v17 = vsub.f32 %v4940_v27, %v4948_v47  ;;  %v4949_v39 = vmax.f32 %v4941_v41, %v4943_v29  ;;  %v4956_v25 = vsub.f32 %v4942_v37, %v4948_v47  ;;  %v4944_v56 = vmul.f32 0.125, %v4931_v13 }
 0x9cf   : > { %v4933_v24 = vpop.f32.mrf.mxu1 }
 0x9d0   : > { %v4952_v28 = vmul.f32 1.442695, %v4950_v17  ;;  %v4951_v10 = vsub.f32 %v4941_v41, %v4949_v39  ;;  %v4957_v2 = vsub.f32 %v4943_v29, %v4949_v39  ;;  %v4958_v36 = vmul.f32 1.442695, %v4956_v25 }
 0x9d1   : > { %v4935_v7 = vpop.f32.mrf.mxu1  ;;  %v4945_v52 = vmul.f32 0.125, %v4933_v24 }
 0x9d2   : > { %v4954_v1 = vmul.f32 1.442695, %v4951_v10  ;;  %v4960_v58 = vmul.f32 1.442695, %v4957_v2  ;;  %v4946_v53 = vmul.f32 0.125, %v4935_v7  ;;  %12202 = vpow2.f32 %v4952_v28 }
 0x9d3   : > { %v4937_v61 = vpop.f32.mrf.mxu1 }
 0x9d4   : > { %v4974_v32 = vmax.f32 %v4944_v56, %v4946_v53  ;;  %v4947_v49 = vmul.f32 0.125, %v4937_v61  ;;  %12204 = vpow2.f32 %v4954_v1  ;;  %v5034_v61 = vld [vmem:[%s1231_s20] sm:$0x3] }
 0x9d5   : > { %12206 = vpow2.f32 %v4960_v58 }
 0x9d6   : > { %v4976_v20 = vsub.f32 %v4944_v56, %v4974_v32  ;;  %v4982_v21 = vsub.f32 %v4946_v53, %v4974_v32  ;;  %v4975_v54 = vmax.f32 %v4945_v52, %v4947_v49  ;;  %12208 = vpow2.f32 %v4958_v36 }
 0x9d7   : > { %v5043_v32 = vrot.slane %v5034_v61, %v14495_v59 }
 0x9d8   : > { %v4978_v51 = vmul.f32 1.442695, %v4976_v20  ;;  %v4984_v46 = vmul.f32 1.442695, %v4982_v21  ;;  %v4977_v63 = vsub.f32 %v4945_v52, %v4975_v54  ;;  %v4983_v60 = vsub.f32 %v4947_v49, %v4975_v54 }
 0x9d9   : > { %v5039_v52 = vrot.slane %v5034_v61, %v14501_v18 }
 0x9da   : > { %12210 = vpow2.f32 %v4978_v51  ;;  %v4980_v5 = vmul.f32 1.442695, %v4977_v63  ;;  %v4986_v50 = vmul.f32 1.442695, %v4983_v60  ;;  %v12234_v63 = vld [vmem:[#allocation2 + $0x10] sm:$0xff] }
 0x9db   : > { %12212 = vpow2.f32 %v4984_v46 }
 0x9dc   : > { %12214 = vpow2.f32 %v4980_v5  ;;  %v12235_v5 = vld [vmem:[#allocation2] sm:$0xff] }
 0x9dd   : > { %12216 = vpow2.f32 %v4986_v50 }
 0x9df   : > { %v12203_v40 = vpop.eup %12202 }
 0x9e0   : > { %v4964_v29 = vmul.f32 %v12203_v40, %v4675_v38 }
 0x9e1   : > { %v12205_v57 = vpop.eup %12204 }
 0x9e2   : > { %v12207_v15 = vpop.eup %12206  ;;  %v4965_v37 = vmul.f32 %v12205_v57, %v4677_v11 }
 0x9e3   : > { %v12209_v0 = vpop.eup %12208  ;;  %v4963_v48 = vadd.f32 %v12207_v15, %v12205_v57  ;;  %v4967_v41 = vmul.f32 %v12207_v15, %v4681_v35  ;;  %v12236_v15 = vld [vmem:[#allocation2 + $0x18] sm:$0xff] }
 0x9e4   : > { %v4962_v26 = vadd.f32 %v12209_v0, %v12203_v40  ;;  %v4966_v13 = vmul.f32 %v12209_v0, %v4679_v33 }
 0x9e5   : > { %12218 = vrcp.f32 %v4963_v48  ;;  %v4969_v28 = vadd.f32 %v4967_v41, %v4965_v37  ;;  %v12237_v48 = vld [vmem:[#allocation2 + $0x8] sm:$0xff]  ;;  %v5401_v37 = vld [vmem:[%s13866_s28 + $0x288] sm:$0xff] }
 0x9e6   : > { %v4968_v2 = vadd.f32 %v4966_v13, %v4964_v29 }
 0x9e7   : > { %v12211_v4 = vpop.eup %12210 }
 0x9e8   : > { %v12213_v22 = vpop.eup %12212  ;;  %v4990_v30 = vmul.f32 %v12211_v4, %v4675_v38  ;;  %v5425_v38 = vld [vmem:[%s13866_s28 + $0x348] sm:$0xff] }
 0x9e9   : > { %v12215_v23 = vpop.eup %12214  ;;  %v4988_v44 = vadd.f32 %v12213_v22, %v12211_v4  ;;  %v4992_v27 = vmul.f32 %v12213_v22, %v4679_v33  ;;  %v5432_v22 = vld [vmem:[%s13866_s28 + $0x380] sm:$0xff] }
 0x9ea   : > { %v12217_v12 = vpop.eup %12216  ;;  %v4991_v31 = vmul.f32 %v12215_v23, %v4677_v11  ;;  %v5400_v33 = vld [vmem:[%s13866_s28 + $0x280] sm:$0xff] }
 0x9eb   : > { %12220 = vrcp.f32 %v4988_v44  ;;  %v4989_v14 = vadd.f32 %v12217_v12, %v12215_v23  ;;  %v4993_v47 = vmul.f32 %v12217_v12, %v4681_v35  ;;  %v4994_v25 = vadd.f32 %v4992_v27, %v4990_v30  ;;  %v5433_v23 = vld [vmem:[%s13866_s28 + $0x388] sm:$0xff]  ;;  %v5408_v27 = vld [vmem:[%s13866_s28 + $0x2c0] sm:$0xff] }
 0x9ec   : > { %12222 = vrcp.f32 %v4962_v26  ;;  %v5440_v26 = vld [vmem:[%s13866_s28 + $0x3c0] sm:$0xff]  ;;  %v10446_v9 = vcombine.low %v5433_v23, %v5441_v43  ;;  %v10447_v3 = vcombine.high %v5433_v23, %v5441_v43  ;;  %v5417_v35 = vld [vmem:[%s13866_s28 + $0x308] sm:$0xff]  ;;  %v10413_v29 = vcombine.high %v5400_v33, %v5408_v27 }
 0x9ed   : > { %12224 = vrcp.f32 %v4989_v14  ;;  %v4995_v45 = vadd.f32 %v4993_v47, %v4991_v31  ;;  %v10444_v44 = vcombine.low %v5432_v22, %v5440_v26  ;;  %v10445_v12 = vcombine.high %v5432_v22, %v5440_v26  ;;  %v5416_v14 = vld [vmem:[%s13866_s28 + $0x300] sm:$0xff]  ;;  %v5409_v31 = vld [vmem:[%s13866_s28 + $0x2c8] sm:$0xff] }
 0x9ee   : > { %v10429_v11 = vcombine.high %v5416_v14, %v5424_v8  ;;  %v10431_v30 = vcombine.high %v5417_v35, %v5425_v38  ;;  %6983 = vmatprep.subr.bf16.mxu0 %v10447_v3  ;;  %v10428_v41 = vcombine.low %v5416_v14, %v5424_v8  ;;  %v10430_v47 = vcombine.low %v5417_v35, %v5425_v38  ;;  %v5320_v26 = vld [vmem:[%s13866_s28] sm:$0xff]  ;;  %v5561_v35 = vld [vmem:[%s13866_s28 + $0x788] sm:$0xff] }
 0x9ef   : > { %6940 = vmatprep.subr.bf16.mxu1 %v10445_v12  ;;  %v10415_v13 = vcombine.high %v5401_v37, %v5409_v31  ;;  %v5328_v23 = vld [vmem:[%s13866_s28 + $0x40] sm:$0xff]  ;;  %v5329_v12 = vld [vmem:[%s13866_s28 + $0x48] sm:$0xff] }
 0x9f0   : > { %6941 = vmatpush1.bf16.msra.mxu1 %v10444_v44  ;;  %v5321_v44 = vld [vmem:[%s13866_s28 + $0x8] sm:$0xff]  ;;  %v10333_v8 = vcombine.high %v5320_v26, %v5328_v23  ;;  %v5560_v3 = vld [vmem:[%s13866_s28 + $0x780] sm:$0xff] }
 0x9f1   : > { %6942 = vmatprep.subr.bf16.mxu1 %v10429_v11  ;;  %v5568_v11 = vld [vmem:[%s13866_s28 + $0x7c0] sm:$0xff]  ;;  %v5569_v38 = vld [vmem:[%s13866_s28 + $0x7c8] sm:$0xff] }
 0x9f2   : > { %v12219_v17 = vpop.eup %12218 }
 0x9f3   : > { %v4973_v1 = vmul.f32 %v12219_v17, %v4969_v28  ;;  %v5384_v17 = vld [vmem:[%s13866_s28 + $0x200] sm:$0xff]  ;;  %v10412_v28 = vcombine.low %v5400_v33, %v5408_v27  ;;  %v10332_v33 = vcombine.low %v5320_v26, %v5328_v23  ;;  %v10573_v27 = vcombine.high %v5560_v3, %v5568_v11  ;;  %v5497_v23 = vld [vmem:[%s13866_s28 + $0x588] sm:$0xff] }
 0x9f4   : > { %6943 = vmatpush1.bf16.msra.mxu1 %v10428_v41  ;;  %v10574_v41 = vcombine.low %v5561_v35, %v5569_v38  ;;  %v5504_v26 = vld [vmem:[%s13866_s28 + $0x5c0] sm:$0xff] }
 0x9f5   : > { %6944 = vmatprep.subr.bf16.mxu1 %v10413_v29 }
 0x9f8   : > { %v12221_v39 = vpop.eup %12220  ;;  %6945 = vmatpush1.bf16.msra.mxu1 %v10412_v28 }
 0x9f9   : > { %v12223_v24 = vpop.eup %12222  ;;  %v4997_v7 = vmul.f32 %v12221_v39, %v4994_v25  ;;  %v5392_v39 = vld [vmem:[%s13866_s28 + $0x240] sm:$0xff]  ;;  %v5385_v25 = vld [vmem:[%s13866_s28 + $0x208] sm:$0xff] }
 0x9fa   : > { %v12225_v10 = vpop.eup %12224  ;;  %v4971_v56 = vmul.f32 %v12223_v24, %v4968_v2  ;;  %v5393_v24 = vld [vmem:[%s13866_s28 + $0x248] sm:$0xff] }
 0x9fb   : > { %v4999_v58 = vmul.f32 %v12225_v10, %v4995_v45  ;;  %v10414_v45 = vcombine.low %v5401_v37, %v5409_v31  ;;  %v10397_v10 = vcombine.high %v5384_v17, %v5392_v39  ;;  %v10399_v2 = vcombine.high %v5385_v25, %v5393_v24 }
 0x9fc   : > { %v5000_v36 = vpack.c.bf16 %v4997_v7, %v4971_v56  ;;  %v5368_v7 = vld [vmem:[%s13866_s28 + $0x180] sm:$0xff]  ;;  %v5377_v56 = vld [vmem:[%s13866_s28 + $0x1c8] sm:$0xff]  ;;  %v10575_v37 = vcombine.high %v5561_v35, %v5569_v38  ;;  %v10572_v31 = vcombine.low %v5560_v3, %v5568_v11 }
 0x9fd   : > { %v5001_v53 = vpack.c.bf16 %v4999_v58, %v4973_v1  ;;  %v5376_v1 = vld [vmem:[%s13866_s28 + $0x1c0] sm:$0xff]  ;;  %v5369_v58 = vld [vmem:[%s13866_s28 + $0x188] sm:$0xff]  ;;  %6946 = vmatprep.subr.bf16.mxu1 %v10397_v10 }
 0x9fe   : > { %v10381_v61 = vcombine.high %v5368_v7, %v5376_v1  ;;  %v5488_v3 = vld [vmem:[%s13866_s28 + $0x540] sm:$0xff]  ;;  %v5481_v11 = vld [vmem:[%s13866_s28 + $0x508] sm:$0xff] }
 0x9ff   : > { %5238 = vmatprep.mubr.bf16.mxu0 %v5001_v53  ;;  %v10396_v53 = vcombine.low %v5384_v17, %v5392_v39  ;;  %v5489_v38 = vld [vmem:[%s13866_s28 + $0x548] sm:$0xff] }
 0xa00   : > { %5239 = vmatmul.mubr.bf16.vlgmr.msra.gmra.mxu0 %v5000_v36  ;;  %v10398_v36 = vcombine.low %v5385_v25, %v5393_v24 }
 0xa01   : > { %6984 = vmatpush1.bf16.msra.mxu0 %v10446_v9  ;;  %6947 = vmatpush1.bf16.msra.mxu1 %v10396_v53  ;;  %v10335_v9 = vcombine.high %v5321_v44, %v5329_v12 }
 0xa02   : > { %6985 = vmatprep.subr.bf16.mxu0 %v10431_v30  ;;  %6948 = vmatprep.subr.bf16.mxu1 %v10381_v61  ;;  %v10334_v30 = vcombine.low %v5321_v44, %v5329_v12  ;;  %v5505_v12 = vld [vmem:[%s13866_s28 + $0x5c8] sm:$0xff] }
 0xa05   : > { %6986 = vmatpush1.bf16.msra.mxu0 %v10430_v47 }
 0xa06   : > { %6987 = vmatprep.subr.bf16.mxu0 %v10415_v13 }
 0xa09   : > { %6988 = vmatpush1.bf16.msra.mxu0 %v10414_v45 }
 0xa0a   : > { %6989 = vmatprep.subr.bf16.mxu0 %v10399_v2 }
 0xa0d   : > { %6990 = vmatpush1.bf16.msra.mxu0 %v10398_v36 }
 0xac0   : > { %v5240_v49 = vpop.f32.mrf.mxu0 }
 0xac1   : > { %v5241_v20 = vadd.f32 %v5240_v49, %v5039_v52  ;;  %v5360_v49 = vld [vmem:[%s13866_s28 + $0x140] sm:$0xff] }
 0xac2   : > { %v5242_v21 = vpop.f32.mrf.mxu0 }
 0xac3   : > { %v5243_v54 = vadd.f32 %v5242_v21, %v5043_v32  ;;  %v14559_v60 = vadd.f32 %v12234_v63, %v5241_v20  ;;  %v5353_v20 = vld [vmem:[%s13866_s28 + $0x108] sm:$0xff] }
 0xac4   : > { %v5244_v51 = vpop.f32.mrf.mxu0  ;;  %v5361_v21 = vld [vmem:[%s13866_s28 + $0x148] sm:$0xff] }
 0xac5   : > { %v5245_v46 = vadd.f32 %v5244_v51, %v5039_v52  ;;  %v14561_v50 = vadd.f32 %v12235_v5, %v5243_v54  ;;  %v10383_v52 = vcombine.high %v5369_v58, %v5377_v56  ;;  %v10380_v54 = vcombine.low %v5368_v7, %v5376_v1  ;;  %v5336_v5 = vld [vmem:[%s13866_s28 + $0x80] sm:$0xff] }
 0xac6   : > { %v5246_v40 = vpop.f32.mrf.mxu0  ;;  %v10382_v51 = vcombine.low %v5369_v58, %v5377_v56  ;;  %v10367_v63 = vcombine.high %v5353_v20, %v5361_v21  ;;  %v5544_v1 = vld [vmem:[%s13866_s28 + $0x700] sm:$0xff]  ;;  %v5545_v58 = vld [vmem:[%s13866_s28 + $0x708] sm:$0xff] }
 0xac7   : > { %v5247_v57 = vadd.f32 %v5246_v40, %v5043_v32  ;;  %v5255_v55 = vadd.f32 %v14561_v50, %v14559_v60  ;;  %v14565_v0 = vadd.f32 %v12236_v15, %v5245_v46  ;;  %v5352_v32 = vld [vmem:[%s13866_s28 + $0x100] sm:$0xff]  ;;  %6991 = vmatprep.subr.bf16.mxu0 %v10383_v52  ;;  %6949 = vmatpush1.bf16.msra.mxu1 %v10380_v54 }
 0xac8   : > { %v10365_v46 = vcombine.high %v5352_v32, %v5360_v49  ;;  %v5344_v40 = vld [vmem:[%s13866_s28 + $0xc0] sm:$0xff]  ;;  %v10364_v15 = vcombine.low %v5352_v32, %v5360_v49  ;;  %6992 = vmatpush1.bf16.msra.mxu0 %v10382_v51  ;;  %v5529_v49 = vld [vmem:[%s13866_s28 + $0x688] sm:$0xff] }
 0xac9   : > { %v14567_v16 = vadd.f32 %v12237_v48, %v5247_v57  ;;  %5256 = vadd.xlane.f32.xlu0 %v5255_v55  ;;  %v5337_v57 = vld [vmem:[%s13866_s28 + $0x88] sm:$0xff]  ;;  %v10366_v48 = vcombine.low %v5353_v20, %v5361_v21  ;;  %6993 = vmatprep.subr.bf16.mxu0 %v10367_v63  ;;  %v10348_v43 = vcombine.low %v5336_v5, %v5344_v40  ;;  %v5528_v52 = vld [vmem:[%s13866_s28 + $0x680] sm:$0xff] }
 0xaca   : > { %v5345_v55 = vld [vmem:[%s13866_s28 + $0xc8] sm:$0xff]  ;;  %6950 = vmatprep.subr.bf16.mxu1 %v10365_v46  ;;  %v5536_v32 = vld [vmem:[%s13866_s28 + $0x6c0] sm:$0xff] }
 0xacb   : > { %v5258_v4 = vadd.f32 %v14567_v16, %v14565_v0  ;;  %v10351_v22 = vcombine.high %v5337_v57, %v5345_v55  ;;  %6951 = vmatpush1.bf16.msra.mxu1 %v10364_v15  ;;  %v10350_v14 = vcombine.low %v5337_v57, %v5345_v55  ;;  %v10541_v20 = vcombine.high %v5528_v52, %v5536_v32  ;;  %v5537_v21 = vld [vmem:[%s13866_s28 + $0x6c8] sm:$0xff]  ;;  %v5512_v63 = vld [vmem:[%s13866_s28 + $0x600] sm:$0xff] }
 0xacc   : > { %6994 = vmatpush1.bf16.msra.mxu0 %v10366_v48  ;;  %v10540_v54 = vcombine.low %v5528_v52, %v5536_v32  ;;  %v10542_v51 = vcombine.low %v5529_v49, %v5537_v21  ;;  %v10543_v46 = vcombine.high %v5529_v49, %v5537_v21  ;;  %v5521_v55 = vld [vmem:[%s13866_s28 + $0x648] sm:$0xff] }
 0xacd   : > { %5259 = vadd.xlane.f32.xlu0 %v5258_v4  ;;  %v10349_v4 = vcombine.high %v5336_v5, %v5344_v40  ;;  %6995 = vmatprep.subr.bf16.mxu0 %v10351_v22  ;;  %v5520_v5 = vld [vmem:[%s13866_s28 + $0x640] sm:$0xff]  ;;  %v5513_v40 = vld [vmem:[%s13866_s28 + $0x608] sm:$0xff] }
 0xace   : > { %v10525_v57 = vcombine.high %v5512_v63, %v5520_v5  ;;  %v10524_v15 = vcombine.low %v5512_v63, %v5520_v5  ;;  %v10526_v48 = vcombine.low %v5513_v40, %v5521_v55  ;;  %v5496_v22 = vld [vmem:[%s13866_s28 + $0x580] sm:$0xff]  ;;  %v5253_v5 = vld [vmem:[%s1240_s5] sm:$0x3] }
 0xacf   : > { %6952 = vmatprep.subr.bf16.mxu1 %v10349_v4  ;;  %v10527_v4 = vcombine.high %v5513_v40, %v5521_v55  ;;  %v10509_v44 = vcombine.high %v5496_v22, %v5504_v26  ;;  %v5292_v55 = vrot.slane %v5253_v5, %v14501_v18 }
 0xad0   : > { %6953 = vmatpush1.bf16.msra.mxu1 %v10348_v43  ;;  %6996 = vmatpush1.bf16.msra.mxu0 %v10350_v14  ;;  %v10508_v43 = vcombine.low %v5496_v22, %v5504_v26  ;;  %v10510_v14 = vcombine.low %v5497_v23, %v5505_v12 }
 0xad1   : > { %6954 = vmatprep.subr.bf16.mxu1 %v10333_v8  ;;  %6997 = vmatprep.subr.bf16.mxu0 %v10335_v9  ;;  %v10511_v8 = vcombine.high %v5497_v23, %v5505_v12  ;;  %v5480_v9 = vld [vmem:[%s13866_s28 + $0x500] sm:$0xff] }
 0xad2   : > { %v10493_v35 = vcombine.high %v5480_v9, %v5488_v3 }
 0xad4   : > { %6955 = vmatpush1.bf16.msra.mxu1 %v10332_v33  ;;  %6998 = vmatpush1.bf16.msra.mxu0 %v10334_v30  ;;  %v10492_v33 = vcombine.low %v5480_v9, %v5488_v3  ;;  %v10494_v30 = vcombine.low %v5481_v11, %v5489_v38 }
 0xad5   : > { %6956 = vmatprep.subr.bf16.mxu1 %v10573_v27  ;;  %6999 = vmatprep.subr.bf16.mxu0 %v10575_v37  ;;  %v10495_v27 = vcombine.high %v5481_v11, %v5489_v38  ;;  %v5464_v37 = vld [vmem:[%s13866_s28 + $0x480] sm:$0xff]  ;;  %v5426_v38 = vld [vmem:[%s13866_s28 + $0x350] sm:$0xff] }
 0xad8   : > { %6957 = vmatpush2.bf16.msra.mxu1 %v10572_v31  ;;  %7000 = vmatpush2.bf16.msra.mxu0 %v10574_v41  ;;  %v5472_v31 = vld [vmem:[%s13866_s28 + $0x4c0] sm:$0xff]  ;;  %v5465_v41 = vld [vmem:[%s13866_s28 + $0x488] sm:$0xff] }
 0xb52   : > { %v5257_v47 = vpop.xlane.xlu0 %5256 }
 0xb53   : > { %v5262_v29 = vmul.f32 0.00390625, %v5257_v47  ;;  %v10477_v47 = vcombine.high %v5464_v37, %v5472_v31 }
 0xb55   : > { %v14608_v13 = vsub.f32 %v14559_v60, %v5262_v29  ;;  %v14611_v17 = vsub.f32 %v14561_v50, %v5262_v29  ;;  %v5473_v29 = vld [vmem:[%s13866_s28 + $0x4c8] sm:$0xff] }
 0xb56   : > { %v5260_v39 = vpop.xlane.xlu0 %5259 }
 0xb57   : > { %v5263_v25 = vmul.f32 0.00390625, %v5260_v39  ;;  %v5268_v24 = vmul.f32 %v14608_v13, %v14608_v13  ;;  %v5269_v28 = vmul.f32 %v14611_v17, %v14611_v17  ;;  %v10476_v39 = vcombine.low %v5464_v37, %v5472_v31 }
 0xb59   : > { %v14618_v45 = vsub.f32 %v14565_v0, %v5263_v25  ;;  %v14621_v10 = vsub.f32 %v14567_v16, %v5263_v25  ;;  %v5272_v60 = vadd.f32 %v5269_v28, %v5268_v24  ;;  %v5552_v0 = vld [vmem:[%s13866_s28 + $0x740] sm:$0xff]  ;;  %v5553_v16 = vld [vmem:[%s13866_s28 + $0x748] sm:$0xff]  ;;  %v10478_v25 = vcombine.low %v5465_v41, %v5473_v29 }
 0xb5a   : > { %v10557_v56 = vcombine.high %v5544_v1, %v5552_v0  ;;  %v10556_v53 = vcombine.low %v5544_v1, %v5552_v0  ;;  %v10558_v36 = vcombine.low %v5545_v58, %v5553_v16  ;;  %v10559_v61 = vcombine.high %v5545_v58, %v5553_v16  ;;  %v5448_v28 = vld [vmem:[%s13866_s28 + $0x400] sm:$0xff]  ;;  %v5442_v16 = vld [vmem:[%s13866_s28 + $0x3d0] sm:$0xff] }
 0xb5b   : > { %5273 = vadd.xlane.f32.xlu1 %v5272_v60  ;;  %v5270_v50 = vmul.f32 %v14618_v45, %v14618_v45  ;;  %v5271_v2 = vmul.f32 %v14621_v10, %v14621_v10  ;;  %v10479_v24 = vcombine.high %v5465_v41, %v5473_v29  ;;  %v5456_v60 = vld [vmem:[%s13866_s28 + $0x440] sm:$0xff]  ;;  %v5410_v41 = vld [vmem:[%s13866_s28 + $0x2d0] sm:$0xff]  ;;  %v5411_v29 = vld [vmem:[%s13866_s28 + $0x2d8] sm:$0xff] }
 0xb5c   : > { %6958 = vmatprep.subr.bf16.mxu1 %v10557_v56  ;;  %7001 = vmatprep.subr.bf16.mxu0 %v10559_v61  ;;  %v10460_v1 = vcombine.low %v5448_v28, %v5456_v60  ;;  %v5434_v56 = vld [vmem:[%s13866_s28 + $0x390] sm:$0xff]  ;;  %v5443_v61 = vld [vmem:[%s13866_s28 + $0x3d8] sm:$0xff] }
 0xb5d   : > { %v5275_v7 = vadd.f32 %v5271_v2, %v5270_v50  ;;  %6959 = vmatpush2.bf16.msra.mxu1 %v10556_v53  ;;  %7002 = vmatpush2.bf16.msra.mxu0 %v10558_v36  ;;  %v5449_v50 = vld [vmem:[%s13866_s28 + $0x408] sm:$0xff]  ;;  %v10461_v2 = vcombine.high %v5448_v28, %v5456_v60  ;;  %v5435_v53 = vld [vmem:[%s13866_s28 + $0x398] sm:$0xff]  ;;  %v10449_v36 = vcombine.high %v5434_v56, %v5442_v16  ;;  %v5386_v60 = vld [vmem:[%s13866_s28 + $0x210] sm:$0xff] }
 0xb5e   : > { %6960 = vmatprep.subr.bf16.mxu1 %v10541_v20  ;;  %7003 = vmatprep.subr.bf16.mxu0 %v10543_v46  ;;  %v10448_v52 = vcombine.low %v5434_v56, %v5442_v16  ;;  %v10450_v32 = vcombine.low %v5435_v53, %v5443_v61  ;;  %v10451_v49 = vcombine.high %v5435_v53, %v5443_v61  ;;  %v5370_v16 = vld [vmem:[%s13866_s28 + $0x190] sm:$0xff]  ;;  %v5379_v61 = vld [vmem:[%s13866_s28 + $0x1d8] sm:$0xff] }
 0xb5f   : > { %5276 = vadd.xlane.f32.xlu1 %v5275_v7  ;;  %v5457_v7 = vld [vmem:[%s13866_s28 + $0x448] sm:$0xff]  ;;  %v5378_v53 = vld [vmem:[%s13866_s28 + $0x1d0] sm:$0xff] }
 0xb60   : > { %v10462_v0 = vcombine.low %v5449_v50, %v5457_v7  ;;  %v10463_v58 = vcombine.high %v5449_v50, %v5457_v7  ;;  %v5394_v50 = vld [vmem:[%s13866_s28 + $0x250] sm:$0xff]  ;;  %v5395_v7 = vld [vmem:[%s13866_s28 + $0x258] sm:$0xff] }
 0xb61   : > { %6961 = vmatpush2.bf16.msra.mxu1 %v10540_v54  ;;  %7004 = vmatpush2.bf16.msra.mxu0 %v10542_v51 }
 0xb62   : > { %6962 = vmatprep.subr.bf16.mxu1 %v10525_v57  ;;  %7005 = vmatprep.subr.bf16.mxu0 %v10527_v4  ;;  %v5254_v57 = vld [vmem:[%s1249_s8] sm:$0x3] }
 0xb63   : > { %v5307_v26 = vrot.slane %v5254_v57, %v14501_v18  ;;  %v5311_v23 = vrot.slane %v5254_v57, %v14495_v59 }
 0xb65   : > { %6963 = vmatpush2.bf16.msra.mxu1 %v10524_v15  ;;  %7006 = vmatpush2.bf16.msra.mxu0 %v10526_v48  ;;  %v5296_v15 = vrot.slane %v5253_v5, %v14495_v59 }
 0xb66   : > { %6964 = vmatprep.subr.bf16.mxu1 %v10509_v44  ;;  %7007 = vmatprep.subr.bf16.mxu0 %v10511_v8 }
 0xb69   : > { %6965 = vmatpush2.bf16.msra.mxu1 %v10508_v43  ;;  %7008 = vmatpush2.bf16.msra.mxu0 %v10510_v14 }
 0xb6a   : > { %6966 = vmatprep.subr.bf16.mxu1 %v10493_v35  ;;  %7009 = vmatprep.subr.bf16.mxu0 %v10495_v27  ;;  %v5418_v35 = vld [vmem:[%s13866_s28 + $0x310] sm:$0xff] }
 0xb6b   : > { %v5402_v27 = vld [vmem:[%s13866_s28 + $0x290] sm:$0xff]  ;;  %v10433_v37 = vcombine.high %v5418_v35, %v5426_v38 }
 0xb6d   : > { %6967 = vmatpush2.bf16.msra.mxu1 %v10492_v33  ;;  %7010 = vmatpush2.bf16.msra.mxu0 %v10494_v30  ;;  %v5419_v33 = vld [vmem:[%s13866_s28 + $0x318] sm:$0xff] }
 0xb6e   : > { %6968 = vmatprep.subr.bf16.mxu1 %v10477_v47  ;;  %7011 = vmatprep.subr.bf16.mxu0 %v10479_v24  ;;  %v5427_v30 = vld [vmem:[%s13866_s28 + $0x358] sm:$0xff]  ;;  %v10417_v24 = vcombine.high %v5402_v27, %v5410_v41 }
 0xb6f   : > { %v10435_v31 = vcombine.high %v5419_v33, %v5427_v30  ;;  %v5403_v47 = vld [vmem:[%s13866_s28 + $0x298] sm:$0xff] }
 0xb70   : > { %v10419_v28 = vcombine.high %v5403_v47, %v5411_v29 }
 0xb71   : > { %6969 = vmatpush2.bf16.msra.mxu1 %v10476_v39  ;;  %7012 = vmatpush2.bf16.msra.mxu0 %v10478_v25  ;;  %v10432_v39 = vcombine.low %v5418_v35, %v5426_v38  ;;  %v10434_v25 = vcombine.low %v5419_v33, %v5427_v30  ;;  %v5562_v30 = vld [vmem:[%s13866_s28 + $0x790] sm:$0xff] }
 0xb72   : > { %6970 = vmatprep.subr.bf16.mxu1 %v10461_v2  ;;  %7013 = vmatprep.subr.bf16.mxu0 %v10463_v58  ;;  %v5387_v2 = vld [vmem:[%s13866_s28 + $0x218] sm:$0xff]  ;;  %v10401_v58 = vcombine.high %v5386_v60, %v5394_v50 }
 0xb73   : > { %v10403_v56 = vcombine.high %v5387_v2, %v5395_v7 }
 0xb75   : > { %6971 = vmatpush2.bf16.msra.mxu1 %v10460_v1  ;;  %7014 = vmatpush2.bf16.msra.mxu0 %v10462_v0  ;;  %v10416_v1 = vcombine.low %v5402_v27, %v5410_v41  ;;  %v10418_v0 = vcombine.low %v5403_v47, %v5411_v29  ;;  %v5570_v27 = vld [vmem:[%s13866_s28 + $0x7d0] sm:$0xff] }
 0xb76   : > { %7026 = vmatprep.subr.bf16.mxu1 %v10449_v36  ;;  %7069 = vmatprep.subr.bf16.mxu0 %v10451_v49  ;;  %v5371_v36 = vld [vmem:[%s13866_s28 + $0x198] sm:$0xff]  ;;  %v10385_v49 = vcombine.high %v5370_v16, %v5378_v53  ;;  %v10577_v29 = vcombine.high %v5562_v30, %v5570_v27 }
 0xb77   : > { %v10386_v5 = vcombine.low %v5371_v36, %v5379_v61 }
 0xbe4   : > { %v5274_v20 = vpop.xlane.xlu1 %5273 }
 0xbe5   : > { %v5278_v21 = vmul.f32 0.00390625, %v5274_v20  ;;  %v10387_v20 = vcombine.high %v5371_v36, %v5379_v61 }
 0xbe7   : > { %v5280_v54 = vadd.f32 1e-05, %v5278_v21  ;;  %v5354_v21 = vld [vmem:[%s13866_s28 + $0x110] sm:$0xff] }
 0xbe8   : > { %v5277_v51 = vpop.xlane.xlu1 %5276 }
 0xbe9   : > { %12226 = vrsqrt.f32 %v5280_v54  ;;  %v5279_v46 = vmul.f32 0.00390625, %v5277_v51  ;;  %v5362_v54 = vld [vmem:[%s13866_s28 + $0x150] sm:$0xff]  ;;  %v5355_v51 = vld [vmem:[%s13866_s28 + $0x118] sm:$0xff] }
 0xbeb   : > { %v5281_v63 = vadd.f32 1e-05, %v5279_v46  ;;  %v5363_v46 = vld [vmem:[%s13866_s28 + $0x158] sm:$0xff] }
 0xbec   : > { %v10371_v57 = vcombine.high %v5355_v51, %v5363_v46 }
 0xbed   : > { %12228 = vrsqrt.f32 %v5281_v63  ;;  %v10384_v63 = vcombine.low %v5370_v16, %v5378_v53  ;;  %v5539_v16 = vld [vmem:[%s13866_s28 + $0x6d8] sm:$0xff] }
 0xbf6   : > { %v12227_v40 = vpop.eup %12226 }
 0xbf7   : > { %v5284_v48 = vmul.f32 %v12227_v40, %v14608_v13  ;;  %v5285_v4 = vmul.f32 %v12227_v40, %v14611_v17  ;;  %v10369_v40 = vcombine.high %v5354_v21, %v5362_v54 }
 0xbf9   : > { %v5299_v44 = vmul.f32 %v5292_v55, %v5284_v48  ;;  %v5300_v12 = vmul.f32 %v5296_v15, %v5285_v4  ;;  %v5339_v48 = vld [vmem:[%s13866_s28 + $0x98] sm:$0xff] }
 0xbfa   : > { %v12229_v22 = vpop.eup %12228  ;;  %v5347_v4 = vld [vmem:[%s13866_s28 + $0xd8] sm:$0xff] }
 0xbfb   : > { %v5286_v43 = vmul.f32 %v12229_v22, %v14618_v45  ;;  %v5287_v14 = vmul.f32 %v12229_v22, %v14621_v10  ;;  %v14671_v13 = vadd.f32 %v5307_v26, %v5299_v44  ;;  %v14673_v17 = vadd.f32 %v5311_v23, %v5300_v12  ;;  %v5322_v12 = vld [vmem:[%s13866_s28 + $0x10] sm:$0xff] }
 0xbfc   : > { %v10368_v22 = vcombine.low %v5354_v21, %v5362_v54  ;;  %v10355_v44 = vcombine.high %v5339_v48, %v5347_v4  ;;  %v10354_v35 = vcombine.low %v5339_v48, %v5347_v4  ;;  %v5523_v21 = vld [vmem:[%s13866_s28 + $0x658] sm:$0xff] }
 0xbfd   : > { %v5301_v8 = vmul.f32 %v5292_v55, %v5286_v43  ;;  %v5302_v9 = vmul.f32 %v5296_v15, %v5287_v14  ;;  %v5338_v55 = vld [vmem:[%s13866_s28 + $0x90] sm:$0xff]  ;;  %v5323_v14 = vld [vmem:[%s13866_s28 + $0x18] sm:$0xff] }
 0xbfe   : > { %v5346_v15 = vld [vmem:[%s13866_s28 + $0xd0] sm:$0xff] }
 0xbff   : > { %v14675_v3 = vadd.f32 %v5307_v26, %v5301_v8  ;;  %v14677_v11 = vadd.f32 %v5311_v23, %v5302_v9  ;;  %v10370_v26 = vcombine.low %v5355_v51, %v5363_v46  ;;  %v10353_v23 = vcombine.high %v5338_v55, %v5346_v15  ;;  %v5330_v43 = vld [vmem:[%s13866_s28 + $0x50] sm:$0xff]  ;;  %v5331_v8 = vld [vmem:[%s13866_s28 + $0x58] sm:$0xff] }
 0xc00   : > { %v10352_v9 = vcombine.low %v5338_v55, %v5346_v15  ;;  %v10337_v38 = vcombine.high %v5322_v12, %v5330_v43  ;;  %v10339_v33 = vcombine.high %v5323_v14, %v5331_v8  ;;  %v10336_v41 = vcombine.low %v5322_v12, %v5330_v43  ;;  %v5507_v55 = vld [vmem:[%s13866_s28 + $0x5d8] sm:$0xff] }
 0xc01   : > { %v14685_v45 = vpack.c.bf16 %v14675_v3, %v14671_v13  ;;  %v14689_v10 = vpack.c.bf16 %v14677_v11, %v14673_v17  ;;  %v10338_v47 = vcombine.low %v5323_v14, %v5331_v8  ;;  %v5491_v12 = vld [vmem:[%s13866_s28 + $0x558] sm:$0xff] }
 0xc03   : > { %6972 = vmatprep.mubr.bf16.mxu1 %v14689_v10  ;;  %7015 = vmatprep.mubr.bf16.mxu0 %v14689_v10 }
 0xc04   : > { %6973 = vmatmul.mubr.bf16.vlgmr.msra.gmra.mxu1 %v14685_v45  ;;  %7016 = vmatmul.mubr.bf16.vlgmr.msra.gmra.mxu0 %v14685_v45 }
 0xc05   : > { %7027 = vmatpush1.bf16.msra.mxu1 %v10448_v52  ;;  %7070 = vmatpush1.bf16.msra.mxu0 %v10450_v32  ;;  %v10400_v52 = vcombine.low %v5386_v60, %v5394_v50  ;;  %v10402_v32 = vcombine.low %v5387_v2, %v5395_v7  ;;  %v5555_v60 = vld [vmem:[%s13866_s28 + $0x758] sm:$0xff]  ;;  %v10576_v50 = vcombine.low %v5562_v30, %v5570_v27 }
 0xc06   : > { %7058 = vmatprep.mubr.bf16.mxu1 %v14689_v10  ;;  %7101 = vmatprep.mubr.bf16.mxu0 %v14689_v10  ;;  %v5475_v30 = vld [vmem:[%s13866_s28 + $0x4d8] sm:$0xff] }
 0xc07   : > { %7028 = vmatprep.subr.bf16.mxu1 %v10433_v37  ;;  %7071 = vmatprep.subr.bf16.mxu0 %v10435_v31  ;;  %v5563_v37 = vld [vmem:[%s13866_s28 + $0x798] sm:$0xff] }
 0xc08   : > { %v5571_v31 = vld [vmem:[%s13866_s28 + $0x7d8] sm:$0xff] }
 0xc09   : > { %7029 = vmatpush1.bf16.msra.mxu1 %v10432_v39  ;;  %7072 = vmatpush1.bf16.msra.mxu0 %v10434_v25  ;;  %v10579_v39 = vcombine.high %v5563_v37, %v5571_v31  ;;  %v5546_v25 = vld [vmem:[%s13866_s28 + $0x710] sm:$0xff]  ;;  %v10578_v2 = vcombine.low %v5563_v37, %v5571_v31 }
 0xc0a   : > { %7030 = vmatprep.subr.bf16.mxu1 %v10417_v24  ;;  %7073 = vmatprep.subr.bf16.mxu0 %v10419_v28  ;;  %v5554_v24 = vld [vmem:[%s13866_s28 + $0x750] sm:$0xff]  ;;  %v5547_v28 = vld [vmem:[%s13866_s28 + $0x718] sm:$0xff] }
 0xc0b   : > { %v10561_v7 = vcombine.high %v5546_v25, %v5554_v24  ;;  %v10560_v53 = vcombine.low %v5546_v25, %v5554_v24  ;;  %v10562_v36 = vcombine.low %v5547_v28, %v5555_v60  ;;  %v5459_v25 = vld [vmem:[%s13866_s28 + $0x458] sm:$0xff] }
 0xc0d   : > { %7031 = vmatpush1.bf16.msra.mxu1 %v10416_v1  ;;  %7074 = vmatpush1.bf16.msra.mxu0 %v10418_v0  ;;  %v10563_v1 = vcombine.high %v5547_v28, %v5555_v60  ;;  %v5530_v0 = vld [vmem:[%s13866_s28 + $0x690] sm:$0xff] }
 0xc0e   : > { %7032 = vmatprep.subr.bf16.mxu1 %v10401_v58  ;;  %7075 = vmatprep.subr.bf16.mxu0 %v10403_v56  ;;  %v5538_v58 = vld [vmem:[%s13866_s28 + $0x6d0] sm:$0xff]  ;;  %v5531_v56 = vld [vmem:[%s13866_s28 + $0x698] sm:$0xff] }
 0xc0f   : > { %v10545_v61 = vcombine.high %v5530_v0, %v5538_v58  ;;  %v10544_v54 = vcombine.low %v5530_v0, %v5538_v58  ;;  %v10546_v51 = vcombine.low %v5531_v56, %v5539_v16  ;;  %v5445_v0 = vld [vmem:[%s13866_s28 + $0x3e8] sm:$0xff] }
 0xc11   : > { %7033 = vmatpush1.bf16.msra.mxu1 %v10400_v52  ;;  %7076 = vmatpush1.bf16.msra.mxu0 %v10402_v32  ;;  %v10547_v52 = vcombine.high %v5531_v56, %v5539_v16  ;;  %v5514_v32 = vld [vmem:[%s13866_s28 + $0x610] sm:$0xff] }
 0xc12   : > { %7034 = vmatprep.subr.bf16.mxu1 %v10385_v49  ;;  %7077 = vmatprep.subr.bf16.mxu0 %v10387_v20  ;;  %v5522_v49 = vld [vmem:[%s13866_s28 + $0x650] sm:$0xff]  ;;  %v5515_v20 = vld [vmem:[%s13866_s28 + $0x618] sm:$0xff] }
 0xc13   : > { %v10529_v46 = vcombine.high %v5514_v32, %v5522_v49  ;;  %v10528_v15 = vcombine.low %v5514_v32, %v5522_v49  ;;  %v10530_v48 = vcombine.low %v5515_v20, %v5523_v21  ;;  %v5429_v32 = vld [vmem:[%s13866_s28 + $0x368] sm:$0xff] }
 0xc15   : > { %7035 = vmatpush1.bf16.msra.mxu1 %v10384_v63  ;;  %7078 = vmatpush1.bf16.msra.mxu0 %v10386_v5  ;;  %v10531_v63 = vcombine.high %v5515_v20, %v5523_v21  ;;  %v5498_v5 = vld [vmem:[%s13866_s28 + $0x590] sm:$0xff] }
 0xc16   : > { %7036 = vmatprep.subr.bf16.mxu1 %v10369_v40  ;;  %7079 = vmatprep.subr.bf16.mxu0 %v10371_v57  ;;  %v5506_v40 = vld [vmem:[%s13866_s28 + $0x5d0] sm:$0xff]  ;;  %v5499_v57 = vld [vmem:[%s13866_s28 + $0x598] sm:$0xff] }
 0xc17   : > { %v10513_v4 = vcombine.high %v5498_v5, %v5506_v40  ;;  %v10512_v43 = vcombine.low %v5498_v5, %v5506_v40  ;;  %v10514_v14 = vcombine.low %v5499_v57, %v5507_v55  ;;  %v5413_v5 = vld [vmem:[%s13866_s28 + $0x2e8] sm:$0xff] }
 0xc19   : > { %7037 = vmatpush1.bf16.msra.mxu1 %v10368_v22  ;;  %7080 = vmatpush1.bf16.msra.mxu0 %v10370_v26  ;;  %v10515_v22 = vcombine.high %v5499_v57, %v5507_v55  ;;  %v5482_v26 = vld [vmem:[%s13866_s28 + $0x510] sm:$0xff] }
 0xc1a   : > { %7038 = vmatprep.subr.bf16.mxu1 %v10353_v23  ;;  %7081 = vmatprep.subr.bf16.mxu0 %v10355_v44  ;;  %v5490_v23 = vld [vmem:[%s13866_s28 + $0x550] sm:$0xff]  ;;  %v5483_v44 = vld [vmem:[%s13866_s28 + $0x518] sm:$0xff] }
 0xc1b   : > { %v10497_v8 = vcombine.high %v5482_v26, %v5490_v23  ;;  %v10496_v27 = vcombine.low %v5482_v26, %v5490_v23  ;;  %v10498_v37 = vcombine.low %v5483_v44, %v5491_v12  ;;  %v5397_v26 = vld [vmem:[%s13866_s28 + $0x268] sm:$0xff] }
 0xc1d   : > { %7039 = vmatpush1.bf16.msra.mxu1 %v10352_v9  ;;  %7082 = vmatpush1.bf16.msra.mxu0 %v10354_v35  ;;  %v10499_v9 = vcombine.high %v5483_v44, %v5491_v12  ;;  %v5466_v35 = vld [vmem:[%s13866_s28 + $0x490] sm:$0xff] }
 0xc1e   : > { %7040 = vmatprep.subr.bf16.mxu1 %v10337_v38  ;;  %7083 = vmatprep.subr.bf16.mxu0 %v10339_v33  ;;  %v5474_v38 = vld [vmem:[%s13866_s28 + $0x4d0] sm:$0xff]  ;;  %v5467_v33 = vld [vmem:[%s13866_s28 + $0x498] sm:$0xff] }
 0xc1f   : > { %v10481_v31 = vcombine.high %v5466_v35, %v5474_v38  ;;  %v10480_v24 = vcombine.low %v5466_v35, %v5474_v38  ;;  %v10482_v28 = vcombine.low %v5467_v33, %v5475_v30  ;;  %v5381_v35 = vld [vmem:[%s13866_s28 + $0x1e8] sm:$0xff] }
 0xc21   : > { %7041 = vmatpush1.bf16.msra.mxu1 %v10336_v41  ;;  %7084 = vmatpush1.bf16.msra.mxu0 %v10338_v47  ;;  %v10483_v41 = vcombine.high %v5467_v33, %v5475_v30  ;;  %v5450_v47 = vld [vmem:[%s13866_s28 + $0x410] sm:$0xff] }
 0xc22   : > { %7042 = vmatprep.subr.bf16.mxu1 %v10577_v29  ;;  %7085 = vmatprep.subr.bf16.mxu0 %v10579_v39  ;;  %v5458_v29 = vld [vmem:[%s13866_s28 + $0x450] sm:$0xff]  ;;  %v5451_v39 = vld [vmem:[%s13866_s28 + $0x418] sm:$0xff] }
 0xc23   : > { %v10465_v60 = vcombine.high %v5450_v47, %v5458_v29  ;;  %v10464_v58 = vcombine.low %v5450_v47, %v5458_v29  ;;  %v10466_v56 = vcombine.low %v5451_v39, %v5459_v25  ;;  %v5365_v47 = vld [vmem:[%s13866_s28 + $0x168] sm:$0xff] }
 0xc25   : > { %7043 = vmatpush2.bf16.msra.mxu1 %v10576_v50  ;;  %7086 = vmatpush2.bf16.msra.mxu0 %v10578_v2  ;;  %v10467_v50 = vcombine.high %v5451_v39, %v5459_v25  ;;  %v5436_v2 = vld [vmem:[%s13866_s28 + $0x3a0] sm:$0xff] }
 0xc26   : > { %7044 = vmatprep.subr.bf16.mxu1 %v10561_v7  ;;  %7087 = vmatprep.subr.bf16.mxu0 %v10563_v1  ;;  %v5444_v7 = vld [vmem:[%s13866_s28 + $0x3e0] sm:$0xff]  ;;  %v5437_v1 = vld [vmem:[%s13866_s28 + $0x3a8] sm:$0xff] }
 0xc27   : > { %v10453_v16 = vcombine.high %v5436_v2, %v5444_v7  ;;  %v10452_v49 = vcombine.low %v5436_v2, %v5444_v7  ;;  %v10454_v20 = vcombine.low %v5437_v1, %v5445_v0  ;;  %v5349_v2 = vld [vmem:[%s13866_s28 + $0xe8] sm:$0xff] }
 0xc29   : > { %7045 = vmatpush2.bf16.msra.mxu1 %v10560_v53  ;;  %7088 = vmatpush2.bf16.msra.mxu0 %v10562_v36  ;;  %v10455_v53 = vcombine.high %v5437_v1, %v5445_v0  ;;  %v5420_v36 = vld [vmem:[%s13866_s28 + $0x320] sm:$0xff] }
 0xc2a   : > { %7046 = vmatprep.subr.bf16.mxu1 %v10545_v61  ;;  %7089 = vmatprep.subr.bf16.mxu0 %v10547_v52  ;;  %v5428_v61 = vld [vmem:[%s13866_s28 + $0x360] sm:$0xff]  ;;  %v5421_v52 = vld [vmem:[%s13866_s28 + $0x328] sm:$0xff] }
 0xc2b   : > { %v10437_v21 = vcombine.high %v5420_v36, %v5428_v61  ;;  %v10436_v40 = vcombine.low %v5420_v36, %v5428_v61  ;;  %v10438_v57 = vcombine.low %v5421_v52, %v5429_v32  ;;  %v5333_v36 = vld [vmem:[%s13866_s28 + $0x68] sm:$0xff] }
 0xc2d   : > { %7047 = vmatpush2.bf16.msra.mxu1 %v10544_v54  ;;  %7090 = vmatpush2.bf16.msra.mxu0 %v10546_v51  ;;  %v10439_v54 = vcombine.high %v5421_v52, %v5429_v32  ;;  %v5404_v51 = vld [vmem:[%s13866_s28 + $0x2a0] sm:$0xff] }
 0xc2e   : > { %7048 = vmatprep.subr.bf16.mxu1 %v10529_v46  ;;  %7091 = vmatprep.subr.bf16.mxu0 %v10531_v63  ;;  %v5412_v46 = vld [vmem:[%s13866_s28 + $0x2e0] sm:$0xff]  ;;  %v5405_v63 = vld [vmem:[%s13866_s28 + $0x2a8] sm:$0xff] }
 0xc2f   : > { %v10421_v55 = vcombine.high %v5404_v51, %v5412_v46  ;;  %v10420_v23 = vcombine.low %v5404_v51, %v5412_v46  ;;  %v10422_v44 = vcombine.low %v5405_v63, %v5413_v5  ;;  %v5573_v51 = vld [vmem:[%s13866_s28 + $0x7e8] sm:$0xff] }
 0xc31   : > { %7049 = vmatpush2.bf16.msra.mxu1 %v10528_v15  ;;  %7092 = vmatpush2.bf16.msra.mxu0 %v10530_v48  ;;  %v10423_v15 = vcombine.high %v5405_v63, %v5413_v5  ;;  %v5388_v48 = vld [vmem:[%s13866_s28 + $0x220] sm:$0xff] }
 0xc32   : > { %7050 = vmatprep.subr.bf16.mxu1 %v10513_v4  ;;  %7093 = vmatprep.subr.bf16.mxu0 %v10515_v22  ;;  %v5396_v4 = vld [vmem:[%s13866_s28 + $0x260] sm:$0xff]  ;;  %v5389_v22 = vld [vmem:[%s13866_s28 + $0x228] sm:$0xff] }
 0xc33   : > { %v10405_v12 = vcombine.high %v5388_v48, %v5396_v4  ;;  %v10404_v38 = vcombine.low %v5388_v48, %v5396_v4  ;;  %v10406_v33 = vcombine.low %v5389_v22, %v5397_v26  ;;  %v5557_v48 = vld [vmem:[%s13866_s28 + $0x768] sm:$0xff] }
 0xc35   : > { %7051 = vmatpush2.bf16.msra.mxu1 %v10512_v43  ;;  %7094 = vmatpush2.bf16.msra.mxu0 %v10514_v14  ;;  %v10407_v43 = vcombine.high %v5389_v22, %v5397_v26  ;;  %v5372_v14 = vld [vmem:[%s13866_s28 + $0x1a0] sm:$0xff] }
 0xc36   : > { %7052 = vmatprep.subr.bf16.mxu1 %v10497_v8  ;;  %7095 = vmatprep.subr.bf16.mxu0 %v10499_v9  ;;  %v5380_v8 = vld [vmem:[%s13866_s28 + $0x1e0] sm:$0xff]  ;;  %v5373_v9 = vld [vmem:[%s13866_s28 + $0x1a8] sm:$0xff] }
 0xc37   : > { %v10389_v30 = vcombine.high %v5372_v14, %v5380_v8  ;;  %v10388_v29 = vcombine.low %v5372_v14, %v5380_v8  ;;  %v10390_v39 = vcombine.low %v5373_v9, %v5381_v35  ;;  %v5541_v14 = vld [vmem:[%s13866_s28 + $0x6e8] sm:$0xff] }
 0xc39   : > { %7053 = vmatpush2.bf16.msra.mxu1 %v10496_v27  ;;  %7096 = vmatpush2.bf16.msra.mxu0 %v10498_v37  ;;  %v10391_v27 = vcombine.high %v5373_v9, %v5381_v35  ;;  %v5356_v37 = vld [vmem:[%s13866_s28 + $0x120] sm:$0xff] }
 0xc3a   : > { %7054 = vmatprep.subr.bf16.mxu1 %v10481_v31  ;;  %7097 = vmatprep.subr.bf16.mxu0 %v10483_v41  ;;  %v5364_v31 = vld [vmem:[%s13866_s28 + $0x160] sm:$0xff]  ;;  %v5357_v41 = vld [vmem:[%s13866_s28 + $0x128] sm:$0xff] }
 0xc3b   : > { %v10373_v25 = vcombine.high %v5356_v37, %v5364_v31  ;;  %v10372_v7 = vcombine.low %v5356_v37, %v5364_v31  ;;  %v10374_v1 = vcombine.low %v5357_v41, %v5365_v47  ;;  %v5525_v37 = vld [vmem:[%s13866_s28 + $0x668] sm:$0xff] }
 0xc3d   : > { %7055 = vmatpush2.bf16.msra.mxu1 %v10480_v24  ;;  %7098 = vmatpush2.bf16.msra.mxu0 %v10482_v28  ;;  %v10375_v24 = vcombine.high %v5357_v41, %v5365_v47  ;;  %v5340_v28 = vld [vmem:[%s13866_s28 + $0xa0] sm:$0xff] }
 0xc3e   : > { %7056 = vmatprep.subr.bf16.mxu1 %v10465_v60  ;;  %7099 = vmatprep.subr.bf16.mxu0 %v10467_v50  ;;  %v5348_v60 = vld [vmem:[%s13866_s28 + $0xe0] sm:$0xff]  ;;  %v5341_v50 = vld [vmem:[%s13866_s28 + $0xa8] sm:$0xff] }
 0xc3f   : > { %v10357_v0 = vcombine.high %v5340_v28, %v5348_v60  ;;  %v10356_v61 = vcombine.low %v5340_v28, %v5348_v60  ;;  %v10358_v52 = vcombine.low %v5341_v50, %v5349_v2  ;;  %v5509_v28 = vld [vmem:[%s13866_s28 + $0x5e8] sm:$0xff] }
 0xc41   : > { %7057 = vmatpush2.bf16.msra.mxu1 %v10464_v58  ;;  %7100 = vmatpush2.bf16.msra.mxu0 %v10466_v56  ;;  %v10359_v58 = vcombine.high %v5341_v50, %v5349_v2  ;;  %v5324_v56 = vld [vmem:[%s13866_s28 + $0x20] sm:$0xff] }
 0xc42   : > { %7112 = vmatprep.subr.bf16.mxu1 %v10453_v16  ;;  %7155 = vmatprep.subr.bf16.mxu0 %v10455_v53  ;;  %v5332_v16 = vld [vmem:[%s13866_s28 + $0x60] sm:$0xff]  ;;  %v5325_v53 = vld [vmem:[%s13866_s28 + $0x28] sm:$0xff] }
 0xc43   : > { %v10341_v32 = vcombine.high %v5324_v56, %v5332_v16  ;;  %v10340_v46 = vcombine.low %v5324_v56, %v5332_v16  ;;  %v10342_v63 = vcombine.low %v5325_v53, %v5333_v36  ;;  %v5493_v56 = vld [vmem:[%s13866_s28 + $0x568] sm:$0xff] }
 0xc44   : > { %7059 = vmatmul.mubr.bf16.vlgmr.msra.gmra.mxu1 %v14685_v45  ;;  %7102 = vmatmul.mubr.bf16.vlgmr.msra.gmra.mxu0 %v14685_v45 }
 0xc45   : > { %7113 = vmatpush1.bf16.msra.mxu1 %v10452_v49  ;;  %7144 = vmatprep.mubr.bf16.mxu1 %v14689_v10  ;;  %v10343_v49 = vcombine.high %v5325_v53, %v5333_v36 }
 0xc46   : > { %7156 = vmatpush1.bf16.msra.mxu0 %v10454_v20  ;;  %7187 = vmatprep.mubr.bf16.mxu0 %v14689_v10  ;;  %v5564_v20 = vld [vmem:[%s13866_s28 + $0x7a0] sm:$0xff] }
 0xc47   : > { %7114 = vmatprep.subr.bf16.mxu1 %v10437_v21  ;;  %7157 = vmatprep.subr.bf16.mxu0 %v10439_v54  ;;  %v5572_v21 = vld [vmem:[%s13866_s28 + $0x7e0] sm:$0xff]  ;;  %v5565_v54 = vld [vmem:[%s13866_s28 + $0x7a8] sm:$0xff] }
 0xc48   : > { %v10581_v5 = vcombine.high %v5564_v20, %v5572_v21  ;;  %v10580_v4 = vcombine.low %v5564_v20, %v5572_v21  ;;  %v10582_v22 = vcombine.low %v5565_v54, %v5573_v51  ;;  %v5477_v20 = vld [vmem:[%s13866_s28 + $0x4e8] sm:$0xff] }
 0xc49   : > { %7115 = vmatpush1.bf16.msra.mxu1 %v10436_v40  ;;  %v10583_v40 = vcombine.high %v5565_v54, %v5573_v51 }
 0xc4a   : > { %7158 = vmatpush1.bf16.msra.mxu0 %v10438_v57  ;;  %7116 = vmatprep.subr.bf16.mxu1 %v10421_v55  ;;  %v5548_v57 = vld [vmem:[%s13866_s28 + $0x720] sm:$0xff] }
 0xc4b   : > { %7159 = vmatprep.subr.bf16.mxu0 %v10423_v15  ;;  %v5556_v55 = vld [vmem:[%s13866_s28 + $0x760] sm:$0xff]  ;;  %v5549_v15 = vld [vmem:[%s13866_s28 + $0x728] sm:$0xff] }
 0xc4c   : > { %v10565_v26 = vcombine.high %v5548_v57, %v5556_v55  ;;  %v10564_v8 = vcombine.low %v5548_v57, %v5556_v55  ;;  %v10566_v9 = vcombine.low %v5549_v15, %v5557_v48  ;;  %v5461_v57 = vld [vmem:[%s13866_s28 + $0x468] sm:$0xff] }
 0xc4d   : > { %7117 = vmatpush1.bf16.msra.mxu1 %v10420_v23  ;;  %v10567_v23 = vcombine.high %v5549_v15, %v5557_v48 }
 0xc4e   : > { %7160 = vmatpush1.bf16.msra.mxu0 %v10422_v44  ;;  %7118 = vmatprep.subr.bf16.mxu1 %v10405_v12  ;;  %v5532_v44 = vld [vmem:[%s13866_s28 + $0x6a0] sm:$0xff] }
 0xc4f   : > { %7161 = vmatprep.subr.bf16.mxu0 %v10407_v43  ;;  %v5540_v12 = vld [vmem:[%s13866_s28 + $0x6e0] sm:$0xff]  ;;  %v5533_v43 = vld [vmem:[%s13866_s28 + $0x6a8] sm:$0xff] }
 0xc50   : > { %v10549_v35 = vcombine.high %v5532_v44, %v5540_v12  ;;  %v10548_v31 = vcombine.low %v5532_v44, %v5540_v12  ;;  %v10550_v41 = vcombine.low %v5533_v43, %v5541_v14  ;;  %v5447_v44 = vld [vmem:[%s13866_s28 + $0x3f8] sm:$0xff] }
 0xc51   : > { %7119 = vmatpush1.bf16.msra.mxu1 %v10404_v38  ;;  %v10551_v38 = vcombine.high %v5533_v43, %v5541_v14 }
 0xc52   : > { %7162 = vmatpush1.bf16.msra.mxu0 %v10406_v33  ;;  %7120 = vmatprep.subr.bf16.mxu1 %v10389_v30  ;;  %v5516_v33 = vld [vmem:[%s13866_s28 + $0x620] sm:$0xff] }
 0xc53   : > { %7163 = vmatprep.subr.bf16.mxu0 %v10391_v27  ;;  %v5524_v30 = vld [vmem:[%s13866_s28 + $0x660] sm:$0xff]  ;;  %v5517_v27 = vld [vmem:[%s13866_s28 + $0x628] sm:$0xff] }
 0xc54   : > { %v10533_v47 = vcombine.high %v5516_v33, %v5524_v30  ;;  %v10532_v60 = vcombine.low %v5516_v33, %v5524_v30  ;;  %v10534_v50 = vcombine.low %v5517_v27, %v5525_v37  ;;  %v5423_v33 = vld [vmem:[%s13866_s28 + $0x338] sm:$0xff] }
 0xc55   : > { %7121 = vmatpush1.bf16.msra.mxu1 %v10388_v29  ;;  %v10535_v29 = vcombine.high %v5517_v27, %v5525_v37  ;;  %v5431_v30 = vld [vmem:[%s13866_s28 + $0x378] sm:$0xff] }
 0xc56   : > { %7164 = vmatpush1.bf16.msra.mxu0 %v10390_v39  ;;  %7122 = vmatprep.subr.bf16.mxu1 %v10373_v25  ;;  %v5500_v39 = vld [vmem:[%s13866_s28 + $0x5a0] sm:$0xff] }
 0xc57   : > { %7165 = vmatprep.subr.bf16.mxu0 %v10375_v24  ;;  %v5508_v25 = vld [vmem:[%s13866_s28 + $0x5e0] sm:$0xff]  ;;  %v5501_v24 = vld [vmem:[%s13866_s28 + $0x5a8] sm:$0xff] }
 0xc58   : > { %v10517_v2 = vcombine.high %v5500_v39, %v5508_v25  ;;  %v10516_v16 = vcombine.low %v5500_v39, %v5508_v25  ;;  %v10518_v53 = vcombine.low %v5501_v24, %v5509_v28  ;;  %v5415_v39 = vld [vmem:[%s13866_s28 + $0x2f8] sm:$0xff] }
 0xc59   : > { %7123 = vmatpush1.bf16.msra.mxu1 %v10372_v7  ;;  %v10519_v7 = vcombine.high %v5501_v24, %v5509_v28  ;;  %v10442_v24 = vcombine.low %v5423_v33, %v5431_v30 }
 0xc5a   : > { %7166 = vmatpush1.bf16.msra.mxu0 %v10374_v1  ;;  %7124 = vmatprep.subr.bf16.mxu1 %v10357_v0  ;;  %v5484_v1 = vld [vmem:[%s13866_s28 + $0x520] sm:$0xff] }
 0xc5b   : > { %7167 = vmatprep.subr.bf16.mxu0 %v10359_v58  ;;  %v5492_v0 = vld [vmem:[%s13866_s28 + $0x560] sm:$0xff]  ;;  %v5485_v58 = vld [vmem:[%s13866_s28 + $0x528] sm:$0xff] }
 0xc5c   : > { %v10501_v36 = vcombine.high %v5484_v1, %v5492_v0  ;;  %v10500_v21 = vcombine.low %v5484_v1, %v5492_v0  ;;  %v10502_v54 = vcombine.low %v5485_v58, %v5493_v56  ;;  %v5399_v1 = vld [vmem:[%s13866_s28 + $0x278] sm:$0xff] }
 0xc5d   : > { %7125 = vmatpush1.bf16.msra.mxu1 %v10356_v61  ;;  %v10503_v61 = vcombine.high %v5485_v58, %v5493_v56 }
 0xc5e   : > { %7168 = vmatpush1.bf16.msra.mxu0 %v10358_v52  ;;  %7126 = vmatprep.subr.bf16.mxu1 %v10341_v32  ;;  %v5468_v52 = vld [vmem:[%s13866_s28 + $0x4a0] sm:$0xff] }
 0xc5f   : > { %7169 = vmatprep.subr.bf16.mxu0 %v10343_v49  ;;  %v5476_v32 = vld [vmem:[%s13866_s28 + $0x4e0] sm:$0xff]  ;;  %v5469_v49 = vld [vmem:[%s13866_s28 + $0x4a8] sm:$0xff] }
 0xc60   : > { %v10485_v51 = vcombine.high %v5468_v52, %v5476_v32  ;;  %v10484_v55 = vcombine.low %v5468_v52, %v5476_v32  ;;  %v10486_v15 = vcombine.low %v5469_v49, %v5477_v20 }
 0xc61   : > { %7127 = vmatpush1.bf16.msra.mxu1 %v10340_v46  ;;  %v10487_v46 = vcombine.high %v5469_v49, %v5477_v20 }
 0xc62   : > { %7170 = vmatpush1.bf16.msra.mxu0 %v10342_v63  ;;  %7128 = vmatprep.subr.bf16.mxu1 %v10581_v5  ;;  %v5452_v63 = vld [vmem:[%s13866_s28 + $0x420] sm:$0xff] }
 0xc63   : > { %7171 = vmatprep.subr.bf16.mxu0 %v10583_v40  ;;  %v5460_v5 = vld [vmem:[%s13866_s28 + $0x460] sm:$0xff]  ;;  %v5453_v40 = vld [vmem:[%s13866_s28 + $0x428] sm:$0xff] }
 0xc64   : > { %v10469_v48 = vcombine.high %v5452_v63, %v5460_v5  ;;  %v10468_v12 = vcombine.low %v5452_v63, %v5460_v5  ;;  %v10470_v43 = vcombine.low %v5453_v40, %v5461_v57 }
 0xc65   : > { %7129 = vmatpush2.bf16.msra.mxu1 %v10580_v4  ;;  %v10471_v4 = vcombine.high %v5453_v40, %v5461_v57 }
 0xc66   : > { %7172 = vmatpush2.bf16.msra.mxu0 %v10582_v22  ;;  %7130 = vmatprep.subr.bf16.mxu1 %v10565_v26  ;;  %v5438_v22 = vld [vmem:[%s13866_s28 + $0x3b0] sm:$0xff] }
 0xc67   : > { %7173 = vmatprep.subr.bf16.mxu0 %v10567_v23  ;;  %v5446_v26 = vld [vmem:[%s13866_s28 + $0x3f0] sm:$0xff]  ;;  %v5439_v23 = vld [vmem:[%s13866_s28 + $0x3b8] sm:$0xff] }
 0xc68   : > { %v10457_v14 = vcombine.high %v5438_v22, %v5446_v26  ;;  %v10458_v27 = vcombine.low %v5439_v23, %v5447_v44 }
 0xc69   : > { %7131 = vmatpush2.bf16.msra.mxu1 %v10564_v8  ;;  %v10459_v8 = vcombine.high %v5439_v23, %v5447_v44 }
 0xc6a   : > { %7174 = vmatpush2.bf16.msra.mxu0 %v10566_v9  ;;  %7132 = vmatprep.subr.bf16.mxu1 %v10549_v35  ;;  %v5422_v9 = vld [vmem:[%s13866_s28 + $0x330] sm:$0xff] }
 0xc6b   : > { %7175 = vmatprep.subr.bf16.mxu0 %v10551_v38  ;;  %v5430_v35 = vld [vmem:[%s13866_s28 + $0x370] sm:$0xff]  ;;  %v10456_v38 = vcombine.low %v5438_v22, %v5446_v26 }
 0xc6c   : > { %v10441_v37 = vcombine.high %v5422_v9, %v5430_v35  ;;  %v10440_v25 = vcombine.low %v5422_v9, %v5430_v35 }
 0xc6d   : > { %7133 = vmatpush2.bf16.msra.mxu1 %v10548_v31  ;;  %v5406_v31 = vld [vmem:[%s13866_s28 + $0x2b0] sm:$0xff] }
 0xc6e   : > { %7176 = vmatpush2.bf16.msra.mxu0 %v10550_v41  ;;  %7134 = vmatprep.subr.bf16.mxu1 %v10533_v47  ;;  %v5414_v41 = vld [vmem:[%s13866_s28 + $0x2f0] sm:$0xff]  ;;  %v10443_v47 = vcombine.high %v5423_v33, %v5431_v30 }
 0xc6f   : > { %7177 = vmatprep.subr.bf16.mxu0 %v10535_v29  ;;  %v5407_v29 = vld [vmem:[%s13866_s28 + $0x2b8] sm:$0xff]  ;;  %v10425_v28 = vcombine.high %v5406_v31, %v5414_v41  ;;  %v10424_v0 = vcombine.low %v5406_v31, %v5414_v41  ;;  %v5566_v30 = vld [vmem:[%s13866_s28 + $0x7b0] sm:$0xff] }
 0xc70   : > { %v10426_v58 = vcombine.low %v5407_v29, %v5415_v39  ;;  %v5575_v31 = vld [vmem:[%s13866_s28 + $0x7f8] sm:$0xff] }
 0xc71   : > { %7135 = vmatpush2.bf16.msra.mxu1 %v10532_v60  ;;  %v10427_v60 = vcombine.high %v5407_v29, %v5415_v39 }
 0xc72   : > { %7178 = vmatpush2.bf16.msra.mxu0 %v10534_v50  ;;  %7136 = vmatprep.subr.bf16.mxu1 %v10517_v2  ;;  %v5390_v50 = vld [vmem:[%s13866_s28 + $0x230] sm:$0xff] }
 0xc73   : > { %7179 = vmatprep.subr.bf16.mxu0 %v10519_v7  ;;  %v5398_v2 = vld [vmem:[%s13866_s28 + $0x270] sm:$0xff]  ;;  %v5391_v7 = vld [vmem:[%s13866_s28 + $0x238] sm:$0xff] }
 0xc74   : > { %v10409_v56 = vcombine.high %v5390_v50, %v5398_v2  ;;  %v10408_v52 = vcombine.low %v5390_v50, %v5398_v2  ;;  %v10410_v32 = vcombine.low %v5391_v7, %v5399_v1 }
 0xc75   : > { %7137 = vmatpush2.bf16.msra.mxu1 %v10516_v16  ;;  %v5374_v16 = vld [vmem:[%s13866_s28 + $0x1b0] sm:$0xff] }
 0xc76   : > { %7180 = vmatpush2.bf16.msra.mxu0 %v10518_v53  ;;  %7138 = vmatprep.subr.bf16.mxu1 %v10501_v36  ;;  %v5382_v53 = vld [vmem:[%s13866_s28 + $0x1f0] sm:$0xff]  ;;  %v5375_v36 = vld [vmem:[%s13866_s28 + $0x1b8] sm:$0xff] }
 0xc77   : > { %7181 = vmatprep.subr.bf16.mxu0 %v10503_v61  ;;  %v5383_v61 = vld [vmem:[%s13866_s28 + $0x1f8] sm:$0xff]  ;;  %v10393_v49 = vcombine.high %v5374_v16, %v5382_v53  ;;  %v10392_v63 = vcombine.low %v5374_v16, %v5382_v53 }
 0xc78   : > { %v10395_v20 = vcombine.high %v5375_v36, %v5383_v61  ;;  %v10394_v5 = vcombine.low %v5375_v36, %v5383_v61 }
 0xc79   : > { %7139 = vmatpush2.bf16.msra.mxu1 %v10500_v21  ;;  %v5358_v21 = vld [vmem:[%s13866_s28 + $0x130] sm:$0xff] }
 0xc7a   : > { %7182 = vmatpush2.bf16.msra.mxu0 %v10502_v54  ;;  %7140 = vmatprep.subr.bf16.mxu1 %v10485_v51  ;;  %v5366_v54 = vld [vmem:[%s13866_s28 + $0x170] sm:$0xff]  ;;  %v5359_v51 = vld [vmem:[%s13866_s28 + $0x138] sm:$0xff] }
 0xc7b   : > { %7183 = vmatprep.subr.bf16.mxu0 %v10487_v46  ;;  %v5367_v46 = vld [vmem:[%s13866_s28 + $0x178] sm:$0xff]  ;;  %v10377_v40 = vcombine.high %v5358_v21, %v5366_v54  ;;  %v10376_v22 = vcombine.low %v5358_v21, %v5366_v54 }
 0xc7c   : > { %v10379_v57 = vcombine.high %v5359_v51, %v5367_v46  ;;  %v10378_v26 = vcombine.low %v5359_v51, %v5367_v46 }
 0xc7d   : > { %7141 = vmatpush2.bf16.msra.mxu1 %v10484_v55  ;;  %v5342_v55 = vld [vmem:[%s13866_s28 + $0xb0] sm:$0xff] }
 0xc7e   : > { %7184 = vmatpush2.bf16.msra.mxu0 %v10486_v15  ;;  %7142 = vmatprep.subr.bf16.mxu1 %v10469_v48  ;;  %v5350_v15 = vld [vmem:[%s13866_s28 + $0xf0] sm:$0xff]  ;;  %v5343_v48 = vld [vmem:[%s13866_s28 + $0xb8] sm:$0xff] }
 0xc7f   : > { %7185 = vmatprep.subr.bf16.mxu0 %v10471_v4  ;;  %v5351_v4 = vld [vmem:[%s13866_s28 + $0xf8] sm:$0xff]  ;;  %v10361_v23 = vcombine.high %v5342_v55, %v5350_v15  ;;  %v10360_v9 = vcombine.low %v5342_v55, %v5350_v15 }
 0xc80   : > { %v10363_v44 = vcombine.high %v5343_v48, %v5351_v4  ;;  %v10362_v35 = vcombine.low %v5343_v48, %v5351_v4 }
 0xc81   : > { %7143 = vmatpush2.bf16.msra.mxu1 %v10468_v12  ;;  %v5326_v12 = vld [vmem:[%s13866_s28 + $0x30] sm:$0xff] }
 0xc82   : > { %7186 = vmatpush2.bf16.msra.mxu0 %v10470_v43  ;;  %7198 = vmatprep.subr.bf16.mxu1 %v10457_v14  ;;  %v5334_v43 = vld [vmem:[%s13866_s28 + $0x70] sm:$0xff]  ;;  %v5327_v14 = vld [vmem:[%s13866_s28 + $0x38] sm:$0xff] }
 0xc83   : > { %7241 = vmatprep.subr.bf16.mxu0 %v10459_v8  ;;  %v5335_v8 = vld [vmem:[%s13866_s28 + $0x78] sm:$0xff]  ;;  %v10344_v41 = vcombine.low %v5326_v12, %v5334_v43 }
 0xc84   : > { %7145 = vmatmul.mubr.bf16.vlgmr.msra.gmra.mxu1 %v14685_v45  ;;  %v10347_v33 = vcombine.high %v5327_v14, %v5335_v8 }
 0xc85   : > { %7188 = vmatmul.mubr.bf16.vlgmr.msra.gmra.mxu0 %v14685_v45  ;;  %7199 = vmatpush1.bf16.msra.mxu1 %v10456_v38  ;;  %v10345_v38 = vcombine.high %v5326_v12, %v5334_v43 }
 0xc86   : > { %7230 = vmatprep.mubr.bf16.mxu1 %v14689_v10  ;;  %7242 = vmatpush1.bf16.msra.mxu0 %v10458_v27  ;;  %v5574_v27 = vld [vmem:[%s13866_s28 + $0x7f0] sm:$0xff] }
 0xc87   : > { %7273 = vmatprep.mubr.bf16.mxu0 %v14689_v10  ;;  %7200 = vmatprep.subr.bf16.mxu1 %v10441_v37  ;;  %v10411_v10 = vcombine.high %v5391_v7, %v5399_v1  ;;  %v5567_v37 = vld [vmem:[%s13866_s28 + $0x7b8] sm:$0xff]  ;;  %v10585_v29 = vcombine.high %v5566_v30, %v5574_v27  ;;  %v10584_v50 = vcombine.low %v5566_v30, %v5574_v27 }
 0xc88   : > { %7243 = vmatprep.subr.bf16.mxu0 %v10443_v47  ;;  %v10346_v47 = vcombine.low %v5327_v14, %v5335_v8  ;;  %v10587_v39 = vcombine.high %v5567_v37, %v5575_v31  ;;  %v10586_v2 = vcombine.low %v5567_v37, %v5575_v31 }
 0xc89   : > { %7201 = vmatpush1.bf16.msra.mxu1 %v10440_v25  ;;  %v5550_v25 = vld [vmem:[%s13866_s28 + $0x730] sm:$0xff] }
 0xc8a   : > { %7244 = vmatpush1.bf16.msra.mxu0 %v10442_v24  ;;  %7202 = vmatprep.subr.bf16.mxu1 %v10425_v28  ;;  %v5558_v24 = vld [vmem:[%s13866_s28 + $0x770] sm:$0xff]  ;;  %v5551_v28 = vld [vmem:[%s13866_s28 + $0x738] sm:$0xff] }
 0xc8b   : > { %7245 = vmatprep.subr.bf16.mxu0 %v10427_v60  ;;  %v5559_v60 = vld [vmem:[%s13866_s28 + $0x778] sm:$0xff]  ;;  %v10569_v7 = vcombine.high %v5550_v25, %v5558_v24  ;;  %v10568_v16 = vcombine.low %v5550_v25, %v5558_v24 }
 0xc8c   : > { %v10571_v1 = vcombine.high %v5551_v28, %v5559_v60  ;;  %v10570_v53 = vcombine.low %v5551_v28, %v5559_v60 }
 0xc8d   : > { %7203 = vmatpush1.bf16.msra.mxu1 %v10424_v0  ;;  %v5534_v0 = vld [vmem:[%s13866_s28 + $0x6b0] sm:$0xff] }
 0xc8e   : > { %7246 = vmatpush1.bf16.msra.mxu0 %v10426_v58  ;;  %7204 = vmatprep.subr.bf16.mxu1 %v10409_v56  ;;  %v5542_v58 = vld [vmem:[%s13866_s28 + $0x6f0] sm:$0xff]  ;;  %v5535_v56 = vld [vmem:[%s13866_s28 + $0x6b8] sm:$0xff] }
 0xc8f   : > { %7247 = vmatprep.subr.bf16.mxu0 %v10411_v10  ;;  %v5543_v10 = vld [vmem:[%s13866_s28 + $0x6f8] sm:$0xff]  ;;  %v10553_v36 = vcombine.high %v5534_v0, %v5542_v58  ;;  %v10552_v21 = vcombine.low %v5534_v0, %v5542_v58 }
 0xc90   : > { %v10555_v61 = vcombine.high %v5535_v56, %v5543_v10  ;;  %v10554_v54 = vcombine.low %v5535_v56, %v5543_v10  ;;  %v11818_v0 = vld [vmem:[%s13875_s17 + $0x70] ss:$8 sps:$4 sm:$0xff]   ;;  %v11826_v56 = vld [vmem:[%s13875_s17 + $0x64] ss:$8 sps:$4 sm:$0xff]  }
 0xc91   : > { %7205 = vmatpush1.bf16.msra.mxu1 %v10408_v52  ;;  %v5518_v52 = vld [vmem:[%s13866_s28 + $0x630] sm:$0xff]  ;;  %v11829_v10 = vld [vmem:[%s13875_s17 + $0x164] ss:$8 sps:$4 sm:$0xff]  }
 0xc92   : > { %7248 = vmatpush1.bf16.msra.mxu0 %v10410_v32  ;;  %7206 = vmatprep.subr.bf16.mxu1 %v10393_v49  ;;  %v5526_v32 = vld [vmem:[%s13866_s28 + $0x670] sm:$0xff]  ;;  %v5519_v49 = vld [vmem:[%s13866_s28 + $0x638] sm:$0xff] }
 0xc93   : > { %7249 = vmatprep.subr.bf16.mxu0 %v10395_v20  ;;  %v5527_v20 = vld [vmem:[%s13866_s28 + $0x678] sm:$0xff]  ;;  %v10537_v51 = vcombine.high %v5518_v52, %v5526_v32  ;;  %v10536_v55 = vcombine.low %v5518_v52, %v5526_v32  ;;  %v11824_v32 = vld [vmem:[%s13875_s17 + $0x60] ss:$8 sps:$4 sm:$0xff]  }
 0xc94   : > { %v10539_v46 = vcombine.high %v5519_v49, %v5527_v20  ;;  %v10538_v15 = vcombine.low %v5519_v49, %v5527_v20  ;;  %v11821_v58 = vld [vmem:[%s13875_s17 + $0x170] ss:$8 sps:$4 sm:$0xff]  }
 0xc95   : > { %7207 = vmatpush1.bf16.msra.mxu1 %v10392_v63  ;;  %v5502_v63 = vld [vmem:[%s13866_s28 + $0x5b0] sm:$0xff] }
 0xc96   : > { %7250 = vmatpush1.bf16.msra.mxu0 %v10394_v5  ;;  %7208 = vmatprep.subr.bf16.mxu1 %v10377_v40  ;;  %v5510_v5 = vld [vmem:[%s13866_s28 + $0x5f0] sm:$0xff]  ;;  %v5503_v40 = vld [vmem:[%s13866_s28 + $0x5b8] sm:$0xff] }
 0xc97   : > { %7251 = vmatprep.subr.bf16.mxu0 %v10379_v57  ;;  %v5511_v57 = vld [vmem:[%s13866_s28 + $0x5f8] sm:$0xff]  ;;  %v10521_v48 = vcombine.high %v5502_v63, %v5510_v5  ;;  %v10520_v12 = vcombine.low %v5502_v63, %v5510_v5 }
 0xc98   : > { %v10523_v4 = vcombine.high %v5503_v40, %v5511_v57  ;;  %v10522_v43 = vcombine.low %v5503_v40, %v5511_v57  ;;  %v11830_v40 = vld [vmem:[%s13875_s17 + $0x50] ss:$8 sps:$4 sm:$0xff]  }
 0xc99   : > { %7209 = vmatpush1.bf16.msra.mxu1 %v10376_v22  ;;  %v5486_v22 = vld [vmem:[%s13866_s28 + $0x530] sm:$0xff] }
 0xc9a   : > { %7252 = vmatpush1.bf16.msra.mxu0 %v10378_v26  ;;  %7210 = vmatprep.subr.bf16.mxu1 %v10361_v23  ;;  %v5494_v26 = vld [vmem:[%s13866_s28 + $0x570] sm:$0xff]  ;;  %v5487_v23 = vld [vmem:[%s13866_s28 + $0x538] sm:$0xff] }
 0xc9b   : > { %7253 = vmatprep.subr.bf16.mxu0 %v10363_v44  ;;  %v5495_v44 = vld [vmem:[%s13866_s28 + $0x578] sm:$0xff]  ;;  %v10505_v14 = vcombine.high %v5486_v22, %v5494_v26  ;;  %v10504_v30 = vcombine.low %v5486_v22, %v5494_v26  ;;  %v11841_v26 = vld [vmem:[%s13875_s17 + $0x144] ss:$8 sps:$4 sm:$0xff]  }
 0xc9c   : > { %v10507_v8 = vcombine.high %v5487_v23, %v5495_v44  ;;  %v10506_v27 = vcombine.low %v5487_v23, %v5495_v44 }
 0xc9d   : > { %7211 = vmatpush1.bf16.msra.mxu1 %v10360_v9  ;;  %v5470_v9 = vld [vmem:[%s13866_s28 + $0x4b0] sm:$0xff] }
 0xc9e   : > { %7254 = vmatpush1.bf16.msra.mxu0 %v10362_v35  ;;  %7212 = vmatprep.subr.bf16.mxu1 %v10345_v38  ;;  %v5478_v35 = vld [vmem:[%s13866_s28 + $0x4f0] sm:$0xff]  ;;  %v5471_v38 = vld [vmem:[%s13866_s28 + $0x4b8] sm:$0xff] }
 0xc9f   : > { %7255 = vmatprep.subr.bf16.mxu0 %v10347_v33  ;;  %v5479_v33 = vld [vmem:[%s13866_s28 + $0x4f8] sm:$0xff]  ;;  %v10489_v37 = vcombine.high %v5470_v9, %v5478_v35  ;;  %v10488_v25 = vcombine.low %v5470_v9, %v5478_v35 }
 0xca0   : > { %v10491_v31 = vcombine.high %v5471_v38, %v5479_v33  ;;  %v10490_v24 = vcombine.low %v5471_v38, %v5479_v33  ;;  %v11844_v38 = vld [vmem:[%s13875_s17 + $0x34] ss:$8 sps:$4 sm:$0xff]  }
 0xca1   : > { %7213 = vmatpush1.bf16.msra.mxu1 %v10344_v41  ;;  %v5454_v41 = vld [vmem:[%s13866_s28 + $0x430] sm:$0xff] }
 0xca2   : > { %7256 = vmatpush1.bf16.msra.mxu0 %v10346_v47  ;;  %7214 = vmatprep.subr.bf16.mxu1 %v10585_v29  ;;  %v5462_v47 = vld [vmem:[%s13866_s28 + $0x470] sm:$0xff]  ;;  %v5455_v29 = vld [vmem:[%s13866_s28 + $0x438] sm:$0xff] }
 0xca3   : > { %7257 = vmatprep.subr.bf16.mxu0 %v10587_v39  ;;  %v5463_v39 = vld [vmem:[%s13866_s28 + $0x478] sm:$0xff]  ;;  %v10473_v28 = vcombine.high %v5454_v41, %v5462_v47 }
 0xca4   : > { %v10475_v60 = vcombine.high %v5455_v29, %v5463_v39  ;;  %v11847_v33 = vld [vmem:[%s13875_s17 + $0x134] ss:$8 sps:$4 sm:$0xff]  }
 0xca5   : > { %7215 = vmatpush2.bf16.msra.mxu1 %v10584_v50  ;;  %v10472_v50 = vcombine.low %v5454_v41, %v5462_v47  ;;  %v11848_v41 = vld [vmem:[%s13875_s17 + $0x20] ss:$8 sps:$4 sm:$0xff]  }
 0xca6   : > { %7258 = vmatpush2.bf16.msra.mxu0 %v10586_v2  ;;  %7216 = vmatprep.subr.bf16.mxu1 %v10569_v7  ;;  %v10474_v2 = vcombine.low %v5455_v29, %v5463_v39  ;;  %v11820_v7 = vld [vmem:[%s13875_s17 + $0x74] ss:$8 sps:$4 sm:$0xff]   ;;  %v11851_v47 = vld [vmem:[%s13875_s17 + $0x120] ss:$8 sps:$4 sm:$0xff]  }
 0xca7   : > { %7259 = vmatprep.subr.bf16.mxu0 %v10571_v1  ;;  %v11823_v1 = vld [vmem:[%s13875_s17 + $0x174] ss:$8 sps:$4 sm:$0xff]  }
 0xca8   : > { %v11856_v29 = vld [vmem:[%s13875_s17 + $0x14] ss:$8 sps:$4 sm:$0xff]  }
 0xca9   : > { %7217 = vmatpush2.bf16.msra.mxu1 %v10568_v16  ;;  %v14897_v16 = vld [vmem:[%s13872_s24] sm:$0xff] }
 0xcaa   : > { %7260 = vmatpush2.bf16.msra.mxu0 %v10570_v53  ;;  %7218 = vmatprep.subr.bf16.mxu1 %v10553_v36  ;;  %v5595_v52 = vrot.slane %v14897_v16, %v14498_v62  ;;  %v11859_v39 = vld [vmem:[%s13875_s17 + $0x114] ss:$8 sps:$4 sm:$0xff]  }
 0xcab   : > { %7261 = vmatprep.subr.bf16.mxu0 %v10555_v61  ;;  %v5587_v61 = vrot.slane %v14897_v16, %v14495_v59 }
 0xcad   : > { %7219 = vmatpush2.bf16.msra.mxu1 %v10552_v21  ;;  %v11827_v21 = vld [vmem:[%s13875_s17 + $0x160] ss:$8 sps:$4 sm:$0xff]  }
 0xcae   : > { %7262 = vmatpush2.bf16.msra.mxu0 %v10554_v54  ;;  %7220 = vmatprep.subr.bf16.mxu1 %v10537_v51  ;;  %v11832_v54 = vld [vmem:[%s13875_s17 + $0x54] ss:$8 sps:$4 sm:$0xff]  }
 0xcaf   : > { %7263 = vmatprep.subr.bf16.mxu0 %v10539_v46  ;;  %v11835_v51 = vld [vmem:[%s13875_s17 + $0x154] ss:$8 sps:$4 sm:$0xff]  }
 0xcb1   : > { %7221 = vmatpush2.bf16.msra.mxu1 %v10536_v55 }
 0xcb2   : > { %7264 = vmatpush2.bf16.msra.mxu0 %v10538_v15  ;;  %7222 = vmatprep.subr.bf16.mxu1 %v10521_v48  ;;  %v11833_v15 = vld [vmem:[%s13875_s17 + $0x150] ss:$8 sps:$4 sm:$0xff]   ;;  %v11838_v48 = vld [vmem:[%s13875_s17 + $0x44] ss:$8 sps:$4 sm:$0xff]  }
 0xcb3   : > { %7265 = vmatprep.subr.bf16.mxu0 %v10523_v4 }
 0xcb5   : > { %7223 = vmatpush2.bf16.msra.mxu1 %v10520_v12 }
 0xcb6   : > { %7266 = vmatpush2.bf16.msra.mxu0 %v10522_v43  ;;  %7224 = vmatprep.subr.bf16.mxu1 %v10505_v14  ;;  %v11836_v14 = vld [vmem:[%s13875_s17 + $0x40] ss:$8 sps:$4 sm:$0xff]  }
 0xcb7   : > { %7267 = vmatprep.subr.bf16.mxu0 %v10507_v8  ;;  %v11839_v8 = vld [vmem:[%s13875_s17 + $0x140] ss:$8 sps:$4 sm:$0xff]  }
 0xcb9   : > { %7225 = vmatpush2.bf16.msra.mxu1 %v10504_v30  ;;  %v11842_v30 = vld [vmem:[%s13875_s17 + $0x30] ss:$8 sps:$4 sm:$0xff]  }
 0xcba   : > { %7268 = vmatpush2.bf16.msra.mxu0 %v10506_v27  ;;  %7226 = vmatprep.subr.bf16.mxu1 %v10489_v37  ;;  %v11845_v27 = vld [vmem:[%s13875_s17 + $0x130] ss:$8 sps:$4 sm:$0xff]   ;;  %v11850_v37 = vld [vmem:[%s13875_s17 + $0x24] ss:$8 sps:$4 sm:$0xff]  }
 0xcbb   : > { %7269 = vmatprep.subr.bf16.mxu0 %v10491_v31  ;;  %v11853_v31 = vld [vmem:[%s13875_s17 + $0x124] ss:$8 sps:$4 sm:$0xff]  }
 0xcbd   : > { %7227 = vmatpush2.bf16.msra.mxu1 %v10488_v25  ;;  %v11854_v25 = vld [vmem:[%s13875_s17 + $0x10] ss:$8 sps:$4 sm:$0xff]  }
 0xcbe   : > { %7270 = vmatpush2.bf16.msra.mxu0 %v10490_v24  ;;  %7228 = vmatprep.subr.bf16.mxu1 %v10473_v28  ;;  %v11857_v24 = vld [vmem:[%s13875_s17 + $0x110] ss:$8 sps:$4 sm:$0xff]   ;;  %v11862_v28 = vld [vmem:[%s13875_s17 + $0x4] ss:$8 sps:$4 sm:$0xff]  }
 0xcbf   : > { %7271 = vmatprep.subr.bf16.mxu0 %v10475_v60  ;;  %v11865_v60 = vld [vmem:[%s13875_s17 + $0x104] ss:$8 sps:$4 sm:$0xff]  }
 0xcc1   : > { %7229 = vmatpush2.bf16.msra.mxu1 %v10472_v50  ;;  %v11860_v50 = vld [vmem:[%s13875_s17] ss:$8 sps:$4 sm:$0xff]  }
 0xcc2   : > { %7272 = vmatpush2.bf16.msra.mxu0 %v10474_v2  ;;  %8880 = vmatprep.subr.bf16.mxu1 %v11820_v7  ;;  %v11863_v2 = vld [vmem:[%s13875_s17 + $0x100] ss:$8 sps:$4 sm:$0xff]   ;;  %v11868_v7 = vld [vmem:[%s13875_s17 + $0xf4] ss:$8 sps:$4 sm:$0xff]  }
 0xcc3   : > { %8923 = vmatprep.subr.bf16.mxu0 %v11823_v1  ;;  %v11871_v1 = vld [vmem:[%s13875_s17 + $0x1f4] ss:$8 sps:$4 sm:$0xff]  }
 0xcc4   : > { %7231 = vmatmul.mubr.bf16.vlgmr.msra.gmra.mxu1 %v14685_v45  ;;  %v14899_v53 = vpop.f32.mrf.mxu1  ;;  %v14901_v36 = vpop.f32.mrf.mxu0 }
 0xcc5   : > { %7274 = vmatmul.mubr.bf16.vlgmr.msra.gmra.mxu0 %v14685_v45  ;;  %8881 = vmatpush1.bf16.msra.mxu1 %v11818_v0  ;;  %v11866_v0 = vld [vmem:[%s13875_s17 + $0xf0] ss:$8 sps:$4 sm:$0xff]  }
 0xcc6   : > { %8924 = vmatpush1.bf16.msra.mxu0 %v11821_v58  ;;  %v6976_v49 = vpop.f32.mrf.mxu1  ;;  %v7019_v20 = vpop.f32.mrf.mxu0  ;;  %8882 = vmatprep.subr.bf16.mxu1 %v11826_v56  ;;  %v11869_v58 = vld [vmem:[%s13875_s17 + $0x1f0] ss:$8 sps:$4 sm:$0xff]   ;;  %v11874_v56 = vld [vmem:[%s13875_s17 + $0xe4] ss:$8 sps:$4 sm:$0xff]  }
 0xcc7   : > { %8925 = vmatprep.subr.bf16.mxu0 %v11829_v10  ;;  %v6977_v63 = vadd.f32 %v6976_v49, %v5587_v61  ;;  %v7020_v5 = vadd.f32 %v7019_v20, %v5595_v52  ;;  %v11877_v10 = vld [vmem:[%s13875_s17 + $0x1e4] ss:$8 sps:$4 sm:$0xff]   ;;  %v11883_v49 = vld [vmem:[%s13875_s17 + $0x1d4] ss:$8 sps:$4 sm:$0xff]   ;;  %v11878_v20 = vld [vmem:[%s13875_s17 + $0xd0] ss:$8 sps:$4 sm:$0xff]  }
 0xcc8   : > { %v14912_v45 = vpop.f32.mrf.mxu1  ;;  %v14914_v46 = vpop.f32.mrf.mxu0 }
 0xcc9   : > { %8883 = vmatpush1.bf16.msra.mxu1 %v11824_v32  ;;  %v7285_v23 = vmax.f32 %v6977_v63, 0.0  ;;  %v7287_v44 = vmax.f32 %v7020_v5, 0.0  ;;  %v11880_v32 = vld [vmem:[%s13875_s17 + $0xd4] ss:$8 sps:$4 sm:$0xff]   ;;  %v11884_v63 = vld [vmem:[%s13875_s17 + $0xc0] ss:$8 sps:$4 sm:$0xff]  }
 0xcca   : > { %8926 = vmatpush1.bf16.msra.mxu0 %v11827_v21  ;;  %v6980_v57 = vpop.f32.mrf.mxu1  ;;  %v7023_v55 = vpop.f32.mrf.mxu0  ;;  %8884 = vmatprep.subr.bf16.mxu1 %v11832_v54  ;;  %v11881_v21 = vld [vmem:[%s13875_s17 + $0x1d0] ss:$8 sps:$4 sm:$0xff]   ;;  %v11886_v54 = vld [vmem:[%s13875_s17 + $0xc4] ss:$8 sps:$4 sm:$0xff]   ;;  %v11887_v5 = vld [vmem:[%s13875_s17 + $0x1c0] ss:$8 sps:$4 sm:$0xff]  }
 0xccb   : > { %v6981_v4 = vadd.f32 %v6980_v57, %v5587_v61  ;;  %v7024_v22 = vadd.f32 %v7023_v55, %v5595_v52  ;;  %8927 = vmatprep.subr.bf16.mxu0 %v11835_v51  ;;  %v11872_v61 = vld [vmem:[%s13875_s17 + $0xe0] ss:$8 sps:$4 sm:$0xff]   ;;  %v11889_v51 = vld [vmem:[%s13875_s17 + $0x1c4] ss:$8 sps:$4 sm:$0xff]   ;;  %v11895_v57 = vld [vmem:[%s13875_s17 + $0x1b4] ss:$8 sps:$4 sm:$0xff]  }
 0xccc   : > { %v11875_v52 = vld [vmem:[%s13875_s17 + $0x1e0] ss:$8 sps:$4 sm:$0xff]   ;;  %v11890_v55 = vld [vmem:[%s13875_s17 + $0xb0] ss:$8 sps:$4 sm:$0xff]  }
 0xccd   : > { %v7301_v12 = vmax.f32 %v6981_v4, 0.0  ;;  %v7303_v43 = vmax.f32 %v7024_v22, 0.0  ;;  %8885 = vmatpush1.bf16.msra.mxu1 %v11830_v40  ;;  %v11892_v40 = vld [vmem:[%s13875_s17 + $0xb4] ss:$8 sps:$4 sm:$0xff]   ;;  %v11901_v4 = vld [vmem:[%s13875_s17 + $0x1a4] ss:$8 sps:$4 sm:$0xff]  }
 0xcce   : > { %8928 = vmatpush1.bf16.msra.mxu0 %v11833_v15  ;;  %8886 = vmatprep.subr.bf16.mxu1 %v11838_v48  ;;  %v11893_v15 = vld [vmem:[%s13875_s17 + $0x1b0] ss:$8 sps:$4 sm:$0xff]   ;;  %v11898_v48 = vld [vmem:[%s13875_s17 + $0xa4] ss:$8 sps:$4 sm:$0xff]   ;;  %v11896_v22 = vld [vmem:[%s13875_s17 + $0xa0] ss:$8 sps:$4 sm:$0xff]  }
 0xccf   : > { %v7317_v9 = vpack.c.bf16 %v7301_v12, %v7285_v23  ;;  %v7319_v35 = vpack.c.bf16 %v7303_v43, %v7287_v44  ;;  %8929 = vmatprep.subr.bf16.mxu0 %v11841_v26  ;;  %v11899_v26 = vld [vmem:[%s13875_s17 + $0x1a0] ss:$8 sps:$4 sm:$0xff]   ;;  %v11904_v23 = vld [vmem:[%s13875_s17 + $0x94] ss:$8 sps:$4 sm:$0xff]   ;;  %v5583_v12 = vrot.slane %v14897_v16, %v14501_v18  ;;  %v5591_v43 = vrot.slane %v14897_v16, %v14504_v19 }
 0xcd0   : > { %v11907_v44 = vld [vmem:[%s13875_s17 + $0x194] ss:$8 sps:$4 sm:$0xff]  }
 0xcd1   : > { %8887 = vmatpush1.bf16.msra.mxu1 %v11836_v14  ;;  %8912 = vmatprep.mubr.bf16.mxu1 %v7317_v9  ;;  %v11902_v14 = vld [vmem:[%s13875_s17 + $0x90] ss:$8 sps:$4 sm:$0xff]  }
 0xcd2   : > { %8930 = vmatpush1.bf16.msra.mxu0 %v11839_v8  ;;  %8955 = vmatprep.mubr.bf16.mxu0 %v7319_v35  ;;  %v6979_v8 = vadd.f32 %v14912_v45, %v5583_v12  ;;  %v11905_v9 = vld [vmem:[%s13875_s17 + $0x190] ss:$8 sps:$4 sm:$0xff]   ;;  %v11910_v35 = vld [vmem:[%s13875_s17 + $0x84] ss:$8 sps:$4 sm:$0xff]   ;;  %v11911_v45 = vld [vmem:[%s13875_s17 + $0x180] ss:$8 sps:$4 sm:$0xff]  }
 0xcd3   : > { %8888 = vmatprep.subr.bf16.mxu1 %v11844_v38  ;;  %8931 = vmatprep.subr.bf16.mxu0 %v11847_v33  ;;  %v7022_v38 = vadd.f32 %v14914_v46, %v5591_v43  ;;  %v11913_v33 = vld [vmem:[%s13875_s17 + $0x184] ss:$8 sps:$4 sm:$0xff]   ;;  %v11919_v46 = vld [vmem:[%s13875_s17 + $0x374] ss:$8 sps:$4 sm:$0xff]  }
 0xcd5   : > { %8889 = vmatpush1.bf16.msra.mxu1 %v11842_v30  ;;  %v6975_v30 = vadd.f32 %v14899_v53, %v5583_v12  ;;  %v5610_v53 = vsub.s32 7, %v14492_v6  ;;  %v11935_v12 = vld [vmem:[%s13875_s17 + $0x340] ss:$8 sps:$4 sm:$0xff]  }
 0xcd6   : > { %8932 = vmatpush1.bf16.msra.mxu0 %v11845_v27  ;;  %8890 = vmatprep.subr.bf16.mxu1 %v11850_v37  ;;  %v7018_v27 = vadd.f32 %v14901_v36, %v5591_v43  ;;  %v11908_v37 = vld [vmem:[%s13875_s17 + $0x80] ss:$8 sps:$4 sm:$0xff]  }
 0xcd7   : > { %8933 = vmatprep.subr.bf16.mxu0 %v11853_v31  ;;  %v7300_v31 = vmax.f32 %v6979_v8, 0.0  ;;  %v11940_v8 = vld [vmem:[%s13875_s17 + $0x234] ss:$8 sps:$4 sm:$0xff]  }
 0xcd9   : > { %8891 = vmatpush1.bf16.msra.mxu1 %v11848_v41  ;;  %v11916_v41 = vld [vmem:[%s13875_s17 + $0x274] ss:$8 sps:$4 sm:$0xff]  }
 0xcda   : > { %8934 = vmatpush1.bf16.msra.mxu0 %v11851_v47  ;;  %8892 = vmatprep.subr.bf16.mxu1 %v11856_v29  ;;  %v7302_v47 = vmax.f32 %v7022_v38, 0.0  ;;  %v7284_v29 = vmax.f32 %v6975_v30, 0.0  ;;  %v11941_v38 = vld [vmem:[%s13875_s17 + $0x330] ss:$8 sps:$4 sm:$0xff]   ;;  %v11949_v30 = vld [vmem:[%s13875_s17 + $0x324] ss:$8 sps:$4 sm:$0xff]  }
 0xcdb   : > { %8935 = vmatprep.subr.bf16.mxu0 %v11859_v39  ;;  %v7286_v39 = vmax.f32 %v7018_v27, 0.0  ;;  %v11944_v27 = vld [vmem:[%s13875_s17 + $0x220] ss:$8 sps:$4 sm:$0xff]  }
 0xcdc   : > { %v7316_v36 = vpack.c.bf16 %v7300_v31, %v7284_v29  ;;  %v11952_v31 = vld [vmem:[%s13875_s17 + $0x214] ss:$8 sps:$4 sm:$0xff]   ;;  %v11961_v29 = vld [vmem:[%s13875_s17 + $0x304] ss:$8 sps:$4 sm:$0xff]  }
 0xcdd   : > { %8893 = vmatpush1.bf16.msra.mxu1 %v11854_v25  ;;  %v11914_v25 = vld [vmem:[%s13875_s17 + $0x270] ss:$8 sps:$4 sm:$0xff]  }
 0xcde   : > { %8936 = vmatpush1.bf16.msra.mxu0 %v11857_v24  ;;  %8894 = vmatprep.subr.bf16.mxu1 %v11862_v28  ;;  %v11917_v24 = vld [vmem:[%s13875_s17 + $0x370] ss:$8 sps:$4 sm:$0xff]   ;;  %v11922_v28 = vld [vmem:[%s13875_s17 + $0x264] ss:$8 sps:$4 sm:$0xff]  }
 0xcdf   : > { %8937 = vmatprep.subr.bf16.mxu0 %v11865_v60  ;;  %v7318_v60 = vpack.c.bf16 %v7302_v47, %v7286_v39  ;;  %v11953_v47 = vld [vmem:[%s13875_s17 + $0x310] ss:$8 sps:$4 sm:$0xff]   ;;  %v11956_v39 = vld [vmem:[%s13875_s17 + $0x200] ss:$8 sps:$4 sm:$0xff]  }
 0xce1   : > { %8895 = vmatpush1.bf16.msra.mxu1 %v11860_v50  ;;  %v11925_v50 = vld [vmem:[%s13875_s17 + $0x364] ss:$8 sps:$4 sm:$0xff]  }
 0xce2   : > { %8938 = vmatpush1.bf16.msra.mxu0 %v11863_v2  ;;  %8896 = vmatprep.subr.bf16.mxu1 %v11868_v7 }
 0xce3   : > { %8939 = vmatprep.subr.bf16.mxu0 %v11871_v1  ;;  %v5603_v1 = vrot.slane %v14897_v16, %v14546_v34 }
 0xce5   : > { %8897 = vmatpush2.bf16.msra.mxu1 %v11866_v0  ;;  %v5611_v0 = vrot.slane %v14897_v16, %v5610_v53 }
 0xce6   : > { %8940 = vmatpush2.bf16.msra.mxu0 %v11869_v58  ;;  %8898 = vmatprep.subr.bf16.mxu1 %v11874_v56  ;;  %v11920_v58 = vld [vmem:[%s13875_s17 + $0x260] ss:$8 sps:$4 sm:$0xff]  }
 0xce7   : > { %8941 = vmatprep.subr.bf16.mxu0 %v11877_v10 }
 0xce9   : > { %8899 = vmatpush2.bf16.msra.mxu1 %v11872_v61  ;;  %v11923_v61 = vld [vmem:[%s13875_s17 + $0x360] ss:$8 sps:$4 sm:$0xff]  }
 0xcea   : > { %8942 = vmatpush2.bf16.msra.mxu0 %v11875_v52  ;;  %8900 = vmatprep.subr.bf16.mxu1 %v11880_v32  ;;  %v11928_v52 = vld [vmem:[%s13875_s17 + $0x254] ss:$8 sps:$4 sm:$0xff]  }
 0xceb   : > { %8943 = vmatprep.subr.bf16.mxu0 %v11883_v49  ;;  %v11931_v32 = vld [vmem:[%s13875_s17 + $0x354] ss:$8 sps:$4 sm:$0xff]  }
 0xced   : > { %8901 = vmatpush2.bf16.msra.mxu1 %v11878_v20 }
 0xcee   : > { %8944 = vmatpush2.bf16.msra.mxu0 %v11881_v21  ;;  %8902 = vmatprep.subr.bf16.mxu1 %v11886_v54 }
 0xcef   : > { %8945 = vmatprep.subr.bf16.mxu0 %v11889_v51  ;;  %v11926_v51 = vld [vmem:[%s13875_s17 + $0x250] ss:$8 sps:$4 sm:$0xff]  }
 0xcf1   : > { %8903 = vmatpush2.bf16.msra.mxu1 %v11884_v63 }
 0xcf2   : > { %8946 = vmatpush2.bf16.msra.mxu0 %v11887_v5  ;;  %8904 = vmatprep.subr.bf16.mxu1 %v11892_v40  ;;  %v11929_v40 = vld [vmem:[%s13875_s17 + $0x350] ss:$8 sps:$4 sm:$0xff]  }
 0xcf3   : > { %8947 = vmatprep.subr.bf16.mxu0 %v11895_v57  ;;  %v11934_v57 = vld [vmem:[%s13875_s17 + $0x244] ss:$8 sps:$4 sm:$0xff]  }
 0xcf5   : > { %8905 = vmatpush2.bf16.msra.mxu1 %v11890_v55 }
 0xcf6   : > { %8948 = vmatpush2.bf16.msra.mxu0 %v11893_v15  ;;  %8906 = vmatprep.subr.bf16.mxu1 %v11898_v48  ;;  %v11937_v48 = vld [vmem:[%s13875_s17 + $0x344] ss:$8 sps:$4 sm:$0xff]  }
 0xcf7   : > { %8949 = vmatprep.subr.bf16.mxu0 %v11901_v4 }
 0xcf9   : > { %8907 = vmatpush2.bf16.msra.mxu1 %v11896_v22 }
 0xcfa   : > { %8950 = vmatpush2.bf16.msra.mxu0 %v11899_v26  ;;  %8908 = vmatprep.subr.bf16.mxu1 %v11904_v23 }
 0xcfb   : > { %8951 = vmatprep.subr.bf16.mxu0 %v11907_v44  ;;  %v11932_v44 = vld [vmem:[%s13875_s17 + $0x240] ss:$8 sps:$4 sm:$0xff]  }
 0xcfd   : > { %8909 = vmatpush2.bf16.msra.mxu1 %v11902_v14 }
 0xcfe   : > { %8952 = vmatpush2.bf16.msra.mxu0 %v11905_v9  ;;  %8910 = vmatprep.subr.bf16.mxu1 %v11910_v35  ;;  %v11943_v9 = vld [vmem:[%s13875_s17 + $0x334] ss:$8 sps:$4 sm:$0xff]   ;;  %v11938_v35 = vld [vmem:[%s13875_s17 + $0x230] ss:$8 sps:$4 sm:$0xff]  }
 0xcff   : > { %8953 = vmatprep.subr.bf16.mxu0 %v11913_v33  ;;  %v11946_v33 = vld [vmem:[%s13875_s17 + $0x224] ss:$8 sps:$4 sm:$0xff]  }
 0xd01   : > { %8911 = vmatpush2.bf16.msra.mxu1 %v11908_v37  ;;  %v11947_v37 = vld [vmem:[%s13875_s17 + $0x320] ss:$8 sps:$4 sm:$0xff]  }
 0xd02   : > { %8954 = vmatpush2.bf16.msra.mxu0 %v11911_v45  ;;  %8966 = vmatprep.subr.bf16.mxu1 %v11916_v41  ;;  %v11955_v45 = vld [vmem:[%s13875_s17 + $0x314] ss:$8 sps:$4 sm:$0xff]   ;;  %v11950_v41 = vld [vmem:[%s13875_s17 + $0x210] ss:$8 sps:$4 sm:$0xff]  }
 0xd03   : > { %9009 = vmatprep.subr.bf16.mxu0 %v11919_v46  ;;  %v11958_v46 = vld [vmem:[%s13875_s17 + $0x204] ss:$8 sps:$4 sm:$0xff]  }
 0xd04   : > { %v14985_v2 = vpop.f32.mrf.mxu1  ;;  %v14987_v7 = vpop.f32.mrf.mxu0  ;;  %8913 = vmatmul.mubr.bf16.vlgmr.msra.gmra.mxu1 %v7316_v36  ;;  %v11964_v36 = vld [vmem:[%s13875_s17 + $0x2f4] ss:$8 sps:$4 sm:$0xff]  }
 0xd05   : > { %8956 = vmatmul.mubr.bf16.vlgmr.msra.gmra.mxu0 %v7318_v60  ;;  %8967 = vmatpush1.bf16.msra.mxu1 %v11914_v25  ;;  %v11959_v25 = vld [vmem:[%s13875_s17 + $0x300] ss:$8 sps:$4 sm:$0xff]   ;;  %v11965_v60 = vld [vmem:[%s13875_s17 + $0x3f0] ss:$8 sps:$4 sm:$0xff]  }
 0xd06   : > { %9010 = vmatpush1.bf16.msra.mxu0 %v11917_v24  ;;  %v7062_v56 = vpop.f32.mrf.mxu1  ;;  %v7105_v10 = vpop.f32.mrf.mxu0  ;;  %8968 = vmatprep.subr.bf16.mxu1 %v11922_v28  ;;  %v11967_v24 = vld [vmem:[%s13875_s17 + $0x3f4] ss:$8 sps:$4 sm:$0xff]   ;;  %v11962_v28 = vld [vmem:[%s13875_s17 + $0x2f0] ss:$8 sps:$4 sm:$0xff]  }
 0xd07   : > { %9011 = vmatprep.subr.bf16.mxu0 %v11925_v50  ;;  %v7063_v21 = vadd.f32 %v7062_v56, %v5603_v1  ;;  %v7106_v54 = vadd.f32 %v7105_v10, %v5611_v0  ;;  %v11970_v50 = vld [vmem:[%s13875_s17 + $0x2e4] ss:$8 sps:$4 sm:$0xff]   ;;  %v11976_v56 = vld [vmem:[%s13875_s17 + $0x2d4] ss:$8 sps:$4 sm:$0xff]  }
 0xd08   : > { %v14998_v49 = vpop.f32.mrf.mxu1  ;;  %v15000_v20 = vpop.f32.mrf.mxu0  ;;  %v11979_v10 = vld [vmem:[%s13875_s17 + $0x3d4] ss:$8 sps:$4 sm:$0xff]  }
 0xd09   : > { %8969 = vmatpush1.bf16.msra.mxu1 %v11920_v58  ;;  %v7289_v4 = vmax.f32 %v7063_v21, 0.0  ;;  %v7291_v22 = vmax.f32 %v7106_v54, 0.0  ;;  %v11971_v58 = vld [vmem:[%s13875_s17 + $0x3e0] ss:$8 sps:$4 sm:$0xff]   ;;  %v11985_v21 = vld [vmem:[%s13875_s17 + $0x3c4] ss:$8 sps:$4 sm:$0xff]  }
 0xd0a   : > { %9012 = vmatpush1.bf16.msra.mxu0 %v11923_v61  ;;  %v7066_v63 = vpop.f32.mrf.mxu1  ;;  %v7109_v5 = vpop.f32.mrf.mxu0  ;;  %8970 = vmatprep.subr.bf16.mxu1 %v11928_v52  ;;  %v11974_v61 = vld [vmem:[%s13875_s17 + $0x2d0] ss:$8 sps:$4 sm:$0xff]   ;;  %v11980_v54 = vld [vmem:[%s13875_s17 + $0x2c0] ss:$8 sps:$4 sm:$0xff]  }
 0xd0b   : > { %v7067_v55 = vadd.f32 %v7066_v63, %v5603_v1  ;;  %v7110_v15 = vadd.f32 %v7109_v5, %v5611_v0  ;;  %9013 = vmatprep.subr.bf16.mxu0 %v11931_v32  ;;  %v11973_v1 = vld [vmem:[%s13875_s17 + $0x3e4] ss:$8 sps:$4 sm:$0xff]   ;;  %v11968_v0 = vld [vmem:[%s13875_s17 + $0x2e0] ss:$8 sps:$4 sm:$0xff]   ;;  %v11977_v52 = vld [vmem:[%s13875_s17 + $0x3d0] ss:$8 sps:$4 sm:$0xff]  }
 0xd0c   : > { %v11982_v32 = vld [vmem:[%s13875_s17 + $0x2c4] ss:$8 sps:$4 sm:$0xff]   ;;  %v11988_v63 = vld [vmem:[%s13875_s17 + $0x2b4] ss:$8 sps:$4 sm:$0xff]  }
 0xd0d   : > { %v7305_v26 = vmax.f32 %v7067_v55, 0.0  ;;  %v7307_v23 = vmax.f32 %v7110_v15, 0.0  ;;  %8971 = vmatpush1.bf16.msra.mxu1 %v11926_v51  ;;  %v11983_v51 = vld [vmem:[%s13875_s17 + $0x3c0] ss:$8 sps:$4 sm:$0xff]   ;;  %v11991_v5 = vld [vmem:[%s13875_s17 + $0x3b4] ss:$8 sps:$4 sm:$0xff]  }
 0xd0e   : > { %9014 = vmatpush1.bf16.msra.mxu0 %v11929_v40  ;;  %8972 = vmatprep.subr.bf16.mxu1 %v11934_v57  ;;  %v11986_v40 = vld [vmem:[%s13875_s17 + $0x2b0] ss:$8 sps:$4 sm:$0xff]   ;;  %v11994_v55 = vld [vmem:[%s13875_s17 + $0x2a4] ss:$8 sps:$4 sm:$0xff]  }
 0xd0f   : > { %v7321_v43 = vpack.c.bf16 %v7305_v26, %v7289_v4  ;;  %v7323_v14 = vpack.c.bf16 %v7307_v23, %v7291_v22  ;;  %9015 = vmatprep.subr.bf16.mxu0 %v11937_v48  ;;  %v11989_v57 = vld [vmem:[%s13875_s17 + $0x3b0] ss:$8 sps:$4 sm:$0xff]   ;;  %v11997_v15 = vld [vmem:[%s13875_s17 + $0x3a4] ss:$8 sps:$4 sm:$0xff]   ;;  %v5606_v48 = vsub.s32 6, %v14492_v6 }
 0xd10   : > { %v11992_v4 = vld [vmem:[%s13875_s17 + $0x2a0] ss:$8 sps:$4 sm:$0xff]   ;;  %v12000_v26 = vld [vmem:[%s13875_s17 + $0x294] ss:$8 sps:$4 sm:$0xff]  }
 0xd11   : > { %8973 = vmatpush1.bf16.msra.mxu1 %v11932_v44  ;;  %8998 = vmatprep.mubr.bf16.mxu1 %v7321_v43  ;;  %v11995_v22 = vld [vmem:[%s13875_s17 + $0x3a0] ss:$8 sps:$4 sm:$0xff]   ;;  %v12003_v23 = vld [vmem:[%s13875_s17 + $0x394] ss:$8 sps:$4 sm:$0xff]   ;;  %v5599_v44 = vrot.slane %v14897_v16, %v14549_v42  ;;  %v11998_v43 = vld [vmem:[%s13875_s17 + $0x290] ss:$8 sps:$4 sm:$0xff]  }
 0xd12   : > { %9016 = vmatpush1.bf16.msra.mxu0 %v11935_v12  ;;  %9041 = vmatprep.mubr.bf16.mxu0 %v7323_v14  ;;  %v5607_v12 = vrot.slane %v14897_v16, %v5606_v48  ;;  %v12196_v6 = vld [vmem:[%s13875_s17 + $0x680] ss:$8 sps:$4 sm:$0xff]  }
 0xd13   : > { %8974 = vmatprep.subr.bf16.mxu1 %v11940_v8  ;;  %9017 = vmatprep.subr.bf16.mxu0 %v11943_v9  ;;  %v7065_v14 = vadd.f32 %v14998_v49, %v5599_v44  ;;  %v12001_v8 = vld [vmem:[%s13875_s17 + $0x390] ss:$8 sps:$4 sm:$0xff]   ;;  %v12006_v9 = vld [vmem:[%s13875_s17 + $0x284] ss:$8 sps:$4 sm:$0xff]   ;;  %v12007_v49 = vld [vmem:[%s13875_s17 + $0x380] ss:$8 sps:$4 sm:$0xff]  }
 0xd14   : > { %v7104_v16 = vadd.f32 %v14987_v7, %v5607_v12 }
 0xd15   : > { %8975 = vmatpush1.bf16.msra.mxu1 %v11938_v35  ;;  %v7108_v35 = vadd.f32 %v15000_v20, %v5607_v12  ;;  %v12015_v20 = vld [vmem:[%s13875_s17 + $0x574] ss:$8 sps:$4 sm:$0xff]  }
 0xd16   : > { %9018 = vmatpush1.bf16.msra.mxu0 %v11941_v38  ;;  %8976 = vmatprep.subr.bf16.mxu1 %v11946_v33  ;;  %v12009_v38 = vld [vmem:[%s13875_s17 + $0x384] ss:$8 sps:$4 sm:$0xff]   ;;  %v7061_v33 = vadd.f32 %v14985_v2, %v5599_v44  ;;  %v12010_v2 = vld [vmem:[%s13875_s17 + $0x470] ss:$8 sps:$4 sm:$0xff]   ;;  %v12031_v44 = vld [vmem:[%s13875_s17 + $0x540] ss:$8 sps:$4 sm:$0xff]  }
 0xd17   : > { %9019 = vmatprep.subr.bf16.mxu0 %v11949_v30  ;;  %v12004_v30 = vld [vmem:[%s13875_s17 + $0x280] ss:$8 sps:$4 sm:$0xff]  }
 0xd19   : > { %8977 = vmatpush1.bf16.msra.mxu1 %v11944_v27  ;;  %v7304_v27 = vmax.f32 %v7065_v14, 0.0  ;;  %v12039_v14 = vld [vmem:[%s13875_s17 + $0x534] ss:$8 sps:$4 sm:$0xff]  }
 0xd1a   : > { %9020 = vmatpush1.bf16.msra.mxu0 %v11947_v37  ;;  %8978 = vmatprep.subr.bf16.mxu1 %v11952_v31  ;;  %v12012_v37 = vld [vmem:[%s13875_s17 + $0x474] ss:$8 sps:$4 sm:$0xff]   ;;  %v7306_v31 = vmax.f32 %v7108_v35, 0.0  ;;  %v12037_v35 = vld [vmem:[%s13875_s17 + $0x530] ss:$8 sps:$4 sm:$0xff]  }
 0xd1b   : > { %9021 = vmatprep.subr.bf16.mxu0 %v11955_v45  ;;  %v7288_v45 = vmax.f32 %v7061_v33, 0.0  ;;  %v12045_v33 = vld [vmem:[%s13875_s17 + $0x524] ss:$8 sps:$4 sm:$0xff]  }
 0xd1d   : > { %8979 = vmatpush1.bf16.msra.mxu1 %v11950_v41  ;;  %v7290_v41 = vmax.f32 %v7104_v16, 0.0  ;;  %v7320_v7 = vpack.c.bf16 %v7304_v27, %v7288_v45  ;;  %v12040_v16 = vld [vmem:[%s13875_s17 + $0x420] ss:$8 sps:$4 sm:$0xff]   ;;  %v12048_v27 = vld [vmem:[%s13875_s17 + $0x414] ss:$8 sps:$4 sm:$0xff]  }
 0xd1e   : > { %9022 = vmatpush1.bf16.msra.mxu0 %v11953_v47  ;;  %8980 = vmatprep.subr.bf16.mxu1 %v11958_v46  ;;  %v12013_v47 = vld [vmem:[%s13875_s17 + $0x570] ss:$8 sps:$4 sm:$0xff]   ;;  %v12018_v46 = vld [vmem:[%s13875_s17 + $0x464] ss:$8 sps:$4 sm:$0xff]  }
 0xd1f   : > { %9023 = vmatprep.subr.bf16.mxu0 %v11961_v29  ;;  %v7322_v29 = vpack.c.bf16 %v7306_v31, %v7290_v41  ;;  %v12049_v31 = vld [vmem:[%s13875_s17 + $0x510] ss:$8 sps:$4 sm:$0xff]   ;;  %v12057_v45 = vld [vmem:[%s13875_s17 + $0x504] ss:$8 sps:$4 sm:$0xff]   ;;  %v12052_v41 = vld [vmem:[%s13875_s17 + $0x400] ss:$8 sps:$4 sm:$0xff]  }
 0xd21   : > { %8981 = vmatpush1.bf16.msra.mxu1 %v11956_v39  ;;  %v12021_v39 = vld [vmem:[%s13875_s17 + $0x564] ss:$8 sps:$4 sm:$0xff]  }
 0xd22   : > { %9024 = vmatpush1.bf16.msra.mxu0 %v11959_v25  ;;  %8982 = vmatprep.subr.bf16.mxu1 %v11964_v36  ;;  %v15073_v25 = vld [vmem:[%s13872_s24 + $0x8] sm:$0xff] }
 0xd23   : > { %9025 = vmatprep.subr.bf16.mxu0 %v11967_v24 }
 0xd25   : > { %8983 = vmatpush2.bf16.msra.mxu1 %v11962_v28  ;;  %v5619_v28 = vrot.slane %v15073_v25, %v14495_v59 }
 0xd26   : > { %9026 = vmatpush2.bf16.msra.mxu0 %v11965_v60  ;;  %8984 = vmatprep.subr.bf16.mxu1 %v11970_v50  ;;  %v12016_v60 = vld [vmem:[%s13875_s17 + $0x460] ss:$8 sps:$4 sm:$0xff]  }
 0xd27   : > { %9027 = vmatprep.subr.bf16.mxu0 %v11973_v1  ;;  %v5627_v1 = vrot.slane %v15073_v25, %v14498_v62 }
 0xd29   : > { %8985 = vmatpush2.bf16.msra.mxu1 %v11968_v0  ;;  %v12019_v0 = vld [vmem:[%s13875_s17 + $0x560] ss:$8 sps:$4 sm:$0xff]  }
 0xd2a   : > { %9028 = vmatpush2.bf16.msra.mxu0 %v11971_v58  ;;  %8986 = vmatprep.subr.bf16.mxu1 %v11976_v56  ;;  %v12024_v58 = vld [vmem:[%s13875_s17 + $0x454] ss:$8 sps:$4 sm:$0xff]  }
 0xd2b   : > { %9029 = vmatprep.subr.bf16.mxu0 %v11979_v10  ;;  %v12027_v10 = vld [vmem:[%s13875_s17 + $0x554] ss:$8 sps:$4 sm:$0xff]  }
 0xd2d   : > { %8987 = vmatpush2.bf16.msra.mxu1 %v11974_v61 }
 0xd2e   : > { %9030 = vmatpush2.bf16.msra.mxu0 %v11977_v52  ;;  %8988 = vmatprep.subr.bf16.mxu1 %v11982_v32 }
 0xd2f   : > { %9031 = vmatprep.subr.bf16.mxu0 %v11985_v21  ;;  %v12022_v21 = vld [vmem:[%s13875_s17 + $0x450] ss:$8 sps:$4 sm:$0xff]  }
 0xd31   : > { %8989 = vmatpush2.bf16.msra.mxu1 %v11980_v54 }
 0xd32   : > { %9032 = vmatpush2.bf16.msra.mxu0 %v11983_v51  ;;  %8990 = vmatprep.subr.bf16.mxu1 %v11988_v63  ;;  %v12025_v51 = vld [vmem:[%s13875_s17 + $0x550] ss:$8 sps:$4 sm:$0xff]   ;;  %v12030_v63 = vld [vmem:[%s13875_s17 + $0x444] ss:$8 sps:$4 sm:$0xff]  }
 0xd33   : > { %9033 = vmatprep.subr.bf16.mxu0 %v11991_v5 }
 0xd35   : > { %8991 = vmatpush2.bf16.msra.mxu1 %v11986_v40 }
 0xd36   : > { %9034 = vmatpush2.bf16.msra.mxu0 %v11989_v57  ;;  %8992 = vmatprep.subr.bf16.mxu1 %v11994_v55  ;;  %v12033_v57 = vld [vmem:[%s13875_s17 + $0x544] ss:$8 sps:$4 sm:$0xff]  }
 0xd37   : > { %9035 = vmatprep.subr.bf16.mxu0 %v11997_v15 }
 0xd39   : > { %8993 = vmatpush2.bf16.msra.mxu1 %v11992_v4 }
 0xd3a   : > { %9036 = vmatpush2.bf16.msra.mxu0 %v11995_v22  ;;  %8994 = vmatprep.subr.bf16.mxu1 %v12000_v26  ;;  %v12028_v22 = vld [vmem:[%s13875_s17 + $0x440] ss:$8 sps:$4 sm:$0xff]  }
 0xd3b   : > { %9037 = vmatprep.subr.bf16.mxu0 %v12003_v23 }
 0xd3d   : > { %8995 = vmatpush2.bf16.msra.mxu1 %v11998_v43  ;;  %v12036_v43 = vld [vmem:[%s13875_s17 + $0x434] ss:$8 sps:$4 sm:$0xff]  }
 0xd3e   : > { %9038 = vmatpush2.bf16.msra.mxu0 %v12001_v8  ;;  %8996 = vmatprep.subr.bf16.mxu1 %v12006_v9  ;;  %v12034_v9 = vld [vmem:[%s13875_s17 + $0x430] ss:$8 sps:$4 sm:$0xff]  }
 0xd3f   : > { %9039 = vmatprep.subr.bf16.mxu0 %v12009_v38  ;;  %v12042_v38 = vld [vmem:[%s13875_s17 + $0x424] ss:$8 sps:$4 sm:$0xff]  }
 0xd41   : > { %8997 = vmatpush2.bf16.msra.mxu1 %v12004_v30  ;;  %v12043_v30 = vld [vmem:[%s13875_s17 + $0x520] ss:$8 sps:$4 sm:$0xff]  }
 0xd42   : > { %9040 = vmatpush2.bf16.msra.mxu0 %v12007_v49  ;;  %9052 = vmatprep.subr.bf16.mxu1 %v12012_v37  ;;  %v12051_v49 = vld [vmem:[%s13875_s17 + $0x514] ss:$8 sps:$4 sm:$0xff]   ;;  %v12046_v37 = vld [vmem:[%s13875_s17 + $0x410] ss:$8 sps:$4 sm:$0xff]  }
 0xd43   : > { %9095 = vmatprep.subr.bf16.mxu0 %v12015_v20  ;;  %v12054_v20 = vld [vmem:[%s13875_s17 + $0x404] ss:$8 sps:$4 sm:$0xff]  }
 0xd44   : > { %v15075_v36 = vpop.f32.mrf.mxu1  ;;  %8999 = vmatmul.mubr.bf16.vlgmr.msra.gmra.mxu1 %v7320_v7  ;;  %v12060_v7 = vld [vmem:[%s13875_s17 + $0x4f4] ss:$8 sps:$4 sm:$0xff]  }
 0xd45   : > { %v15077_v24 = vpop.f32.mrf.mxu0  ;;  %9042 = vmatmul.mubr.bf16.vlgmr.msra.gmra.mxu0 %v7322_v29  ;;  %9053 = vmatpush1.bf16.msra.mxu1 %v12010_v2  ;;  %v12055_v2 = vld [vmem:[%s13875_s17 + $0x500] ss:$8 sps:$4 sm:$0xff]   ;;  %v12061_v29 = vld [vmem:[%s13875_s17 + $0x5f0] ss:$8 sps:$4 sm:$0xff]  }
 0xd46   : > { %9096 = vmatpush1.bf16.msra.mxu0 %v12013_v47  ;;  %v7148_v50 = vpop.f32.mrf.mxu1  ;;  %9054 = vmatprep.subr.bf16.mxu1 %v12018_v46  ;;  %v12063_v47 = vld [vmem:[%s13875_s17 + $0x5f4] ss:$8 sps:$4 sm:$0xff]   ;;  %v12058_v46 = vld [vmem:[%s13875_s17 + $0x4f0] ss:$8 sps:$4 sm:$0xff]  }
 0xd47   : > { %v7191_v56 = vpop.f32.mrf.mxu0  ;;  %9097 = vmatprep.subr.bf16.mxu0 %v12021_v39  ;;  %v7149_v52 = vadd.f32 %v7148_v50, %v5619_v28  ;;  %v12066_v39 = vld [vmem:[%s13875_s17 + $0x4e4] ss:$8 sps:$4 sm:$0xff]   ;;  %v12067_v50 = vld [vmem:[%s13875_s17 + $0x5e0] ss:$8 sps:$4 sm:$0xff]  }
 0xd48   : > { %v15087_v61 = vpop.f32.mrf.mxu1  ;;  %v7192_v54 = vadd.f32 %v7191_v56, %v5627_v1  ;;  %v12073_v56 = vld [vmem:[%s13875_s17 + $0x5d0] ss:$8 sps:$4 sm:$0xff]  }
 0xd49   : > { %v15089_v32 = vpop.f32.mrf.mxu0  ;;  %9055 = vmatpush1.bf16.msra.mxu1 %v12016_v60  ;;  %v7293_v15 = vmax.f32 %v7149_v52, 0.0  ;;  %v12064_v60 = vld [vmem:[%s13875_s17 + $0x4e0] ss:$8 sps:$4 sm:$0xff]   ;;  %v12081_v52 = vld [vmem:[%s13875_s17 + $0x5c4] ss:$8 sps:$4 sm:$0xff]  }
 0xd4a   : > { %9098 = vmatpush1.bf16.msra.mxu0 %v12019_v0  ;;  %v7152_v62 = vpop.f32.mrf.mxu1  ;;  %9056 = vmatprep.subr.bf16.mxu1 %v12024_v58  ;;  %v7295_v26 = vmax.f32 %v7192_v54, 0.0  ;;  %v12075_v0 = vld [vmem:[%s13875_s17 + $0x5d4] ss:$8 sps:$4 sm:$0xff]   ;;  %v12070_v58 = vld [vmem:[%s13875_s17 + $0x4d0] ss:$8 sps:$4 sm:$0xff]  }
 0xd4b   : > { %v7153_v5 = vadd.f32 %v7152_v62, %v5619_v28  ;;  %v7195_v40 = vpop.f32.mrf.mxu0  ;;  %9099 = vmatprep.subr.bf16.mxu0 %v12027_v10  ;;  %v12069_v28 = vld [vmem:[%s13875_s17 + $0x5e4] ss:$8 sps:$4 sm:$0xff]   ;;  %v12079_v54 = vld [vmem:[%s13875_s17 + $0x5c0] ss:$8 sps:$4 sm:$0xff]   ;;  %v12084_v62 = vld [vmem:[%s13875_s17 + $0x4b4] ss:$8 sps:$4 sm:$0xff]  }
 0xd4c   : > { %v7196_v55 = vadd.f32 %v7195_v40, %v5627_v1  ;;  %v12072_v1 = vld [vmem:[%s13875_s17 + $0x4d4] ss:$8 sps:$4 sm:$0xff]   ;;  %v12078_v10 = vld [vmem:[%s13875_s17 + $0x4c4] ss:$8 sps:$4 sm:$0xff]  }
 0xd4d   : > { %v7309_v4 = vmax.f32 %v7153_v5, 0.0  ;;  %9057 = vmatpush1.bf16.msra.mxu1 %v12022_v21  ;;  %v12076_v21 = vld [vmem:[%s13875_s17 + $0x4c0] ss:$8 sps:$4 sm:$0xff]   ;;  %v12085_v5 = vld [vmem:[%s13875_s17 + $0x5b0] ss:$8 sps:$4 sm:$0xff]  }
 0xd4e   : > { %v7311_v23 = vmax.f32 %v7196_v55, 0.0  ;;  %9100 = vmatpush1.bf16.msra.mxu0 %v12025_v51  ;;  %9058 = vmatprep.subr.bf16.mxu1 %v12030_v63  ;;  %v12087_v51 = vld [vmem:[%s13875_s17 + $0x5b4] ss:$8 sps:$4 sm:$0xff]   ;;  %v12082_v63 = vld [vmem:[%s13875_s17 + $0x4b0] ss:$8 sps:$4 sm:$0xff]  }
 0xd4f   : > { %v7325_v12 = vpack.c.bf16 %v7309_v4, %v7293_v15  ;;  %9101 = vmatprep.subr.bf16.mxu0 %v12033_v57  ;;  %v12090_v40 = vld [vmem:[%s13875_s17 + $0x4a4] ss:$8 sps:$4 sm:$0xff]   ;;  %v12088_v55 = vld [vmem:[%s13875_s17 + $0x4a0] ss:$8 sps:$4 sm:$0xff]   ;;  %v12096_v4 = vld [vmem:[%s13875_s17 + $0x494] ss:$8 sps:$4 sm:$0xff]  }
 0xd50   : > { %v7327_v8 = vpack.c.bf16 %v7311_v23, %v7295_v26  ;;  %v12093_v57 = vld [vmem:[%s13875_s17 + $0x5a4] ss:$8 sps:$4 sm:$0xff]   ;;  %v12091_v15 = vld [vmem:[%s13875_s17 + $0x5a0] ss:$8 sps:$4 sm:$0xff]   ;;  %v5615_v26 = vrot.slane %v15073_v25, %v14501_v18  ;;  %v5623_v23 = vrot.slane %v15073_v25, %v14504_v19 }
 0xd51   : > { %9059 = vmatpush1.bf16.msra.mxu1 %v12028_v22  ;;  %9084 = vmatprep.mubr.bf16.mxu1 %v7325_v12  ;;  %v12099_v22 = vld [vmem:[%s13875_s17 + $0x594] ss:$8 sps:$4 sm:$0xff]  }
 0xd52   : > { %9102 = vmatpush1.bf16.msra.mxu0 %v12031_v44  ;;  %9127 = vmatprep.mubr.bf16.mxu0 %v7327_v8  ;;  %v12094_v44 = vld [vmem:[%s13875_s17 + $0x490] ss:$8 sps:$4 sm:$0xff]   ;;  %v7151_v12 = vadd.f32 %v15087_v61, %v5615_v26  ;;  %v7194_v8 = vadd.f32 %v15089_v32, %v5623_v23  ;;  %v7190_v19 = vadd.f32 %v15077_v24, %v5623_v23  ;;  %v12103_v61 = vld [vmem:[%s13875_s17 + $0x580] ss:$8 sps:$4 sm:$0xff]   ;;  %v12111_v32 = vld [vmem:[%s13875_s17 + $0x774] ss:$8 sps:$4 sm:$0xff]  }
 0xd53   : > { %9060 = vmatprep.subr.bf16.mxu1 %v12036_v43  ;;  %9103 = vmatprep.subr.bf16.mxu0 %v12039_v14  ;;  %v12097_v43 = vld [vmem:[%s13875_s17 + $0x590] ss:$8 sps:$4 sm:$0xff]   ;;  %v12102_v14 = vld [vmem:[%s13875_s17 + $0x484] ss:$8 sps:$4 sm:$0xff]  }
 0xd54   : > { %v12109_v24 = vld [vmem:[%s13875_s17 + $0x770] ss:$8 sps:$4 sm:$0xff]  }
 0xd55   : > { %9061 = vmatpush1.bf16.msra.mxu1 %v12034_v9  ;;  %v12105_v9 = vld [vmem:[%s13875_s17 + $0x584] ss:$8 sps:$4 sm:$0xff]  }
 0xd56   : > { %9104 = vmatpush1.bf16.msra.mxu0 %v12037_v35  ;;  %9062 = vmatprep.subr.bf16.mxu1 %v12042_v38  ;;  %v7147_v35 = vadd.f32 %v15075_v36, %v5615_v26  ;;  %v12100_v38 = vld [vmem:[%s13875_s17 + $0x480] ss:$8 sps:$4 sm:$0xff]   ;;  %v12106_v36 = vld [vmem:[%s13875_s17 + $0x670] ss:$8 sps:$4 sm:$0xff]   ;;  %v12135_v26 = vld [vmem:[%s13875_s17 + $0x734] ss:$8 sps:$4 sm:$0xff]  }
 0xd57   : > { %9105 = vmatprep.subr.bf16.mxu0 %v12045_v33  ;;  %v7308_v33 = vmax.f32 %v7151_v12, 0.0  ;;  %v12133_v12 = vld [vmem:[%s13875_s17 + $0x730] ss:$8 sps:$4 sm:$0xff]  }
 0xd59   : > { %9063 = vmatpush1.bf16.msra.mxu1 %v12040_v16  ;;  %v12108_v16 = vld [vmem:[%s13875_s17 + $0x674] ss:$8 sps:$4 sm:$0xff]  }
 0xd5a   : > { %9106 = vmatpush1.bf16.msra.mxu0 %v12043_v30  ;;  %9064 = vmatprep.subr.bf16.mxu1 %v12048_v27  ;;  %v7310_v30 = vmax.f32 %v7194_v8, 0.0  ;;  %v7292_v27 = vmax.f32 %v7147_v35, 0.0  ;;  %v12136_v8 = vld [vmem:[%s13875_s17 + $0x620] ss:$8 sps:$4 sm:$0xff]   ;;  %v12144_v35 = vld [vmem:[%s13875_s17 + $0x614] ss:$8 sps:$4 sm:$0xff]  }
 0xd5b   : > { %9107 = vmatprep.subr.bf16.mxu0 %v12051_v49  ;;  %v7294_v49 = vmax.f32 %v7190_v19, 0.0  ;;  %v12147_v19 = vld [vmem:[%s13875_s17 + $0x714] ss:$8 sps:$4 sm:$0xff]  }
 0xd5d   : > { %9065 = vmatpush1.bf16.msra.mxu1 %v12046_v37  ;;  %v7324_v37 = vpack.c.bf16 %v7308_v33, %v7292_v27  ;;  %v12145_v33 = vld [vmem:[%s13875_s17 + $0x710] ss:$8 sps:$4 sm:$0xff]   ;;  %v12156_v27 = vld [vmem:[%s13875_s17 + $0x6f4] ss:$8 sps:$4 sm:$0xff]  }
 0xd5e   : > { %9108 = vmatpush1.bf16.msra.mxu0 %v12049_v31  ;;  %9066 = vmatprep.subr.bf16.mxu1 %v12054_v20  ;;  %v12114_v31 = vld [vmem:[%s13875_s17 + $0x664] ss:$8 sps:$4 sm:$0xff]   ;;  %v7326_v20 = vpack.c.bf16 %v7310_v30, %v7294_v49  ;;  %v12148_v30 = vld [vmem:[%s13875_s17 + $0x600] ss:$8 sps:$4 sm:$0xff]   ;;  %v12159_v49 = vld [vmem:[%s13875_s17 + $0x7f4] ss:$8 sps:$4 sm:$0xff]  }
 0xd5f   : > { %9109 = vmatprep.subr.bf16.mxu0 %v12057_v45  ;;  %v12117_v45 = vld [vmem:[%s13875_s17 + $0x764] ss:$8 sps:$4 sm:$0xff]  }
 0xd61   : > { %9067 = vmatpush1.bf16.msra.mxu1 %v12052_v41 }
 0xd62   : > { %9110 = vmatpush1.bf16.msra.mxu0 %v12055_v2  ;;  %9068 = vmatprep.subr.bf16.mxu1 %v12060_v7  ;;  %v5635_v7 = vrot.slane %v15073_v25, %v14546_v34 }
 0xd63   : > { %9111 = vmatprep.subr.bf16.mxu0 %v12063_v47  ;;  %v12112_v47 = vld [vmem:[%s13875_s17 + $0x660] ss:$8 sps:$4 sm:$0xff]  }
 0xd65   : > { %9069 = vmatpush2.bf16.msra.mxu1 %v12058_v46 }
 0xd66   : > { %9112 = vmatpush2.bf16.msra.mxu0 %v12061_v29  ;;  %9070 = vmatprep.subr.bf16.mxu1 %v12066_v39  ;;  %v5643_v29 = vrot.slane %v15073_v25, %v5610_v53  ;;  %v12115_v39 = vld [vmem:[%s13875_s17 + $0x760] ss:$8 sps:$4 sm:$0xff]  }
 0xd67   : > { %9113 = vmatprep.subr.bf16.mxu0 %v12069_v28  ;;  %v12120_v28 = vld [vmem:[%s13875_s17 + $0x654] ss:$8 sps:$4 sm:$0xff]  }
 0xd69   : > { %9071 = vmatpush2.bf16.msra.mxu1 %v12064_v60 }
 0xd6a   : > { %9114 = vmatpush2.bf16.msra.mxu0 %v12067_v50  ;;  %9072 = vmatprep.subr.bf16.mxu1 %v12072_v1  ;;  %v12123_v50 = vld [vmem:[%s13875_s17 + $0x754] ss:$8 sps:$4 sm:$0xff]  }
 0xd6b   : > { %9115 = vmatprep.subr.bf16.mxu0 %v12075_v0 }
 0xd6d   : > { %9073 = vmatpush2.bf16.msra.mxu1 %v12070_v58  ;;  %v12118_v58 = vld [vmem:[%s13875_s17 + $0x650] ss:$8 sps:$4 sm:$0xff]  }
 0xd6e   : > { %9116 = vmatpush2.bf16.msra.mxu0 %v12073_v56  ;;  %9074 = vmatprep.subr.bf16.mxu1 %v12078_v10  ;;  %v12121_v10 = vld [vmem:[%s13875_s17 + $0x750] ss:$8 sps:$4 sm:$0xff]  }
 0xd6f   : > { %9117 = vmatprep.subr.bf16.mxu0 %v12081_v52  ;;  %v12126_v52 = vld [vmem:[%s13875_s17 + $0x644] ss:$8 sps:$4 sm:$0xff]  }
 0xd71   : > { %9075 = vmatpush2.bf16.msra.mxu1 %v12076_v21 }
 0xd72   : > { %9118 = vmatpush2.bf16.msra.mxu0 %v12079_v54  ;;  %9076 = vmatprep.subr.bf16.mxu1 %v12084_v62  ;;  %v12129_v62 = vld [vmem:[%s13875_s17 + $0x744] ss:$8 sps:$4 sm:$0xff]  }
 0xd73   : > { %9119 = vmatprep.subr.bf16.mxu0 %v12087_v51 }
 0xd75   : > { %9077 = vmatpush2.bf16.msra.mxu1 %v12082_v63 }
 0xd76   : > { %9120 = vmatpush2.bf16.msra.mxu0 %v12085_v5  ;;  %9078 = vmatprep.subr.bf16.mxu1 %v12090_v40  ;;  %v12124_v40 = vld [vmem:[%s13875_s17 + $0x640] ss:$8 sps:$4 sm:$0xff]  }
 0xd77   : > { %9121 = vmatprep.subr.bf16.mxu0 %v12093_v57 }
 0xd79   : > { %9079 = vmatpush2.bf16.msra.mxu1 %v12088_v55 }
 0xd7a   : > { %9122 = vmatpush2.bf16.msra.mxu0 %v12091_v15  ;;  %9080 = vmatprep.subr.bf16.mxu1 %v12096_v4  ;;  %v12127_v15 = vld [vmem:[%s13875_s17 + $0x740] ss:$8 sps:$4 sm:$0xff]  }
 0xd7b   : > { %9123 = vmatprep.subr.bf16.mxu0 %v12099_v22  ;;  %v12132_v22 = vld [vmem:[%s13875_s17 + $0x634] ss:$8 sps:$4 sm:$0xff]  }
 0xd7d   : > { %9081 = vmatpush2.bf16.msra.mxu1 %v12094_v44  ;;  %v12130_v44 = vld [vmem:[%s13875_s17 + $0x630] ss:$8 sps:$4 sm:$0xff]  }
 0xd7e   : > { %9124 = vmatpush2.bf16.msra.mxu0 %v12097_v43  ;;  %9082 = vmatprep.subr.bf16.mxu1 %v12102_v14  ;;  %v12138_v43 = vld [vmem:[%s13875_s17 + $0x624] ss:$8 sps:$4 sm:$0xff]  }
 0xd7f   : > { %9125 = vmatprep.subr.bf16.mxu0 %v12105_v9  ;;  %v12141_v14 = vld [vmem:[%s13875_s17 + $0x724] ss:$8 sps:$4 sm:$0xff]   ;;  %v12139_v9 = vld [vmem:[%s13875_s17 + $0x720] ss:$8 sps:$4 sm:$0xff]  }
 0xd81   : > { %9083 = vmatpush2.bf16.msra.mxu1 %v12100_v38  ;;  %v12142_v38 = vld [vmem:[%s13875_s17 + $0x610] ss:$8 sps:$4 sm:$0xff]  }
 0xd82   : > { %9126 = vmatpush2.bf16.msra.mxu0 %v12103_v61  ;;  %9138 = vmatprep.subr.bf16.mxu1 %v12108_v16  ;;  %v12150_v61 = vld [vmem:[%s13875_s17 + $0x604] ss:$8 sps:$4 sm:$0xff]  }
 0xd83   : > { %9181 = vmatprep.subr.bf16.mxu0 %v12111_v32  ;;  %v12153_v16 = vld [vmem:[%s13875_s17 + $0x704] ss:$8 sps:$4 sm:$0xff]   ;;  %v12151_v32 = vld [vmem:[%s13875_s17 + $0x700] ss:$8 sps:$4 sm:$0xff]  }
 0xd84   : > { %v15159_v41 = vpop.f32.mrf.mxu1  ;;  %9085 = vmatmul.mubr.bf16.vlgmr.msra.gmra.mxu1 %v7324_v37  ;;  %v12157_v37 = vld [vmem:[%s13875_s17 + $0x7f0] ss:$8 sps:$4 sm:$0xff]  }
 0xd85   : > { %v15161_v2 = vpop.f32.mrf.mxu0  ;;  %9128 = vmatmul.mubr.bf16.vlgmr.msra.gmra.mxu0 %v7326_v20  ;;  %9139 = vmatpush1.bf16.msra.mxu1 %v12106_v36  ;;  %v12154_v36 = vld [vmem:[%s13875_s17 + $0x6f0] ss:$8 sps:$4 sm:$0xff]   ;;  %v12160_v20 = vld [vmem:[%s13875_s17 + $0x6e0] ss:$8 sps:$4 sm:$0xff]  }
 0xd86   : > { %9182 = vmatpush1.bf16.msra.mxu0 %v12109_v24  ;;  %v7234_v46 = vpop.f32.mrf.mxu1  ;;  %9140 = vmatprep.subr.bf16.mxu1 %v12114_v31  ;;  %v12162_v24 = vld [vmem:[%s13875_s17 + $0x6e4] ss:$8 sps:$4 sm:$0xff]  }
 0xd87   : > { %v7277_v60 = vpop.f32.mrf.mxu0  ;;  %9183 = vmatprep.subr.bf16.mxu0 %v12117_v45  ;;  %v7235_v0 = vadd.f32 %v7234_v46, %v5635_v7  ;;  %v12165_v31 = vld [vmem:[%s13875_s17 + $0x7e4] ss:$8 sps:$4 sm:$0xff]   ;;  %v12163_v45 = vld [vmem:[%s13875_s17 + $0x7e0] ss:$8 sps:$4 sm:$0xff]   ;;  %v12166_v46 = vld [vmem:[%s13875_s17 + $0x6d0] ss:$8 sps:$4 sm:$0xff]  }
 0xd88   : > { %v15172_v1 = vpop.f32.mrf.mxu1  ;;  %v7278_v56 = vadd.f32 %v7277_v60, %v5643_v29  ;;  %v12172_v60 = vld [vmem:[%s13875_s17 + $0x6c0] ss:$8 sps:$4 sm:$0xff]  }
 0xd89   : > { %v15174_v34 = vpop.f32.mrf.mxu0  ;;  %9141 = vmatpush1.bf16.msra.mxu1 %v12112_v47  ;;  %v7297_v63 = vmax.f32 %v7235_v0, 0.0  ;;  %v12171_v47 = vld [vmem:[%s13875_s17 + $0x7d4] ss:$8 sps:$4 sm:$0xff]  }
 0xd8a   : > { %9184 = vmatpush1.bf16.msra.mxu0 %v12115_v39  ;;  %v7238_v53 = vpop.f32.mrf.mxu1  ;;  %9142 = vmatprep.subr.bf16.mxu1 %v12120_v28  ;;  %v7299_v57 = vmax.f32 %v7278_v56, 0.0  ;;  %v12174_v39 = vld [vmem:[%s13875_s17 + $0x6c4] ss:$8 sps:$4 sm:$0xff]   ;;  %v12180_v0 = vld [vmem:[%s13875_s17 + $0x6b4] ss:$8 sps:$4 sm:$0xff]  }
 0xd8b   : > { %v7239_v21 = vadd.f32 %v7238_v53, %v5635_v7  ;;  %v7281_v54 = vpop.f32.mrf.mxu0  ;;  %9185 = vmatprep.subr.bf16.mxu0 %v12123_v50  ;;  %v12168_v7 = vld [vmem:[%s13875_s17 + $0x6d4] ss:$8 sps:$4 sm:$0xff]   ;;  %v12177_v28 = vld [vmem:[%s13875_s17 + $0x7c4] ss:$8 sps:$4 sm:$0xff]   ;;  %v12175_v50 = vld [vmem:[%s13875_s17 + $0x7c0] ss:$8 sps:$4 sm:$0xff]  }
 0xd8c   : > { %v7282_v51 = vadd.f32 %v7281_v54, %v5643_v29  ;;  %v12169_v29 = vld [vmem:[%s13875_s17 + $0x7d0] ss:$8 sps:$4 sm:$0xff]   ;;  %v12187_v54 = vld [vmem:[%s13875_s17 + $0x7a0] ss:$8 sps:$4 sm:$0xff]  }
 0xd8d   : > { %v7313_v5 = vmax.f32 %v7239_v21, 0.0  ;;  %9143 = vmatpush1.bf16.msra.mxu1 %v12118_v58  ;;  %v12183_v58 = vld [vmem:[%s13875_s17 + $0x7b4] ss:$8 sps:$4 sm:$0xff]   ;;  %v12178_v56 = vld [vmem:[%s13875_s17 + $0x6b0] ss:$8 sps:$4 sm:$0xff]  }
 0xd8e   : > { %v7315_v55 = vmax.f32 %v7282_v51, 0.0  ;;  %9186 = vmatpush1.bf16.msra.mxu0 %v12121_v10  ;;  %9144 = vmatprep.subr.bf16.mxu1 %v12126_v52  ;;  %v12181_v53 = vld [vmem:[%s13875_s17 + $0x7b0] ss:$8 sps:$4 sm:$0xff]   ;;  %v12186_v10 = vld [vmem:[%s13875_s17 + $0x6a4] ss:$8 sps:$4 sm:$0xff]  }
 0xd8f   : > { %v7329_v4 = vpack.c.bf16 %v7313_v5, %v7297_v63  ;;  %9187 = vmatprep.subr.bf16.mxu0 %v12129_v62  ;;  %v12189_v52 = vld [vmem:[%s13875_s17 + $0x7a4] ss:$8 sps:$4 sm:$0xff]   ;;  %v12184_v21 = vld [vmem:[%s13875_s17 + $0x6a0] ss:$8 sps:$4 sm:$0xff]   ;;  %v12192_v62 = vld [vmem:[%s13875_s17 + $0x694] ss:$8 sps:$4 sm:$0xff]   ;;  %v5631_v63 = vrot.slane %v15073_v25, %v14549_v42  ;;  %v5639_v5 = vrot.slane %v15073_v25, %v5606_v48 }
 0xd90   : > { %v7331_v23 = vpack.c.bf16 %v7315_v55, %v7299_v57  ;;  %v12195_v51 = vld [vmem:[%s13875_s17 + $0x794] ss:$8 sps:$4 sm:$0xff]   ;;  %v12193_v55 = vld [vmem:[%s13875_s17 + $0x790] ss:$8 sps:$4 sm:$0xff]   ;;  %v12199_v25 = vld [vmem:[%s13875_s17 + $0x780] ss:$8 sps:$4 sm:$0xff]  }
 0xd91   : > { %9145 = vmatpush1.bf16.msra.mxu1 %v12124_v40  ;;  %9170 = vmatprep.mubr.bf16.mxu1 %v7329_v4  ;;  %v12190_v40 = vld [vmem:[%s13875_s17 + $0x690] ss:$8 sps:$4 sm:$0xff]   ;;  %v7237_v57 = vadd.f32 %v15172_v1, %v5631_v63  ;;  %v7280_v4 = vadd.f32 %v15174_v34, %v5639_v5  ;;  %v7276_v42 = vadd.f32 %v15161_v2, %v5639_v5 }
 0xd92   : > { %9188 = vmatpush1.bf16.msra.mxu0 %v12127_v15  ;;  %9213 = vmatprep.mubr.bf16.mxu0 %v7331_v23  ;;  %v12198_v15 = vld [vmem:[%s13875_s17 + $0x684] ss:$8 sps:$4 sm:$0xff]  }
 0xd93   : > { %9146 = vmatprep.subr.bf16.mxu1 %v12132_v22  ;;  %9189 = vmatprep.subr.bf16.mxu0 %v12135_v26  ;;  %v12201_v22 = vld [vmem:[%s13875_s17 + $0x784] ss:$8 sps:$4 sm:$0xff]   ;;  %v7233_v26 = vadd.f32 %v15159_v41, %v5631_v63  ;;  %v7312_v48 = vmax.f32 %v7237_v57, 0.0  ;;  %v7314_v23 = vmax.f32 %v7280_v4, 0.0 }
 0xd95   : > { %9147 = vmatpush1.bf16.msra.mxu1 %v12130_v44  ;;  %v7296_v1 = vmax.f32 %v7233_v26, 0.0  ;;  %v7298_v44 = vmax.f32 %v7276_v42, 0.0 }
 0xd96   : > { %9190 = vmatpush1.bf16.msra.mxu0 %v12133_v12  ;;  %9148 = vmatprep.subr.bf16.mxu1 %v12138_v43 }
 0xd97   : > { %9191 = vmatprep.subr.bf16.mxu0 %v12141_v14  ;;  %v7328_v12 = vpack.c.bf16 %v7312_v48, %v7296_v1  ;;  %v7330_v34 = vpack.c.bf16 %v7314_v23, %v7298_v44 }
 0xd99   : > { %9149 = vmatpush1.bf16.msra.mxu1 %v12136_v8 }
 0xd9a   : > { %9192 = vmatpush1.bf16.msra.mxu0 %v12139_v9  ;;  %9150 = vmatprep.subr.bf16.mxu1 %v12144_v35 }
 0xd9b   : > { %9193 = vmatprep.subr.bf16.mxu0 %v12147_v19 }
 0xd9d   : > { %9151 = vmatpush1.bf16.msra.mxu1 %v12142_v38 }
 0xd9e   : > { %9194 = vmatpush1.bf16.msra.mxu0 %v12145_v33  ;;  %9152 = vmatprep.subr.bf16.mxu1 %v12150_v61  ;;  %v7588_v61 = vld [vmem:[%s1285_s1] sm:$0x3] }
 0xd9f   : > { %9195 = vmatprep.subr.bf16.mxu0 %v12153_v16 }
 0xda1   : > { %9153 = vmatpush1.bf16.msra.mxu1 %v12148_v30 }
 0xda2   : > { %9196 = vmatpush1.bf16.msra.mxu0 %v12151_v32  ;;  %9154 = vmatprep.subr.bf16.mxu1 %v12156_v27  ;;  %v7593_v32 = vrot.slane %v7588_v61, %v14501_v18 }
 0xda3   : > { %9197 = vmatprep.subr.bf16.mxu0 %v12159_v49  ;;  %v7597_v49 = vrot.slane %v7588_v61, %v14495_v59 }
 0xda5   : > { %9155 = vmatpush2.bf16.msra.mxu1 %v12154_v36 }
 0xda6   : > { %9198 = vmatpush2.bf16.msra.mxu0 %v12157_v37  ;;  %9156 = vmatprep.subr.bf16.mxu1 %v12162_v24 }
 0xda7   : > { %9199 = vmatprep.subr.bf16.mxu0 %v12165_v31 }
 0xda9   : > { %9157 = vmatpush2.bf16.msra.mxu1 %v12160_v20 }
 0xdaa   : > { %9200 = vmatpush2.bf16.msra.mxu0 %v12163_v45  ;;  %9158 = vmatprep.subr.bf16.mxu1 %v12168_v7 }
 0xdab   : > { %9201 = vmatprep.subr.bf16.mxu0 %v12171_v47 }
 0xdad   : > { %9159 = vmatpush2.bf16.msra.mxu1 %v12166_v46 }
 0xdae   : > { %9202 = vmatpush2.bf16.msra.mxu0 %v12169_v29  ;;  %9160 = vmatprep.subr.bf16.mxu1 %v12174_v39 }
 0xdaf   : > { %9203 = vmatprep.subr.bf16.mxu0 %v12177_v28 }
 0xdb1   : > { %9161 = vmatpush2.bf16.msra.mxu1 %v12172_v60 }
 0xdb2   : > { %9204 = vmatpush2.bf16.msra.mxu0 %v12175_v50  ;;  %9162 = vmatprep.subr.bf16.mxu1 %v12180_v0 }
 0xdb3   : > { %9205 = vmatprep.subr.bf16.mxu0 %v12183_v58 }
 0xdb5   : > { %9163 = vmatpush2.bf16.msra.mxu1 %v12178_v56 }
 0xdb6   : > { %9206 = vmatpush2.bf16.msra.mxu0 %v12181_v53  ;;  %9164 = vmatprep.subr.bf16.mxu1 %v12186_v10 }
 0xdb7   : > { %9207 = vmatprep.subr.bf16.mxu0 %v12189_v52 }
 0xdb9   : > { %9165 = vmatpush2.bf16.msra.mxu1 %v12184_v21 }
 0xdba   : > { %9208 = vmatpush2.bf16.msra.mxu0 %v12187_v54  ;;  %9166 = vmatprep.subr.bf16.mxu1 %v12192_v62 }
 0xdbb   : > { %9209 = vmatprep.subr.bf16.mxu0 %v12195_v51 }
 0xdbd   : > { %9167 = vmatpush2.bf16.msra.mxu1 %v12190_v40 }
 0xdbe   : > { %9210 = vmatpush2.bf16.msra.mxu0 %v12193_v55  ;;  %9168 = vmatprep.subr.bf16.mxu1 %v12198_v15 }
 0xdbf   : > { %9211 = vmatprep.subr.bf16.mxu0 %v12201_v22 }
 0xdc1   : > { %9169 = vmatpush2.bf16.msra.mxu1 %v12196_v6 }
 0xdc2   : > { %9212 = vmatpush2.bf16.msra.mxu0 %v12199_v25 }
 0xdc4   : > { %9171 = vmatmul.mubr.bf16.vlgmr.msra.gmra.mxu1 %v7328_v12  ;;  %v8914_v41 = vpop.f32.mrf.mxu1 }
 0xdc5   : > { %9214 = vmatmul.mubr.bf16.vlgmr.msra.gmra.mxu0 %v7330_v34  ;;  %v8957_v43 = vpop.f32.mrf.mxu0  ;;  %v8915_v37 = vadd.f32 %v8914_v41, %v7593_v32 }
 0xdc6   : > { %v8916_v2 = vpop.f32.mrf.mxu1 }
 0xdc7   : > { %v8959_v14 = vpop.f32.mrf.mxu0  ;;  %v8917_v31 = vadd.f32 %v8916_v2, %v7597_v49  ;;  %v8958_v7 = vadd.f32 %v8957_v43, %v8915_v37 }
 0xdc8   : > { %v8918_v8 = vpop.f32.mrf.mxu1 }
 0xdc9   : > { %v8961_v9 = vpop.f32.mrf.mxu0  ;;  %v8919_v47 = vadd.f32 %v8918_v8, %v7593_v32  ;;  %v8960_v29 = vadd.f32 %v8959_v14, %v8917_v31 }
 0xdca   : > { %v8920_v35 = vpop.f32.mrf.mxu1 }
 0xdcb   : > { %v8963_v19 = vpop.f32.mrf.mxu0  ;;  %v8921_v39 = vadd.f32 %v8920_v35, %v7597_v49  ;;  %v8962_v50 = vadd.f32 %v8961_v9, %v8919_v47 }
 0xdcd   : > { %v8964_v56 = vadd.f32 %v8963_v19, %v8921_v39 }
 0xe04   : > { %v9000_v38 = vpop.f32.mrf.mxu1 }
 0xe05   : > { %v9043_v33 = vpop.f32.mrf.mxu0  ;;  %v9001_v28 = vadd.f32 %v9000_v38, %v8958_v7 }
 0xe06   : > { %v9002_v16 = vpop.f32.mrf.mxu1 }
 0xe07   : > { %v9045_v30 = vpop.f32.mrf.mxu0  ;;  %v9003_v0 = vadd.f32 %v9002_v16, %v8960_v29  ;;  %v9044_v53 = vadd.f32 %v9043_v33, %v9001_v28 }
 0xe08   : > { %v9004_v27 = vpop.f32.mrf.mxu1 }
 0xe09   : > { %v9047_v36 = vpop.f32.mrf.mxu0  ;;  %v9005_v10 = vadd.f32 %v9004_v27, %v8962_v50  ;;  %v9046_v21 = vadd.f32 %v9045_v30, %v9003_v0 }
 0xe0a   : > { %v9006_v24 = vpop.f32.mrf.mxu1 }
 0xe0b   : > { %v9049_v20 = vpop.f32.mrf.mxu0  ;;  %v9007_v54 = vadd.f32 %v9006_v24, %v8964_v56  ;;  %v9048_v63 = vadd.f32 %v9047_v36, %v9005_v10  ;;  %v9229_v56 = vld [vmem:[%s1303_s10] sm:$0x3] }
 0xe0d   : > { %v9050_v57 = vadd.f32 %v9049_v20, %v9007_v54  ;;  %v9285_v54 = vrot.slane %v9229_v56, %v14495_v59 }
 0xe44   : > { %v9086_v45 = vpop.f32.mrf.mxu1 }
 0xe45   : > { %v9129_v46 = vpop.f32.mrf.mxu0  ;;  %v9087_v62 = vadd.f32 %v9086_v45, %v9044_v53 }
 0xe46   : > { %v9088_v60 = vpop.f32.mrf.mxu1 }
 0xe47   : > { %v9131_v58 = vpop.f32.mrf.mxu0  ;;  %v9089_v5 = vadd.f32 %v9088_v60, %v9046_v21  ;;  %v9130_v55 = vadd.f32 %v9129_v46, %v9087_v62  ;;  %v9281_v21 = vrot.slane %v9229_v56, %v14501_v18 }
 0xe48   : > { %v9090_v52 = vpop.f32.mrf.mxu1 }
 0xe49   : > { %v9133_v51 = vpop.f32.mrf.mxu0  ;;  %v9091_v15 = vadd.f32 %v9090_v52, %v9048_v63  ;;  %v9132_v26 = vadd.f32 %v9131_v58, %v9089_v5  ;;  %v9228_v58 = vld [vmem:[%s1294_s0] sm:$0x3] }
 0xe4a   : > { %v9092_v40 = vpop.f32.mrf.mxu1  ;;  %v9266_v53 = vrot.slane %v9228_v58, %v14501_v18  ;;  %v9270_v10 = vrot.slane %v9228_v58, %v14495_v59 }
 0xe4b   : > { %v9135_v4 = vpop.f32.mrf.mxu0  ;;  %v9093_v42 = vadd.f32 %v9092_v40, %v9050_v57  ;;  %v9134_v23 = vadd.f32 %v9133_v51, %v9091_v15 }
 0xe4d   : > { %v9136_v41 = vadd.f32 %v9135_v4, %v9093_v42 }
 0xe84   : > { %v9172_v22 = vpop.f32.mrf.mxu1 }
 0xe85   : > { %v9173_v6 = vadd.f32 %v9172_v22, %v9130_v55  ;;  %v9215_v48 = vpop.f32.mrf.mxu0 }
 0xe86   : > { %v9174_v25 = vpop.f32.mrf.mxu1 }
 0xe87   : > { %v9216_v1 = vadd.f32 %v9215_v48, %v9173_v6  ;;  %v9175_v44 = vadd.f32 %v9174_v25, %v9132_v26  ;;  %v9217_v12 = vpop.f32.mrf.mxu0 }
 0xe88   : > { %v9176_v34 = vpop.f32.mrf.mxu1 }
 0xe89   : > { %v9218_v43 = vadd.f32 %v9217_v12, %v9175_v44  ;;  %v9177_v2 = vadd.f32 %v9176_v34, %v9134_v23  ;;  %v9219_v14 = vpop.f32.mrf.mxu0  ;;  %v9224_v9 = vadd.f32 %v9216_v1, %v14671_v13 }
 0xe8a   : > { %v9178_v8 = vpop.f32.mrf.mxu1 }
 0xe8b   : > { %v9225_v35 = vadd.f32 %v9218_v43, %v14673_v17  ;;  %v9220_v19 = vadd.f32 %v9219_v14, %v9177_v2  ;;  %v9179_v38 = vadd.f32 %v9178_v8, %v9136_v41  ;;  %v9221_v33 = vpop.f32.mrf.mxu0 }
 0xe8d   : > { %v9222_v61 = vadd.f32 %v9221_v33, %v9179_v38  ;;  %v9230_v16 = vadd.f32 %v9225_v35, %v9224_v9  ;;  %v9226_v30 = vadd.f32 %v9220_v19, %v14675_v3 }
 0xe8f   : > { %v9227_v32 = vadd.f32 %v9222_v61, %v14677_v11  ;;  %9231 = vadd.xlane.f32.xlu0 %v9230_v16 }
 0xe91   : > { %v9233_v27 = vadd.f32 %v9227_v32, %v9226_v30 }
 0xe93   : > { %9234 = vadd.xlane.f32.xlu1 %v9233_v27 }
 0xf18   : > { %v9232_v49 = vpop.xlane.xlu0 %9231 }
 0xf19   : > { %v9236_v36 = vmul.f32 0.00390625, %v9232_v49 }
 0xf1b   : > { %v9238_v37 = vsub.f32 %v9224_v9, %v9236_v36  ;;  %v9239_v24 = vsub.f32 %v9225_v35, %v9236_v36 }
 0xf1c   : > { %v9235_v31 = vpop.xlane.xlu1 %9234 }
 0xf1d   : > { %v9237_v13 = vmul.f32 0.00390625, %v9235_v31  ;;  %v9242_v20 = vmul.f32 %v9238_v37, %v9238_v37  ;;  %v9243_v17 = vmul.f32 %v9239_v24, %v9239_v24 }
 0xf1f   : > { %v9240_v45 = vsub.f32 %v9226_v30, %v9237_v13  ;;  %v9241_v7 = vsub.f32 %v9227_v32, %v9237_v13  ;;  %v9246_v47 = vadd.f32 %v9243_v17, %v9242_v20 }
 0xf21   : > { %9247 = vadd.xlane.f32.xlu0 %v9246_v47  ;;  %v9244_v3 = vmul.f32 %v9240_v45, %v9240_v45  ;;  %v9245_v46 = vmul.f32 %v9241_v7, %v9241_v7 }
 0xf23   : > { %v9249_v11 = vadd.f32 %v9245_v46, %v9244_v3 }
 0xf25   : > { %9250 = vadd.xlane.f32.xlu1 %v9249_v11 }
 0xfaa   : > { %v9248_v29 = vpop.xlane.xlu0 %9247 }
 0xfab   : > { %v9252_v39 = vmul.f32 0.00390625, %v9248_v29 }
 0xfad   : > { %v9254_v28 = vadd.f32 1e-05, %v9252_v39 }
 0xfae   : > { %v9251_v60 = vpop.xlane.xlu1 %9250 }
 0xfaf   : > { %12230 = vrsqrt.f32 %v9254_v28  ;;  %v9253_v50 = vmul.f32 0.00390625, %v9251_v60 }
 0xfb1   : > { %v9255_v0 = vadd.f32 1e-05, %v9253_v50 }
 0xfb3   : > { %12232 = vrsqrt.f32 %v9255_v0 }
 0xfbc   : > { %v12231_v52 = vpop.eup %12230 }
 0xfbd   : > { %v9258_v62 = vmul.f32 %v12231_v52, %v9238_v37  ;;  %v9259_v51 = vmul.f32 %v12231_v52, %v9239_v24 }
 0xfbf   : > { %v9273_v63 = vmul.f32 %v9266_v53, %v9258_v62  ;;  %v9274_v5 = vmul.f32 %v9270_v10, %v9259_v51 }
 0xfc0   : > { %v12233_v40 = vpop.eup %12232 }
 0xfc1   : > { %v9288_v57 = vadd.f32 %v9281_v21, %v9273_v63  ;;  %v9289_v55 = vadd.f32 %v9285_v54, %v9274_v5  ;;  %v9260_v15 = vmul.f32 %v12233_v40, %v9240_v45  ;;  %v9261_v4 = vmul.f32 %v12233_v40, %v9241_v7 }
 0xfc3   : > { %9292 = vst [vmem:[#allocation2 + $0x10] sm:$0xff] %v9288_v57  ;;  %9293 = vst [vmem:[#allocation2] sm:$0xff] %v9289_v55  ;;  %v9275_v22 = vmul.f32 %v9266_v53, %v9260_v15  ;;  %v9276_v26 = vmul.f32 %v9270_v10, %v9261_v4  ;;  %9299 = sbr.rel (%p10844_p5) target bundleno = 4277 (0x10b5), region = 236 }
 0xfc5   : > { %v9290_v42 = vadd.f32 %v9281_v21, %v9275_v22  ;;  %v9291_v6 = vadd.f32 %v9285_v54, %v9276_v26 }
 0xfc7   : > { %9294 = vst [vmem:[#allocation2 + $0x18] sm:$0xff] %v9290_v42  ;;  %9295 = vst [vmem:[#allocation2 + $0x8] sm:$0xff] %v9291_v6 }
 0xfc8   : > { %v12238_v59 = vld [vmem:[#allocation40 + $0x78] sm:$0xff]   ;;  %v9301_v18 = vpack.c.bf16 %v9291_v6, %v9289_v55  ;;  %v12240_v25 = vld [vmem:[#allocation40 + $0x70] sm:$0xff]   ;;  %v12242_v1 = vld [vmem:[#allocation40 + $0x68] sm:$0xff]   ;;  %v9300_v38 = vpack.c.bf16 %v9290_v42, %v9288_v57 }
 0xfc9   : > { %v12239_v48 = vld [vmem:[#allocation40 + $0x38] sm:$0xff]   ;;  %11066 = vmatprep.subr.bf16.mxu0 %v12238_v59  ;;  %v12241_v23 = vld [vmem:[#allocation40 + $0x30] sm:$0xff]   ;;  %v12243_v44 = vld [vmem:[#allocation40 + $0x28] sm:$0xff]  }
 0xfca   : > { %9469 = vmatprep.mubr.bf16.mxu0 %v9301_v18  ;;  %11067 = vmatpush3.bf16.msra.mxu0 %v12239_v48  ;;  %v12244_v12 = vld [vmem:[#allocation40 + $0x60] sm:$0xff]   ;;  %v12246_v41 = vld [vmem:[#allocation40 + $0x58] sm:$0xff]   ;;  %v12248_v2 = vld [vmem:[#allocation40 + $0x50] sm:$0xff]  }
 0xfcb   : > { %11068 = vmatprep.subr.bf16.mxu0 %v12240_v25  ;;  %v12245_v34 = vld [vmem:[#allocation40 + $0x20] sm:$0xff]   ;;  %v12247_v43 = vld [vmem:[#allocation40 + $0x18] sm:$0xff]   ;;  %v12249_v14 = vld [vmem:[#allocation40 + $0x10] sm:$0xff]  }
 0xfcc   : > { %v12250_v8 = vld [vmem:[#allocation40 + $0x48] sm:$0xff]   ;;  %v12252_v35 = vld [vmem:[#allocation40 + $0x40] sm:$0xff]  }
 0xfcd   : > { %v12251_v9 = vld [vmem:[#allocation40 + $0x8] sm:$0xff]   ;;  %v12253_v19 = vld [vmem:[#allocation40] sm:$0xff]  }
 0xfce   : > { %11069 = vmatpush3.bf16.msra.mxu0 %v12241_v23  ;;  %v10845_v61 = vld [vmem:[#allocation42] ss:$0 sm:$0xff] }
 0xfcf   : > { %11070 = vmatprep.subr.bf16.mxu0 %v12242_v1 }
 0xfd2   : > { %11071 = vmatpush3.bf16.msra.mxu0 %v12243_v44 }
 0xfd3   : > { %11072 = vmatprep.subr.bf16.mxu0 %v12244_v12 }
 0xfd6   : > { %11073 = vmatpush3.bf16.msra.mxu0 %v12245_v34 }
 0xfd7   : > { %11074 = vmatprep.subr.bf16.mxu0 %v12246_v41 }
 0xfda   : > { %11075 = vmatpush3.bf16.msra.mxu0 %v12247_v43 }
 0xfdb   : > { %11076 = vmatprep.subr.bf16.mxu0 %v12248_v2 }
 0xfde   : > { %11077 = vmatpush3.bf16.msra.mxu0 %v12249_v14 }
 0xfdf   : > { %11078 = vmatprep.subr.bf16.mxu0 %v12250_v8 }
 0xfe2   : > { %11079 = vmatpush3.bf16.msra.mxu0 %v12251_v9 }
 0xfe3   : > { %11080 = vmatprep.subr.bf16.mxu0 %v12252_v35 }
 0xfe6   : > { %11081 = vmatpush3.bf16.msra.mxu0 %v12253_v19 }
 0xfe9   : > { %9470 = vmatmul.mubr.bf16.vlgmr.msra.gmra.mxu0 %v9300_v38 }
0x10a9   : > { %v11082_v33 = vpop.f32.mrf.mxu0 }
0x10ab   : > { %v11083_v16 = vpop.f32.mrf.mxu0 }
0x10ac   : > { %v11084_v30 = vadd.f32 %v11083_v16, %v11082_v33 }
0x10ad   : > { %v11085_v32 = vpop.f32.mrf.mxu0 }
0x10ae   : > { %v9472_v27 = vadd.f32 %v11084_v30, %v10845_v61 }
0x10af   : > { %v11086_v49 = vpop.f32.mrf.mxu0 }
0x10b0   : > { %9478 = vst [vmem:[#allocation44] sm:$0xff] %v9472_v27  ;;  %v11087_v36 = vadd.f32 %v11086_v49, %v11085_v32 }
0x10b2   : > { %v9475_v37 = vadd.f32 %v11087_v36, %v10845_v61 }
0x10b4   : > { %9479 = vst [vmem:[#allocation44 + $0x8] sm:$0xff] %v9475_v37 }
0x10b5 PF: > { %s15545_s27 = sld [smem:[#allocation63_spill]]  ;;  %s13105_s2 = smov [#allocation43]  }
0x10b6   : > { %s9487_s6 = sshll.u32 %s13105_s2, 4  ;;  %s13106_s20 = smov [#allocation44]   ;;  %s9488_s6 = int_to_ptr.vmem [resolvable:$true] %s9487_s6 }
0x10b7   : > { %s9497_s5 = sshll.u32 %s13106_s20, 4  ;;  %s12928_s8 = scalar_lea.vmem %s9488_s6, 32  ;;  %s9498_s5 = int_to_ptr.vmem [resolvable:$true] %s9497_s5 }
0x10b8   : > { %p12929_p12 = scmp.ne.s32.totalorder %s9488_s6, %s12928_s8  ;;  %p12935_p1 = scmp.lt.s32.totalorder %s9488_s6, %s9488_s6 }
0x10b9   : > { %p12936_p13 = scmp.lt.s32.totalorder %s12928_s8, %s12928_s8 }
0x10bb   : > { %p11348_p10 = scmp.eq.s32.totalorder %s15545_s27, 1  ;;  %p12937_p2 = por %p12936_p13, %p12935_p1 }
0x10bd   : > { %p12930_p0 = pnand %p12929_p12, %p11348_p10 }
0x10bf   : > { %p12931_p9 = pneg %p12930_p0 }
0x10c1   : > { %p12938_p8 = pnand %p12937_p2, %p12931_p9 }
0x10c3   : > { %12941 = shalt.err (!%p12938_p8)
}
0x10c4   : > { %s15546_s17 = sld [smem:[#allocation110_spill]]  ;;  %s12952_s1 = scalar_lea.vmem %s9498_s5, 256 }
0x10c5   : > { %p12953_p11 = scmp.ne.s32.totalorder %s9498_s5, %s12952_s1  ;;  %p12959_p7 = scmp.lt.s32.totalorder %s9498_s5, %s9498_s5 }
0x10c6   : > { %p12960_p3 = scmp.lt.s32.totalorder %s12952_s1, %s12952_s1 }
0x10c7   : > { %p12954_p4 = pnand %p12953_p11, %p11348_p10 }
0x10c8   : > { %p12961_p5 = por %p12960_p3, %p12959_p7 }
0x10c9   : > { %p12955_p6 = pneg %p12954_p4 }
0x10ca   : > { %11237 = dma.vmem_to_hbm [thread:$0]  (%p11348_p10), %s9488_s6, 32, %s15546_s17, [#allocation6]  }
0x10cb   : > { %p12962_p12 = pnand %p12961_p5, %p12955_p6 }
0x10cd   : > { %12965 = shalt.err (!%p12962_p12)
}
0x10ce   : > { %s13107_s0 = smov 128   ;;  %s13108_s10 = smov 8  }
0x10cf   : > { %s15547_s13 = sld [smem:[#allocation111_spill]] }
0x10d5   : > { %11239 = dma.vmem_to_hbm [thread:$0]  (%p11348_p10), %s9498_s5, 256, %s15547_s13, [#allocation45], %s13107_s0, %s13107_s0, %s13108_s10  }
0x10d6   : > { %13045 = dma.done.wait (%p11348_p10), [#allocation6], 32  }
0x10d7   : > { %13047 = vsyncadd (%p11348_p10), [#allocation6], 4294967264 }
0x10d8   : > { %13049 = dma.done.wait (%p11348_p10), [#allocation45], 256  }
0x10d9   : > { %13051 = vsyncadd (%p11348_p10), [#allocation45], 4294967040 }
0x10da PF: > { %s15548_s30 = sld [smem:[#allocation65_spill]] }
0x10db   : > { %s15549_s8 = sld [smem:[#allocation61_spill]] }
0x10dc   : > { %s15550_s5 = sld [smem:[#allocation62_spill]] }
0x10dd   : > { %s15551_s9 = sld [smem:[#allocation66_spill]] }
0x10e0   : > { %p63_p0 = scmp.ge.s32.totalorder %s15548_s30, 4  }
0x10e2   :  { %65 = sbr.rel (!%p63_p0) target bundleno = 46 (0x2e), region = 365 }
0x10e7   :  { %9517 = vsyncpa [#allocation5], 1 }
0x10e8   :  { %9519 = vsyncpa [#allocation5 + $0x1], 1 }
0x10e9   :  { %9520 = vsyncpa [#allocation8], 1 }
0x10ea   :  { %9521 = vsyncpa [#allocation11], 1 }
0x10eb   :  { %9522 = vsyncpa [#allocation14], 1 }
0x10ec   :  { %9523 = vsyncpa [#allocation17], 1 }
0x10ed   :  { %9524 = vsyncpa [#allocation20], 1 }
0x10ee   :  { %9525 = vsyncpa [#allocation23], 1 }
0x10ef   :  { %9527 = vsyncpa [#allocation23 + $0x1], 1 }
0x10f0   :  { %9528 = vsyncpa [#allocation26], 1 }
0x10f1   :  { %9530 = vsyncpa [#allocation26 + $0x1], 1 }
0x10f2   :  { %9531 = vsyncpa [#allocation29], 1 }
0x10f3   :  { %9533 = vsyncpa [#allocation29 + $0x1], 1 }
0x10f4   :  { %9534 = vsyncpa [#allocation32], 1 }
0x10f5   :  { %9536 = vsyncpa [#allocation32 + $0x1], 1 }
0x10f6   :  { %9537 = vsyncpa [#allocation35], 1 }
0x10f7   :  { %9539 = vsyncpa [#allocation35 + $0x1], 1 }
0x10f8   :  { %9540 = vsyncpa [#allocation38], 1 }
0x10f9   :  { %9542 = vsyncpa [#allocation38 + $0x1], 1 }
0x10fa   :  { %9543 = vsyncpa [#allocation41], 1 }
0x10fb   :  { %9544 = vsyncpa [#allocation6], 1 }
0x10fc   :  { %9546 = vsyncpa [#allocation6 + $0x1], 1 }
0x10fd   :  { %9547 = vsyncpa [#allocation45], 1 }

</bundles_post_ra>
